<compile_context>
chip_gen: v5e
topology: v5e:2x2
jax: 0.10.0
libtpu: 0.0.40
codegen_flags: <defaults>
</compile_context>

<pallas_src>
import functools

import jax
import jax.numpy as jnp
from jax.experimental import pallas as pl
from jax.experimental.pallas import tpu as pltpu

EPS = 1e-5
LANES = 128


def _default_vmem_limit():
    # 128 MiB physical VMEM on v5e/v6e -> allow ~64 MiB scoped; 64 MiB on v7x -> 32 MiB.
    try:
        cap = int(pltpu.get_tpu_info().vmem_capacity_bytes)
        return int(min(64 * 1024 * 1024, max(cap // 2, 16 * 1024 * 1024)))
    except Exception:
        return 32 * 1024 * 1024


VMEM_LIMIT = _default_vmem_limit()


def _round_up(x, m):
    return (x + m - 1) // m * m


def _pick_tile(dim, candidates):
    for c in candidates:
        if dim % c == 0:
            return c
    return dim


# ----------------------------------------------------------------------------
# Kernel 0: NCHW -> lane-dense flat NHWC (transpose + channel pad + bf16 cast),
# one image per grid step.  The result is both the conv1 input and the residual.
# ----------------------------------------------------------------------------
def _nchw_to_lanes_kernel(x_ref, o_ref, *, cin):
    xt = x_ref[0].T                                    # (H*W, Cin) f32, XLU transpose
    if cin == o_ref.shape[-1]:
        o_ref[...] = xt.astype(jnp.bfloat16)
    else:
        o_ref[...] = jnp.zeros_like(o_ref)             # padded lanes stay exactly zero
        o_ref[:, 0:cin] = xt.astype(jnp.bfloat16)      # masked store of the real channels


def _nchw_to_lanes(x_nchw, cin_p):
    n, cin, h, w = x_nchw.shape
    hw = h * w
    x3 = x_nchw.reshape(n, cin, hw)                    # metadata-only reshape in XLA
    return pl.pallas_call(
        functools.partial(_nchw_to_lanes_kernel, cin=cin),
        out_shape=jax.ShapeDtypeStruct((n * hw, cin_p), jnp.bfloat16),
        grid=(n,),
        in_specs=[pl.BlockSpec((1, cin, hw), lambda i: (i, 0, 0))],
        out_specs=pl.BlockSpec((hw, cin_p), lambda i: (i, 0)),
        compiler_params=pltpu.CompilerParams(
            dimension_semantics=("parallel",),
            vmem_limit_bytes=VMEM_LIMIT,
        ),
    )(x3)


# ----------------------------------------------------------------------------
# Kernel A: tiled matmul (+ optional fused input BN+ReLU) + per-tile BN stats
# ----------------------------------------------------------------------------
def _apply_bn_relu_bf16(x_bf, scale, shift):
    # BN(prev stage) + ReLU applied to the input tile.  f32 math (v5e-safe), bf16 to MXU.
    xf = x_bf.astype(jnp.float32)
    return jnp.maximum(xf * scale + shift, 0.0).astype(jnp.bfloat16)


def _write_stats(stats_ref, acc):
    # Channel sum / sum-of-squares (f32).  Note: folding uses E[x^2]-mean^2; fine for the
    # BN-normalized activation magnitudes here, a shifted/Welford reduction would be safer
    # for extreme-scale inputs.
    stats_ref[0, 0:1, :] = jnp.sum(acc, axis=0, keepdims=True)
    stats_ref[0, 1:2, :] = jnp.sum(acc * acc, axis=0, keepdims=True)


def _mm_stats_kernel_1k(*refs, apply_input_bn_relu):
    # Single K tile: no f32 accumulator scratch, no init/finalize.
    if apply_input_bn_relu:
        x_ref, w_ref, scale_ref, shift_ref, y_ref, stats_ref = refs
    else:
        x_ref, w_ref, y_ref, stats_ref = refs
        scale_ref = shift_ref = None

    x = x_ref[...]
    if apply_input_bn_relu:
        x = _apply_bn_relu_bf16(x, scale_ref[...], shift_ref[...])
    acc = jnp.dot(x, w_ref[...], preferred_element_type=jnp.float32)
    y_ref[...] = acc.astype(y_ref.dtype)
    _write_stats(stats_ref, acc)


def _mm_stats_kernel(*refs, apply_input_bn_relu):
    # General K-tiled path with an f32 accumulator carried across the k grid axis.
    if apply_input_bn_relu:
        x_ref, w_ref, scale_ref, shift_ref, y_ref, stats_ref, acc_ref = refs
    else:
        x_ref, w_ref, y_ref, stats_ref, acc_ref = refs
        scale_ref = shift_ref = None

    k = pl.program_id(2)

    @pl.when(k == 0)
    def _init():
        acc_ref[...] = jnp.zeros_like(acc_ref)

    x = x_ref[...]
    if apply_input_bn_relu:
        x = _apply_bn_relu_bf16(x, scale_ref[...], shift_ref[...])
    acc_ref[...] += jnp.dot(x, w_ref[...], preferred_element_type=jnp.float32)

    @pl.when(k == pl.num_programs(2) - 1)
    def _finalize():
        acc = acc_ref[...]
        y_ref[...] = acc.astype(y_ref.dtype)
        _write_stats(stats_ref, acc)


def _matmul_bn_stats(x_bf, w_bf, scale=None, shift=None):
    M, K = x_bf.shape
    Kw, C = w_bf.shape
    assert K == Kw and M % 8 == 0
    tm = _pick_tile(M, (512, 256, 128, 64, 32, 16, 8))   # biggest tile first
    tn = _pick_tile(C, (512, 256, 128))                   # gn == 1 for conv3-sized C
    tk = _pick_tile(K, (512, 256, 128))
    gm, gn, gk = M // tm, C // tn, K // tk
    apply_bn = scale is not None

    out_shape = (
        jax.ShapeDtypeStruct((M, C), jnp.bfloat16),
        jax.ShapeDtypeStruct((gm, 2, C), jnp.float32),
    )

    if gk == 1:
        in_specs = [
            pl.BlockSpec((tm, tk), lambda i, j: (i, 0)),
            pl.BlockSpec((tk, tn), lambda i, j: (0, j)),
        ]
        args = [x_bf, w_bf]
        if apply_bn:
            in_specs += [
                pl.BlockSpec((1, tk), lambda i, j: (0, 0)),
                pl.BlockSpec((1, tk), lambda i, j: (0, 0)),
            ]
            args += [scale, shift]
        return pl.pallas_call(
            functools.partial(_mm_stats_kernel_1k, apply_input_bn_relu=apply_bn),
            out_shape=out_shape,
            grid=(gm, gn),
            in_specs=in_specs,
            out_specs=(
                pl.BlockSpec((tm, tn), lambda i, j: (i, j)),
                pl.BlockSpec((1, 2, tn), lambda i, j: (i, 0, j)),
            ),
            compiler_params=pltpu.CompilerParams(
                dimension_semantics=("parallel", "parallel"),
                vmem_limit_bytes=VMEM_LIMIT,
            ),
        )(*args)

    in_specs = [
        pl.BlockSpec((tm, tk), lambda i, j, k: (i, k)),
        pl.BlockSpec((tk, tn), lambda i, j, k: (k, j)),
    ]
    args = [x_bf, w_bf]
    if apply_bn:
        in_specs += [
            pl.BlockSpec((1, tk), lambda i, j, k: (0, k)),
            pl.BlockSpec((1, tk), lambda i, j, k: (0, k)),
        ]
        args += [scale, shift]
    return pl.pallas_call(
        functools.partial(_mm_stats_kernel, apply_input_bn_relu=apply_bn),
        out_shape=out_shape,
        grid=(gm, gn, gk),
        in_specs=in_specs,
        out_specs=(
            pl.BlockSpec((tm, tn), lambda i, j, k: (i, j)),
            pl.BlockSpec((1, 2, tn), lambda i, j, k: (i, 0, j)),
        ),
        scratch_shapes=[pltpu.VMEM((tm, tn), jnp.float32)],
        compiler_params=pltpu.CompilerParams(
            dimension_semantics=("parallel", "parallel", "arbitrary"),
            vmem_limit_bytes=VMEM_LIMIT,
        ),
    )(*args)


# ----------------------------------------------------------------------------
# Kernel B: 3x3 conv (pad=1, stride=1) with fused input BN1+ReLU, per-image.
# No HBM im2col: three kw-shifted bf16 copies live in VMEM scratch, taps read
# them with leading-dim (row) offsets only, 9 statically-unrolled matmuls.
# ----------------------------------------------------------------------------
def _conv3x3_kernel(x_ref, scale_ref, shift_ref, w_ref, y_ref, stats_ref,
                    xsh_ref, *, H, W):
    # x_ref:       (1, H, W, Cp)   bf16   pre-BN conv1 output for one image (resident over j)
    # scale/shift: (1, Cp)         f32    folded BN1 affine
    # w_ref:       (9, Cp, tn)     bf16   3x3 weights, tap-major (kh*3+kw)
    # y_ref:       (H*W, tn)       bf16   pre-BN conv2 output
    # stats_ref:   (1, 2, tn)      f32    per-image channel sum / sum-of-squares
    # xsh_ref:     (3, H+2, W, Cp) bf16   kw-shifted, halo-padded BN1+ReLU(x)
    # TODO(synk): stride != 1 not implemented (identity shortcut requires stride == 1).
    # TODO(synk): for v7x-sized images (e.g. 56x56 with Cp >= 256) tile spatially in row
    #             bands with a 1-row halo instead of whole images (64 MiB VMEM per TC).
    j = pl.program_id(1)

    # BN1 + ReLU and the shifted/halo'd fill are identical for every output-channel tile
    # j, so they run only at j == 0; the j grid axis is "arbitrary" (never core-split) so
    # carrying the scratch across j on one core is legal.
    @pl.when(j == 0)
    def _prep():
        xf = x_ref[0].astype(jnp.float32)                              # (H, W, Cp)
        a = jnp.maximum(xf * scale_ref[...] + shift_ref[...], 0.0)
        a = a.astype(jnp.bfloat16)                                     # cast once (bf16 scratch)
        xsh_ref[...] = jnp.zeros_like(xsh_ref)                         # zero halo rows/cols
        # Tap (kh, kw) later reads xsh[kw] at a row offset only -> no sublane relayout.
        xsh_ref[0, 1:H + 1, 1:W, :] = a[:, 0:W - 1, :]                 # kw = 0
        xsh_ref[1, 1:H + 1, :, :] = a                                  # kw = 1
        xsh_ref[2, 1:H + 1, 0:W - 1, :] = a[:, 1:W, :]                 # kw = 2

    Cp = w_ref.shape[1]

    def tap(t):
        kh, kw = divmod(t, 3)
        xs = xsh_ref[kw, kh:kh + H, :, :].reshape(H * W, Cp)           # leading-dim slice
        return jnp.dot(xs, w_ref[t], preferred_element_type=jnp.float32)

    acc = tap(0)
    for t in range(1, 9):                                              # static unroll over taps
        acc = acc + tap(t)

    y_ref[...] = acc.astype(y_ref.dtype)
    _write_stats(stats_ref, acc)


def _conv3x3_bn_stats(y1_4d, scale1, shift1, w2_taps):
    N, H, W, Cp = y1_4d.shape
    taps, Cpw, Co = w2_taps.shape
    assert taps == 9 and Cpw == Cp
    assert (H * W) % 8 == 0  # output BlockSpec sublane constraint (16x16 demo: OK)
    tn = _pick_tile(Co, (256, 128))
    gj = Co // tn

    y2, stats = pl.pallas_call(
        functools.partial(_conv3x3_kernel, H=H, W=W),
        out_shape=(
            jax.ShapeDtypeStruct((N * H * W, Co), jnp.bfloat16),
            jax.ShapeDtypeStruct((N, 2, Co), jnp.float32),
        ),
        grid=(N, gj),
        in_specs=[
            pl.BlockSpec((1, H, W, Cp), lambda n, j: (n, 0, 0, 0)),
            pl.BlockSpec((1, Cp), lambda n, j: (0, 0)),
            pl.BlockSpec((1, Cp), lambda n, j: (0, 0)),
            pl.BlockSpec((9, Cp, tn), lambda n, j: (0, 0, j)),
        ],
        out_specs=(
            pl.BlockSpec((H * W, tn), lambda n, j: (n, j)),
            pl.BlockSpec((1, 2, tn), lambda n, j: (n, 0, j)),
        ),
        scratch_shapes=[
            pltpu.VMEM((3, H + 2, W, Cp), jnp.bfloat16),   # kw-shifted activations (bf16)
        ],
        compiler_params=pltpu.CompilerParams(
            dimension_semantics=("parallel", "arbitrary"),
            vmem_limit_bytes=VMEM_LIMIT,
        ),
    )(y1_4d, scale1, shift1, w2_taps)
    return y2, stats


# ----------------------------------------------------------------------------
# Kernel C: BN3 apply + residual add + ReLU (tiled elementwise, bf16 in/out)
# ----------------------------------------------------------------------------
def _bn_add_relu_kernel(y_ref, id_ref, scale_ref, shift_ref, o_ref):
    y = y_ref[...].astype(jnp.float32)
    o = y * scale_ref[...] + shift_ref[...] + id_ref[...].astype(jnp.float32)
    o_ref[...] = jnp.maximum(o, 0.0).astype(o_ref.dtype)


def _bn_add_relu(y3, identity_bf, scale3, shift3):
    M, C = y3.shape
    tm = _pick_tile(M, (512, 256, 128, 64, 32, 16, 8))
    tn = _pick_tile(C, (512, 256, 128))
    return pl.pallas_call(
        _bn_add_relu_kernel,
        out_shape=jax.ShapeDtypeStruct((M, C), jnp.bfloat16),
        grid=(M // tm, C // tn),
        in_specs=[
            pl.BlockSpec((tm, tn), lambda i, j: (i, j)),
            pl.BlockSpec((tm, tn), lambda i, j: (i, j)),
            pl.BlockSpec((1, tn), lambda i, j: (0, j)),
            pl.BlockSpec((1, tn), lambda i, j: (0, j)),
        ],
        out_specs=pl.BlockSpec((tm, tn), lambda i, j: (i, j)),
        compiler_params=pltpu.CompilerParams(
            dimension_semantics=("parallel", "parallel"),
            vmem_limit_bytes=VMEM_LIMIT,
        ),
    )(y3, identity_bf, scale3, shift3)


# ----------------------------------------------------------------------------
# Host-side glue: stats folding, channel padding, parameters, forward
# ----------------------------------------------------------------------------
def _bn_fold(stats, count, gamma, beta):
    """Reduce per-tile (sum, sumsq) -> folded BN affine (scale, shift), f32 (1,C)."""
    s = jnp.sum(stats, axis=0)                          # (2, C)
    mean = s[0] / count
    var = jnp.maximum(s[1] / count - mean * mean, 0.0)  # biased var (training BN)
    scale = gamma * jax.lax.rsqrt(var + EPS)
    shift = beta - mean * scale
    return scale.reshape(1, -1).astype(jnp.float32), shift.reshape(1, -1).astype(jnp.float32)


def _pad2(w, rows, cols):
    r, c = w.shape
    return jnp.pad(w, ((0, rows - r), (0, cols - c)))


def _pad_vec(v, n, fill):
    return jnp.pad(v, (0, n - v.shape[0]), constant_values=fill).astype(jnp.float32)


def init_params(key, in_channels, out_channels, expansion=4):
    exp_c = out_channels * expansion
    ks = jax.random.split(key, 6)
    return {
        # conv1: 1x1  (Cin -> Cout)  stored (Cin, Cout)
        "w1": jax.random.normal(ks[0], (in_channels, out_channels), jnp.float32) * 0.1,
        "b1": jax.random.normal(ks[1], (out_channels,), jnp.float32) * 0.05,
        "g1": jnp.ones((out_channels,), jnp.float32),
        "be1": jnp.zeros((out_channels,), jnp.float32),
        # conv2: 3x3  stored HWIO (3, 3, Cout, Cout)
        "w2": jax.random.normal(ks[2], (3, 3, out_channels, out_channels), jnp.float32) * 0.1,
        "b2": jax.random.normal(ks[3], (out_channels,), jnp.float32) * 0.05,
        "g2": jnp.ones((out_channels,), jnp.float32),
        "be2": jnp.zeros((out_channels,), jnp.float32),
        # conv3: 1x1  (Cout -> Cout*expansion)
        "w3": jax.random.normal(ks[4], (out_channels, exp_c), jnp.float32) * 0.1,
        "b3": jax.random.normal(ks[5], (exp_c,), jnp.float32) * 0.05,
        "g3": jnp.ones((exp_c,), jnp.float32),
        "be3": jnp.zeros((exp_c,), jnp.float32),
    }


@functools.partial(jax.jit, static_argnames=("stride",))
def bottleneck_forward(x_nchw, params, stride=1):
    N, Cin, H, W = x_nchw.shape
    C1 = params["w1"].shape[1]        # out_channels
    C3 = params["w3"].shape[1]        # out_channels * expansion
    if stride != 1 or Cin != C3:
        # TODO(synk): i_downsample / stride>1 residual path not implemented
        #             (identity add requires matching spatial dims and channels).
        raise NotImplementedError("Pallas Bottleneck supports stride=1, i_downsample=None only")

    Cin_p = _round_up(Cin, LANES)
    C1_p = _round_up(C1, LANES)
    C3_p = _round_up(C3, LANES)
    M = N * H * W

    # ---- stage 0: NCHW -> lane-dense (M, Cin_p) bf16 (fused transpose + pad + cast).
    # The result is both the conv1 input and the bf16 residual; padded channels are
    # exactly zero through every stage and are sliced off at the end.
    x_bf = _nchw_to_lanes(x_nchw, Cin_p)

    # ---- stage 1: conv1 (1x1) -> pre-BN output + batch stats -------------------
    w1p = _pad2(params["w1"], Cin_p, C1_p).astype(jnp.bfloat16)
    y1, stats1 = _matmul_bn_stats(x_bf, w1p)
    scale1, shift1 = _bn_fold(stats1, M, _pad_vec(params["g1"], C1_p, 1.0),
                              _pad_vec(params["be1"], C1_p, 0.0))

    # ---- stage 2: BN1+ReLU fused into conv2 (3x3, pad=1) -> stats --------------
    w2p = jnp.pad(params["w2"], ((0, 0), (0, 0), (0, C1_p - C1), (0, C1_p - C1)))
    w2_taps = w2p.reshape(9, C1_p, C1_p).astype(jnp.bfloat16)
    y1_4d = y1.reshape(N, H, W, C1_p)
    y2, stats2 = _conv3x3_bn_stats(y1_4d, scale1, shift1, w2_taps)
    scale2, shift2 = _bn_fold(stats2, M, _pad_vec(params["g2"], C1_p, 1.0),
                              _pad_vec(params["be2"], C1_p, 0.0))

    # ---- stage 3: BN2+ReLU fused into conv3 (1x1) -> stats ---------------------
    w3p = _pad2(params["w3"], C1_p, C3_p).astype(jnp.bfloat16)
    y3, stats3 = _matmul_bn_stats(y2, w3p, scale2, shift2)
    scale3, shift3 = _bn_fold(stats3, M, _pad_vec(params["g3"], C3_p, 1.0),
                              _pad_vec(params["be3"], C3_p, 0.0))

    # ---- BN3 + residual add + ReLU (bf16 residual, bf16 output) ----------------
    out = _bn_add_relu(y3, x_bf, scale3, shift3)
    out = out.reshape(N, H, W, C3_p)[:, :, :, :C3]
    # TODO(synk): keep NHWC (or write NCHW straight from kernel C's out_spec) to drop
    #             this final transpose pass entirely; it now runs on bf16 data.
    return jnp.transpose(out, (0, 3, 1, 2)).astype(jnp.float32)


# ----------------------------------------------------------------------------
# Pure-JAX f32 reference (with conv biases, which training-mode BN cancels)
# ----------------------------------------------------------------------------
def _bn_train_ref(y_nhwc, gamma, beta):
    mean = y_nhwc.mean(axis=(0, 1, 2))
    var = y_nhwc.var(axis=(0, 1, 2))
    return (y_nhwc - mean) * jax.lax.rsqrt(var + EPS) * gamma + beta


def bottleneck_ref(x_nchw, params, stride=1):
    x = jnp.transpose(x_nchw, (0, 2, 3, 1)).astype(jnp.float32)
    identity = x
    dn = ("NHWC", "HWIO", "NHWC")

    w1 = params["w1"][None, None]
    y = jax.lax.conv_general_dilated(x, w1, (1, 1), "VALID", dimension_numbers=dn) + params["b1"]
    y = jax.nn.relu(_bn_train_ref(y, params["g1"], params["be1"]))

    y = jax.lax.conv_general_dilated(y, params["w2"], (stride, stride),
                                     [(1, 1), (1, 1)], dimension_numbers=dn) + params["b2"]
    y = jax.nn.relu(_bn_train_ref(y, params["g2"], params["be2"]))

    w3 = params["w3"][None, None]
    y = jax.lax.conv_general_dilated(y, w3, (1, 1), "VALID", dimension_numbers=dn) + params["b3"]
    y = _bn_train_ref(y, params["g3"], params["be3"])
    y = jax.nn.relu(y + identity)
    return jnp.transpose(y, (0, 3, 1, 2))


if __name__ == "__main__":
    key = jax.random.PRNGKey(0)
    k_x, k_p = jax.random.split(key)

    # Small shapes: in_channels = out_channels * expansion so the identity add is
    # valid with i_downsample=None and stride=1 (as in the reference module).
    N, out_channels, expansion = 2, 4, 4
    in_channels = out_channels * expansion    # 16
    H = W = 16
    stride = 1

    x = jax.random.normal(k_x, (N, in_channels, H, W), jnp.float32)
    params = init_params(k_p, in_channels, out_channels, expansion)

    out = jax.block_until_ready(bottleneck_forward(x, params, stride=stride))
    ref = jax.block_until_ready(bottleneck_ref(x, params, stride=stride))

    assert out.shape == (N, out_channels * expansion, H, W), out.shape
    max_err = float(jnp.max(jnp.abs(out - ref)))
    # bf16 MXU path end-to-end (bf16 activations/residual/output) -> loose tolerance.
    assert jnp.allclose(out, ref, atol=1e-1, rtol=1e-1), max_err

    print("KERNEL_OK")
</pallas_src>

<mosaic_0001>
module attributes {stable_mosaic.version = 11 : i64} {
  func.func @_nchw_to_lanes_kernel(%arg0: i32, %arg1: memref<1x16x256xf32, #tpu.memory_space<vmem>>, %arg2: memref<256x128xbf16, #tpu.memory_space<vmem>>) attributes {dimension_semantics = [#tpu.dimension_semantics<parallel>], iteration_bounds = array<i64: 2>, scalar_prefetch = 0 : i64, scratch_operands = 0 : i64, tpu.core_type = #tpu.core_type<tc>, window_params = [{transform_indices = @transform_0, window_bounds = array<i64: 1, 16, 256>}, {transform_indices = @transform_1, window_bounds = array<i64: 256, 128>}]} {
    %c0 = arith.constant 0 : index
    %c0_0 = arith.constant 0 : index
    %c0_1 = arith.constant 0 : index
    %0 = vector.load %arg1[%c0, %c0_0, %c0_1] : memref<1x16x256xf32, #tpu.memory_space<vmem>>, vector<1x16x256xf32>
    %1 = vector.shape_cast %0 : vector<1x16x256xf32> to vector<16x256xf32>
    %2 = tpu.transpose %1, [1, 0] : vector<16x256xf32> -> vector<256x16xf32>
    %cst = arith.constant 0.000000e+00 : bf16
    %3 = vector.broadcast %cst : bf16 to vector<256x128xbf16>
    %c0_2 = arith.constant 0 : index
    %c0_3 = arith.constant 0 : index
    %4 = vector.load %arg2[%c0_2, %c0_3] : memref<256x128xbf16, #tpu.memory_space<vmem>>, vector<256x128xbf16>
    tpu.vector_store %arg2[%c0_2, %c0_3], %3 {strides = array<i32>} : memref<256x128xbf16, #tpu.memory_space<vmem>>, vector<256x128xbf16>,
    %5 = arith.truncf %2 : vector<256x16xf32> to vector<256x16xbf16>
    %c0_4 = arith.constant 0 : index
    %c0_5 = arith.constant 0 : index
    %6 = vector.load %arg2[%c0_4, %c0_5] : memref<256x128xbf16, #tpu.memory_space<vmem>>, vector<256x16xbf16>
    tpu.vector_store %arg2[%c0_4, %c0_5], %5 {strides = array<i32>} : memref<256x128xbf16, #tpu.memory_space<vmem>>, vector<256x16xbf16>,
    return
  }
  func.func @transform_0(%arg0: i32) -> (i32, i32, i32) {
    %c0_i32 = arith.constant 0 : i32
    %c0_i32_0 = arith.constant 0 : i32
    %c0_i32_1 = arith.constant 0 : i32
    return %arg0, %c0_i32, %c0_i32_0 : i32, i32, i32
  }
  func.func @transform_1(%arg0: i32) -> (i32, i32) {
    %c0_i32 = arith.constant 0 : i32
    %c0_i32_0 = arith.constant 0 : i32
    return %arg0, %c0_i32 : i32, i32
  }
}

module attributes {stable_mosaic.version = 11 : i64} {
  func.func @_mm_stats_kernel_1k(%arg0: i32, %arg1: i32, %arg2: memref<512x128xbf16, #tpu.memory_space<vmem>>, %arg3: memref<128x128xbf16, #tpu.memory_space<vmem>>, %arg4: memref<512x128xbf16, #tpu.memory_space<vmem>>, %arg5: memref<1x2x128xf32, #tpu.memory_space<vmem>>) attributes {dimension_semantics = [#tpu.dimension_semantics<parallel>, #tpu.dimension_semantics<parallel>], iteration_bounds = array<i64: 1, 1>, scalar_prefetch = 0 : i64, scratch_operands = 0 : i64, tpu.core_type = #tpu.core_type<tc>, window_params = [{transform_indices = @transform_0, window_bounds = array<i64: 512, 128>}, {transform_indices = @transform_1, window_bounds = array<i64: 128, 128>}, {transform_indices = @transform_2, window_bounds = array<i64: 512, 128>}, {transform_indices = @transform_3, window_bounds = array<i64: 1, 2, 128>}]} {
    %c0 = arith.constant 0 : index
    %c0_0 = arith.constant 0 : index
    %0 = vector.load %arg2[%c0, %c0_0] : memref<512x128xbf16, #tpu.memory_space<vmem>>, vector<512x128xbf16>
    %c0_1 = arith.constant 0 : index
    %c0_2 = arith.constant 0 : index
    %1 = vector.load %arg3[%c0_1, %c0_2] : memref<128x128xbf16, #tpu.memory_space<vmem>>, vector<128x128xbf16>
    %cst = arith.constant dense<0.000000e+00> : vector<512x128xf32>
    %2 = tpu.matmul %0, %1, %cst {dimension_numbers = #tpu.dot_dimension_numbers<[1], [0], [0], [1], [0, 0, 1, 1], [], []>} : vector<512x128xbf16>, vector<128x128xbf16>, vector<512x128xf32> -> vector<512x128xf32>
    %3 = arith.truncf %2 : vector<512x128xf32> to vector<512x128xbf16>
    %c0_3 = arith.constant 0 : index
    %c0_4 = arith.constant 0 : index
    %4 = vector.load %arg4[%c0_3, %c0_4] : memref<512x128xbf16, #tpu.memory_space<vmem>>, vector<512x128xbf16>
    tpu.vector_store %arg4[%c0_3, %c0_4], %3 {strides = array<i32>} : memref<512x128xbf16, #tpu.memory_space<vmem>>, vector<512x128xbf16>,
    %cst_5 = arith.constant dense<0.000000e+00> : vector<128xf32>
    %5 = vector.multi_reduction <add>, %2, %cst_5 [0] : vector<512x128xf32> to vector<128xf32>
    %6 = vector.shape_cast %5 : vector<128xf32> to vector<1x128xf32>
    %c0_6 = arith.constant 0 : index
    %c0_7 = arith.constant 0 : index
    %c0_8 = arith.constant 0 : index
    %7 = vector.load %arg5[%c0_6, %c0_7, %c0_8] : memref<1x2x128xf32, #tpu.memory_space<vmem>>, vector<1x1x128xf32>
    %8 = vector.shape_cast %7 : vector<1x1x128xf32> to vector<1x128xf32>
    %9 = vector.shape_cast %6 : vector<1x128xf32> to vector<1x1x128xf32>
    tpu.vector_store %arg5[%c0_6, %c0_7, %c0_8], %9 {strides = array<i32>} : memref<1x2x128xf32, #tpu.memory_space<vmem>>, vector<1x1x128xf32>,
    %10 = arith.mulf %2, %2 : vector<512x128xf32>
    %cst_9 = arith.constant dense<0.000000e+00> : vector<128xf32>
    %11 = vector.multi_reduction <add>, %10, %cst_9 [0] : vector<512x128xf32> to vector<128xf32>
    %12 = vector.shape_cast %11 : vector<128xf32> to vector<1x128xf32>
    %c0_10 = arith.constant 0 : index
    %c1 = arith.constant 1 : index
    %c0_11 = arith.constant 0 : index
    %13 = vector.load %arg5[%c0_10, %c1, %c0_11] : memref<1x2x128xf32, #tpu.memory_space<vmem>>, vector<1x1x128xf32>
    %14 = vector.shape_cast %13 : vector<1x1x128xf32> to vector<1x128xf32>
    %15 = vector.shape_cast %12 : vector<1x128xf32> to vector<1x1x128xf32>
    tpu.vector_store %arg5[%c0_10, %c1, %c0_11], %15 {strides = array<i32>} : memref<1x2x128xf32, #tpu.memory_space<vmem>>, vector<1x1x128xf32>,
    return
  }
  func.func @transform_0(%arg0: i32, %arg1: i32) -> (i32, i32) {
    %c0_i32 = arith.constant 0 : i32
    %c0_i32_0 = arith.constant 0 : i32
    return %arg0, %c0_i32 : i32, i32
  }
  func.func @transform_1(%arg0: i32, %arg1: i32) -> (i32, i32) {
    %c0_i32 = arith.constant 0 : i32
    %c0_i32_0 = arith.constant 0 : i32
    return %c0_i32, %arg1 : i32, i32
  }
  func.func @transform_2(%arg0: i32, %arg1: i32) -> (i32, i32) {
    %c0_i32 = arith.constant 0 : i32
    return %arg0, %arg1 : i32, i32
  }
  func.func @transform_3(%arg0: i32, %arg1: i32) -> (i32, i32, i32) {
    %c0_i32 = arith.constant 0 : i32
    %c0_i32_0 = arith.constant 0 : i32
    return %arg0, %c0_i32, %arg1 : i32, i32, i32
  }
}

module attributes {stable_mosaic.version = 11 : i64} {
  func.func @_conv3x3_kernel(%arg0: i32, %arg1: i32, %arg2: memref<1x16x16x128xbf16, #tpu.memory_space<vmem>>, %arg3: memref<1x128xf32, #tpu.memory_space<vmem>>, %arg4: memref<1x128xf32, #tpu.memory_space<vmem>>, %arg5: memref<9x128x128xbf16, #tpu.memory_space<vmem>>, %arg6: memref<256x128xbf16, #tpu.memory_space<vmem>>, %arg7: memref<1x2x128xf32, #tpu.memory_space<vmem>>, %arg8: memref<3x18x16x128xbf16, #tpu.memory_space<vmem>>) attributes {dimension_semantics = [#tpu.dimension_semantics<parallel>, #tpu.dimension_semantics<arbitrary>], iteration_bounds = array<i64: 2, 1>, scalar_prefetch = 0 : i64, scratch_operands = 1 : i64, tpu.core_type = #tpu.core_type<tc>, window_params = [{transform_indices = @transform_0, window_bounds = array<i64: 1, 16, 16, 128>}, {pipeline_mode = #tpu.pipeline_mode<synchronous>, transform_indices = @transform_1, window_bounds = array<i64: 1, 128>}, {pipeline_mode = #tpu.pipeline_mode<synchronous>, transform_indices = @transform_2, window_bounds = array<i64: 1, 128>}, {transform_indices = @transform_3, window_bounds = array<i64: 9, 128, 128>}, {transform_indices = @transform_4, window_bounds = array<i64: 256, 128>}, {transform_indices = @transform_5, window_bounds = array<i64: 1, 2, 128>}]} {
    %c0_i32 = arith.constant 0 : i32
    %0 = arith.cmpi eq, %arg1, %c0_i32 : i32
    %1 = arith.extui %0 : i1 to i32
    %c0_i32_0 = arith.constant 0 : i32
    %2 = arith.cmpi ne, %1, %c0_i32_0 : i32
    scf.if %2 {
      %c0_73 = arith.constant 0 : index
      %c0_74 = arith.constant 0 : index
      %c0_75 = arith.constant 0 : index
      %c0_76 = arith.constant 0 : index
      %78 = vector.load %arg2[%c0_73, %c0_74, %c0_75, %c0_76] : memref<1x16x16x128xbf16, #tpu.memory_space<vmem>>, vector<1x16x16x128xbf16>
      %79 = vector.shape_cast %78 : vector<1x16x16x128xbf16> to vector<16x16x128xbf16>
      %80 = arith.extf %79 : vector<16x16x128xbf16> to vector<16x16x128xf32>
      %c0_77 = arith.constant 0 : index
      %c0_78 = arith.constant 0 : index
      %81 = vector.load %arg3[%c0_77, %c0_78] : memref<1x128xf32, #tpu.memory_space<vmem>>, vector<1x128xf32>
      %82 = vector.shape_cast %81 : vector<1x128xf32> to vector<1x1x128xf32>
      %83 = vector.broadcast %82 : vector<1x1x128xf32> to vector<16x16x128xf32>
      %84 = arith.mulf %80, %83 : vector<16x16x128xf32>
      %c0_79 = arith.constant 0 : index
      %c0_80 = arith.constant 0 : index
      %85 = vector.load %arg4[%c0_79, %c0_80] : memref<1x128xf32, #tpu.memory_space<vmem>>, vector<1x128xf32>
      %86 = vector.shape_cast %85 : vector<1x128xf32> to vector<1x1x128xf32>
      %87 = vector.broadcast %86 : vector<1x1x128xf32> to vector<16x16x128xf32>
      %88 = arith.addf %84, %87 : vector<16x16x128xf32>
      %cst_81 = arith.constant 0.000000e+00 : f32
      %89 = vector.broadcast %cst_81 : f32 to vector<16x16x128xf32>
      %90 = arith.maximumf %88, %89 : vector<16x16x128xf32>
      %91 = arith.truncf %90 : vector<16x16x128xf32> to vector<16x16x128xbf16>
      %cst_82 = arith.constant 0.000000e+00 : bf16
      %92 = vector.broadcast %cst_82 : bf16 to vector<3x18x16x128xbf16>
      %c0_83 = arith.constant 0 : index
      %c0_84 = arith.constant 0 : index
      %c0_85 = arith.constant 0 : index
      %c0_86 = arith.constant 0 : index
      %93 = vector.load %arg8[%c0_83, %c0_84, %c0_85, %c0_86] : memref<3x18x16x128xbf16, #tpu.memory_space<vmem>>, vector<3x18x16x128xbf16>
      tpu.vector_store %arg8[%c0_83, %c0_84, %c0_85, %c0_86], %92 {strides = array<i32>} : memref<3x18x16x128xbf16, #tpu.memory_space<vmem>>, vector<3x18x16x128xbf16>,
      %94 = vector.extract_strided_slice %91 {offsets = [0, 0, 0], sizes = [16, 15, 128], strides = [1, 1, 1]} : vector<16x16x128xbf16> to vector<16x15x128xbf16>
      %c0_87 = arith.constant 0 : index
      %c1_88 = arith.constant 1 : index
      %c1_89 = arith.constant 1 : index
      %c0_90 = arith.constant 0 : index
      %95 = vector.load %arg8[%c0_87, %c1_88, %c1_89, %c0_90] : memref<3x18x16x128xbf16, #tpu.memory_space<vmem>>, vector<1x16x15x128xbf16>
      %96 = vector.shape_cast %95 : vector<1x16x15x128xbf16> to vector<16x15x128xbf16>
      %97 = vector.shape_cast %94 : vector<16x15x128xbf16> to vector<1x16x15x128xbf16>
      tpu.vector_store %arg8[%c0_87, %c1_88, %c1_89, %c0_90], %97 {strides = array<i32>} : memref<3x18x16x128xbf16, #tpu.memory_space<vmem>>, vector<1x16x15x128xbf16>,
      %c1_91 = arith.constant 1 : index
      %c1_92 = arith.constant 1 : index
      %c0_93 = arith.constant 0 : index
      %c0_94 = arith.constant 0 : index
      %98 = vector.load %arg8[%c1_91, %c1_92, %c0_93, %c0_94] : memref<3x18x16x128xbf16, #tpu.memory_space<vmem>>, vector<1x16x16x128xbf16>
      %99 = vector.shape_cast %98 : vector<1x16x16x128xbf16> to vector<16x16x128xbf16>
      %100 = vector.shape_cast %91 : vector<16x16x128xbf16> to vector<1x16x16x128xbf16>
      tpu.vector_store %arg8[%c1_91, %c1_92, %c0_93, %c0_94], %100 {strides = array<i32>} : memref<3x18x16x128xbf16, #tpu.memory_space<vmem>>, vector<1x16x16x128xbf16>,
      %101 = vector.extract_strided_slice %91 {offsets = [0, 1, 0], sizes = [16, 15, 128], strides = [1, 1, 1]} : vector<16x16x128xbf16> to vector<16x15x128xbf16>
      %c2_95 = arith.constant 2 : index
      %c1_96 = arith.constant 1 : index
      %c0_97 = arith.constant 0 : index
      %c0_98 = arith.constant 0 : index
      %102 = vector.load %arg8[%c2_95, %c1_96, %c0_97, %c0_98] : memref<3x18x16x128xbf16, #tpu.memory_space<vmem>>, vector<1x16x15x128xbf16>
      %103 = vector.shape_cast %102 : vector<1x16x15x128xbf16> to vector<16x15x128xbf16>
      %104 = vector.shape_cast %101 : vector<16x15x128xbf16> to vector<1x16x15x128xbf16>
      tpu.vector_store %arg8[%c2_95, %c1_96, %c0_97, %c0_98], %104 {strides = array<i32>} : memref<3x18x16x128xbf16, #tpu.memory_space<vmem>>, vector<1x16x15x128xbf16>,
    } else {
    }
    %c0 = arith.constant 0 : index
    %c0_1 = arith.constant 0 : index
    %c0_2 = arith.constant 0 : index
    %c0_3 = arith.constant 0 : index
    %3 = vector.load %arg8[%c0, %c0_1, %c0_2, %c0_3] : memref<3x18x16x128xbf16, #tpu.memory_space<vmem>>, vector<1x16x16x128xbf16>
    %4 = vector.shape_cast %3 : vector<1x16x16x128xbf16> to vector<16x16x128xbf16>
    %5 = vector.shape_cast %4 : vector<16x16x128xbf16> to vector<256x128xbf16>
    %c0_4 = arith.constant 0 : index
    %c0_5 = arith.constant 0 : index
    %c0_6 = arith.constant 0 : index
    %6 = vector.load %arg5[%c0_4, %c0_5, %c0_6] : memref<9x128x128xbf16, #tpu.memory_space<vmem>>, vector<1x128x128xbf16>
    %7 = vector.shape_cast %6 : vector<1x128x128xbf16> to vector<128x128xbf16>
    %cst = arith.constant dense<0.000000e+00> : vector<256x128xf32>
    %8 = tpu.matmul %5, %7, %cst {dimension_numbers = #tpu.dot_dimension_numbers<[1], [0], [0], [1], [0, 0, 1, 1], [], []>} : vector<256x128xbf16>, vector<128x128xbf16>, vector<256x128xf32> -> vector<256x128xf32>
    %c1 = arith.constant 1 : index
    %c0_7 = arith.constant 0 : index
    %c0_8 = arith.constant 0 : index
    %c0_9 = arith.constant 0 : index
    %9 = vector.load %arg8[%c1, %c0_7, %c0_8, %c0_9] : memref<3x18x16x128xbf16, #tpu.memory_space<vmem>>, vector<1x16x16x128xbf16>
    %10 = vector.shape_cast %9 : vector<1x16x16x128xbf16> to vector<16x16x128xbf16>
    %11 = vector.shape_cast %10 : vector<16x16x128xbf16> to vector<256x128xbf16>
    %c1_10 = arith.constant 1 : index
    %c0_11 = arith.constant 0 : index
    %c0_12 = arith.constant 0 : index
    %12 = vector.load %arg5[%c1_10, %c0_11, %c0_12] : memref<9x128x128xbf16, #tpu.memory_space<vmem>>, vector<1x128x128xbf16>
    %13 = vector.shape_cast %12 : vector<1x128x128xbf16> to vector<128x128xbf16>
    %cst_13 = arith.constant dense<0.000000e+00> : vector<256x128xf32>
    %14 = tpu.matmul %11, %13, %cst_13 {dimension_numbers = #tpu.dot_dimension_numbers<[1], [0], [0], [1], [0, 0, 1, 1], [], []>} : vector<256x128xbf16>, vector<128x128xbf16>, vector<256x128xf32> -> vector<256x128xf32>
    %15 = arith.addf %8, %14 : vector<256x128xf32>
    %c2 = arith.constant 2 : index
    %c0_14 = arith.constant 0 : index
    %c0_15 = arith.constant 0 : index
    %c0_16 = arith.constant 0 : index
    %16 = vector.load %arg8[%c2, %c0_14, %c0_15, %c0_16] : memref<3x18x16x128xbf16, #tpu.memory_space<vmem>>, vector<1x16x16x128xbf16>
    %17 = vector.shape_cast %16 : vector<1x16x16x128xbf16> to vector<16x16x128xbf16>
    %18 = vector.shape_cast %17 : vector<16x16x128xbf16> to vector<256x128xbf16>
    %c2_17 = arith.constant 2 : index
    %c0_18 = arith.constant 0 : index
    %c0_19 = arith.constant 0 : index
    %19 = vector.load %arg5[%c2_17, %c0_18, %c0_19] : memref<9x128x128xbf16, #tpu.memory_space<vmem>>, vector<1x128x128xbf16>
    %20 = vector.shape_cast %19 : vector<1x128x128xbf16> to vector<128x128xbf16>
    %cst_20 = arith.constant dense<0.000000e+00> : vector<256x128xf32>
    %21 = tpu.matmul %18, %20, %cst_20 {dimension_numbers = #tpu.dot_dimension_numbers<[1], [0], [0], [1], [0, 0, 1, 1], [], []>} : vector<256x128xbf16>, vector<128x128xbf16>, vector<256x128xf32> -> vector<256x128xf32>
    %22 = arith.addf %15, %21 : vector<256x128xf32>
    %c0_21 = arith.constant 0 : index
    %c1_22 = arith.constant 1 : index
    %c0_23 = arith.constant 0 : index
    %c0_24 = arith.constant 0 : index
    %23 = vector.load %arg8[%c0_21, %c1_22, %c0_23, %c0_24] : memref<3x18x16x128xbf16, #tpu.memory_space<vmem>>, vector<1x16x16x128xbf16>
    %24 = vector.shape_cast %23 : vector<1x16x16x128xbf16> to vector<16x16x128xbf16>
    %25 = vector.shape_cast %24 : vector<16x16x128xbf16> to vector<256x128xbf16>
    %c3 = arith.constant 3 : index
    %c0_25 = arith.constant 0 : index
    %c0_26 = arith.constant 0 : index
    %26 = vector.load %arg5[%c3, %c0_25, %c0_26] : memref<9x128x128xbf16, #tpu.memory_space<vmem>>, vector<1x128x128xbf16>
    %27 = vector.shape_cast %26 : vector<1x128x128xbf16> to vector<128x128xbf16>
    %cst_27 = arith.constant dense<0.000000e+00> : vector<256x128xf32>
    %28 = tpu.matmul %25, %27, %cst_27 {dimension_numbers = #tpu.dot_dimension_numbers<[1], [0], [0], [1], [0, 0, 1, 1], [], []>} : vector<256x128xbf16>, vector<128x128xbf16>, vector<256x128xf32> -> vector<256x128xf32>
    %29 = arith.addf %22, %28 : vector<256x128xf32>
    %c1_28 = arith.constant 1 : index
    %c1_29 = arith.constant 1 : index
    %c0_30 = arith.constant 0 : index
    %c0_31 = arith.constant 0 : index
    %30 = vector.load %arg8[%c1_28, %c1_29, %c0_30, %c0_31] : memref<3x18x16x128xbf16, #tpu.memory_space<vmem>>, vector<1x16x16x128xbf16>
    %31 = vector.shape_cast %30 : vector<1x16x16x128xbf16> to vector<16x16x128xbf16>
    %32 = vector.shape_cast %31 : vector<16x16x128xbf16> to vector<256x128xbf16>
    %c4 = arith.constant 4 : index
    %c0_32 = arith.constant 0 : index
    %c0_33 = arith.constant 0 : index
    %33 = vector.load %arg5[%c4, %c0_32, %c0_33] : memref<9x128x128xbf16, #tpu.memory_space<vmem>>, vector<1x128x128xbf16>
    %34 = vector.shape_cast %33 : vector<1x128x128xbf16> to vector<128x128xbf16>
    %cst_34 = arith.constant dense<0.000000e+00> : vector<256x128xf32>
    %35 = tpu.matmul %32, %34, %cst_34 {dimension_numbers = #tpu.dot_dimension_numbers<[1], [0], [0], [1], [0, 0, 1, 1], [], []>} : vector<256x128xbf16>, vector<128x128xbf16>, vector<256x128xf32> -> vector<256x128xf32>
    %36 = arith.addf %29, %35 : vector<256x128xf32>
    %c2_35 = arith.constant 2 : index
    %c1_36 = arith.constant 1 : index
    %c0_37 = arith.constant 0 : index
    %c0_38 = arith.constant 0 : index
    %37 = vector.load %arg8[%c2_35, %c1_36, %c0_37, %c0_38] : memref<3x18x16x128xbf16, #tpu.memory_space<vmem>>, vector<1x16x16x128xbf16>
    %38 = vector.shape_cast %37 : vector<1x16x16x128xbf16> to vector<16x16x128xbf16>
    %39 = vector.shape_cast %38 : vector<16x16x128xbf16> to vector<256x128xbf16>
    %c5 = arith.constant 5 : index
    %c0_39 = arith.constant 0 : index
    %c0_40 = arith.constant 0 : index
    %40 = vector.load %arg5[%c5, %c0_39, %c0_40] : memref<9x128x128xbf16, #tpu.memory_space<vmem>>, vector<1x128x128xbf16>
    %41 = vector.shape_cast %40 : vector<1x128x128xbf16> to vector<128x128xbf16>
    %cst_41 = arith.constant dense<0.000000e+00> : vector<256x128xf32>
    %42 = tpu.matmul %39, %41, %cst_41 {dimension_numbers = #tpu.dot_dimension_numbers<[1], [0], [0], [1], [0, 0, 1, 1], [], []>} : vector<256x128xbf16>, vector<128x128xbf16>, vector<256x128xf32> -> vector<256x128xf32>
    %43 = arith.addf %36, %42 : vector<256x128xf32>
    %c0_42 = arith.constant 0 : index
    %c2_43 = arith.constant 2 : index
    %c0_44 = arith.constant 0 : index
    %c0_45 = arith.constant 0 : index
    %44 = vector.load %arg8[%c0_42, %c2_43, %c0_44, %c0_45] : memref<3x18x16x128xbf16, #tpu.memory_space<vmem>>, vector<1x16x16x128xbf16>
    %45 = vector.shape_cast %44 : vector<1x16x16x128xbf16> to vector<16x16x128xbf16>
    %46 = vector.shape_cast %45 : vector<16x16x128xbf16> to vector<256x128xbf16>
    %c6 = arith.constant 6 : index
    %c0_46 = arith.constant 0 : index
    %c0_47 = arith.constant 0 : index
    %47 = vector.load %arg5[%c6, %c0_46, %c0_47] : memref<9x128x128xbf16, #tpu.memory_space<vmem>>, vector<1x128x128xbf16>
    %48 = vector.shape_cast %47 : vector<1x128x128xbf16> to vector<128x128xbf16>
    %cst_48 = arith.constant dense<0.000000e+00> : vector<256x128xf32>
    %49 = tpu.matmul %46, %48, %cst_48 {dimension_numbers = #tpu.dot_dimension_numbers<[1], [0], [0], [1], [0, 0, 1, 1], [], []>} : vector<256x128xbf16>, vector<128x128xbf16>, vector<256x128xf32> -> vector<256x128xf32>
    %50 = arith.addf %43, %49 : vector<256x128xf32>
    %c1_49 = arith.constant 1 : index
    %c2_50 = arith.constant 2 : index
    %c0_51 = arith.constant 0 : index
    %c0_52 = arith.constant 0 : index
    %51 = vector.load %arg8[%c1_49, %c2_50, %c0_51, %c0_52] : memref<3x18x16x128xbf16, #tpu.memory_space<vmem>>, vector<1x16x16x128xbf16>
    %52 = vector.shape_cast %51 : vector<1x16x16x128xbf16> to vector<16x16x128xbf16>
    %53 = vector.shape_cast %52 : vector<16x16x128xbf16> to vector<256x128xbf16>
    %c7 = arith.constant 7 : index
    %c0_53 = arith.constant 0 : index
    %c0_54 = arith.constant 0 : index
    %54 = vector.load %arg5[%c7, %c0_53, %c0_54] : memref<9x128x128xbf16, #tpu.memory_space<vmem>>, vector<1x128x128xbf16>
    %55 = vector.shape_cast %54 : vector<1x128x128xbf16> to vector<128x128xbf16>
    %cst_55 = arith.constant dense<0.000000e+00> : vector<256x128xf32>
    %56 = tpu.matmul %53, %55, %cst_55 {dimension_numbers = #tpu.dot_dimension_numbers<[1], [0], [0], [1], [0, 0, 1, 1], [], []>} : vector<256x128xbf16>, vector<128x128xbf16>, vector<256x128xf32> -> vector<256x128xf32>
    %57 = arith.addf %50, %56 : vector<256x128xf32>
    %c2_56 = arith.constant 2 : index
    %c2_57 = arith.constant 2 : index
    %c0_58 = arith.constant 0 : index
    %c0_59 = arith.constant 0 : index
    %58 = vector.load %arg8[%c2_56, %c2_57, %c0_58, %c0_59] : memref<3x18x16x128xbf16, #tpu.memory_space<vmem>>, vector<1x16x16x128xbf16>
    %59 = vector.shape_cast %58 : vector<1x16x16x128xbf16> to vector<16x16x128xbf16>
    %60 = vector.shape_cast %59 : vector<16x16x128xbf16> to vector<256x128xbf16>
    %c8 = arith.constant 8 : index
    %c0_60 = arith.constant 0 : index
    %c0_61 = arith.constant 0 : index
    %61 = vector.load %arg5[%c8, %c0_60, %c0_61] : memref<9x128x128xbf16, #tpu.memory_space<vmem>>, vector<1x128x128xbf16>
    %62 = vector.shape_cast %61 : vector<1x128x128xbf16> to vector<128x128xbf16>
    %cst_62 = arith.constant dense<0.000000e+00> : vector<256x128xf32>
    %63 = tpu.matmul %60, %62, %cst_62 {dimension_numbers = #tpu.dot_dimension_numbers<[1], [0], [0], [1], [0, 0, 1, 1], [], []>} : vector<256x128xbf16>, vector<128x128xbf16>, vector<256x128xf32> -> vector<256x128xf32>
    %64 = arith.addf %57, %63 : vector<256x128xf32>
    %65 = arith.truncf %64 : vector<256x128xf32> to vector<256x128xbf16>
    %c0_63 = arith.constant 0 : index
    %c0_64 = arith.constant 0 : index
    %66 = vector.load %arg6[%c0_63, %c0_64] : memref<256x128xbf16, #tpu.memory_space<vmem>>, vector<256x128xbf16>
    tpu.vector_store %arg6[%c0_63, %c0_64], %65 {strides = array<i32>} : memref<256x128xbf16, #tpu.memory_space<vmem>>, vector<256x128xbf16>,
    %cst_65 = arith.constant dense<0.000000e+00> : vector<128xf32>
    %67 = vector.multi_reduction <add>, %64, %cst_65 [0] : vector<256x128xf32> to vector<128xf32>
    %68 = vector.shape_cast %67 : vector<128xf32> to vector<1x128xf32>
    %c0_66 = arith.constant 0 : index
    %c0_67 = arith.constant 0 : index
    %c0_68 = arith.constant 0 : index
    %69 = vector.load %arg7[%c0_66, %c0_67, %c0_68] : memref<1x2x128xf32, #tpu.memory_space<vmem>>, vector<1x1x128xf32>
    %70 = vector.shape_cast %69 : vector<1x1x128xf32> to vector<1x128xf32>
    %71 = vector.shape_cast %68 : vector<1x128xf32> to vector<1x1x128xf32>
    tpu.vector_store %arg7[%c0_66, %c0_67, %c0_68], %71 {strides = array<i32>} : memref<1x2x128xf32, #tpu.memory_space<vmem>>, vector<1x1x128xf32>,
    %72 = arith.mulf %64, %64 : vector<256x128xf32>
    %cst_69 = arith.constant dense<0.000000e+00> : vector<128xf32>
    %73 = vector.multi_reduction <add>, %72, %cst_69 [0] : vector<256x128xf32> to vector<128xf32>
    %74 = vector.shape_cast %73 : vector<128xf32> to vector<1x128xf32>
    %c0_70 = arith.constant 0 : index
    %c1_71 = arith.constant 1 : index
    %c0_72 = arith.constant 0 : index
    %75 = vector.load %arg7[%c0_70, %c1_71, %c0_72] : memref<1x2x128xf32, #tpu.memory_space<vmem>>, vector<1x1x128xf32>
    %76 = vector.shape_cast %75 : vector<1x1x128xf32> to vector<1x128xf32>
    %77 = vector.shape_cast %74 : vector<1x128xf32> to vector<1x1x128xf32>
    tpu.vector_store %arg7[%c0_70, %c1_71, %c0_72], %77 {strides = array<i32>} : memref<1x2x128xf32, #tpu.memory_space<vmem>>, vector<1x1x128xf32>,
    return
  }
  func.func @transform_0(%arg0: i32, %arg1: i32) -> (i32, i32, i32, i32) {
    %c0_i32 = arith.constant 0 : i32
    %c0_i32_0 = arith.constant 0 : i32
    %c0_i32_1 = arith.constant 0 : i32
    %c0_i32_2 = arith.constant 0 : i32
    return %arg0, %c0_i32, %c0_i32_0, %c0_i32_1 : i32, i32, i32, i32
  }
  func.func @transform_1(%arg0: i32, %arg1: i32) -> (i32, i32) {
    %c0_i32 = arith.constant 0 : i32
    %c0_i32_0 = arith.constant 0 : i32
    %c0_i32_1 = arith.constant 0 : i32
    return %c0_i32, %c0_i32_0 : i32, i32
  }
  func.func @transform_2(%arg0: i32, %arg1: i32) -> (i32, i32) {
    %c0_i32 = arith.constant 0 : i32
    %c0_i32_0 = arith.constant 0 : i32
    %c0_i32_1 = arith.constant 0 : i32
    return %c0_i32, %c0_i32_0 : i32, i32
  }
  func.func @transform_3(%arg0: i32, %arg1: i32) -> (i32, i32, i32) {
    %c0_i32 = arith.constant 0 : i32
    %c0_i32_0 = arith.constant 0 : i32
    %c0_i32_1 = arith.constant 0 : i32
    return %c0_i32, %c0_i32_0, %arg1 : i32, i32, i32
  }
  func.func @transform_4(%arg0: i32, %arg1: i32) -> (i32, i32) {
    %c0_i32 = arith.constant 0 : i32
    return %arg0, %arg1 : i32, i32
  }
  func.func @transform_5(%arg0: i32, %arg1: i32) -> (i32, i32, i32) {
    %c0_i32 = arith.constant 0 : i32
    %c0_i32_0 = arith.constant 0 : i32
    return %arg0, %c0_i32, %arg1 : i32, i32, i32
  }
}

module attributes {stable_mosaic.version = 11 : i64} {
  func.func @_mm_stats_kernel_1k(%arg0: i32, %arg1: i32, %arg2: memref<512x128xbf16, #tpu.memory_space<vmem>>, %arg3: memref<128x128xbf16, #tpu.memory_space<vmem>>, %arg4: memref<1x128xf32, #tpu.memory_space<vmem>>, %arg5: memref<1x128xf32, #tpu.memory_space<vmem>>, %arg6: memref<512x128xbf16, #tpu.memory_space<vmem>>, %arg7: memref<1x2x128xf32, #tpu.memory_space<vmem>>) attributes {dimension_semantics = [#tpu.dimension_semantics<parallel>, #tpu.dimension_semantics<parallel>], iteration_bounds = array<i64: 1, 1>, scalar_prefetch = 0 : i64, scratch_operands = 0 : i64, tpu.core_type = #tpu.core_type<tc>, window_params = [{transform_indices = @transform_0, window_bounds = array<i64: 512, 128>}, {transform_indices = @transform_1, window_bounds = array<i64: 128, 128>}, {pipeline_mode = #tpu.pipeline_mode<synchronous>, transform_indices = @transform_2, window_bounds = array<i64: 1, 128>}, {pipeline_mode = #tpu.pipeline_mode<synchronous>, transform_indices = @transform_3, window_bounds = array<i64: 1, 128>}, {transform_indices = @transform_4, window_bounds = array<i64: 512, 128>}, {transform_indices = @transform_5, window_bounds = array<i64: 1, 2, 128>}]} {
    %c0 = arith.constant 0 : index
    %c0_0 = arith.constant 0 : index
    %0 = vector.load %arg2[%c0, %c0_0] : memref<512x128xbf16, #tpu.memory_space<vmem>>, vector<512x128xbf16>
    %c0_1 = arith.constant 0 : index
    %c0_2 = arith.constant 0 : index
    %1 = vector.load %arg4[%c0_1, %c0_2] : memref<1x128xf32, #tpu.memory_space<vmem>>, vector<1x128xf32>
    %c0_3 = arith.constant 0 : index
    %c0_4 = arith.constant 0 : index
    %2 = vector.load %arg5[%c0_3, %c0_4] : memref<1x128xf32, #tpu.memory_space<vmem>>, vector<1x128xf32>
    %3 = arith.extf %0 : vector<512x128xbf16> to vector<512x128xf32>
    %4 = vector.broadcast %1 : vector<1x128xf32> to vector<512x128xf32>
    %5 = arith.mulf %3, %4 : vector<512x128xf32>
    %6 = vector.broadcast %2 : vector<1x128xf32> to vector<512x128xf32>
    %7 = arith.addf %5, %6 : vector<512x128xf32>
    %cst = arith.constant 0.000000e+00 : f32
    %8 = vector.broadcast %cst : f32 to vector<512x128xf32>
    %9 = arith.maximumf %7, %8 : vector<512x128xf32>
    %10 = arith.truncf %9 : vector<512x128xf32> to vector<512x128xbf16>
    %c0_5 = arith.constant 0 : index
    %c0_6 = arith.constant 0 : index
    %11 = vector.load %arg3[%c0_5, %c0_6] : memref<128x128xbf16, #tpu.memory_space<vmem>>, vector<128x128xbf16>
    %cst_7 = arith.constant dense<0.000000e+00> : vector<512x128xf32>
    %12 = tpu.matmul %10, %11, %cst_7 {dimension_numbers = #tpu.dot_dimension_numbers<[1], [0], [0], [1], [0, 0, 1, 1], [], []>} : vector<512x128xbf16>, vector<128x128xbf16>, vector<512x128xf32> -> vector<512x128xf32>
    %13 = arith.truncf %12 : vector<512x128xf32> to vector<512x128xbf16>
    %c0_8 = arith.constant 0 : index
    %c0_9 = arith.constant 0 : index
    %14 = vector.load %arg6[%c0_8, %c0_9] : memref<512x128xbf16, #tpu.memory_space<vmem>>, vector<512x128xbf16>
    tpu.vector_store %arg6[%c0_8, %c0_9], %13 {strides = array<i32>} : memref<512x128xbf16, #tpu.memory_space<vmem>>, vector<512x128xbf16>,
    %cst_10 = arith.constant dense<0.000000e+00> : vector<128xf32>
    %15 = vector.multi_reduction <add>, %12, %cst_10 [0] : vector<512x128xf32> to vector<128xf32>
    %16 = vector.shape_cast %15 : vector<128xf32> to vector<1x128xf32>
    %c0_11 = arith.constant 0 : index
    %c0_12 = arith.constant 0 : index
    %c0_13 = arith.constant 0 : index
    %17 = vector.load %arg7[%c0_11, %c0_12, %c0_13] : memref<1x2x128xf32, #tpu.memory_space<vmem>>, vector<1x1x128xf32>
    %18 = vector.shape_cast %17 : vector<1x1x128xf32> to vector<1x128xf32>
    %19 = vector.shape_cast %16 : vector<1x128xf32> to vector<1x1x128xf32>
    tpu.vector_store %arg7[%c0_11, %c0_12, %c0_13], %19 {strides = array<i32>} : memref<1x2x128xf32, #tpu.memory_space<vmem>>, vector<1x1x128xf32>,
    %20 = arith.mulf %12, %12 : vector<512x128xf32>
    %cst_14 = arith.constant dense<0.000000e+00> : vector<128xf32>
    %21 = vector.multi_reduction <add>, %20, %cst_14 [0] : vector<512x128xf32> to vector<128xf32>
    %22 = vector.shape_cast %21 : vector<128xf32> to vector<1x128xf32>
    %c0_15 = arith.constant 0 : index
    %c1 = arith.constant 1 : index
    %c0_16 = arith.constant 0 : index
    %23 = vector.load %arg7[%c0_15, %c1, %c0_16] : memref<1x2x128xf32, #tpu.memory_space<vmem>>, vector<1x1x128xf32>
    %24 = vector.shape_cast %23 : vector<1x1x128xf32> to vector<1x128xf32>
    %25 = vector.shape_cast %22 : vector<1x128xf32> to vector<1x1x128xf32>
    tpu.vector_store %arg7[%c0_15, %c1, %c0_16], %25 {strides = array<i32>} : memref<1x2x128xf32, #tpu.memory_space<vmem>>, vector<1x1x128xf32>,
    return
  }
  func.func @transform_0(%arg0: i32, %arg1: i32) -> (i32, i32) {
    %c0_i32 = arith.constant 0 : i32
    %c0_i32_0 = arith.constant 0 : i32
    return %arg0, %c0_i32 : i32, i32
  }
  func.func @transform_1(%arg0: i32, %arg1: i32) -> (i32, i32) {
    %c0_i32 = arith.constant 0 : i32
    %c0_i32_0 = arith.constant 0 : i32
    return %c0_i32, %arg1 : i32, i32
  }
  func.func @transform_2(%arg0: i32, %arg1: i32) -> (i32, i32) {
    %c0_i32 = arith.constant 0 : i32
    %c0_i32_0 = arith.constant 0 : i32
    %c0_i32_1 = arith.constant 0 : i32
    return %c0_i32, %c0_i32_0 : i32, i32
  }
  func.func @transform_3(%arg0: i32, %arg1: i32) -> (i32, i32) {
    %c0_i32 = arith.constant 0 : i32
    %c0_i32_0 = arith.constant 0 : i32
    %c0_i32_1 = arith.constant 0 : i32
    return %c0_i32, %c0_i32_0 : i32, i32
  }
  func.func @transform_4(%arg0: i32, %arg1: i32) -> (i32, i32) {
    %c0_i32 = arith.constant 0 : i32
    return %arg0, %arg1 : i32, i32
  }
  func.func @transform_5(%arg0: i32, %arg1: i32) -> (i32, i32, i32) {
    %c0_i32 = arith.constant 0 : i32
    %c0_i32_0 = arith.constant 0 : i32
    return %arg0, %c0_i32, %arg1 : i32, i32, i32
  }
}

module attributes {stable_mosaic.version = 11 : i64} {
  func.func @_bn_add_relu_kernel(%arg0: i32, %arg1: i32, %arg2: memref<512x128xbf16, #tpu.memory_space<vmem>>, %arg3: memref<512x128xbf16, #tpu.memory_space<vmem>>, %arg4: memref<1x128xf32, #tpu.memory_space<vmem>>, %arg5: memref<1x128xf32, #tpu.memory_space<vmem>>, %arg6: memref<512x128xbf16, #tpu.memory_space<vmem>>) attributes {dimension_semantics = [#tpu.dimension_semantics<parallel>, #tpu.dimension_semantics<parallel>], iteration_bounds = array<i64: 1, 1>, scalar_prefetch = 0 : i64, scratch_operands = 0 : i64, tpu.core_type = #tpu.core_type<tc>, window_params = [{transform_indices = @transform_0, window_bounds = array<i64: 512, 128>}, {transform_indices = @transform_1, window_bounds = array<i64: 512, 128>}, {transform_indices = @transform_2, window_bounds = array<i64: 1, 128>}, {transform_indices = @transform_3, window_bounds = array<i64: 1, 128>}, {transform_indices = @transform_4, window_bounds = array<i64: 512, 128>}]} {
    %c0 = arith.constant 0 : index
    %c0_0 = arith.constant 0 : index
    %0 = vector.load %arg2[%c0, %c0_0] : memref<512x128xbf16, #tpu.memory_space<vmem>>, vector<512x128xbf16>
    %1 = arith.extf %0 : vector<512x128xbf16> to vector<512x128xf32>
    %c0_1 = arith.constant 0 : index
    %c0_2 = arith.constant 0 : index
    %2 = vector.load %arg4[%c0_1, %c0_2] : memref<1x128xf32, #tpu.memory_space<vmem>>, vector<1x128xf32>
    %3 = vector.broadcast %2 : vector<1x128xf32> to vector<512x128xf32>
    %4 = arith.mulf %1, %3 : vector<512x128xf32>
    %c0_3 = arith.constant 0 : index
    %c0_4 = arith.constant 0 : index
    %5 = vector.load %arg5[%c0_3, %c0_4] : memref<1x128xf32, #tpu.memory_space<vmem>>, vector<1x128xf32>
    %6 = vector.broadcast %5 : vector<1x128xf32> to vector<512x128xf32>
    %7 = arith.addf %4, %6 : vector<512x128xf32>
    %c0_5 = arith.constant 0 : index
    %c0_6 = arith.constant 0 : index
    %8 = vector.load %arg3[%c0_5, %c0_6] : memref<512x128xbf16, #tpu.memory_space<vmem>>, vector<512x128xbf16>
    %9 = arith.extf %8 : vector<512x128xbf16> to vector<512x128xf32>
    %10 = arith.addf %7, %9 : vector<512x128xf32>
    %cst = arith.constant 0.000000e+00 : f32
    %11 = vector.broadcast %cst : f32 to vector<512x128xf32>
    %12 = arith.maximumf %10, %11 : vector<512x128xf32>
    %13 = arith.truncf %12 : vector<512x128xf32> to vector<512x128xbf16>
    %c0_7 = arith.constant 0 : index
    %c0_8 = arith.constant 0 : index
    %14 = vector.load %arg6[%c0_7, %c0_8] : memref<512x128xbf16, #tpu.memory_space<vmem>>, vector<512x128xbf16>
    tpu.vector_store %arg6[%c0_7, %c0_8], %13 {strides = array<i32>} : memref<512x128xbf16, #tpu.memory_space<vmem>>, vector<512x128xbf16>,
    return
  }
  func.func @transform_0(%arg0: i32, %arg1: i32) -> (i32, i32) {
    %c0_i32 = arith.constant 0 : i32
    return %arg0, %arg1 : i32, i32
  }
  func.func @transform_1(%arg0: i32, %arg1: i32) -> (i32, i32) {
    %c0_i32 = arith.constant 0 : i32
    return %arg0, %arg1 : i32, i32
  }
  func.func @transform_2(%arg0: i32, %arg1: i32) -> (i32, i32) {
    %c0_i32 = arith.constant 0 : i32
    %c0_i32_0 = arith.constant 0 : i32
    return %c0_i32, %arg1 : i32, i32
  }
  func.func @transform_3(%arg0: i32, %arg1: i32) -> (i32, i32) {
    %c0_i32 = arith.constant 0 : i32
    %c0_i32_0 = arith.constant 0 : i32
    return %c0_i32, %arg1 : i32, i32
  }
  func.func @transform_4(%arg0: i32, %arg1: i32) -> (i32, i32) {
    %c0_i32 = arith.constant 0 : i32
    return %arg0, %arg1 : i32, i32
  }
}

</mosaic_0001>

<bundles_post_ra>
// kernel: bottleneck_forward.5
= control target key start
LH: loop header
LB: loop body
LE: loop exit
PB: predicated region body
PF: predicated region fallthrough
CT: control target
= control target key end

     0   :  { %s465_s6 = smov 0   ;;  %s580_s0 = inlined_call_operand.vmem [shape: f32[2,16,256], index: 0, kind: input, shape index: {}]   ;;  %s581_s1 = inlined_call_operand.vmem [shape: bf16[512,128], index: 1, kind: output, shape index: {}]  }
   0x1 LB: > { %s340_s7 = sadd.s32 4294967295, %s452_s6   ;;  %p344_p0 = scmp.ge.s32.totalorder %s452_s6, 1  ;;  %s452_s6 = sphi %s465_s6, %s11_s6  }
   0x2   : > { %p87_p1 = scmp.lt.s32.totalorder %s452_s6, 3 }
   0x4   : > { %p88_p2 = pnand %p344_p0, %p87_p1 }
   0x5   : > { %p107_p3 = scmp.lt.s32.totalorder (!%p88_p2), %s340_s7, 1  ;;  %s347_s8 = sshll.u32 (!%p88_p2), %s340_s7, 5 }
   0x6   : > { %91 = sbr.rel (%p88_p2) target bundleno = 308 (0x134), region = 24  ;;  %p113_p4 = scmp.lt.s32.totalorder (!%p88_p2), %s347_s8, 63 }
   0xb   : > { %s583_s7 = smov (!%p107_p3, %s340_s7), 1  ;;  %s585_s8 = smov (!%p113_p4, %s347_s8), 63  ;;  %v454_v3 = vmov 0   ;;  %vm251_vm0 = vcmask 125952  }
   0xc   : > { %s351_s9 = sshll.u32 %s583_s7, 5  ;;  %s348_s13 = sshll.u32 %s585_s8, 2 }
   0xd   : > { %s111_s12 = scalar_lea.vmem %s580_s0, %s351_s9  ;;  %s479_s16 = scalar_lea.vmem %s581_s1, %s348_s13 }
   0xe   : > { %v119_v0 = vld [vmem:[%s111_s12] sm:$0xff]  ;;  %v120_v1 = vld [vmem:[%s111_s12 + $0x8] sm:$0xff]  ;;  %187 = vst [vmem:[%s479_s16] sm:$0xf] %v454_v3  ;;  %v121_v4 = vld [vmem:[%s111_s12 + $0x10] sm:$0xff] }
   0xf   : > { %v362_v2 = vpack.i.bf16 %v120_v1, %v119_v0  ;;  %203 = vst [vmem:[%s479_s16 + $0x40] sm:$0xf] %v454_v3  ;;  %v122_v5 = vld [vmem:[%s111_s12 + $0x18] sm:$0xff] }
  0x10   : > { %188 = vst [vmem:[%s479_s16 + $0x4] sm:$0xf] %v454_v3  ;;  %v364_v6 = vpack.i.bf16 %v122_v5, %v121_v4 }
  0x11   : > { %363 = vxpose.xlu0.b32.start [1/2] (short) %v362_v2, 128  ;;  %189 = vst [vmem:[%s479_s16 + $0x8] sm:$0xf] %v454_v3 }
  0x12   : > { %190 = vst [vmem:[%s479_s16 + $0xc] sm:$0xf] %v454_v3 }
  0x13   : > { %191 = vst [vmem:[%s479_s16 + $0x10] sm:$0xf] %v454_v3 }
  0x14   : > { %192 = vst [vmem:[%s479_s16 + $0x14] sm:$0xf] %v454_v3 }
  0x15   : > { %193 = vst [vmem:[%s479_s16 + $0x18] sm:$0xf] %v454_v3 }
  0x16   : > { %194 = vst [vmem:[%s479_s16 + $0x1c] sm:$0xf] %v454_v3 }
  0x17   : > { %195 = vst [vmem:[%s479_s16 + $0x20] sm:$0xf] %v454_v3 }
  0x18   : > { %196 = vst [vmem:[%s479_s16 + $0x24] sm:$0xf] %v454_v3 }
  0x19   : > { %365 = vxpose.xlu0.b32.end [2/2] (short) %v364_v6, 128  ;;  %197 = vst [vmem:[%s479_s16 + $0x28] sm:$0xf] %v454_v3 }
  0x1a   : > { %198 = vst [vmem:[%s479_s16 + $0x2c] sm:$0xf] %v454_v3 }
  0x1b   : > { %199 = vst [vmem:[%s479_s16 + $0x30] sm:$0xf] %v454_v3 }
  0x1c   : > { %200 = vst [vmem:[%s479_s16 + $0x34] sm:$0xf] %v454_v3 }
  0x1d   : > { %201 = vst [vmem:[%s479_s16 + $0x38] sm:$0xf] %v454_v3 }
  0x1e   : > { %202 = vst [vmem:[%s479_s16 + $0x3c] sm:$0xf] %v454_v3 }
  0x1f   : > { %204 = vst [vmem:[%s479_s16 + $0x44] sm:$0xf] %v454_v3 }
  0x20   : > { %205 = vst [vmem:[%s479_s16 + $0x48] sm:$0xf] %v454_v3 }
  0x21   : > { %206 = vst [vmem:[%s479_s16 + $0x4c] sm:$0xf] %v454_v3 }
  0x22   : > { %207 = vst [vmem:[%s479_s16 + $0x50] sm:$0xf] %v454_v3 }
  0x23   : > { %208 = vst [vmem:[%s479_s16 + $0x54] sm:$0xf] %v454_v3 }
  0x24   : > { %209 = vst [vmem:[%s479_s16 + $0x58] sm:$0xf] %v454_v3 }
  0x25   : > { %210 = vst [vmem:[%s479_s16 + $0x5c] sm:$0xf] %v454_v3 }
  0x26   : > { %211 = vst [vmem:[%s479_s16 + $0x60] sm:$0xf] %v454_v3 }
  0x27   : > { %212 = vst [vmem:[%s479_s16 + $0x64] sm:$0xf] %v454_v3 }
  0x28   : > { %213 = vst [vmem:[%s479_s16 + $0x68] sm:$0xf] %v454_v3 }
  0x29   : > { %214 = vst [vmem:[%s479_s16 + $0x6c] sm:$0xf] %v454_v3 }
  0x2a   : > { %215 = vst [vmem:[%s479_s16 + $0x70] sm:$0xf] %v454_v3 }
  0x2b   : > { %216 = vst [vmem:[%s479_s16 + $0x74] sm:$0xf] %v454_v3 }
  0x2c   : > { %217 = vst [vmem:[%s479_s16 + $0x78] sm:$0xf] %v454_v3 }
  0x2d   : > { %218 = vst [vmem:[%s479_s16 + $0x7c] sm:$0xf] %v454_v3 }
  0xb5   : > { %v366_v7 = vpop.trf.xlu0 }
  0xb6   : > { %v370_v8 = vunpack.i.h.bf16 %v366_v7  ;;  %v367_v9 = vunpack.i.l.bf16 %v366_v7 }
  0xb8   : > { %v235_v10 = vpack.c.bf16 %v370_v8, %v370_v8  ;;  %v219_v11 = vpack.c.bf16 %v367_v9, %v367_v9 }
  0xba   : > { %268 = vst.msk [vmem:[%s479_s16 + $0x40] sm:$0xf] %vm251_vm0, %v235_v10 }
  0xbb   : > { %252 = vst.msk [vmem:[%s479_s16] sm:$0xf] %vm251_vm0, %v219_v11 }
  0xbd   : > { %v371_v12 = vpop.trf.xlu0 }
  0xbe   : > { %v375_v13 = vunpack.i.h.bf16 %v371_v12  ;;  %v372_v14 = vunpack.i.l.bf16 %v371_v12 }
  0xc0   : > { %v236_v15 = vpack.c.bf16 %v375_v13, %v375_v13  ;;  %v220_v16 = vpack.c.bf16 %v372_v14, %v372_v14 }
  0xc2   : > { %269 = vst.msk [vmem:[%s479_s16 + $0x44] sm:$0xf] %vm251_vm0, %v236_v15 }
  0xc3   : > { %253 = vst.msk [vmem:[%s479_s16 + $0x4] sm:$0xf] %vm251_vm0, %v220_v16 }
  0xc5   : > { %v376_v17 = vpop.trf.xlu0 }
  0xc6   : > { %v380_v18 = vunpack.i.h.bf16 %v376_v17  ;;  %v377_v19 = vunpack.i.l.bf16 %v376_v17 }
  0xc8   : > { %v237_v20 = vpack.c.bf16 %v380_v18, %v380_v18  ;;  %v221_v21 = vpack.c.bf16 %v377_v19, %v377_v19 }
  0xca   : > { %270 = vst.msk [vmem:[%s479_s16 + $0x48] sm:$0xf] %vm251_vm0, %v237_v20 }
  0xcb   : > { %254 = vst.msk [vmem:[%s479_s16 + $0x8] sm:$0xf] %vm251_vm0, %v221_v21 }
  0xcd   : > { %v381_v22 = vpop.trf.xlu0 }
  0xce   : > { %v385_v23 = vunpack.i.h.bf16 %v381_v22  ;;  %v382_v24 = vunpack.i.l.bf16 %v381_v22 }
  0xd0   : > { %v238_v25 = vpack.c.bf16 %v385_v23, %v385_v23  ;;  %v222_v26 = vpack.c.bf16 %v382_v24, %v382_v24 }
  0xd2   : > { %271 = vst.msk [vmem:[%s479_s16 + $0x4c] sm:$0xf] %vm251_vm0, %v238_v25 }
  0xd3   : > { %255 = vst.msk [vmem:[%s479_s16 + $0xc] sm:$0xf] %vm251_vm0, %v222_v26 }
  0xd5   : > { %v386_v27 = vpop.trf.xlu0 }
  0xd6   : > { %v390_v28 = vunpack.i.h.bf16 %v386_v27  ;;  %v387_v29 = vunpack.i.l.bf16 %v386_v27 }
  0xd8   : > { %v239_v30 = vpack.c.bf16 %v390_v28, %v390_v28  ;;  %v223_v31 = vpack.c.bf16 %v387_v29, %v387_v29 }
  0xda   : > { %272 = vst.msk [vmem:[%s479_s16 + $0x50] sm:$0xf] %vm251_vm0, %v239_v30 }
  0xdb   : > { %256 = vst.msk [vmem:[%s479_s16 + $0x10] sm:$0xf] %vm251_vm0, %v223_v31 }
  0xdd   : > { %v391_v32 = vpop.trf.xlu0 }
  0xde   : > { %v395_v33 = vunpack.i.h.bf16 %v391_v32  ;;  %v392_v34 = vunpack.i.l.bf16 %v391_v32 }
  0xe0   : > { %v240_v35 = vpack.c.bf16 %v395_v33, %v395_v33  ;;  %v224_v36 = vpack.c.bf16 %v392_v34, %v392_v34 }
  0xe2   : > { %273 = vst.msk [vmem:[%s479_s16 + $0x54] sm:$0xf] %vm251_vm0, %v240_v35 }
  0xe3   : > { %257 = vst.msk [vmem:[%s479_s16 + $0x14] sm:$0xf] %vm251_vm0, %v224_v36 }
  0xe5   : > { %v396_v37 = vpop.trf.xlu0 }
  0xe6   : > { %v400_v38 = vunpack.i.h.bf16 %v396_v37  ;;  %v397_v39 = vunpack.i.l.bf16 %v396_v37 }
  0xe8   : > { %v241_v40 = vpack.c.bf16 %v400_v38, %v400_v38  ;;  %v225_v41 = vpack.c.bf16 %v397_v39, %v397_v39 }
  0xea   : > { %274 = vst.msk [vmem:[%s479_s16 + $0x58] sm:$0xf] %vm251_vm0, %v241_v40 }
  0xeb   : > { %258 = vst.msk [vmem:[%s479_s16 + $0x18] sm:$0xf] %vm251_vm0, %v225_v41 }
  0xed   : > { %v401_v42 = vpop.trf.xlu0 }
  0xee   : > { %v405_v43 = vunpack.i.h.bf16 %v401_v42  ;;  %v402_v44 = vunpack.i.l.bf16 %v401_v42 }
  0xf0   : > { %v242_v45 = vpack.c.bf16 %v405_v43, %v405_v43  ;;  %v226_v46 = vpack.c.bf16 %v402_v44, %v402_v44 }
  0xf2   : > { %275 = vst.msk [vmem:[%s479_s16 + $0x5c] sm:$0xf] %vm251_vm0, %v242_v45 }
  0xf3   : > { %259 = vst.msk [vmem:[%s479_s16 + $0x1c] sm:$0xf] %vm251_vm0, %v226_v46 }
  0xf5   : > { %v406_v47 = vpop.trf.xlu0 }
  0xf6   : > { %v410_v48 = vunpack.i.h.bf16 %v406_v47  ;;  %v407_v49 = vunpack.i.l.bf16 %v406_v47 }
  0xf8   : > { %v243_v50 = vpack.c.bf16 %v410_v48, %v410_v48  ;;  %v227_v51 = vpack.c.bf16 %v407_v49, %v407_v49 }
  0xfa   : > { %276 = vst.msk [vmem:[%s479_s16 + $0x60] sm:$0xf] %vm251_vm0, %v243_v50 }
  0xfb   : > { %260 = vst.msk [vmem:[%s479_s16 + $0x20] sm:$0xf] %vm251_vm0, %v227_v51 }
  0xfd   : > { %v411_v52 = vpop.trf.xlu0 }
  0xfe   : > { %v415_v53 = vunpack.i.h.bf16 %v411_v52  ;;  %v412_v54 = vunpack.i.l.bf16 %v411_v52 }
 0x100   : > { %v244_v55 = vpack.c.bf16 %v415_v53, %v415_v53  ;;  %v228_v56 = vpack.c.bf16 %v412_v54, %v412_v54 }
 0x102   : > { %277 = vst.msk [vmem:[%s479_s16 + $0x64] sm:$0xf] %vm251_vm0, %v244_v55 }
 0x103   : > { %261 = vst.msk [vmem:[%s479_s16 + $0x24] sm:$0xf] %vm251_vm0, %v228_v56 }
 0x105   : > { %v416_v57 = vpop.trf.xlu0 }
 0x106   : > { %v420_v58 = vunpack.i.h.bf16 %v416_v57  ;;  %v417_v59 = vunpack.i.l.bf16 %v416_v57 }
 0x108   : > { %v245_v60 = vpack.c.bf16 %v420_v58, %v420_v58  ;;  %v229_v61 = vpack.c.bf16 %v417_v59, %v417_v59 }
 0x10a   : > { %278 = vst.msk [vmem:[%s479_s16 + $0x68] sm:$0xf] %vm251_vm0, %v245_v60 }
 0x10b   : > { %262 = vst.msk [vmem:[%s479_s16 + $0x28] sm:$0xf] %vm251_vm0, %v229_v61 }
 0x10d   : > { %v421_v62 = vpop.trf.xlu0 }
 0x10e   : > { %v425_v63 = vunpack.i.h.bf16 %v421_v62  ;;  %v422_v0 = vunpack.i.l.bf16 %v421_v62 }
 0x110   : > { %v246_v1 = vpack.c.bf16 %v425_v63, %v425_v63  ;;  %v230_v2 = vpack.c.bf16 %v422_v0, %v422_v0 }
 0x112   : > { %279 = vst.msk [vmem:[%s479_s16 + $0x6c] sm:$0xf] %vm251_vm0, %v246_v1 }
 0x113   : > { %263 = vst.msk [vmem:[%s479_s16 + $0x2c] sm:$0xf] %vm251_vm0, %v230_v2 }
 0x115   : > { %v426_v3 = vpop.trf.xlu0 }
 0x116   : > { %v430_v4 = vunpack.i.h.bf16 %v426_v3  ;;  %v427_v5 = vunpack.i.l.bf16 %v426_v3 }
 0x118   : > { %v247_v6 = vpack.c.bf16 %v430_v4, %v430_v4  ;;  %v231_v7 = vpack.c.bf16 %v427_v5, %v427_v5 }
 0x11a   : > { %280 = vst.msk [vmem:[%s479_s16 + $0x70] sm:$0xf] %vm251_vm0, %v247_v6 }
 0x11b   : > { %264 = vst.msk [vmem:[%s479_s16 + $0x30] sm:$0xf] %vm251_vm0, %v231_v7 }
 0x11d   : > { %v431_v8 = vpop.trf.xlu0 }
 0x11e   : > { %v435_v9 = vunpack.i.h.bf16 %v431_v8  ;;  %v432_v10 = vunpack.i.l.bf16 %v431_v8 }
 0x120   : > { %v248_v11 = vpack.c.bf16 %v435_v9, %v435_v9  ;;  %v232_v12 = vpack.c.bf16 %v432_v10, %v432_v10 }
 0x122   : > { %281 = vst.msk [vmem:[%s479_s16 + $0x74] sm:$0xf] %vm251_vm0, %v248_v11 }
 0x123   : > { %265 = vst.msk [vmem:[%s479_s16 + $0x34] sm:$0xf] %vm251_vm0, %v232_v12 }
 0x125   : > { %v436_v13 = vpop.trf.xlu0 }
 0x126   : > { %v440_v14 = vunpack.i.h.bf16 %v436_v13  ;;  %v437_v15 = vunpack.i.l.bf16 %v436_v13 }
 0x128   : > { %v249_v16 = vpack.c.bf16 %v440_v14, %v440_v14  ;;  %v233_v17 = vpack.c.bf16 %v437_v15, %v437_v15 }
 0x12a   : > { %282 = vst.msk [vmem:[%s479_s16 + $0x78] sm:$0xf] %vm251_vm0, %v249_v16 }
 0x12b   : > { %266 = vst.msk [vmem:[%s479_s16 + $0x38] sm:$0xf] %vm251_vm0, %v233_v17 }
 0x12d   : > { %v441_v18 = vpop.trf.xlu0 }
 0x12e   : > { %v445_v19 = vunpack.i.h.bf16 %v441_v18  ;;  %v442_v20 = vunpack.i.l.bf16 %v441_v18 }
 0x130   : > { %v250_v21 = vpack.c.bf16 %v445_v19, %v445_v19  ;;  %v234_v22 = vpack.c.bf16 %v442_v20, %v442_v20 }
 0x132   : > { %283 = vst.msk [vmem:[%s479_s16 + $0x7c] sm:$0xf] %vm251_vm0, %v250_v21 }
 0x133   : > { %267 = vst.msk [vmem:[%s479_s16 + $0x3c] sm:$0xf] %vm251_vm0, %v234_v22 }
 0x134 PF: > { %s11_s6 = sadd.s32 1, %s452_s6  }
 0x135   : > { %p8_p5 = scmp.ge.s32.totalorder %s11_s6, 4  }
 0x137   :  { %10 = sbr.rel (!%p8_p5) target bundleno = 1 (0x1), region = 54 }

// kernel: bottleneck_forward.6
= control target key start
LH: loop header
LB: loop body
LE: loop exit
PB: predicated region body
PF: predicated region fallthrough
CT: control target
= control target key end

     0   :  { %s1787_s1 = inlined_call_operand.vmem [shape: bf16[128,128], index: 1, kind: input, shape index: {}]   ;;  %s1788_s0 = inlined_call_operand.vmem [shape: bf16[512,128], index: 0, kind: input, shape index: {}]   ;;  %s1789_s2 = inlined_call_operand.vmem [shape: bf16[512,128], index: 2, kind: output, shape index: {0}]   ;;  %s1790_s3 = inlined_call_operand.vmem [shape: f32[1,2,128], index: 3, kind: output, shape index: {1}]  }
   0x1   :  { %v1041_v0 = vld [vmem:[%s1787_s1 + $0x38] sm:$0xff]  ;;  %v1040_v1 = vld [vmem:[%s1787_s1 + $0x30] sm:$0xff]  ;;  %v1039_v2 = vld [vmem:[%s1787_s1 + $0x28] sm:$0xff] }
   0x2   :  { %333 = vmatpush.bf16.msra.mxu0 %v1041_v0  ;;  %1233 = vmatpush.bf16.msra.mxu1 %v1041_v0  ;;  %v1038_v3 = vld [vmem:[%s1787_s1 + $0x20] sm:$0xff]  ;;  %v1037_v4 = vld [vmem:[%s1787_s1 + $0x18] sm:$0xff]  ;;  %v1036_v5 = vld [vmem:[%s1787_s1 + $0x10] sm:$0xff] }
   0x3   :  { %1234 = vmatpush.bf16.msra.mxu2 %v1041_v0  ;;  %1235 = vmatpush.bf16.msra.mxu3 %v1041_v0  ;;  %v1035_v6 = vld [vmem:[%s1787_s1 + $0x8] sm:$0xff]  ;;  %v1034_v7 = vld [vmem:[%s1787_s1] sm:$0xff]  ;;  %v1004_v13 = vld [vmem:[%s1788_s0 + $0x10] sm:$0xff] }
   0x4   :  { %v1002_v8 = vld [vmem:[%s1788_s0] sm:$0xff]  ;;  %v1003_v10 = vld [vmem:[%s1788_s0 + $0x8] sm:$0xff]  ;;  %v1012_v14 = vld [vmem:[%s1788_s0 + $0x50] sm:$0xff] }
   0x5   :  { %v1010_v9 = vld [vmem:[%s1788_s0 + $0x40] sm:$0xff]  ;;  %v1011_v11 = vld [vmem:[%s1788_s0 + $0x48] sm:$0xff]  ;;  %v1005_v16 = vld [vmem:[%s1788_s0 + $0x18] sm:$0xff] }
   0x6   :  { %334 = vmatpush.bf16.msra.mxu0 %v1040_v1  ;;  %1236 = vmatpush.bf16.msra.mxu1 %v1040_v1  ;;  %v1018_v12 = vld [vmem:[%s1788_s0 + $0x80] sm:$0xff]  ;;  %v1019_v15 = vld [vmem:[%s1788_s0 + $0x88] sm:$0xff]  ;;  %v1013_v17 = vld [vmem:[%s1788_s0 + $0x58] sm:$0xff] }
   0x7   :  { %1237 = vmatpush.bf16.msra.mxu2 %v1040_v1  ;;  %1238 = vmatpush.bf16.msra.mxu3 %v1040_v1  ;;  %v1020_v18 = vld [vmem:[%s1788_s0 + $0x90] sm:$0xff]  ;;  %v1026_v19 = vld [vmem:[%s1788_s0 + $0xc0] sm:$0xff]  ;;  %v1021_v22 = vld [vmem:[%s1788_s0 + $0x98] sm:$0xff] }
   0x8   :  { %v1006_v20 = vld [vmem:[%s1788_s0 + $0x20] sm:$0xff]  ;;  %v1027_v23 = vld [vmem:[%s1788_s0 + $0xc8] sm:$0xff]  ;;  %v1028_v27 = vld [vmem:[%s1788_s0 + $0xd0] sm:$0xff] }
   0x9   :  { %v1014_v21 = vld [vmem:[%s1788_s0 + $0x60] sm:$0xff]  ;;  %v1007_v24 = vld [vmem:[%s1788_s0 + $0x28] sm:$0xff]  ;;  %v1008_v28 = vld [vmem:[%s1788_s0 + $0x30] sm:$0xff] }
   0xa   :  { %335 = vmatpush.bf16.msra.mxu0 %v1039_v2  ;;  %1239 = vmatpush.bf16.msra.mxu1 %v1039_v2  ;;  %v1015_v25 = vld [vmem:[%s1788_s0 + $0x68] sm:$0xff]  ;;  %v1022_v26 = vld [vmem:[%s1788_s0 + $0xa0] sm:$0xff]  ;;  %v1016_v29 = vld [vmem:[%s1788_s0 + $0x70] sm:$0xff] }
   0xb   :  { %1240 = vmatpush.bf16.msra.mxu2 %v1039_v2  ;;  %1241 = vmatpush.bf16.msra.mxu3 %v1039_v2  ;;  %v1023_v30 = vld [vmem:[%s1788_s0 + $0xa8] sm:$0xff]  ;;  %v1029_v31 = vld [vmem:[%s1788_s0 + $0xd8] sm:$0xff]  ;;  %v1024_v34 = vld [vmem:[%s1788_s0 + $0xb0] sm:$0xff] }
   0xc   :  { %v1009_v32 = vld [vmem:[%s1788_s0 + $0x38] sm:$0xff]  ;;  %v1030_v35 = vld [vmem:[%s1788_s0 + $0xe0] sm:$0xff]  ;;  %v1031_v39 = vld [vmem:[%s1788_s0 + $0xe8] sm:$0xff] }
   0xd   :  { %v1017_v33 = vld [vmem:[%s1788_s0 + $0x78] sm:$0xff]  ;;  %v1032_v53 = vld [vmem:[%s1788_s0 + $0xf0] sm:$0xff] }
   0xe   :  { %336 = vmatpush.bf16.msra.mxu0 %v1038_v3  ;;  %1242 = vmatpush.bf16.msra.mxu1 %v1038_v3  ;;  %v1025_v38 = vld [vmem:[%s1788_s0 + $0xb8] sm:$0xff] }
   0xf   :  { %1243 = vmatpush.bf16.msra.mxu2 %v1038_v3  ;;  %1244 = vmatpush.bf16.msra.mxu3 %v1038_v3 }
  0x12   :  { %337 = vmatpush.bf16.msra.mxu0 %v1037_v4  ;;  %1245 = vmatpush.bf16.msra.mxu1 %v1037_v4 }
  0x13   :  { %1246 = vmatpush.bf16.msra.mxu2 %v1037_v4  ;;  %1247 = vmatpush.bf16.msra.mxu3 %v1037_v4 }
  0x16   :  { %338 = vmatpush.bf16.msra.mxu0 %v1036_v5  ;;  %1248 = vmatpush.bf16.msra.mxu1 %v1036_v5 }
  0x17   :  { %1249 = vmatpush.bf16.msra.mxu2 %v1036_v5  ;;  %1250 = vmatpush.bf16.msra.mxu3 %v1036_v5  ;;  %v1033_v5 = vld [vmem:[%s1788_s0 + $0xf8] sm:$0xff] }
  0x1a   :  { %339 = vmatpush.bf16.msra.mxu0 %v1035_v6  ;;  %1251 = vmatpush.bf16.msra.mxu1 %v1035_v6 }
  0x1b   :  { %1252 = vmatpush.bf16.msra.mxu2 %v1035_v6  ;;  %1253 = vmatpush.bf16.msra.mxu3 %v1035_v6 }
  0x1e   :  { %340 = vmatpush.bf16.msra.mxu0 %v1034_v7  ;;  %1254 = vmatpush.bf16.msra.mxu1 %v1034_v7 }
  0x1f   :  { %1255 = vmatpush.bf16.msra.mxu2 %v1034_v7  ;;  %1256 = vmatpush.bf16.msra.mxu3 %v1034_v7 }
  0x21   :  { %341 = vmatmul.bf16.vlgmr.msra.gmra.mxu0 %v1002_v8  ;;  %381 = vmatmul.bf16.vlgmr.msra.gmra.mxu1 %v1010_v9 }
  0x22   :  { %421 = vmatmul.bf16.vlgmr.msra.gmra.mxu2 %v1018_v12  ;;  %461 = vmatmul.bf16.vlgmr.msra.gmra.mxu3 %v1026_v19 }
  0x31   :  { %346 = vmatmul.bf16.gmra.mxu0 %v1003_v10  ;;  %386 = vmatmul.bf16.gmra.mxu1 %v1011_v11 }
  0x32   :  { %426 = vmatmul.bf16.gmra.mxu2 %v1019_v15  ;;  %466 = vmatmul.bf16.gmra.mxu3 %v1027_v23 }
  0x41   :  { %351 = vmatmul.bf16.gmra.mxu0 %v1004_v13  ;;  %391 = vmatmul.bf16.gmra.mxu1 %v1012_v14 }
  0x42   :  { %431 = vmatmul.bf16.gmra.mxu2 %v1020_v18  ;;  %471 = vmatmul.bf16.gmra.mxu3 %v1028_v27 }
  0x51   :  { %356 = vmatmul.bf16.gmra.mxu0 %v1005_v16  ;;  %396 = vmatmul.bf16.gmra.mxu1 %v1013_v17 }
  0x52   :  { %436 = vmatmul.bf16.gmra.mxu2 %v1021_v22  ;;  %476 = vmatmul.bf16.gmra.mxu3 %v1029_v31 }
  0x61   :  { %361 = vmatmul.bf16.gmra.mxu0 %v1006_v20  ;;  %401 = vmatmul.bf16.gmra.mxu1 %v1014_v21 }
  0x62   :  { %441 = vmatmul.bf16.gmra.mxu2 %v1022_v26  ;;  %481 = vmatmul.bf16.gmra.mxu3 %v1030_v35 }
  0x71   :  { %366 = vmatmul.bf16.gmra.mxu0 %v1007_v24  ;;  %406 = vmatmul.bf16.gmra.mxu1 %v1015_v25 }
  0x72   :  { %446 = vmatmul.bf16.gmra.mxu2 %v1023_v30  ;;  %486 = vmatmul.bf16.gmra.mxu3 %v1031_v39 }
  0x81   :  { %371 = vmatmul.bf16.gmra.mxu0 %v1008_v28  ;;  %411 = vmatmul.bf16.gmra.mxu1 %v1016_v29 }
  0x82   :  { %451 = vmatmul.bf16.gmra.mxu2 %v1024_v34  ;;  %491 = vmatmul.bf16.gmra.mxu3 %v1032_v53 }
  0x91   :  { %376 = vmatmul.bf16.gmra.mxu0 %v1009_v32  ;;  %416 = vmatmul.bf16.gmra.mxu1 %v1017_v33 }
  0x92   :  { %456 = vmatmul.bf16.gmra.mxu2 %v1025_v38  ;;  %496 = vmatmul.bf16.gmra.mxu3 %v1033_v5 }
  0x9e   :  { %v342_v36 = vpop.f32.mrf.mxu0  ;;  %v1385_v37 = vpop.f32.mrf.mxu1 }
  0x9f   :  { %v700_v40 = vmul.f32 %v342_v36, %v342_v36 }
  0xa5   :  { %v1412_v60 = vpop.f32.mrf.mxu2  ;;  %v1463_v20 = vpop.f32.mrf.mxu3 }
  0xa6   :  { %v344_v41 = vpop.f32.mrf.mxu0  ;;  %v1393_v42 = vpop.f32.mrf.mxu1 }
  0xa7   :  { %v1045_v43 = vpack.c.bf16 %v344_v41, %v342_v36  ;;  %v630_v44 = vadd.f32 %v344_v41, %v342_v36  ;;  %v701_v45 = vmul.f32 %v344_v41, %v344_v41  ;;  %v1085_v46 = vpack.c.bf16 %v1393_v42, %v1385_v37 }
  0xa9   :  { %1046 = vst [vmem:[%s1789_s2] sm:$0xff] %v1045_v43   ;;  %v764_v47 = vadd.f32 %v701_v45, %v700_v40 }
  0xaa   :  { %1209 = vst [vmem:[%s1789_s2 + $0x40] sm:$0xff] %v1085_v46  }
  0xad   :  { %v1424_v2 = vpop.f32.mrf.mxu2  ;;  %v1475_v24 = vpop.f32.mrf.mxu3 }
  0xae   :  { %v347_v48 = vpop.f32.mrf.mxu0  ;;  %v1403_v49 = vpop.f32.mrf.mxu1  ;;  %v1125_v3 = vpack.c.bf16 %v1424_v2, %v1412_v60  ;;  %v1165_v26 = vpack.c.bf16 %v1475_v24, %v1463_v20 }
  0xaf   :  { %v631_v50 = vadd.f32 %v630_v44, %v347_v48  ;;  %v702_v51 = vmul.f32 %v347_v48, %v347_v48 }
  0xb0   :  { %1217 = vst [vmem:[%s1789_s2 + $0x80] sm:$0xff] %v1125_v3  }
  0xb1   :  { %v765_v52 = vadd.f32 %v764_v47, %v702_v51  ;;  %1225 = vst [vmem:[%s1789_s2 + $0xc0] sm:$0xff] %v1165_v26  }
  0xb5   :  { %v1440_v10 = vpop.f32.mrf.mxu2  ;;  %v1493_v32 = vpop.f32.mrf.mxu3 }
  0xb6   :  { %v349_v54 = vpop.f32.mrf.mxu0  ;;  %v1408_v55 = vpop.f32.mrf.mxu1 }
  0xb7   :  { %v1050_v56 = vpack.c.bf16 %v349_v54, %v347_v48  ;;  %v632_v57 = vadd.f32 %v631_v50, %v349_v54  ;;  %v703_v58 = vmul.f32 %v349_v54, %v349_v54  ;;  %v1090_v59 = vpack.c.bf16 %v1408_v55, %v1403_v49 }
  0xb9   :  { %1202 = vst [vmem:[%s1789_s2 + $0x8] sm:$0xff] %v1050_v56   ;;  %v766_v61 = vadd.f32 %v765_v52, %v703_v58 }
  0xba   :  { %1210 = vst [vmem:[%s1789_s2 + $0x48] sm:$0xff] %v1090_v59  }
  0xbd   :  { %v1450_v13 = vpop.f32.mrf.mxu2  ;;  %v1505_v36 = vpop.f32.mrf.mxu3 }
  0xbe   :  { %v352_v62 = vpop.f32.mrf.mxu0  ;;  %v1420_v63 = vpop.f32.mrf.mxu1  ;;  %v1130_v14 = vpack.c.bf16 %v1450_v13, %v1440_v10  ;;  %v1170_v39 = vpack.c.bf16 %v1505_v36, %v1493_v32 }
  0xbf   :  { %v1422_v0 = vadd.f32 %v632_v57, %v352_v62  ;;  %v704_v1 = vmul.f32 %v352_v62, %v352_v62 }
  0xc0   :  { %1218 = vst [vmem:[%s1789_s2 + $0x88] sm:$0xff] %v1130_v14  }
  0xc1   :  { %v1428_v4 = vadd.f32 %v766_v61, %v704_v1  ;;  %1226 = vst [vmem:[%s1789_s2 + $0xc8] sm:$0xff] %v1170_v39  }
  0xc5   :  { %v1461_v19 = vpop.f32.mrf.mxu2  ;;  %v1523_v46 = vpop.f32.mrf.mxu3 }
  0xc6   :  { %v354_v6 = vpop.f32.mrf.mxu0  ;;  %v1436_v7 = vpop.f32.mrf.mxu1 }
  0xc7   :  { %v1055_v8 = vpack.c.bf16 %v354_v6, %v352_v62  ;;  %v1095_v9 = vpack.c.bf16 %v1436_v7, %v1420_v63  ;;  %v705_v52 = vmul.f32 %v354_v6, %v354_v6  ;;  %v634_v57 = vadd.f32 %v1422_v0, %v354_v6 }
  0xc9   :  { %1203 = vst [vmem:[%s1789_s2 + $0x10] sm:$0xff] %v1055_v8   ;;  %v768_v58 = vadd.f32 %v1428_v4, %v705_v52 }
  0xca   :  { %1211 = vst [vmem:[%s1789_s2 + $0x50] sm:$0xff] %v1095_v9  }
  0xcd   :  { %v1473_v23 = vpop.f32.mrf.mxu2  ;;  %v1535_v51 = vpop.f32.mrf.mxu3 }
  0xce   :  { %v357_v11 = vpop.f32.mrf.mxu0  ;;  %v1448_v12 = vpop.f32.mrf.mxu1  ;;  %v1135_v25 = vpack.c.bf16 %v1473_v23, %v1461_v19  ;;  %v1175_v54 = vpack.c.bf16 %v1535_v51, %v1523_v46 }
  0xcf   :  { %v706_v56 = vmul.f32 %v357_v11, %v357_v11  ;;  %v635_v61 = vadd.f32 %v634_v57, %v357_v11 }
  0xd0   :  { %1219 = vst [vmem:[%s1789_s2 + $0x90] sm:$0xff] %v1135_v25  }
  0xd1   :  { %1227 = vst [vmem:[%s1789_s2 + $0xd0] sm:$0xff] %v1175_v54   ;;  %v769_v62 = vadd.f32 %v768_v58, %v706_v56 }
  0xd5   :  { %v1491_v31 = vpop.f32.mrf.mxu2  ;;  %v1555_v0 = vpop.f32.mrf.mxu3 }
  0xd6   :  { %v359_v15 = vpop.f32.mrf.mxu0  ;;  %v1457_v16 = vpop.f32.mrf.mxu1 }
  0xd7   :  { %v1060_v17 = vpack.c.bf16 %v359_v15, %v357_v11  ;;  %v1100_v18 = vpack.c.bf16 %v1457_v16, %v1448_v12  ;;  %v707_v59 = vmul.f32 %v359_v15, %v359_v15  ;;  %v636_v8 = vadd.f32 %v635_v61, %v359_v15 }
  0xd9   :  { %1204 = vst [vmem:[%s1789_s2 + $0x18] sm:$0xff] %v1060_v17   ;;  %v770_v6 = vadd.f32 %v769_v62, %v707_v59 }
  0xda   :  { %1212 = vst [vmem:[%s1789_s2 + $0x58] sm:$0xff] %v1100_v18  }
  0xdd   :  { %v1503_v35 = vpop.f32.mrf.mxu2 }
  0xde   :  { %v362_v21 = vpop.f32.mrf.mxu0  ;;  %v1471_v22 = vpop.f32.mrf.mxu1  ;;  %v1140_v38 = vpack.c.bf16 %v1503_v35, %v1491_v31 }
  0xdf   :  { %v708_v1 = vmul.f32 %v362_v21, %v362_v21  ;;  %v637_v25 = vadd.f32 %v636_v8, %v362_v21 }
  0xe0   :  { %1220 = vst [vmem:[%s1789_s2 + $0x98] sm:$0xff] %v1140_v38  }
  0xe1   :  { %v771_v4 = vadd.f32 %v770_v6, %v708_v1 }
  0xe5   :  { %v1521_v45 = vpop.f32.mrf.mxu2 }
  0xe6   :  { %v364_v27 = vpop.f32.mrf.mxu0  ;;  %v1487_v28 = vpop.f32.mrf.mxu1 }
  0xe7   :  { %v1065_v29 = vpack.c.bf16 %v364_v27, %v362_v21  ;;  %v1105_v30 = vpack.c.bf16 %v1487_v28, %v1471_v22  ;;  %v709_v18 = vmul.f32 %v364_v27, %v364_v27  ;;  %v638_v15 = vadd.f32 %v637_v25, %v364_v27 }
  0xe9   :  { %1205 = vst [vmem:[%s1789_s2 + $0x20] sm:$0xff] %v1065_v29   ;;  %v772_v26 = vadd.f32 %v771_v4, %v709_v18 }
  0xea   :  { %1213 = vst [vmem:[%s1789_s2 + $0x60] sm:$0xff] %v1105_v30  }
  0xed   :  { %v1533_v50 = vpop.f32.mrf.mxu2 }
  0xee   :  { %v367_v33 = vpop.f32.mrf.mxu0  ;;  %v1501_v34 = vpop.f32.mrf.mxu1  ;;  %v1145_v53 = vpack.c.bf16 %v1533_v50, %v1521_v45 }
  0xef   :  { %v710_v11 = vmul.f32 %v367_v33, %v367_v33  ;;  %v639_v30 = vadd.f32 %v638_v15, %v367_v33 }
  0xf0   :  { %1221 = vst [vmem:[%s1789_s2 + $0xa0] sm:$0xff] %v1145_v53   ;;  %v1567_v53 = vpop.f32.mrf.mxu3 }
  0xf1   :  { %v773_v38 = vadd.f32 %v772_v26, %v710_v11  ;;  %v1180_v27 = vpack.c.bf16 %v1567_v53, %v1555_v0  ;;  %v717_v26 = vmul.f32 %v1393_v42, %v1393_v42 }
  0xf3   :  { %1228 = vst [vmem:[%s1789_s2 + $0xd8] sm:$0xff] %v1180_v27  }
  0xf5   :  { %v1553_v17 = vpop.f32.mrf.mxu2 }
  0xf6   :  { %v369_v40 = vpop.f32.mrf.mxu0  ;;  %v1517_v41 = vpop.f32.mrf.mxu1 }
  0xf7   :  { %v1070_v43 = vpack.c.bf16 %v369_v40, %v367_v33  ;;  %v1110_v44 = vpack.c.bf16 %v1517_v41, %v1501_v34  ;;  %v711_v29 = vmul.f32 %v369_v40, %v369_v40  ;;  %v640_v21 = vadd.f32 %v639_v30, %v369_v40 }
  0xf8   :  { %v1585_v4 = vpop.f32.mrf.mxu3 }
  0xf9   :  { %1206 = vst [vmem:[%s1789_s2 + $0x28] sm:$0xff] %v1070_v43   ;;  %v774_v54 = vadd.f32 %v773_v38, %v711_v29  ;;  %v718_v38 = vmul.f32 %v1403_v49, %v1403_v49 }
  0xfa   :  { %1214 = vst [vmem:[%s1789_s2 + $0x68] sm:$0xff] %v1110_v44  }
  0xfd   :  { %v1565_v52 = vpop.f32.mrf.mxu2 }
  0xfe   :  { %v372_v47 = vpop.f32.mrf.mxu0  ;;  %v1531_v48 = vpop.f32.mrf.mxu1  ;;  %v1150_v57 = vpack.c.bf16 %v1565_v52, %v1553_v17 }
  0xff   :  { %v712_v39 = vmul.f32 %v372_v47, %v372_v47  ;;  %v641_v58 = vadd.f32 %v640_v21, %v372_v47 }
 0x100   :  { %1222 = vst [vmem:[%s1789_s2 + $0xa8] sm:$0xff] %v1150_v57   ;;  %v1607_v57 = vpop.f32.mrf.mxu3 }
 0x101   :  { %v775_v33 = vadd.f32 %v774_v54, %v712_v39  ;;  %v1185_v27 = vpack.c.bf16 %v1607_v57, %v1585_v4 }
 0x103   :  { %1229 = vst [vmem:[%s1789_s2 + $0xe0] sm:$0xff] %v1185_v27  }
 0x105   :  { %v1583_v25 = vpop.f32.mrf.mxu2 }
 0x106   :  { %v374_v3 = vpop.f32.mrf.mxu0  ;;  %v1549_v5 = vpop.f32.mrf.mxu1 }
 0x107   :  { %v1075_v9 = vpack.c.bf16 %v374_v3, %v372_v47  ;;  %v1115_v14 = vpack.c.bf16 %v1549_v5, %v1531_v48  ;;  %v713_v56 = vmul.f32 %v374_v3, %v374_v3  ;;  %v642_v40 = vadd.f32 %v641_v58, %v374_v3 }
 0x108   :  { %v716_v3 = vmul.f32 %v1385_v37, %v1385_v37  ;;  %v729_v27 = vmul.f32 %v1549_v5, %v1549_v5 }
 0x109   :  { %1207 = vst [vmem:[%s1789_s2 + $0x30] sm:$0xff] %v1075_v9   ;;  %v776_v61 = vadd.f32 %v775_v33, %v713_v56 }
 0x10a   :  { %1215 = vst [vmem:[%s1789_s2 + $0x70] sm:$0xff] %v1115_v14  }
 0x10d   :  { %v1605_v56 = vpop.f32.mrf.mxu2 }
 0x10e   :  { %v377_v43 = vpop.f32.mrf.mxu0  ;;  %v1563_v44 = vpop.f32.mrf.mxu1 }
 0x10f   :  { %v714_v59 = vmul.f32 %v377_v43, %v377_v43  ;;  %v643_v62 = vadd.f32 %v642_v40, %v377_v43 }
 0x111   :  { %v777_v1 = vadd.f32 %v776_v61, %v714_v59  ;;  %v722_v61 = vmul.f32 %v1448_v12, %v1448_v12 }
 0x116   :  { %v379_v8 = vpop.f32.mrf.mxu0  ;;  %v1579_v9 = vpop.f32.mrf.mxu1 }
 0x117   :  { %v1080_v14 = vpack.c.bf16 %v379_v8, %v377_v43  ;;  %v644_v6 = vadd.f32 %v643_v62, %v379_v8  ;;  %v715_v47 = vmul.f32 %v379_v8, %v379_v8  ;;  %v1120_v18 = vpack.c.bf16 %v1579_v9, %v1563_v44 }
 0x119   :  { %1208 = vst [vmem:[%s1789_s2 + $0x38] sm:$0xff] %v1080_v14   ;;  %v645_v11 = vadd.f32 %v644_v6, %v1385_v37  ;;  %v778_v15 = vadd.f32 %v777_v1, %v715_v47  ;;  %v719_v37 = vmul.f32 %v1408_v55, %v1408_v55  ;;  %v723_v1 = vmul.f32 %v1457_v16, %v1457_v16  ;;  %v1631_v6 = vpop.f32.mrf.mxu2 }
 0x11a   :  { %1216 = vst [vmem:[%s1789_s2 + $0x78] sm:$0xff] %v1120_v18   ;;  %v724_v47 = vmul.f32 %v1471_v22, %v1471_v22 }
 0x11b   :  { %v646_v29 = vadd.f32 %v645_v11, %v1393_v42  ;;  %v779_v30 = vadd.f32 %v778_v15, %v716_v3  ;;  %v1155_v42 = vpack.c.bf16 %v1605_v56, %v1583_v25  ;;  %v725_v11 = vmul.f32 %v1487_v28, %v1487_v28 }
 0x11d   :  { %v647_v39 = vadd.f32 %v646_v29, %v1403_v49  ;;  %v780_v43 = vadd.f32 %v779_v30, %v717_v26  ;;  %v720_v49 = vmul.f32 %v1420_v63, %v1420_v63  ;;  %1223 = vst [vmem:[%s1789_s2 + $0xb0] sm:$0xff] %v1155_v42   ;;  %v727_v30 = vmul.f32 %v1517_v41, %v1517_v41 }
 0x11f   :  { %v648_v21 = vadd.f32 %v647_v39, %v1408_v55  ;;  %v781_v54 = vadd.f32 %v780_v43, %v718_v38  ;;  %v721_v55 = vmul.f32 %v1436_v7, %v1436_v7 }
 0x121   :  { %v649_v58 = vadd.f32 %v648_v21, %v1420_v63  ;;  %v782_v33 = vadd.f32 %v781_v54, %v719_v37 }
 0x123   :  { %v650_v59 = vadd.f32 %v649_v58, %v1436_v7  ;;  %v783_v40 = vadd.f32 %v782_v33, %v720_v49  ;;  %v1633_v7 = vpop.f32.mrf.mxu3 }
 0x125   :  { %v784_v62 = vadd.f32 %v783_v40, %v721_v55  ;;  %v651_v63 = vadd.f32 %v650_v59, %v1448_v12  ;;  %v731_v59 = vmul.f32 %v1579_v9, %v1579_v9 }
 0x127   :  { %v652_v8 = vadd.f32 %v651_v63, %v1457_v16  ;;  %v785_v14 = vadd.f32 %v784_v62, %v722_v61  ;;  %v726_v16 = vmul.f32 %v1501_v34, %v1501_v34  ;;  %v733_v63 = vmul.f32 %v1424_v2, %v1424_v2 }
 0x129   :  { %v653_v18 = vadd.f32 %v652_v8, %v1471_v22  ;;  %v786_v3 = vadd.f32 %v785_v14, %v723_v1  ;;  %v1647_v22 = vpop.f32.mrf.mxu2  ;;  %v734_v8 = vmul.f32 %v1440_v10, %v1440_v10 }
 0x12b   :  { %v654_v12 = vadd.f32 %v653_v18, %v1487_v28  ;;  %v787_v15 = vadd.f32 %v786_v3, %v724_v47  ;;  %v1649_v43 = vpop.f32.mrf.mxu3  ;;  %v1160_v28 = vpack.c.bf16 %v1647_v22, %v1631_v6  ;;  %v735_v47 = vmul.f32 %v1450_v13, %v1450_v13 }
 0x12c   :  { %v1190_v37 = vpack.c.bf16 %v1649_v43, %v1633_v7 }
 0x12d   :  { %v655_v26 = vadd.f32 %v654_v12, %v1501_v34  ;;  %v788_v29 = vadd.f32 %v787_v15, %v725_v11  ;;  %v728_v34 = vmul.f32 %v1531_v48, %v1531_v48  ;;  %1224 = vst [vmem:[%s1789_s2 + $0xb8] sm:$0xff] %v1160_v28  }
 0x12e   :  { %1230 = vst [vmem:[%s1789_s2 + $0xe8] sm:$0xff] %v1190_v37   ;;  %v740_v37 = vmul.f32 %v1521_v45, %v1521_v45 }
 0x12f   :  { %v656_v38 = vadd.f32 %v655_v26, %v1517_v41  ;;  %v789_v39 = vadd.f32 %v788_v29, %v726_v16  ;;  %v738_v26 = vmul.f32 %v1491_v31, %v1491_v31 }
 0x131   :  { %v657_v21 = vadd.f32 %v656_v38, %v1531_v48  ;;  %v790_v54 = vadd.f32 %v789_v39, %v727_v30  ;;  %v730_v48 = vmul.f32 %v1563_v44, %v1563_v44 }
 0x133   :  { %v791_v41 = vadd.f32 %v790_v54, %v728_v34  ;;  %v658_v42 = vadd.f32 %v657_v21, %v1549_v5  ;;  %v1673_v40 = vpop.f32.mrf.mxu3  ;;  %v732_v5 = vmul.f32 %v1412_v60, %v1412_v60  ;;  %v741_v34 = vmul.f32 %v1533_v50, %v1533_v50 }
 0x135   :  { %v792_v49 = vadd.f32 %v791_v41, %v729_v27  ;;  %v659_v58 = vadd.f32 %v658_v42, %v1563_v44  ;;  %v742_v41 = vmul.f32 %v1553_v17, %v1553_v17 }
 0x137   :  { %v793_v33 = vadd.f32 %v792_v49, %v730_v48  ;;  %v660_v55 = vadd.f32 %v659_v58, %v1579_v9  ;;  %v743_v49 = vmul.f32 %v1565_v52, %v1565_v52 }
 0x139   :  { %v661_v61 = vadd.f32 %v660_v55, %v1412_v60  ;;  %v794_v62 = vadd.f32 %v793_v33, %v731_v59 }
 0x13b   :  { %v662_v1 = vadd.f32 %v661_v61, %v1424_v2  ;;  %v795_v44 = vadd.f32 %v794_v62, %v732_v5  ;;  %v1687_v60 = vpop.f32.mrf.mxu3  ;;  %v736_v2 = vmul.f32 %v1461_v19, %v1461_v19  ;;  %v746_v62 = vmul.f32 %v1631_v6, %v1631_v6 }
 0x13c   :  { %v1195_v11 = vpack.c.bf16 %v1687_v60, %v1673_v40 }
 0x13d   :  { %v663_v14 = vadd.f32 %v662_v1, %v1440_v10  ;;  %v796_v9 = vadd.f32 %v795_v44, %v733_v63  ;;  %v737_v10 = vmul.f32 %v1473_v23, %v1473_v23  ;;  %v748_v44 = vmul.f32 %v1463_v20, %v1463_v20 }
 0x13e   :  { %1231 = vst [vmem:[%s1789_s2 + $0xf0] sm:$0xff] %v1195_v11  }
 0x13f   :  { %v664_v18 = vadd.f32 %v663_v14, %v1450_v13  ;;  %v797_v3 = vadd.f32 %v796_v9, %v734_v8 }
 0x141   :  { %v665_v12 = vadd.f32 %v664_v18, %v1461_v19  ;;  %v798_v15 = vadd.f32 %v797_v3, %v735_v47  ;;  %v739_v19 = vmul.f32 %v1503_v35, %v1503_v35 }
 0x143   :  { %v666_v13 = vadd.f32 %v665_v12, %v1473_v23  ;;  %v799_v16 = vadd.f32 %v798_v15, %v736_v2  ;;  %v1706_v28 = vpop.f32.mrf.mxu3 }
 0x145   :  { %v800_v29 = vadd.f32 %v799_v16, %v737_v10  ;;  %v667_v30 = vadd.f32 %v666_v13, %v1491_v31 }
 0x147   :  { %v668_v38 = vadd.f32 %v667_v30, %v1503_v35  ;;  %v801_v39 = vadd.f32 %v800_v29, %v738_v26 }
 0x149   :  { %v669_v23 = vadd.f32 %v668_v38, %v1521_v45  ;;  %v802_v21 = vadd.f32 %v801_v39, %v739_v19 }
 0x14b   :  { %v670_v54 = vadd.f32 %v669_v23, %v1533_v50  ;;  %v803_v31 = vadd.f32 %v802_v21, %v740_v37  ;;  %v499_v45 = vpop.f32.mrf.mxu3  ;;  %v744_v50 = vmul.f32 %v1583_v25, %v1583_v25 }
 0x14c   :  { %v1200_v48 = vpack.c.bf16 %v499_v45, %v1706_v28 }
 0x14d   :  { %v671_v35 = vadd.f32 %v670_v54, %v1553_v17  ;;  %v804_v42 = vadd.f32 %v803_v31, %v741_v34  ;;  %v759_v34 = vmul.f32 %v1649_v43, %v1649_v43 }
 0x14e   :  { %1232 = vst [vmem:[%s1789_s2 + $0xf8] sm:$0xff] %v1200_v48   ;;  %v763_v48 = vmul.f32 %v499_v45, %v499_v45 }
 0x14f   :  { %v672_v27 = vadd.f32 %v671_v35, %v1565_v52  ;;  %v805_v58 = vadd.f32 %v804_v42, %v742_v41  ;;  %v745_v52 = vmul.f32 %v1605_v56, %v1605_v56  ;;  %v760_v41 = vmul.f32 %v1673_v40, %v1673_v40 }
 0x150   :  { %v761_v42 = vmul.f32 %v1687_v60, %v1687_v60 }
 0x151   :  { %v806_v33 = vadd.f32 %v805_v58, %v743_v49  ;;  %v673_v55 = vadd.f32 %v672_v27, %v1583_v25  ;;  %v747_v25 = vmul.f32 %v1647_v22, %v1647_v22  ;;  %v762_v49 = vmul.f32 %v1706_v28, %v1706_v28 }
 0x153   :  { %v807_v17 = vadd.f32 %v806_v33, %v744_v50  ;;  %v674_v59 = vadd.f32 %v673_v55, %v1605_v56  ;;  %v749_v56 = vmul.f32 %v1475_v24, %v1475_v24 }
 0x155   :  { %v808_v5 = vadd.f32 %v807_v17, %v745_v52  ;;  %v675_v61 = vadd.f32 %v674_v59, %v1631_v6  ;;  %v750_v6 = vmul.f32 %v1493_v32, %v1493_v32 }
 0x157   :  { %v809_v63 = vadd.f32 %v808_v5, %v746_v62  ;;  %v676_v1 = vadd.f32 %v675_v61, %v1647_v22  ;;  %v751_v22 = vmul.f32 %v1505_v36, %v1505_v36 }
 0x159   :  { %v677_v8 = vadd.f32 %v676_v1, %v1463_v20  ;;  %v810_v14 = vadd.f32 %v809_v63, %v747_v25  ;;  %v752_v20 = vmul.f32 %v1523_v46, %v1523_v46 }
 0x15b   :  { %v678_v9 = vadd.f32 %v677_v8, %v1475_v24  ;;  %v811_v47 = vadd.f32 %v810_v14, %v748_v44  ;;  %v753_v24 = vmul.f32 %v1535_v51, %v1535_v51 }
 0x15d   :  { %v679_v18 = vadd.f32 %v678_v9, %v1493_v32  ;;  %v812_v3 = vadd.f32 %v811_v47, %v749_v56  ;;  %v754_v32 = vmul.f32 %v1555_v0, %v1555_v0 }
 0x15f   :  { %v680_v11 = vadd.f32 %v679_v18, %v1505_v36  ;;  %v813_v2 = vadd.f32 %v812_v3, %v750_v6  ;;  %v755_v36 = vmul.f32 %v1567_v53, %v1567_v53 }
 0x161   :  { %v681_v12 = vadd.f32 %v680_v11, %v1523_v46  ;;  %v814_v15 = vadd.f32 %v813_v2, %v751_v22  ;;  %v756_v46 = vmul.f32 %v1585_v4, %v1585_v4 }
 0x163   :  { %v682_v10 = vadd.f32 %v681_v12, %v1535_v51  ;;  %v815_v13 = vadd.f32 %v814_v15, %v752_v20  ;;  %v757_v51 = vmul.f32 %v1607_v57, %v1607_v57 }
 0x165   :  { %v816_v16 = vadd.f32 %v815_v13, %v753_v24  ;;  %v683_v26 = vadd.f32 %v682_v10, %v1555_v0  ;;  %v758_v0 = vmul.f32 %v1633_v7, %v1633_v7 }
 0x167   :  { %v684_v29 = vadd.f32 %v683_v26, %v1567_v53  ;;  %v817_v30 = vadd.f32 %v816_v16, %v754_v32 }
 0x169   :  { %v685_v19 = vadd.f32 %v684_v29, %v1585_v4  ;;  %v818_v38 = vadd.f32 %v817_v30, %v755_v36 }
 0x16b   :  { %v686_v39 = vadd.f32 %v685_v19, %v1607_v57  ;;  %v819_v37 = vadd.f32 %v818_v38, %v756_v46 }
 0x16d   :  { %v687_v23 = vadd.f32 %v686_v39, %v1633_v7  ;;  %v820_v21 = vadd.f32 %v819_v37, %v757_v51 }
 0x16f   :  { %v688_v53 = vadd.f32 %v687_v23, %v1649_v43  ;;  %v821_v54 = vadd.f32 %v820_v21, %v758_v0 }
 0x171   :  { %v822_v4 = vadd.f32 %v821_v54, %v759_v34  ;;  %v689_v31 = vadd.f32 %v688_v53, %v1673_v40 }
 0x173   :  { %v823_v57 = vadd.f32 %v822_v4, %v760_v41  ;;  %v690_v35 = vadd.f32 %v689_v31, %v1687_v60 }
 0x175   :  { %v824_v7 = vadd.f32 %v823_v57, %v761_v42  ;;  %v691_v27 = vadd.f32 %v690_v35, %v1706_v28 }
 0x177   :  { %v825_v43 = vadd.f32 %v824_v7, %v762_v49  ;;  %v692_v58 = vadd.f32 %v691_v27, %v499_v45 }
 0x179   :  { %v693_v33 = vrot.slane %v692_v58, 4  ;;  %v826_v55 = vadd.f32 %v825_v43, %v763_v48 }
 0x17b   :  { %v694_v50 = vadd.f32 %v693_v33, %v692_v58  ;;  %v827_v17 = vrot.slane %v826_v55, 4 }
 0x17d   :  { %v695_v40 = vrot.slane %v694_v50, 2  ;;  %v828_v59 = vadd.f32 %v827_v17, %v826_v55 }
 0x17f   :  { %v696_v52 = vadd.f32 %v695_v40, %v694_v50  ;;  %v829_v5 = vrot.slane %v828_v59, 2 }
 0x181   :  { %v697_v61 = vrot.slane %v696_v52, 1  ;;  %v830_v62 = vadd.f32 %v829_v5, %v828_v59 }
 0x183   :  { %v698_v60 = vadd.f32 %v697_v61, %v696_v52  ;;  %v831_v63 = vrot.slane %v830_v62, 1 }
 0x185   :  { %699 = vst [vmem:[%s1790_s3] sm:$0x1] %v698_v60  ;;  %v832_v28 = vadd.f32 %v831_v63, %v830_v62 }
 0x187   :  { %833 = vst [vmem:[%s1790_s3 + $0x1] sm:$0x1] %v832_v28 }

// kernel: bottleneck_forward.8
= control target key start
LH: loop header
LB: loop body
LE: loop exit
PB: predicated region body
PF: predicated region fallthrough
CT: control target
= control target key end

     0   :  { %s2046_s1 = inlined_call_operand.vmem [shape: bf16[128,128], index: 1, kind: input, shape index: {}]   ;;  %s2047_s2 = inlined_call_operand.vmem [shape: f32[1,128], index: 2, kind: input, shape index: {}]   ;;  %s2048_s3 = inlined_call_operand.vmem [shape: f32[1,128], index: 3, kind: input, shape index: {}]   ;;  %s2049_s0 = inlined_call_operand.vmem [shape: bf16[512,128], index: 0, kind: input, shape index: {}]   ;;  %s2050_s4 = inlined_call_operand.vmem [shape: bf16[512,128], index: 4, kind: output, shape index: {0}]   ;;  %s2051_s5 = inlined_call_operand.vmem [shape: f32[1,2,128], index: 5, kind: output, shape index: {1}]  }
   0x1   :  { %v991_v0 = vld [vmem:[%s2046_s1 + $0x38] sm:$0xff]  ;;  %v990_v1 = vld [vmem:[%s2046_s1 + $0x30] sm:$0xff]  ;;  %v989_v2 = vld [vmem:[%s2046_s1 + $0x28] sm:$0xff] }
   0x2   :  { %443 = vmatpush.bf16.msra.mxu0 %v991_v0  ;;  %1342 = vmatpush.bf16.msra.mxu1 %v991_v0  ;;  %v988_v3 = vld [vmem:[%s2046_s1 + $0x20] sm:$0xff]  ;;  %v987_v8 = vld [vmem:[%s2046_s1 + $0x18] sm:$0xff]  ;;  %v986_v17 = vld [vmem:[%s2046_s1 + $0x10] sm:$0xff] }
   0x3   :  { %1343 = vmatpush.bf16.msra.mxu2 %v991_v0  ;;  %1344 = vmatpush.bf16.msra.mxu3 %v991_v0  ;;  %v993_v4 = vld [vmem:[%s2049_s0] sm:$0xff]   ;;  %v985_v22 = vld [vmem:[%s2046_s1 + $0x8] sm:$0xff]  ;;  %v1281_v47 = vld [vmem:[%s2049_s0 + $0x10] sm:$0xff]  }
   0x4   :  { %v994_v5 = vunpack.c.l.bf16 %v993_v4  ;;  %v995_v6 = vunpack.c.h.bf16 %v993_v4  ;;  %v1416_v7 = vld [vmem:[%s2047_s2] ss:$0 sm:$0xff]  ;;  %v1280_v25 = vld [vmem:[%s2049_s0 + $0x8] sm:$0xff]   ;;  %v1002_v54 = vunpack.c.l.bf16 %v1281_v47  ;;  %v1003_v55 = vunpack.c.h.bf16 %v1281_v47  ;;  %v1289_v60 = vld [vmem:[%s2049_s0 + $0x50] sm:$0xff]  }
   0x5   :  { %v1287_v9 = vld [vmem:[%s2049_s0 + $0x40] sm:$0xff]   ;;  %v998_v29 = vunpack.c.l.bf16 %v1280_v25  ;;  %v999_v30 = vunpack.c.h.bf16 %v1280_v25  ;;  %v1288_v33 = vld [vmem:[%s2049_s0 + $0x48] sm:$0xff]   ;;  %v1034_v63 = vunpack.c.l.bf16 %v1289_v60  ;;  %v1035_v0 = vunpack.c.h.bf16 %v1289_v60 }
   0x6   :  { %444 = vmatpush.bf16.msra.mxu0 %v990_v1  ;;  %1345 = vmatpush.bf16.msra.mxu1 %v990_v1  ;;  %v1026_v10 = vunpack.c.l.bf16 %v1287_v9  ;;  %v1027_v11 = vunpack.c.h.bf16 %v1287_v9  ;;  %v152_v12 = vmul.f32 %v1416_v7, %v994_v5  ;;  %v153_v13 = vmul.f32 %v1416_v7, %v995_v6  ;;  %v1429_v14 = vld [vmem:[%s2048_s3] ss:$0 sm:$0xff] }
   0x7   :  { %1346 = vmatpush.bf16.msra.mxu2 %v990_v1  ;;  %1347 = vmatpush.bf16.msra.mxu3 %v990_v1  ;;  %v984_v28 = vld [vmem:[%s2046_s1] sm:$0xff]  ;;  %v1030_v34 = vunpack.c.l.bf16 %v1288_v33  ;;  %v1031_v35 = vunpack.c.h.bf16 %v1288_v33  ;;  %v154_v36 = vmul.f32 %v1416_v7, %v998_v29  ;;  %v155_v37 = vmul.f32 %v1416_v7, %v999_v30 }
   0x8   :  { %v168_v15 = vmul.f32 %v1416_v7, %v1026_v10  ;;  %v169_v16 = vmul.f32 %v1416_v7, %v1027_v11  ;;  %v219_v18 = vadd.f32 %v1429_v14, %v152_v12  ;;  %v220_v19 = vadd.f32 %v1429_v14, %v153_v13  ;;  %v1295_v46 = vld [vmem:[%s2049_s0 + $0x80] sm:$0xff]   ;;  %v1296_v13 = vld [vmem:[%s2049_s0 + $0x88] sm:$0xff]  }
   0x9   :  { %v170_v38 = vmul.f32 %v1416_v7, %v1030_v34  ;;  %v171_v39 = vmul.f32 %v1416_v7, %v1031_v35  ;;  %v221_v40 = vadd.f32 %v1429_v14, %v154_v36  ;;  %v222_v41 = vadd.f32 %v1429_v14, %v155_v37  ;;  %v1303_v47 = vld [vmem:[%s2049_s0 + $0xc0] sm:$0xff]  }
   0xa   :  { %445 = vmatpush.bf16.msra.mxu0 %v989_v2  ;;  %1348 = vmatpush.bf16.msra.mxu1 %v989_v2  ;;  %v235_v20 = vadd.f32 %v1429_v14, %v168_v15  ;;  %v236_v21 = vadd.f32 %v1429_v14, %v169_v16  ;;  %v283_v23 = vmax.f32 %v219_v18, 0.0  ;;  %v284_v24 = vmax.f32 %v220_v19, 0.0  ;;  %v1282_v15 = vld [vmem:[%s2049_s0 + $0x18] sm:$0xff]  }
   0xb   :  { %1349 = vmatpush.bf16.msra.mxu2 %v989_v2  ;;  %1350 = vmatpush.bf16.msra.mxu3 %v989_v2  ;;  %v237_v42 = vadd.f32 %v1429_v14, %v170_v38  ;;  %v238_v43 = vadd.f32 %v1429_v14, %v171_v39  ;;  %v285_v44 = vmax.f32 %v221_v40, 0.0  ;;  %v286_v45 = vmax.f32 %v222_v41, 0.0 }
   0xc   :  { %v299_v26 = vmax.f32 %v235_v20, 0.0  ;;  %v300_v27 = vmax.f32 %v236_v21, 0.0  ;;  %v347_v31 = vpack.c.bf16 %v284_v24, %v283_v23  ;;  %v1058_v50 = vunpack.c.l.bf16 %v1295_v46 }
   0xd   :  { %v301_v48 = vmax.f32 %v237_v42, 0.0  ;;  %v302_v49 = vmax.f32 %v238_v43, 0.0  ;;  %v1059_v51 = vunpack.c.h.bf16 %v1295_v46  ;;  %v348_v56 = vpack.c.bf16 %v286_v45, %v285_v44  ;;  %v1297_v46 = vld [vmem:[%s2049_s0 + $0x90] sm:$0xff]  }
   0xe   :  { %446 = vmatpush.bf16.msra.mxu0 %v988_v3  ;;  %1351 = vmatpush.bf16.msra.mxu1 %v988_v3  ;;  %v355_v32 = vpack.c.bf16 %v300_v27, %v299_v26  ;;  %v184_v52 = vmul.f32 %v1416_v7, %v1058_v50  ;;  %v156_v1 = vmul.f32 %v1416_v7, %v1002_v54  ;;  %v1062_v18 = vunpack.c.l.bf16 %v1296_v13 }
   0xf   :  { %1352 = vmatpush.bf16.msra.mxu2 %v988_v3  ;;  %1353 = vmatpush.bf16.msra.mxu3 %v988_v3  ;;  %v185_v53 = vmul.f32 %v1416_v7, %v1059_v51  ;;  %v356_v57 = vpack.c.bf16 %v302_v49, %v301_v48  ;;  %v157_v2 = vmul.f32 %v1416_v7, %v1003_v55  ;;  %v1063_v19 = vunpack.c.h.bf16 %v1296_v13  ;;  %v1283_v48 = vld [vmem:[%s2049_s0 + $0x20] sm:$0xff]  }
  0x10   :  { %v251_v58 = vadd.f32 %v1429_v14, %v184_v52  ;;  %v172_v4 = vmul.f32 %v1416_v7, %v1034_v63  ;;  %v173_v5 = vmul.f32 %v1416_v7, %v1035_v0  ;;  %v223_v6 = vadd.f32 %v1429_v14, %v156_v1  ;;  %v1291_v1 = vld [vmem:[%s2049_s0 + $0x60] sm:$0xff]  }
  0x11   :  { %v252_v59 = vadd.f32 %v1429_v14, %v185_v53  ;;  %v186_v20 = vmul.f32 %v1416_v7, %v1062_v18  ;;  %v187_v21 = vmul.f32 %v1416_v7, %v1063_v19  ;;  %v1007_v23 = vunpack.c.h.bf16 %v1282_v15 }
  0x12   :  { %447 = vmatpush.bf16.msra.mxu0 %v987_v8  ;;  %1354 = vmatpush.bf16.msra.mxu1 %v987_v8  ;;  %v315_v61 = vmax.f32 %v251_v58, 0.0  ;;  %v239_v9 = vadd.f32 %v1429_v14, %v172_v4  ;;  %v240_v10 = vadd.f32 %v1429_v14, %v173_v5  ;;  %v287_v11 = vmax.f32 %v223_v6, 0.0 }
  0x13   :  { %1355 = vmatpush.bf16.msra.mxu2 %v987_v8  ;;  %1356 = vmatpush.bf16.msra.mxu3 %v987_v8  ;;  %v316_v62 = vmax.f32 %v252_v59, 0.0  ;;  %v224_v8 = vadd.f32 %v1429_v14, %v157_v2  ;;  %v253_v26 = vadd.f32 %v1429_v14, %v186_v20  ;;  %v254_v27 = vadd.f32 %v1429_v14, %v187_v21 }
  0x14   :  { %v303_v16 = vmax.f32 %v239_v9, 0.0  ;;  %v159_v34 = vmul.f32 %v1416_v7, %v1007_v23  ;;  %v1066_v49 = vunpack.c.l.bf16 %v1297_v46  ;;  %v1067_v50 = vunpack.c.h.bf16 %v1297_v46 }
  0x15   :  { %v363_v3 = vpack.c.bf16 %v316_v62, %v315_v61  ;;  %v288_v12 = vmax.f32 %v224_v8, 0.0  ;;  %v317_v29 = vmax.f32 %v253_v26, 0.0  ;;  %v318_v30 = vmax.f32 %v254_v27, 0.0  ;;  %v1284_v26 = vld [vmem:[%s2049_s0 + $0x28] sm:$0xff]  }
  0x16   :  { %448 = vmatpush.bf16.msra.mxu0 %v986_v17  ;;  %1357 = vmatpush.bf16.msra.mxu1 %v986_v17  ;;  %v226_v39 = vadd.f32 %v1429_v14, %v159_v34  ;;  %v1090_v51 = vunpack.c.l.bf16 %v1303_v47  ;;  %v1091_v52 = vunpack.c.h.bf16 %v1303_v47  ;;  %v188_v53 = vmul.f32 %v1416_v7, %v1066_v49 }
  0x17   :  { %1358 = vmatpush.bf16.msra.mxu2 %v986_v17  ;;  %1359 = vmatpush.bf16.msra.mxu3 %v986_v17  ;;  %v304_v17 = vmax.f32 %v240_v10, 0.0  ;;  %v349_v24 = vpack.c.bf16 %v288_v12, %v287_v11  ;;  %v364_v35 = vpack.c.bf16 %v318_v30, %v317_v29  ;;  %v189_v54 = vmul.f32 %v1416_v7, %v1067_v50 }
  0x18   :  { %v290_v43 = vmax.f32 %v226_v39, 0.0  ;;  %v200_v55 = vmul.f32 %v1416_v7, %v1090_v51  ;;  %v1010_v58 = vunpack.c.l.bf16 %v1283_v48  ;;  %v1011_v59 = vunpack.c.h.bf16 %v1283_v48 }
  0x19   :  { %v357_v25 = vpack.c.bf16 %v304_v17, %v303_v16  ;;  %v255_v61 = vadd.f32 %v1429_v14, %v188_v53  ;;  %v256_v62 = vadd.f32 %v1429_v14, %v189_v54  ;;  %v1042_v9 = vunpack.c.l.bf16 %v1291_v1 }
  0x1a   :  { %449 = vmatpush.bf16.msra.mxu0 %v985_v22  ;;  %1360 = vmatpush.bf16.msra.mxu1 %v985_v22  ;;  %v267_v63 = vadd.f32 %v1429_v14, %v200_v55  ;;  %v160_v6 = vmul.f32 %v1416_v7, %v1010_v58  ;;  %v161_v8 = vmul.f32 %v1416_v7, %v1011_v59  ;;  %v1043_v10 = vunpack.c.h.bf16 %v1291_v1  ;;  %v1305_v1 = vld [vmem:[%s2049_s0 + $0xd0] sm:$0xff]  }
  0x1b   :  { %1361 = vmatpush.bf16.msra.mxu2 %v985_v22  ;;  %1362 = vmatpush.bf16.msra.mxu3 %v985_v22  ;;  %v1006_v22 = vunpack.c.l.bf16 %v1282_v15  ;;  %v319_v2 = vmax.f32 %v255_v61, 0.0  ;;  %v176_v13 = vmul.f32 %v1416_v7, %v1042_v9 }
  0x1c   :  { %v331_v4 = vmax.f32 %v267_v63, 0.0  ;;  %v177_v15 = vmul.f32 %v1416_v7, %v1043_v10  ;;  %v227_v16 = vadd.f32 %v1429_v14, %v160_v6  ;;  %v228_v17 = vadd.f32 %v1429_v14, %v161_v8 }
  0x1d   :  { %v158_v33 = vmul.f32 %v1416_v7, %v1006_v22  ;;  %v243_v18 = vadd.f32 %v1429_v14, %v176_v13  ;;  %v1099_v6 = vunpack.c.h.bf16 %v1305_v1 }
  0x1e   :  { %450 = vmatpush.bf16.msra.mxu0 %v984_v28  ;;  %1363 = vmatpush.bf16.msra.mxu1 %v984_v28  ;;  %v244_v19 = vadd.f32 %v1429_v14, %v177_v15  ;;  %v291_v20 = vmax.f32 %v227_v16, 0.0  ;;  %v292_v21 = vmax.f32 %v228_v17, 0.0 }
  0x1f   :  { %1364 = vmatpush.bf16.msra.mxu2 %v984_v28  ;;  %1365 = vmatpush.bf16.msra.mxu3 %v984_v28  ;;  %v1290_v28 = vld [vmem:[%s2049_s0 + $0x58] sm:$0xff]   ;;  %v225_v38 = vadd.f32 %v1429_v14, %v158_v33  ;;  %v307_v22 = vmax.f32 %v243_v18, 0.0 }
  0x20   :  { %v308_v23 = vmax.f32 %v244_v19, 0.0 }
  0x21   :  { %451 = vmatmul.bf16.vlgmr.msra.gmra.mxu0 %v347_v31  ;;  %491 = vmatmul.bf16.vlgmr.msra.gmra.mxu1 %v355_v32  ;;  %v1038_v31 = vunpack.c.l.bf16 %v1290_v28  ;;  %v1039_v32 = vunpack.c.h.bf16 %v1290_v28  ;;  %v289_v42 = vmax.f32 %v225_v38, 0.0 }
  0x22   :  { %531 = vmatmul.bf16.vlgmr.msra.gmra.mxu2 %v363_v3  ;;  %v320_v3 = vmax.f32 %v256_v62, 0.0  ;;  %v359_v38 = vpack.c.bf16 %v308_v23, %v307_v22 }
  0x23   :  { %v174_v36 = vmul.f32 %v1416_v7, %v1038_v31  ;;  %v175_v37 = vmul.f32 %v1416_v7, %v1039_v32 }
  0x24   :  { %v365_v11 = vpack.c.bf16 %v320_v3, %v319_v2  ;;  %v1285_v2 = vld [vmem:[%s2049_s0 + $0x30] sm:$0xff]  }
  0x25   :  { %v241_v40 = vadd.f32 %v1429_v14, %v174_v36  ;;  %v242_v41 = vadd.f32 %v1429_v14, %v175_v37  ;;  %v1014_v36 = vunpack.c.l.bf16 %v1284_v26  ;;  %v1015_v37 = vunpack.c.h.bf16 %v1284_v26 }
  0x26   :  { %v1018_v13 = vunpack.c.l.bf16 %v1285_v2  ;;  %v1019_v15 = vunpack.c.h.bf16 %v1285_v2 }
  0x27   :  { %v305_v44 = vmax.f32 %v241_v40, 0.0  ;;  %v306_v45 = vmax.f32 %v242_v41, 0.0  ;;  %v162_v48 = vmul.f32 %v1416_v7, %v1014_v36  ;;  %v163_v49 = vmul.f32 %v1416_v7, %v1015_v37 }
  0x28   :  { %v164_v26 = vmul.f32 %v1416_v7, %v1018_v13 }
  0x29   :  { %v358_v60 = vpack.c.bf16 %v306_v45, %v305_v44 }
  0x31   :  { %456 = vmatmul.bf16.gmra.mxu0 %v348_v56  ;;  %496 = vmatmul.bf16.gmra.mxu1 %v356_v57  ;;  %v201_v56 = vmul.f32 %v1416_v7, %v1091_v52  ;;  %v350_v57 = vpack.c.bf16 %v290_v43, %v289_v42  ;;  %v1292_v43 = vld [vmem:[%s2049_s0 + $0x68] sm:$0xff]  }
  0x32   :  { %536 = vmatmul.bf16.gmra.mxu2 %v364_v35  ;;  %v351_v35 = vpack.c.bf16 %v292_v21, %v291_v20  ;;  %v1046_v50 = vunpack.c.l.bf16 %v1292_v43  ;;  %v1047_v51 = vunpack.c.h.bf16 %v1292_v43  ;;  %v1293_v21 = vld [vmem:[%s2049_s0 + $0x70] sm:$0xff]   ;;  %v1306_v43 = vld [vmem:[%s2049_s0 + $0xd8] sm:$0xff]  }
  0x33   :  { %v268_v0 = vadd.f32 %v1429_v14, %v201_v56  ;;  %v229_v56 = vadd.f32 %v1429_v14, %v162_v48  ;;  %v1103_v48 = vunpack.c.h.bf16 %v1306_v43 }
  0x34   :  { %v178_v54 = vmul.f32 %v1416_v7, %v1046_v50  ;;  %v179_v55 = vmul.f32 %v1416_v7, %v1047_v51 }
  0x35   :  { %v332_v5 = vmax.f32 %v268_v0, 0.0  ;;  %v1299_v0 = vld [vmem:[%s2049_s0 + $0xa0] sm:$0xff]  }
  0x36   :  { %v245_v58 = vadd.f32 %v1429_v14, %v178_v54  ;;  %v246_v59 = vadd.f32 %v1429_v14, %v179_v55  ;;  %v1074_v3 = vunpack.c.l.bf16 %v1299_v0 }
  0x37   :  { %v371_v12 = vpack.c.bf16 %v332_v5, %v331_v4  ;;  %v1075_v4 = vunpack.c.h.bf16 %v1299_v0  ;;  %v1098_v5 = vunpack.c.l.bf16 %v1305_v1 }
  0x38   :  { %v309_v62 = vmax.f32 %v245_v58, 0.0  ;;  %v310_v63 = vmax.f32 %v246_v59, 0.0  ;;  %v192_v8 = vmul.f32 %v1416_v7, %v1074_v3 }
  0x39   :  { %571 = vmatmul.bf16.vlgmr.msra.gmra.mxu3 %v371_v12  ;;  %v193_v9 = vmul.f32 %v1416_v7, %v1075_v4  ;;  %v204_v10 = vmul.f32 %v1416_v7, %v1098_v5 }
  0x3a   :  { %v360_v16 = vpack.c.bf16 %v310_v63, %v309_v62  ;;  %v259_v17 = vadd.f32 %v1429_v14, %v192_v8 }
  0x3b   :  { %v260_v18 = vadd.f32 %v1429_v14, %v193_v9  ;;  %v271_v19 = vadd.f32 %v1429_v14, %v204_v10 }
  0x3c   :  { %v323_v22 = vmax.f32 %v259_v17, 0.0 }
  0x3d   :  { %v324_v23 = vmax.f32 %v260_v18, 0.0 }
  0x41   :  { %461 = vmatmul.bf16.gmra.mxu0 %v349_v24  ;;  %501 = vmatmul.bf16.gmra.mxu1 %v357_v25  ;;  %v1298_v24 = vld [vmem:[%s2049_s0 + $0x98] sm:$0xff]   ;;  %v1304_v25 = vld [vmem:[%s2049_s0 + $0xc8] sm:$0xff]  }
  0x42   :  { %541 = vmatmul.bf16.gmra.mxu2 %v365_v11  ;;  %v1070_v27 = vunpack.c.l.bf16 %v1298_v24  ;;  %v1071_v28 = vunpack.c.h.bf16 %v1298_v24  ;;  %v1094_v29 = vunpack.c.l.bf16 %v1304_v25  ;;  %v1095_v30 = vunpack.c.h.bf16 %v1304_v25 }
  0x43   :  { %v205_v11 = vmul.f32 %v1416_v7, %v1099_v6  ;;  %v335_v24 = vmax.f32 %v271_v19, 0.0 }
  0x44   :  { %v190_v31 = vmul.f32 %v1416_v7, %v1070_v27  ;;  %v191_v32 = vmul.f32 %v1416_v7, %v1071_v28  ;;  %v202_v33 = vmul.f32 %v1416_v7, %v1094_v29  ;;  %v203_v34 = vmul.f32 %v1416_v7, %v1095_v30 }
  0x45   :  { %v272_v20 = vadd.f32 %v1429_v14, %v205_v11  ;;  %v165_v27 = vmul.f32 %v1416_v7, %v1019_v15  ;;  %v1050_v28 = vunpack.c.l.bf16 %v1293_v21  ;;  %v1051_v29 = vunpack.c.h.bf16 %v1293_v21  ;;  %v1307_v21 = vld [vmem:[%s2049_s0 + $0xe0] sm:$0xff]  }
  0x46   :  { %v257_v39 = vadd.f32 %v1429_v14, %v190_v31  ;;  %v258_v40 = vadd.f32 %v1429_v14, %v191_v32  ;;  %v269_v41 = vadd.f32 %v1429_v14, %v202_v33  ;;  %v270_v42 = vadd.f32 %v1429_v14, %v203_v34 }
  0x47   :  { %v336_v25 = vmax.f32 %v272_v20, 0.0  ;;  %v367_v30 = vpack.c.bf16 %v324_v23, %v323_v22  ;;  %v180_v32 = vmul.f32 %v1416_v7, %v1050_v28  ;;  %v181_v33 = vmul.f32 %v1416_v7, %v1051_v29  ;;  %v1301_v20 = vld [vmem:[%s2049_s0 + $0xb0] sm:$0xff]  }
  0x48   :  { %v321_v44 = vmax.f32 %v257_v39, 0.0  ;;  %v322_v45 = vmax.f32 %v258_v40, 0.0  ;;  %v333_v46 = vmax.f32 %v269_v41, 0.0  ;;  %v334_v47 = vmax.f32 %v270_v42, 0.0  ;;  %v1300_v42 = vld [vmem:[%s2049_s0 + $0xa8] sm:$0xff]  }
  0x49   :  { %v373_v31 = vpack.c.bf16 %v336_v25, %v335_v24  ;;  %v231_v34 = vadd.f32 %v1429_v14, %v164_v26  ;;  %v247_v36 = vadd.f32 %v1429_v14, %v180_v32  ;;  %v248_v37 = vadd.f32 %v1429_v14, %v181_v33 }
  0x4a   :  { %v366_v52 = vpack.c.bf16 %v322_v45, %v321_v44  ;;  %v372_v53 = vpack.c.bf16 %v334_v47, %v333_v46  ;;  %v1286_v44 = vld [vmem:[%s2049_s0 + $0x38] sm:$0xff]   ;;  %v1078_v45 = vunpack.c.l.bf16 %v1300_v42  ;;  %v1079_v46 = vunpack.c.h.bf16 %v1300_v42 }
  0x4b   :  { %v311_v40 = vmax.f32 %v247_v36, 0.0  ;;  %v312_v41 = vmax.f32 %v248_v37, 0.0  ;;  %v1102_v47 = vunpack.c.l.bf16 %v1306_v43  ;;  %v1022_v54 = vunpack.c.l.bf16 %v1286_v44  ;;  %v1302_v42 = vld [vmem:[%s2049_s0 + $0xb8] sm:$0xff]   ;;  %v1308_v43 = vld [vmem:[%s2049_s0 + $0xe8] sm:$0xff]  }
  0x4c   :  { %576 = vmatmul.bf16.gmra.mxu3 %v372_v53  ;;  %v195_v50 = vmul.f32 %v1416_v7, %v1079_v46  ;;  %v1023_v55 = vunpack.c.h.bf16 %v1286_v44  ;;  %v1082_v22 = vunpack.c.l.bf16 %v1301_v20  ;;  %v1083_v23 = vunpack.c.h.bf16 %v1301_v20 }
  0x4d   :  { %v206_v51 = vmul.f32 %v1416_v7, %v1102_v47  ;;  %v166_v2 = vmul.f32 %v1416_v7, %v1022_v54  ;;  %v1106_v24 = vunpack.c.l.bf16 %v1307_v21  ;;  %v1107_v25 = vunpack.c.h.bf16 %v1307_v21 }
  0x4e   :  { %v262_v58 = vadd.f32 %v1429_v14, %v195_v50  ;;  %v167_v3 = vmul.f32 %v1416_v7, %v1023_v55  ;;  %v196_v26 = vmul.f32 %v1416_v7, %v1082_v22  ;;  %v1086_v44 = vunpack.c.l.bf16 %v1302_v42 }
  0x4f   :  { %v273_v59 = vadd.f32 %v1429_v14, %v206_v51  ;;  %v233_v11 = vadd.f32 %v1429_v14, %v166_v2  ;;  %v208_v28 = vmul.f32 %v1416_v7, %v1106_v24  ;;  %v209_v29 = vmul.f32 %v1416_v7, %v1107_v25 }
  0x50   :  { %v326_v63 = vmax.f32 %v262_v58, 0.0  ;;  %v263_v32 = vadd.f32 %v1429_v14, %v196_v26  ;;  %v1110_v46 = vunpack.c.l.bf16 %v1308_v43  ;;  %v1111_v47 = vunpack.c.h.bf16 %v1308_v43 }
  0x51   :  { %466 = vmatmul.bf16.gmra.mxu0 %v350_v57  ;;  %506 = vmatmul.bf16.gmra.mxu1 %v358_v60  ;;  %v230_v57 = vadd.f32 %v1429_v14, %v163_v49  ;;  %v293_v60 = vmax.f32 %v229_v56, 0.0  ;;  %v194_v49 = vmul.f32 %v1416_v7, %v1078_v45  ;;  %v361_v56 = vpack.c.bf16 %v312_v41, %v311_v40 }
  0x52   :  { %546 = vmatmul.bf16.gmra.mxu2 %v366_v52  ;;  %v207_v52 = vmul.f32 %v1416_v7, %v1103_v48  ;;  %v337_v0 = vmax.f32 %v273_v59, 0.0  ;;  %v327_v36 = vmax.f32 %v263_v32, 0.0  ;;  %v1087_v45 = vunpack.c.h.bf16 %v1302_v42  ;;  %v1310_v32 = vld [vmem:[%s2049_s0 + $0xf8] sm:$0xff]  }
  0x53   :  { %v294_v61 = vmax.f32 %v230_v57, 0.0  ;;  %v261_v57 = vadd.f32 %v1429_v14, %v194_v49  ;;  %v198_v48 = vmul.f32 %v1416_v7, %v1086_v44  ;;  %v210_v50 = vmul.f32 %v1416_v7, %v1110_v46 }
  0x54   :  { %v199_v49 = vmul.f32 %v1416_v7, %v1087_v45  ;;  %v211_v51 = vmul.f32 %v1416_v7, %v1111_v47 }
  0x55   :  { %v352_v12 = vpack.c.bf16 %v294_v61, %v293_v60  ;;  %v274_v60 = vadd.f32 %v1429_v14, %v207_v52  ;;  %v1294_v61 = vld [vmem:[%s2049_s0 + $0x78] sm:$0xff]   ;;  %v325_v62 = vmax.f32 %v261_v57, 0.0  ;;  %v265_v52 = vadd.f32 %v1429_v14, %v198_v48 }
  0x56   :  { %v1054_v4 = vunpack.c.l.bf16 %v1294_v61  ;;  %v1055_v5 = vunpack.c.h.bf16 %v1294_v61  ;;  %v277_v54 = vadd.f32 %v1429_v14, %v210_v50  ;;  %v278_v55 = vadd.f32 %v1429_v14, %v211_v51 }
  0x57   :  { %v338_v1 = vmax.f32 %v274_v60, 0.0  ;;  %v368_v6 = vpack.c.bf16 %v326_v63, %v325_v62  ;;  %v329_v58 = vmax.f32 %v265_v52, 0.0 }
  0x58   :  { %v182_v9 = vmul.f32 %v1416_v7, %v1054_v4  ;;  %v183_v10 = vmul.f32 %v1416_v7, %v1055_v5  ;;  %v341_v60 = vmax.f32 %v277_v54, 0.0  ;;  %v342_v61 = vmax.f32 %v278_v55, 0.0 }
  0x59   :  { %v374_v8 = vpack.c.bf16 %v338_v1, %v337_v0 }
  0x5a   :  { %v249_v13 = vadd.f32 %v1429_v14, %v182_v9  ;;  %v250_v15 = vadd.f32 %v1429_v14, %v183_v10  ;;  %v376_v63 = vpack.c.bf16 %v342_v61, %v341_v60 }
  0x5c   :  { %581 = vmatmul.bf16.gmra.mxu3 %v373_v31  ;;  %v313_v18 = vmax.f32 %v249_v13, 0.0  ;;  %v314_v19 = vmax.f32 %v250_v15, 0.0 }
  0x5e   :  { %v362_v31 = vpack.c.bf16 %v314_v19, %v313_v18 }
  0x61   :  { %471 = vmatmul.bf16.gmra.mxu0 %v351_v35  ;;  %511 = vmatmul.bf16.gmra.mxu1 %v359_v38  ;;  %v232_v35 = vadd.f32 %v1429_v14, %v165_v27  ;;  %v295_v38 = vmax.f32 %v231_v34, 0.0  ;;  %v197_v27 = vmul.f32 %v1416_v7, %v1083_v23  ;;  %v275_v34 = vadd.f32 %v1429_v14, %v208_v28 }
  0x62   :  { %551 = vmatmul.bf16.gmra.mxu2 %v367_v30 }
  0x63   :  { %v296_v39 = vmax.f32 %v232_v35, 0.0  ;;  %v264_v33 = vadd.f32 %v1429_v14, %v197_v27  ;;  %v276_v35 = vadd.f32 %v1429_v14, %v209_v29 }
  0x65   :  { %v353_v53 = vpack.c.bf16 %v296_v39, %v295_v38  ;;  %v328_v37 = vmax.f32 %v264_v33, 0.0  ;;  %v339_v38 = vmax.f32 %v275_v34, 0.0  ;;  %v340_v39 = vmax.f32 %v276_v35, 0.0 }
  0x66   :  { %v1118_v34 = vunpack.c.l.bf16 %v1310_v32  ;;  %v1119_v35 = vunpack.c.h.bf16 %v1310_v32 }
  0x67   :  { %v369_v40 = vpack.c.bf16 %v328_v37, %v327_v36  ;;  %v375_v41 = vpack.c.bf16 %v340_v39, %v339_v38 }
  0x68   :  { %v214_v36 = vmul.f32 %v1416_v7, %v1118_v34  ;;  %v215_v37 = vmul.f32 %v1416_v7, %v1119_v35 }
  0x6a   :  { %v281_v38 = vadd.f32 %v1429_v14, %v214_v36  ;;  %v282_v39 = vadd.f32 %v1429_v14, %v215_v37 }
  0x6c   :  { %586 = vmatmul.bf16.gmra.mxu3 %v374_v8  ;;  %v1309_v8 = vld [vmem:[%s2049_s0 + $0xf0] sm:$0xff]   ;;  %v345_v45 = vmax.f32 %v281_v38, 0.0  ;;  %v346_v47 = vmax.f32 %v282_v39, 0.0 }
  0x6d   :  { %v1114_v10 = vunpack.c.l.bf16 %v1309_v8 }
  0x71   :  { %476 = vmatmul.bf16.gmra.mxu0 %v352_v12  ;;  %516 = vmatmul.bf16.gmra.mxu1 %v360_v16  ;;  %v234_v12 = vadd.f32 %v1429_v14, %v167_v3  ;;  %v297_v16 = vmax.f32 %v233_v11, 0.0  ;;  %v1115_v11 = vunpack.c.h.bf16 %v1309_v8 }
  0x72   :  { %556 = vmatmul.bf16.gmra.mxu2 %v368_v6 }
  0x73   :  { %v298_v17 = vmax.f32 %v234_v12, 0.0  ;;  %v212_v12 = vmul.f32 %v1416_v7, %v1114_v10  ;;  %v213_v13 = vmul.f32 %v1416_v7, %v1115_v11  ;;  %v378_v7 = vpack.c.bf16 %v346_v47, %v345_v45 }
  0x75   :  { %v354_v30 = vpack.c.bf16 %v298_v17, %v297_v16  ;;  %v279_v15 = vadd.f32 %v1429_v14, %v212_v12  ;;  %v280_v16 = vadd.f32 %v1429_v14, %v213_v13 }
  0x77   :  { %v343_v21 = vmax.f32 %v279_v15, 0.0  ;;  %v344_v22 = vmax.f32 %v280_v16, 0.0 }
  0x79   :  { %v377_v24 = vpack.c.bf16 %v344_v22, %v343_v21 }
  0x7c   :  { %591 = vmatmul.bf16.gmra.mxu3 %v375_v41 }
  0x81   :  { %481 = vmatmul.bf16.gmra.mxu0 %v353_v53  ;;  %521 = vmatmul.bf16.gmra.mxu1 %v361_v56  ;;  %v266_v53 = vadd.f32 %v1429_v14, %v199_v49 }
  0x82   :  { %561 = vmatmul.bf16.gmra.mxu2 %v369_v40 }
  0x83   :  { %v330_v59 = vmax.f32 %v266_v53, 0.0 }
  0x85   :  { %v370_v62 = vpack.c.bf16 %v330_v59, %v329_v58 }
  0x8c   :  { %596 = vmatmul.bf16.gmra.mxu3 %v376_v63 }
  0x91   :  { %486 = vmatmul.bf16.gmra.mxu0 %v354_v30  ;;  %526 = vmatmul.bf16.gmra.mxu1 %v362_v31 }
  0x92   :  { %566 = vmatmul.bf16.gmra.mxu2 %v370_v62 }
  0x9c   :  { %601 = vmatmul.bf16.gmra.mxu3 %v377_v24 }
  0x9e   :  { %v452_v56 = vpop.f32.mrf.mxu0  ;;  %v1642_v57 = vpop.f32.mrf.mxu1 }
  0x9f   :  { %v810_v0 = vmul.f32 %v452_v56, %v452_v56 }
  0xa5   :  { %v1667_v31 = vpop.f32.mrf.mxu2 }
  0xa6   :  { %v454_v1 = vpop.f32.mrf.mxu0  ;;  %v1644_v2 = vpop.f32.mrf.mxu1 }
  0xa7   :  { %v1123_v3 = vpack.c.bf16 %v454_v1, %v452_v56  ;;  %v740_v4 = vadd.f32 %v454_v1, %v452_v56  ;;  %v811_v5 = vmul.f32 %v454_v1, %v454_v1  ;;  %v1163_v6 = vpack.c.bf16 %v1644_v2, %v1642_v57 }
  0xa9   :  { %1124 = vst [vmem:[%s2050_s4] sm:$0xff] %v1123_v3   ;;  %v874_v9 = vadd.f32 %v811_v5, %v810_v0 }
  0xaa   :  { %1318 = vst [vmem:[%s2050_s4 + $0x40] sm:$0xff] %v1163_v6  }
  0xac   :  { %606 = vmatmul.bf16.gmra.mxu3 %v378_v7 }
  0xad   :  { %v1686_v44 = vpop.f32.mrf.mxu2 }
  0xae   :  { %v457_v17 = vpop.f32.mrf.mxu0  ;;  %v1661_v18 = vpop.f32.mrf.mxu1  ;;  %v1203_v46 = vpack.c.bf16 %v1686_v44, %v1667_v31 }
  0xaf   :  { %v741_v19 = vadd.f32 %v740_v4, %v457_v17  ;;  %v812_v20 = vmul.f32 %v457_v17, %v457_v17 }
  0xb0   :  { %1326 = vst [vmem:[%s2050_s4 + $0x80] sm:$0xff] %v1203_v46  }
  0xb1   :  { %v875_v23 = vadd.f32 %v874_v9, %v812_v20 }
  0xb5   :  { %v1699_v52 = vpop.f32.mrf.mxu2 }
  0xb6   :  { %v459_v25 = vpop.f32.mrf.mxu0  ;;  %v1663_v26 = vpop.f32.mrf.mxu1 }
  0xb7   :  { %v1128_v27 = vpack.c.bf16 %v459_v25, %v457_v17  ;;  %v742_v28 = vadd.f32 %v741_v19, %v459_v25  ;;  %v813_v29 = vmul.f32 %v459_v25, %v459_v25  ;;  %v1168_v30 = vpack.c.bf16 %v1663_v26, %v1661_v18 }
  0xb9   :  { %1311 = vst [vmem:[%s2050_s4 + $0x8] sm:$0xff] %v1128_v27   ;;  %v876_v33 = vadd.f32 %v875_v23, %v813_v29 }
  0xba   :  { %1319 = vst [vmem:[%s2050_s4 + $0x48] sm:$0xff] %v1168_v30  }
  0xbc   :  { %v1722_v63 = vpop.f32.mrf.mxu3 }
  0xbd   :  { %v1709_v55 = vpop.f32.mrf.mxu2 }
  0xbe   :  { %v462_v40 = vpop.f32.mrf.mxu0  ;;  %v1682_v41 = vpop.f32.mrf.mxu1  ;;  %v1208_v56 = vpack.c.bf16 %v1709_v55, %v1699_v52 }
  0xbf   :  { %v1684_v42 = vadd.f32 %v742_v28, %v462_v40  ;;  %v814_v43 = vmul.f32 %v462_v40, %v462_v40 }
  0xc0   :  { %1327 = vst [vmem:[%s2050_s4 + $0x88] sm:$0xff] %v1208_v56  }
  0xc1   :  { %v1690_v48 = vadd.f32 %v876_v33, %v814_v43 }
  0xc4   :  { %v1734_v4 = vpop.f32.mrf.mxu3 }
  0xc5   :  { %v1720_v62 = vpop.f32.mrf.mxu2  ;;  %v1243_v6 = vpack.c.bf16 %v1734_v4, %v1722_v63 }
  0xc6   :  { %v464_v14 = vpop.f32.mrf.mxu0  ;;  %v1695_v49 = vpop.f32.mrf.mxu1 }
  0xc7   :  { %v1133_v50 = vpack.c.bf16 %v464_v14, %v462_v40  ;;  %v1173_v51 = vpack.c.bf16 %v1695_v49, %v1682_v41  ;;  %1334 = vst [vmem:[%s2050_s4 + $0xc0] sm:$0xff] %v1243_v6   ;;  %v815_v34 = vmul.f32 %v464_v14, %v464_v14  ;;  %v744_v38 = vadd.f32 %v1684_v42, %v464_v14 }
  0xc9   :  { %1312 = vst [vmem:[%s2050_s4 + $0x10] sm:$0xff] %v1133_v50   ;;  %v878_v39 = vadd.f32 %v1690_v48, %v815_v34 }
  0xca   :  { %1320 = vst [vmem:[%s2050_s4 + $0x50] sm:$0xff] %v1173_v51  }
  0xcd   :  { %v1732_v3 = vpop.f32.mrf.mxu2 }
  0xce   :  { %v467_v53 = vpop.f32.mrf.mxu0  ;;  %v1707_v54 = vpop.f32.mrf.mxu1  ;;  %v1213_v5 = vpack.c.bf16 %v1732_v3, %v1720_v62 }
  0xcf   :  { %v1752_v13 = vpop.f32.mrf.mxu3  ;;  %v816_v37 = vmul.f32 %v467_v53, %v467_v53  ;;  %v745_v43 = vadd.f32 %v744_v38, %v467_v53 }
  0xd0   :  { %1328 = vst [vmem:[%s2050_s4 + $0x90] sm:$0xff] %v1213_v5  }
  0xd1   :  { %v879_v45 = vadd.f32 %v878_v39, %v816_v37 }
  0xd5   :  { %v1750_v12 = vpop.f32.mrf.mxu2 }
  0xd6   :  { %v469_v58 = vpop.f32.mrf.mxu0  ;;  %v1716_v59 = vpop.f32.mrf.mxu1 }
  0xd7   :  { %v1138_v60 = vpack.c.bf16 %v469_v58, %v467_v53  ;;  %v1178_v61 = vpack.c.bf16 %v1716_v59, %v1707_v54  ;;  %v1764_v19 = vpop.f32.mrf.mxu3  ;;  %v817_v40 = vmul.f32 %v469_v58, %v469_v58  ;;  %v746_v50 = vadd.f32 %v745_v43, %v469_v58 }
  0xd8   :  { %v1248_v21 = vpack.c.bf16 %v1764_v19, %v1752_v13 }
  0xd9   :  { %1313 = vst [vmem:[%s2050_s4 + $0x18] sm:$0xff] %v1138_v60   ;;  %v880_v14 = vadd.f32 %v879_v45, %v817_v40 }
  0xda   :  { %1321 = vst [vmem:[%s2050_s4 + $0x58] sm:$0xff] %v1178_v61  }
  0xdb   :  { %1335 = vst [vmem:[%s2050_s4 + $0xc8] sm:$0xff] %v1248_v21  }
  0xdd   :  { %v1762_v17 = vpop.f32.mrf.mxu2 }
  0xde   :  { %v472_v0 = vpop.f32.mrf.mxu0  ;;  %v1730_v1 = vpop.f32.mrf.mxu1  ;;  %v1218_v20 = vpack.c.bf16 %v1762_v17, %v1750_v12 }
  0xdf   :  { %v1782_v28 = vpop.f32.mrf.mxu3  ;;  %v818_v46 = vmul.f32 %v472_v0, %v472_v0  ;;  %v747_v5 = vadd.f32 %v746_v50, %v472_v0 }
  0xe0   :  { %1329 = vst [vmem:[%s2050_s4 + $0x98] sm:$0xff] %v1218_v20  }
  0xe1   :  { %v881_v48 = vadd.f32 %v880_v14, %v818_v46 }
  0xe5   :  { %v1780_v27 = vpop.f32.mrf.mxu2 }
  0xe6   :  { %v474_v8 = vpop.f32.mrf.mxu0  ;;  %v1746_v9 = vpop.f32.mrf.mxu1 }
  0xe7   :  { %v1143_v10 = vpack.c.bf16 %v474_v8, %v472_v0  ;;  %v1183_v11 = vpack.c.bf16 %v1746_v9, %v1730_v1  ;;  %v1794_v33 = vpop.f32.mrf.mxu3  ;;  %v819_v61 = vmul.f32 %v474_v8, %v474_v8  ;;  %v748_v58 = vadd.f32 %v747_v5, %v474_v8 }
  0xe8   :  { %v1253_v36 = vpack.c.bf16 %v1794_v33, %v1782_v28 }
  0xe9   :  { %1314 = vst [vmem:[%s2050_s4 + $0x20] sm:$0xff] %v1143_v10   ;;  %v882_v6 = vadd.f32 %v881_v48, %v819_v61 }
  0xea   :  { %1322 = vst [vmem:[%s2050_s4 + $0x60] sm:$0xff] %v1183_v11  }
  0xeb   :  { %1336 = vst [vmem:[%s2050_s4 + $0xd0] sm:$0xff] %v1253_v36  }
  0xed   :  { %v1792_v32 = vpop.f32.mrf.mxu2 }
  0xee   :  { %v477_v15 = vpop.f32.mrf.mxu0  ;;  %v1760_v16 = vpop.f32.mrf.mxu1  ;;  %v1223_v35 = vpack.c.bf16 %v1792_v32, %v1780_v27 }
  0xef   :  { %v1814_v42 = vpop.f32.mrf.mxu3  ;;  %v820_v53 = vmul.f32 %v477_v15, %v477_v15  ;;  %v749_v11 = vadd.f32 %v748_v58, %v477_v15 }
  0xf0   :  { %1330 = vst [vmem:[%s2050_s4 + $0xa0] sm:$0xff] %v1223_v35  }
  0xf1   :  { %v883_v20 = vadd.f32 %v882_v6, %v820_v53  ;;  %v827_v6 = vmul.f32 %v1644_v2, %v1644_v2 }
  0xf5   :  { %v1812_v60 = vpop.f32.mrf.mxu2 }
  0xf6   :  { %v479_v22 = vpop.f32.mrf.mxu0  ;;  %v1776_v23 = vpop.f32.mrf.mxu1 }
  0xf7   :  { %v1148_v24 = vpack.c.bf16 %v479_v22, %v477_v15  ;;  %v1188_v25 = vpack.c.bf16 %v1776_v23, %v1760_v16  ;;  %v821_v10 = vmul.f32 %v479_v22, %v479_v22  ;;  %v750_v0 = vadd.f32 %v749_v11, %v479_v22  ;;  %v1826_v35 = vpop.f32.mrf.mxu3 }
  0xf8   :  { %v1258_v8 = vpack.c.bf16 %v1826_v35, %v1814_v42 }
  0xf9   :  { %1315 = vst [vmem:[%s2050_s4 + $0x28] sm:$0xff] %v1148_v24   ;;  %v884_v36 = vadd.f32 %v883_v20, %v821_v10  ;;  %v828_v20 = vmul.f32 %v1661_v18, %v1661_v18 }
  0xfa   :  { %1323 = vst [vmem:[%s2050_s4 + $0x68] sm:$0xff] %v1188_v25  }
  0xfb   :  { %1337 = vst [vmem:[%s2050_s4 + $0xd8] sm:$0xff] %v1258_v8  }
  0xfd   :  { %v1824_v34 = vpop.f32.mrf.mxu2 }
  0xfe   :  { %v482_v29 = vpop.f32.mrf.mxu0  ;;  %v1790_v30 = vpop.f32.mrf.mxu1  ;;  %v1228_v38 = vpack.c.bf16 %v1824_v34, %v1812_v60 }
  0xff   :  { %v822_v21 = vmul.f32 %v482_v29, %v482_v29  ;;  %v751_v39 = vadd.f32 %v750_v0, %v482_v29  ;;  %v1844_v48 = vpop.f32.mrf.mxu3 }
 0x100   :  { %1331 = vst [vmem:[%s2050_s4 + $0xa8] sm:$0xff] %v1228_v38  }
 0x101   :  { %v885_v15 = vadd.f32 %v884_v36, %v822_v21 }
 0x105   :  { %v1842_v5 = vpop.f32.mrf.mxu2 }
 0x106   :  { %v484_v47 = vpop.f32.mrf.mxu0  ;;  %v1808_v7 = vpop.f32.mrf.mxu1 }
 0x107   :  { %v1153_v51 = vpack.c.bf16 %v484_v47, %v482_v29  ;;  %v1193_v56 = vpack.c.bf16 %v1808_v7, %v1790_v30  ;;  %v823_v37 = vmul.f32 %v484_v47, %v484_v47  ;;  %v752_v22 = vadd.f32 %v751_v39, %v484_v47  ;;  %v1866_v38 = vpop.f32.mrf.mxu3 }
 0x108   :  { %v826_v47 = vmul.f32 %v1642_v57, %v1642_v57  ;;  %v1263_v8 = vpack.c.bf16 %v1866_v38, %v1844_v48 }
 0x109   :  { %1316 = vst [vmem:[%s2050_s4 + $0x30] sm:$0xff] %v1153_v51   ;;  %v886_v43 = vadd.f32 %v885_v15, %v823_v37 }
 0x10a   :  { %1324 = vst [vmem:[%s2050_s4 + $0x70] sm:$0xff] %v1193_v56  }
 0x10b   :  { %1338 = vst [vmem:[%s2050_s4 + $0xe0] sm:$0xff] %v1263_v8   ;;  %v839_v8 = vmul.f32 %v1808_v7, %v1808_v7 }
 0x10d   :  { %v1864_v37 = vpop.f32.mrf.mxu2 }
 0x10e   :  { %v487_v24 = vpop.f32.mrf.mxu0  ;;  %v1822_v25 = vpop.f32.mrf.mxu1 }
 0x10f   :  { %v824_v40 = vmul.f32 %v487_v24, %v487_v24  ;;  %v753_v45 = vadd.f32 %v752_v22, %v487_v24 }
 0x111   :  { %v887_v46 = vadd.f32 %v886_v43, %v824_v40  ;;  %v832_v43 = vmul.f32 %v1707_v54, %v1707_v54 }
 0x116   :  { %v489_v50 = vpop.f32.mrf.mxu0  ;;  %v1838_v51 = vpop.f32.mrf.mxu1 }
 0x117   :  { %v1158_v56 = vpack.c.bf16 %v489_v50, %v487_v24  ;;  %v754_v14 = vadd.f32 %v753_v45, %v489_v50  ;;  %v825_v29 = vmul.f32 %v489_v50, %v489_v50  ;;  %v1198_v61 = vpack.c.bf16 %v1838_v51, %v1822_v25 }
 0x119   :  { %1317 = vst [vmem:[%s2050_s4 + $0x38] sm:$0xff] %v1158_v56   ;;  %v755_v53 = vadd.f32 %v754_v14, %v1642_v57  ;;  %v888_v58 = vadd.f32 %v887_v46, %v825_v29  ;;  %v829_v57 = vmul.f32 %v1663_v26, %v1663_v26  ;;  %v833_v46 = vmul.f32 %v1716_v59, %v1716_v59  ;;  %v1890_v14 = vpop.f32.mrf.mxu2 }
 0x11a   :  { %1325 = vst [vmem:[%s2050_s4 + $0x78] sm:$0xff] %v1198_v61   ;;  %v834_v29 = vmul.f32 %v1730_v1, %v1730_v1 }
 0x11b   :  { %v756_v10 = vadd.f32 %v755_v53, %v1644_v2  ;;  %v889_v11 = vadd.f32 %v888_v58, %v826_v47  ;;  %v1233_v2 = vpack.c.bf16 %v1864_v37, %v1842_v5  ;;  %v835_v53 = vmul.f32 %v1746_v9, %v1746_v9 }
 0x11d   :  { %v757_v21 = vadd.f32 %v756_v10, %v1661_v18  ;;  %v890_v24 = vadd.f32 %v889_v11, %v827_v6  ;;  %v830_v18 = vmul.f32 %v1682_v41, %v1682_v41  ;;  %1332 = vst [vmem:[%s2050_s4 + $0xb0] sm:$0xff] %v1233_v2   ;;  %v837_v11 = vmul.f32 %v1776_v23, %v1776_v23 }
 0x11f   :  { %v758_v0 = vadd.f32 %v757_v21, %v1663_v26  ;;  %v891_v36 = vadd.f32 %v890_v24, %v828_v20  ;;  %v831_v26 = vmul.f32 %v1695_v49, %v1695_v49 }
 0x121   :  { %v759_v39 = vadd.f32 %v758_v0, %v1682_v41  ;;  %v892_v15 = vadd.f32 %v891_v36, %v829_v57 }
 0x123   :  { %v760_v40 = vadd.f32 %v759_v39, %v1695_v49  ;;  %v893_v22 = vadd.f32 %v892_v15, %v830_v18  ;;  %v1892_v49 = vpop.f32.mrf.mxu3 }
 0x125   :  { %v894_v45 = vadd.f32 %v893_v22, %v831_v26  ;;  %v761_v41 = vadd.f32 %v760_v40, %v1707_v54  ;;  %v841_v40 = vmul.f32 %v1838_v51, %v1838_v51 }
 0x127   :  { %v762_v50 = vadd.f32 %v761_v41, %v1716_v59  ;;  %v895_v56 = vadd.f32 %v894_v45, %v832_v43  ;;  %v836_v59 = vmul.f32 %v1760_v16, %v1760_v16  ;;  %v843_v41 = vmul.f32 %v1686_v44, %v1686_v44 }
 0x129   :  { %v763_v61 = vadd.f32 %v762_v50, %v1730_v1  ;;  %v896_v47 = vadd.f32 %v895_v56, %v833_v46  ;;  %v1906_v1 = vpop.f32.mrf.mxu2  ;;  %v844_v50 = vmul.f32 %v1699_v52, %v1699_v52 }
 0x12b   :  { %v764_v54 = vadd.f32 %v763_v61, %v1746_v9  ;;  %v897_v58 = vadd.f32 %v896_v47, %v834_v29  ;;  %v1908_v24 = vpop.f32.mrf.mxu3  ;;  %v1238_v9 = vpack.c.bf16 %v1906_v1, %v1890_v14  ;;  %v845_v29 = vmul.f32 %v1709_v55, %v1709_v55 }
 0x12c   :  { %v1268_v57 = vpack.c.bf16 %v1908_v24, %v1892_v49 }
 0x12d   :  { %v765_v6 = vadd.f32 %v764_v54, %v1760_v16  ;;  %v898_v10 = vadd.f32 %v897_v58, %v835_v53  ;;  %v838_v16 = vmul.f32 %v1790_v30, %v1790_v30  ;;  %1333 = vst [vmem:[%s2050_s4 + $0xb8] sm:$0xff] %v1238_v9  }
 0x12e   :  { %1339 = vst [vmem:[%s2050_s4 + $0xe8] sm:$0xff] %v1268_v57   ;;  %v850_v57 = vmul.f32 %v1780_v27, %v1780_v27 }
 0x12f   :  { %v766_v20 = vadd.f32 %v765_v6, %v1776_v23  ;;  %v899_v21 = vadd.f32 %v898_v10, %v836_v59  ;;  %v848_v6 = vmul.f32 %v1750_v12, %v1750_v12 }
 0x131   :  { %v767_v0 = vadd.f32 %v766_v20, %v1790_v30  ;;  %v900_v36 = vadd.f32 %v899_v21, %v837_v11  ;;  %v840_v30 = vmul.f32 %v1822_v25, %v1822_v25 }
 0x133   :  { %v901_v23 = vadd.f32 %v900_v36, %v838_v16  ;;  %v768_v2 = vadd.f32 %v767_v0, %v1808_v7  ;;  %v1932_v22 = vpop.f32.mrf.mxu3  ;;  %v842_v7 = vmul.f32 %v1667_v31, %v1667_v31  ;;  %v851_v16 = vmul.f32 %v1792_v32, %v1792_v32 }
 0x135   :  { %v902_v18 = vadd.f32 %v901_v23, %v839_v8  ;;  %v769_v39 = vadd.f32 %v768_v2, %v1822_v25  ;;  %v852_v23 = vmul.f32 %v1812_v60, %v1812_v60 }
 0x137   :  { %v903_v15 = vadd.f32 %v902_v18, %v840_v30  ;;  %v770_v26 = vadd.f32 %v769_v39, %v1838_v51  ;;  %v853_v18 = vmul.f32 %v1824_v34, %v1824_v34 }
 0x139   :  { %v771_v43 = vadd.f32 %v770_v26, %v1667_v31  ;;  %v904_v45 = vadd.f32 %v903_v15, %v841_v40 }
 0x13b   :  { %v772_v46 = vadd.f32 %v771_v43, %v1686_v44  ;;  %v905_v25 = vadd.f32 %v904_v45, %v842_v7  ;;  %v1946_v31 = vpop.f32.mrf.mxu3  ;;  %v846_v44 = vmul.f32 %v1720_v62, %v1720_v62  ;;  %v856_v45 = vmul.f32 %v1890_v14, %v1890_v14 }
 0x13c   :  { %v1273_v53 = vpack.c.bf16 %v1946_v31, %v1932_v22 }
 0x13d   :  { %v773_v56 = vadd.f32 %v772_v46, %v1699_v52  ;;  %v906_v51 = vadd.f32 %v905_v25, %v843_v41  ;;  %v847_v52 = vmul.f32 %v1732_v3, %v1732_v3  ;;  %v858_v25 = vmul.f32 %v1722_v63, %v1722_v63 }
 0x13e   :  { %1340 = vst [vmem:[%s2050_s4 + $0xf0] sm:$0xff] %v1273_v53  }
 0x13f   :  { %v774_v61 = vadd.f32 %v773_v56, %v1709_v55  ;;  %v907_v47 = vadd.f32 %v906_v51, %v844_v50 }
 0x141   :  { %v775_v54 = vadd.f32 %v774_v61, %v1720_v62  ;;  %v908_v58 = vadd.f32 %v907_v47, %v845_v29  ;;  %v849_v62 = vmul.f32 %v1762_v17, %v1762_v17 }
 0x143   :  { %v776_v55 = vadd.f32 %v775_v54, %v1732_v3  ;;  %v909_v59 = vadd.f32 %v908_v58, %v846_v44  ;;  %v1965_v9 = vpop.f32.mrf.mxu3 }
 0x145   :  { %v910_v10 = vadd.f32 %v909_v59, %v847_v52  ;;  %v777_v11 = vadd.f32 %v776_v55, %v1750_v12 }
 0x147   :  { %v778_v20 = vadd.f32 %v777_v11, %v1762_v17  ;;  %v911_v21 = vadd.f32 %v910_v10, %v848_v6 }
 0x149   :  { %v779_v3 = vadd.f32 %v778_v20, %v1780_v27  ;;  %v912_v0 = vadd.f32 %v911_v21, %v849_v62 }
 0x14b   :  { %v780_v36 = vadd.f32 %v779_v3, %v1792_v32  ;;  %v913_v12 = vadd.f32 %v912_v0, %v850_v57  ;;  %v609_v27 = vpop.f32.mrf.mxu3  ;;  %v854_v32 = vmul.f32 %v1842_v5, %v1842_v5 }
 0x14c   :  { %v1278_v30 = vpack.c.bf16 %v609_v27, %v1965_v9 }
 0x14d   :  { %v781_v17 = vadd.f32 %v780_v36, %v1812_v60  ;;  %v914_v2 = vadd.f32 %v913_v12, %v851_v16  ;;  %v869_v16 = vmul.f32 %v1908_v24, %v1908_v24 }
 0x14e   :  { %1341 = vst [vmem:[%s2050_s4 + $0xf8] sm:$0xff] %v1278_v30   ;;  %v873_v30 = vmul.f32 %v609_v27, %v609_v27 }
 0x14f   :  { %v782_v8 = vadd.f32 %v781_v17, %v1824_v34  ;;  %v915_v39 = vadd.f32 %v914_v2, %v852_v23  ;;  %v855_v34 = vmul.f32 %v1864_v37, %v1864_v37  ;;  %v870_v23 = vmul.f32 %v1932_v22, %v1932_v22 }
 0x150   :  { %v871_v2 = vmul.f32 %v1946_v31, %v1946_v31 }
 0x151   :  { %v916_v15 = vadd.f32 %v915_v39, %v853_v18  ;;  %v783_v26 = vadd.f32 %v782_v8, %v1842_v5  ;;  %v857_v5 = vmul.f32 %v1906_v1, %v1906_v1  ;;  %v872_v18 = vmul.f32 %v1965_v9, %v1965_v9 }
 0x153   :  { %v917_v60 = vadd.f32 %v916_v15, %v854_v32  ;;  %v784_v40 = vadd.f32 %v783_v26, %v1864_v37  ;;  %v859_v37 = vmul.f32 %v1734_v4, %v1734_v4 }
 0x155   :  { %v918_v7 = vadd.f32 %v917_v60, %v855_v34  ;;  %v785_v43 = vadd.f32 %v784_v40, %v1890_v14  ;;  %v860_v14 = vmul.f32 %v1752_v13, %v1752_v13 }
 0x157   :  { %v919_v41 = vadd.f32 %v918_v7, %v856_v45  ;;  %v786_v46 = vadd.f32 %v785_v43, %v1906_v1  ;;  %v861_v1 = vmul.f32 %v1764_v19, %v1764_v19 }
 0x159   :  { %v787_v50 = vadd.f32 %v786_v46, %v1722_v63  ;;  %v920_v56 = vadd.f32 %v919_v41, %v857_v5  ;;  %v862_v63 = vmul.f32 %v1782_v28, %v1782_v28 }
 0x15b   :  { %v788_v51 = vadd.f32 %v787_v50, %v1734_v4  ;;  %v921_v29 = vadd.f32 %v920_v56, %v858_v25  ;;  %v863_v4 = vmul.f32 %v1794_v33, %v1794_v33 }
 0x15d   :  { %v789_v61 = vadd.f32 %v788_v51, %v1752_v13  ;;  %v922_v47 = vadd.f32 %v921_v29, %v859_v37  ;;  %v864_v13 = vmul.f32 %v1814_v42, %v1814_v42 }
 0x15f   :  { %v790_v53 = vadd.f32 %v789_v61, %v1764_v19  ;;  %v923_v44 = vadd.f32 %v922_v47, %v860_v14  ;;  %v865_v19 = vmul.f32 %v1826_v35, %v1826_v35 }
 0x161   :  { %v791_v54 = vadd.f32 %v790_v53, %v1782_v28  ;;  %v924_v58 = vadd.f32 %v923_v44, %v861_v1  ;;  %v866_v28 = vmul.f32 %v1844_v48, %v1844_v48 }
 0x163   :  { %v792_v52 = vadd.f32 %v791_v54, %v1794_v33  ;;  %v925_v55 = vadd.f32 %v924_v58, %v862_v63  ;;  %v867_v33 = vmul.f32 %v1866_v38, %v1866_v38 }
 0x165   :  { %v926_v59 = vadd.f32 %v925_v55, %v863_v4  ;;  %v793_v6 = vadd.f32 %v792_v52, %v1814_v42  ;;  %v868_v42 = vmul.f32 %v1892_v49, %v1892_v49 }
 0x167   :  { %v794_v10 = vadd.f32 %v793_v6, %v1826_v35  ;;  %v927_v11 = vadd.f32 %v926_v59, %v864_v13 }
 0x169   :  { %v795_v62 = vadd.f32 %v794_v10, %v1844_v48  ;;  %v928_v20 = vadd.f32 %v927_v11, %v865_v19 }
 0x16b   :  { %v796_v21 = vadd.f32 %v795_v62, %v1866_v38  ;;  %v929_v57 = vadd.f32 %v928_v20, %v866_v28 }
 0x16d   :  { %v797_v3 = vadd.f32 %v796_v21, %v1892_v49  ;;  %v930_v0 = vadd.f32 %v929_v57, %v867_v33 }
 0x16f   :  { %v798_v35 = vadd.f32 %v797_v3, %v1908_v24  ;;  %v931_v36 = vadd.f32 %v930_v0, %v868_v42 }
 0x171   :  { %v932_v48 = vadd.f32 %v931_v36, %v869_v16  ;;  %v799_v12 = vadd.f32 %v798_v35, %v1932_v22 }
 0x173   :  { %v933_v38 = vadd.f32 %v932_v48, %v870_v23  ;;  %v800_v17 = vadd.f32 %v799_v12, %v1946_v31 }
 0x175   :  { %v934_v49 = vadd.f32 %v933_v38, %v871_v2  ;;  %v801_v8 = vadd.f32 %v800_v17, %v1965_v9 }
 0x177   :  { %v935_v24 = vadd.f32 %v934_v49, %v872_v18  ;;  %v802_v39 = vadd.f32 %v801_v8, %v609_v27 }
 0x179   :  { %v803_v15 = vrot.slane %v802_v39, 4  ;;  %v936_v26 = vadd.f32 %v935_v24, %v873_v30 }
 0x17b   :  { %v804_v32 = vadd.f32 %v803_v15, %v802_v39  ;;  %v937_v60 = vrot.slane %v936_v26, 4 }
 0x17d   :  { %v805_v22 = vrot.slane %v804_v32, 2  ;;  %v938_v40 = vadd.f32 %v937_v60, %v936_v26 }
 0x17f   :  { %v806_v34 = vadd.f32 %v805_v22, %v804_v32  ;;  %v939_v7 = vrot.slane %v938_v40, 2 }
 0x181   :  { %v807_v43 = vrot.slane %v806_v34, 1  ;;  %v940_v45 = vadd.f32 %v939_v7, %v938_v40 }
 0x183   :  { %v808_v31 = vadd.f32 %v807_v43, %v806_v34  ;;  %v941_v41 = vrot.slane %v940_v45, 1 }
 0x185   :  { %809 = vst [vmem:[%s2051_s5] sm:$0x1] %v808_v31  ;;  %v942_v9 = vadd.f32 %v941_v41, %v940_v45 }
 0x187   :  { %943 = vst [vmem:[%s2051_s5 + $0x1] sm:$0x1] %v942_v9 }

// kernel: bottleneck_forward.9
= control target key start
LH: loop header
LB: loop body
LE: loop exit
PB: predicated region body
PF: predicated region fallthrough
CT: control target
= control target key end

     0   :  { %s1631_s0 = inlined_call_operand.vmem [shape: bf16[512,128], index: 0, kind: input, shape index: {}]   ;;  %s1632_s1 = inlined_call_operand.vmem [shape: bf16[512,128], index: 1, kind: input, shape index: {}]   ;;  %s1633_s2 = inlined_call_operand.vmem [shape: f32[1,128], index: 2, kind: input, shape index: {}]   ;;  %s1634_s3 = inlined_call_operand.vmem [shape: f32[1,128], index: 3, kind: input, shape index: {}]   ;;  %s1635_s4 = inlined_call_operand.vmem [shape: bf16[512,128], index: 4, kind: output, shape index: {}]  }
   0x1   :  { %v670_v0 = vld [vmem:[%s1631_s0] sm:$0xff]   ;;  %v1085_v8 = vld [vmem:[%s1631_s0 + $0x8] sm:$0xff]   ;;  %v1086_v10 = vld [vmem:[%s1631_s0 + $0x10] sm:$0xff]  }
   0x2   :  { %v1211_v1 = vld [vmem:[%s1633_s2] ss:$0 sm:$0xff]  ;;  %v671_v2 = vunpack.c.l.bf16 %v670_v0  ;;  %v672_v3 = vunpack.c.h.bf16 %v670_v0  ;;  %v1116_v9 = vld [vmem:[%s1632_s1 + $0x8] sm:$0xff]   ;;  %v675_v13 = vunpack.c.l.bf16 %v1085_v8  ;;  %v676_v14 = vunpack.c.h.bf16 %v1085_v8  ;;  %v1117_v15 = vld [vmem:[%s1632_s1 + $0x10] sm:$0xff]  }
   0x3   :  { %v1216_v4 = vld [vmem:[%s1634_s3] ss:$0 sm:$0xff]  ;;  %v803_v16 = vunpack.c.l.bf16 %v1116_v9  ;;  %v804_v17 = vunpack.c.h.bf16 %v1116_v9  ;;  %v679_v18 = vunpack.c.l.bf16 %v1086_v10  ;;  %v680_v19 = vunpack.c.h.bf16 %v1086_v10  ;;  %v1087_v24 = vld [vmem:[%s1631_s0 + $0x18] sm:$0xff]   ;;  %v1089_v56 = vld [vmem:[%s1631_s0 + $0x28] sm:$0xff]  }
   0x4   :  { %v798_v5 = vld [vmem:[%s1632_s1] sm:$0xff]   ;;  %v149_v11 = vmul.f32 %v1211_v1, %v671_v2  ;;  %v150_v12 = vmul.f32 %v1211_v1, %v672_v3  ;;  %v151_v22 = vmul.f32 %v1211_v1, %v675_v13  ;;  %v152_v23 = vmul.f32 %v1211_v1, %v676_v14  ;;  %v1118_v37 = vld [vmem:[%s1632_s1 + $0x18] sm:$0xff]   ;;  %v1120_v61 = vld [vmem:[%s1632_s1 + $0x28] sm:$0xff]  }
   0x5   :  { %v799_v6 = vunpack.c.l.bf16 %v798_v5  ;;  %v800_v7 = vunpack.c.h.bf16 %v798_v5  ;;  %v153_v25 = vmul.f32 %v1211_v1, %v679_v18  ;;  %v154_v26 = vmul.f32 %v1211_v1, %v680_v19  ;;  %v1088_v46 = vld [vmem:[%s1631_s0 + $0x20] sm:$0xff]   ;;  %v1090_v8 = vld [vmem:[%s1631_s0 + $0x30] sm:$0xff]  }
   0x6   :  { %v217_v20 = vadd.f32 %v1216_v4, %v149_v11  ;;  %v218_v21 = vadd.f32 %v1216_v4, %v150_v12  ;;  %v807_v27 = vunpack.c.l.bf16 %v1117_v15  ;;  %v808_v28 = vunpack.c.h.bf16 %v1117_v15  ;;  %v1119_v51 = vld [vmem:[%s1632_s1 + $0x20] sm:$0xff]   ;;  %v1121_v9 = vld [vmem:[%s1632_s1 + $0x30] sm:$0xff]  }
   0x7   :  { %v219_v31 = vadd.f32 %v1216_v4, %v151_v22  ;;  %v220_v32 = vadd.f32 %v1216_v4, %v152_v23  ;;  %v221_v33 = vadd.f32 %v1216_v4, %v153_v25  ;;  %v222_v34 = vadd.f32 %v1216_v4, %v154_v26  ;;  %v1091_v22 = vld [vmem:[%s1631_s0 + $0x38] sm:$0xff]  }
   0x8   :  { %v409_v29 = vadd.f32 %v799_v6, %v217_v20  ;;  %v410_v30 = vadd.f32 %v800_v7, %v218_v21  ;;  %v683_v35 = vunpack.c.l.bf16 %v1087_v24  ;;  %v684_v36 = vunpack.c.h.bf16 %v1087_v24 }
   0x9   :  { %v411_v40 = vadd.f32 %v803_v16, %v219_v31  ;;  %v412_v41 = vadd.f32 %v804_v17, %v220_v32  ;;  %v413_v42 = vadd.f32 %v807_v27, %v221_v33  ;;  %v414_v43 = vadd.f32 %v808_v28, %v222_v34  ;;  %v1122_v31 = vld [vmem:[%s1632_s1 + $0x38] sm:$0xff]  }
   0xa   :  { %v473_v38 = vmax.f32 %v409_v29, 0.0  ;;  %v474_v39 = vmax.f32 %v410_v30, 0.0  ;;  %v155_v44 = vmul.f32 %v1211_v1, %v683_v35  ;;  %v156_v45 = vmul.f32 %v1211_v1, %v684_v36 }
   0xb   :  { %v475_v48 = vmax.f32 %v411_v40, 0.0  ;;  %v476_v49 = vmax.f32 %v412_v41, 0.0  ;;  %v811_v50 = vunpack.c.l.bf16 %v1118_v37  ;;  %v477_v52 = vmax.f32 %v413_v42, 0.0  ;;  %v1092_v40 = vld [vmem:[%s1631_s0 + $0x40] sm:$0xff]  }
   0xc   :  { %v928_v47 = vpack.c.bf16 %v474_v39, %v473_v38  ;;  %v478_v53 = vmax.f32 %v414_v43, 0.0  ;;  %v223_v54 = vadd.f32 %v1216_v4, %v155_v44  ;;  %v224_v55 = vadd.f32 %v1216_v4, %v156_v45 }
   0xd   :  { %v933_v57 = vpack.c.bf16 %v476_v49, %v475_v48  ;;  %v812_v58 = vunpack.c.h.bf16 %v1118_v37  ;;  %v687_v59 = vunpack.c.l.bf16 %v1088_v46  ;;  %v688_v60 = vunpack.c.h.bf16 %v1088_v46  ;;  %v1123_v49 = vld [vmem:[%s1632_s1 + $0x40] sm:$0xff]  }
   0xe   :  { %929 = vst [vmem:[%s1635_s4] sm:$0xff] %v928_v47   ;;  %v938_v62 = vpack.c.bf16 %v478_v53, %v477_v52  ;;  %v415_v63 = vadd.f32 %v811_v50, %v223_v54  ;;  %v815_v0 = vunpack.c.l.bf16 %v1119_v51  ;;  %v816_v2 = vunpack.c.h.bf16 %v1119_v51  ;;  %v1093_v54 = vld [vmem:[%s1631_s0 + $0x48] sm:$0xff]  }
   0xf   :  { %1147 = vst [vmem:[%s1635_s4 + $0x8] sm:$0xff] %v933_v57   ;;  %v416_v3 = vadd.f32 %v812_v58, %v224_v55  ;;  %v157_v5 = vmul.f32 %v1211_v1, %v687_v59  ;;  %v158_v6 = vmul.f32 %v1211_v1, %v688_v60  ;;  %v691_v7 = vunpack.c.l.bf16 %v1089_v56 }
  0x10   :  { %1148 = vst [vmem:[%s1635_s4 + $0x10] sm:$0xff] %v938_v62   ;;  %v479_v10 = vmax.f32 %v415_v63, 0.0  ;;  %v692_v11 = vunpack.c.h.bf16 %v1089_v56  ;;  %v819_v12 = vunpack.c.l.bf16 %v1120_v61  ;;  %v820_v13 = vunpack.c.h.bf16 %v1120_v61  ;;  %v1124_v63 = vld [vmem:[%s1632_s1 + $0x48] sm:$0xff]  }
  0x11   :  { %v480_v14 = vmax.f32 %v416_v3, 0.0  ;;  %v225_v15 = vadd.f32 %v1216_v4, %v157_v5  ;;  %v226_v16 = vadd.f32 %v1216_v4, %v158_v6  ;;  %v159_v17 = vmul.f32 %v1211_v1, %v691_v7  ;;  %v1094_v6 = vld [vmem:[%s1631_s0 + $0x50] sm:$0xff]  }
  0x12   :  { %v160_v18 = vmul.f32 %v1211_v1, %v692_v11  ;;  %v695_v19 = vunpack.c.l.bf16 %v1090_v8  ;;  %v696_v20 = vunpack.c.h.bf16 %v1090_v8  ;;  %v823_v21 = vunpack.c.l.bf16 %v1121_v9  ;;  %v1125_v11 = vld [vmem:[%s1632_s1 + $0x50] sm:$0xff]  }
  0x13   :  { %v943_v23 = vpack.c.bf16 %v480_v14, %v479_v10  ;;  %v417_v24 = vadd.f32 %v815_v0, %v225_v15  ;;  %v418_v25 = vadd.f32 %v816_v2, %v226_v16  ;;  %v227_v26 = vadd.f32 %v1216_v4, %v159_v17 }
  0x14   :  { %v228_v27 = vadd.f32 %v1216_v4, %v160_v18  ;;  %v161_v28 = vmul.f32 %v1211_v1, %v695_v19  ;;  %v162_v29 = vmul.f32 %v1211_v1, %v696_v20  ;;  %v824_v30 = vunpack.c.h.bf16 %v1121_v9  ;;  %v1095_v20 = vld [vmem:[%s1631_s0 + $0x58] sm:$0xff]  }
  0x15   :  { %1149 = vst [vmem:[%s1635_s4 + $0x18] sm:$0xff] %v943_v23   ;;  %v481_v32 = vmax.f32 %v417_v24, 0.0  ;;  %v482_v33 = vmax.f32 %v418_v25, 0.0  ;;  %v419_v34 = vadd.f32 %v819_v12, %v227_v26  ;;  %v699_v35 = vunpack.c.l.bf16 %v1091_v22 }
  0x16   :  { %v420_v36 = vadd.f32 %v820_v13, %v228_v27  ;;  %v229_v37 = vadd.f32 %v1216_v4, %v161_v28  ;;  %v230_v38 = vadd.f32 %v1216_v4, %v162_v29  ;;  %v700_v39 = vunpack.c.h.bf16 %v1091_v22  ;;  %v1126_v29 = vld [vmem:[%s1632_s1 + $0x58] sm:$0xff]  }
  0x17   :  { %v948_v41 = vpack.c.bf16 %v482_v33, %v481_v32  ;;  %v483_v42 = vmax.f32 %v419_v34, 0.0  ;;  %v163_v43 = vmul.f32 %v1211_v1, %v699_v35  ;;  %v827_v44 = vunpack.c.l.bf16 %v1122_v31 }
  0x18   :  { %v484_v45 = vmax.f32 %v420_v36, 0.0  ;;  %v421_v46 = vadd.f32 %v823_v21, %v229_v37  ;;  %v422_v47 = vadd.f32 %v824_v30, %v230_v38  ;;  %v164_v48 = vmul.f32 %v1211_v1, %v700_v39  ;;  %v1096_v38 = vld [vmem:[%s1631_s0 + $0x60] sm:$0xff]  }
  0x19   :  { %1150 = vst [vmem:[%s1635_s4 + $0x20] sm:$0xff] %v948_v41   ;;  %v231_v50 = vadd.f32 %v1216_v4, %v163_v43  ;;  %v828_v51 = vunpack.c.h.bf16 %v1122_v31  ;;  %v703_v52 = vunpack.c.l.bf16 %v1092_v40  ;;  %v704_v53 = vunpack.c.h.bf16 %v1092_v40  ;;  %v1127_v43 = vld [vmem:[%s1632_s1 + $0x60] sm:$0xff]  }
  0x1a   :  { %v953_v55 = vpack.c.bf16 %v484_v45, %v483_v42  ;;  %v485_v56 = vmax.f32 %v421_v46, 0.0  ;;  %v486_v57 = vmax.f32 %v422_v47, 0.0  ;;  %v232_v58 = vadd.f32 %v1216_v4, %v164_v48 }
  0x1b   :  { %v423_v59 = vadd.f32 %v827_v44, %v231_v50  ;;  %v165_v60 = vmul.f32 %v1211_v1, %v703_v52  ;;  %v166_v61 = vmul.f32 %v1211_v1, %v704_v53  ;;  %v831_v62 = vunpack.c.l.bf16 %v1123_v49  ;;  %v1097_v52 = vld [vmem:[%s1631_s0 + $0x68] sm:$0xff]  }
  0x1c   :  { %1151 = vst [vmem:[%s1635_s4 + $0x28] sm:$0xff] %v953_v55   ;;  %v958_v0 = vpack.c.bf16 %v486_v57, %v485_v56  ;;  %v424_v2 = vadd.f32 %v828_v51, %v232_v58  ;;  %v832_v3 = vunpack.c.h.bf16 %v1123_v49  ;;  %v707_v5 = vunpack.c.l.bf16 %v1093_v54 }
  0x1d   :  { %v487_v7 = vmax.f32 %v423_v59, 0.0  ;;  %v233_v8 = vadd.f32 %v1216_v4, %v165_v60  ;;  %v234_v9 = vadd.f32 %v1216_v4, %v166_v61  ;;  %v708_v10 = vunpack.c.h.bf16 %v1093_v54  ;;  %v1128_v61 = vld [vmem:[%s1632_s1 + $0x68] sm:$0xff]  }
  0x1e   :  { %1152 = vst [vmem:[%s1635_s4 + $0x30] sm:$0xff] %v958_v0   ;;  %v488_v12 = vmax.f32 %v424_v2, 0.0  ;;  %v167_v13 = vmul.f32 %v1211_v1, %v707_v5  ;;  %v835_v14 = vunpack.c.l.bf16 %v1124_v63  ;;  %v836_v15 = vunpack.c.h.bf16 %v1124_v63 }
  0x1f   :  { %v425_v16 = vadd.f32 %v831_v62, %v233_v8  ;;  %v426_v17 = vadd.f32 %v832_v3, %v234_v9  ;;  %v168_v18 = vmul.f32 %v1211_v1, %v708_v10  ;;  %v711_v19 = vunpack.c.l.bf16 %v1094_v6  ;;  %v1098_v3 = vld [vmem:[%s1631_s0 + $0x70] sm:$0xff]  }
  0x20   :  { %v963_v21 = vpack.c.bf16 %v488_v12, %v487_v7  ;;  %v235_v22 = vadd.f32 %v1216_v4, %v167_v13  ;;  %v712_v23 = vunpack.c.h.bf16 %v1094_v6  ;;  %v839_v24 = vunpack.c.l.bf16 %v1125_v11  ;;  %v1129_v13 = vld [vmem:[%s1632_s1 + $0x70] sm:$0xff]  }
  0x21   :  { %v489_v25 = vmax.f32 %v425_v16, 0.0  ;;  %v490_v26 = vmax.f32 %v426_v17, 0.0  ;;  %v236_v27 = vadd.f32 %v1216_v4, %v168_v18  ;;  %v169_v28 = vmul.f32 %v1211_v1, %v711_v19 }
  0x22   :  { %1153 = vst [vmem:[%s1635_s4 + $0x38] sm:$0xff] %v963_v21   ;;  %v427_v30 = vadd.f32 %v835_v14, %v235_v22  ;;  %v170_v31 = vmul.f32 %v1211_v1, %v712_v23  ;;  %v840_v32 = vunpack.c.h.bf16 %v1125_v11  ;;  %v715_v33 = vunpack.c.l.bf16 %v1095_v20  ;;  %v1099_v22 = vld [vmem:[%s1631_s0 + $0x78] sm:$0xff]  }
  0x23   :  { %v968_v34 = vpack.c.bf16 %v490_v26, %v489_v25  ;;  %v428_v35 = vadd.f32 %v836_v15, %v236_v27  ;;  %v237_v36 = vadd.f32 %v1216_v4, %v169_v28  ;;  %v716_v37 = vunpack.c.h.bf16 %v1095_v20  ;;  %v1130_v27 = vld [vmem:[%s1632_s1 + $0x78] sm:$0xff]  }
  0x24   :  { %v491_v39 = vmax.f32 %v427_v30, 0.0  ;;  %v238_v40 = vadd.f32 %v1216_v4, %v170_v31  ;;  %v171_v41 = vmul.f32 %v1211_v1, %v715_v33  ;;  %v843_v42 = vunpack.c.l.bf16 %v1126_v29 }
  0x25   :  { %1154 = vst [vmem:[%s1635_s4 + $0x40] sm:$0xff] %v968_v34   ;;  %v492_v44 = vmax.f32 %v428_v35, 0.0  ;;  %v429_v45 = vadd.f32 %v839_v24, %v237_v36  ;;  %v172_v46 = vmul.f32 %v1211_v1, %v716_v37  ;;  %v844_v47 = vunpack.c.h.bf16 %v1126_v29  ;;  %v1100_v36 = vld [vmem:[%s1631_s0 + $0x80] sm:$0xff]  }
  0x26   :  { %v430_v48 = vadd.f32 %v840_v32, %v238_v40  ;;  %v239_v49 = vadd.f32 %v1216_v4, %v171_v41  ;;  %v719_v50 = vunpack.c.l.bf16 %v1096_v38  ;;  %v720_v51 = vunpack.c.h.bf16 %v1096_v38  ;;  %v1131_v41 = vld [vmem:[%s1632_s1 + $0x80] sm:$0xff]  }
  0x27   :  { %v973_v53 = vpack.c.bf16 %v492_v44, %v491_v39  ;;  %v493_v54 = vmax.f32 %v429_v45, 0.0  ;;  %v240_v55 = vadd.f32 %v1216_v4, %v172_v46  ;;  %v847_v56 = vunpack.c.l.bf16 %v1127_v43 }
  0x28   :  { %v494_v57 = vmax.f32 %v430_v48, 0.0  ;;  %v431_v58 = vadd.f32 %v843_v42, %v239_v49  ;;  %v173_v59 = vmul.f32 %v1211_v1, %v719_v50  ;;  %v174_v60 = vmul.f32 %v1211_v1, %v720_v51  ;;  %v1101_v50 = vld [vmem:[%s1631_s0 + $0x88] sm:$0xff]  }
  0x29   :  { %1155 = vst [vmem:[%s1635_s4 + $0x48] sm:$0xff] %v973_v53   ;;  %v432_v62 = vadd.f32 %v844_v47, %v240_v55  ;;  %v848_v63 = vunpack.c.h.bf16 %v1127_v43  ;;  %v723_v0 = vunpack.c.l.bf16 %v1097_v52  ;;  %v724_v2 = vunpack.c.h.bf16 %v1097_v52  ;;  %v1132_v55 = vld [vmem:[%s1632_s1 + $0x88] sm:$0xff]  }
  0x2a   :  { %v978_v5 = vpack.c.bf16 %v494_v57, %v493_v54  ;;  %v495_v6 = vmax.f32 %v431_v58, 0.0  ;;  %v241_v7 = vadd.f32 %v1216_v4, %v173_v59  ;;  %v242_v8 = vadd.f32 %v1216_v4, %v174_v60 }
  0x2b   :  { %v496_v9 = vmax.f32 %v432_v62, 0.0  ;;  %v175_v10 = vmul.f32 %v1211_v1, %v723_v0  ;;  %v176_v11 = vmul.f32 %v1211_v1, %v724_v2  ;;  %v851_v12 = vunpack.c.l.bf16 %v1128_v61  ;;  %v1102_v0 = vld [vmem:[%s1631_s0 + $0x90] sm:$0xff]  }
  0x2c   :  { %1156 = vst [vmem:[%s1635_s4 + $0x50] sm:$0xff] %v978_v5   ;;  %v433_v14 = vadd.f32 %v847_v56, %v241_v7  ;;  %v434_v15 = vadd.f32 %v848_v63, %v242_v8  ;;  %v852_v16 = vunpack.c.h.bf16 %v1128_v61  ;;  %v727_v17 = vunpack.c.l.bf16 %v1098_v3 }
  0x2d   :  { %v983_v18 = vpack.c.bf16 %v496_v9, %v495_v6  ;;  %v243_v19 = vadd.f32 %v1216_v4, %v175_v10  ;;  %v244_v20 = vadd.f32 %v1216_v4, %v176_v11  ;;  %v728_v21 = vunpack.c.h.bf16 %v1098_v3  ;;  %v1133_v11 = vld [vmem:[%s1632_s1 + $0x90] sm:$0xff]  }
  0x2e   :  { %v497_v23 = vmax.f32 %v433_v14, 0.0  ;;  %v498_v24 = vmax.f32 %v434_v15, 0.0  ;;  %v177_v25 = vmul.f32 %v1211_v1, %v727_v17  ;;  %v855_v26 = vunpack.c.l.bf16 %v1129_v13 }
  0x2f   :  { %1157 = vst [vmem:[%s1635_s4 + $0x58] sm:$0xff] %v983_v18   ;;  %v435_v28 = vadd.f32 %v851_v12, %v243_v19  ;;  %v436_v29 = vadd.f32 %v852_v16, %v244_v20  ;;  %v178_v30 = vmul.f32 %v1211_v1, %v728_v21  ;;  %v856_v31 = vunpack.c.h.bf16 %v1129_v13  ;;  %v1103_v20 = vld [vmem:[%s1631_s0 + $0x98] sm:$0xff]  }
  0x30   :  { %v988_v32 = vpack.c.bf16 %v498_v24, %v497_v23  ;;  %v245_v33 = vadd.f32 %v1216_v4, %v177_v25  ;;  %v731_v34 = vunpack.c.l.bf16 %v1099_v22  ;;  %v732_v35 = vunpack.c.h.bf16 %v1099_v22  ;;  %v1134_v25 = vld [vmem:[%s1632_s1 + $0x98] sm:$0xff]  }
  0x31   :  { %v499_v37 = vmax.f32 %v435_v28, 0.0  ;;  %v500_v38 = vmax.f32 %v436_v29, 0.0  ;;  %v246_v39 = vadd.f32 %v1216_v4, %v178_v30  ;;  %v859_v40 = vunpack.c.l.bf16 %v1130_v27 }
  0x32   :  { %1158 = vst [vmem:[%s1635_s4 + $0x60] sm:$0xff] %v988_v32   ;;  %v437_v42 = vadd.f32 %v855_v26, %v245_v33  ;;  %v179_v43 = vmul.f32 %v1211_v1, %v731_v34  ;;  %v180_v44 = vmul.f32 %v1211_v1, %v732_v35  ;;  %v860_v45 = vunpack.c.h.bf16 %v1130_v27  ;;  %v1104_v34 = vld [vmem:[%s1631_s0 + $0xa0] sm:$0xff]  }
  0x33   :  { %v993_v46 = vpack.c.bf16 %v500_v38, %v499_v37  ;;  %v438_v47 = vadd.f32 %v856_v31, %v246_v39  ;;  %v735_v48 = vunpack.c.l.bf16 %v1100_v36  ;;  %v736_v49 = vunpack.c.h.bf16 %v1100_v36  ;;  %v1135_v39 = vld [vmem:[%s1632_s1 + $0xa0] sm:$0xff]  }
  0x34   :  { %v501_v51 = vmax.f32 %v437_v42, 0.0  ;;  %v247_v52 = vadd.f32 %v1216_v4, %v179_v43  ;;  %v248_v53 = vadd.f32 %v1216_v4, %v180_v44  ;;  %v863_v54 = vunpack.c.l.bf16 %v1131_v41 }
  0x35   :  { %1159 = vst [vmem:[%s1635_s4 + $0x68] sm:$0xff] %v993_v46   ;;  %v502_v56 = vmax.f32 %v438_v47, 0.0  ;;  %v181_v57 = vmul.f32 %v1211_v1, %v735_v48  ;;  %v182_v58 = vmul.f32 %v1211_v1, %v736_v49  ;;  %v864_v59 = vunpack.c.h.bf16 %v1131_v41  ;;  %v1105_v48 = vld [vmem:[%s1631_s0 + $0xa8] sm:$0xff]  }
  0x36   :  { %v439_v60 = vadd.f32 %v859_v40, %v247_v52  ;;  %v440_v61 = vadd.f32 %v860_v45, %v248_v53  ;;  %v739_v62 = vunpack.c.l.bf16 %v1101_v50  ;;  %v740_v63 = vunpack.c.h.bf16 %v1101_v50  ;;  %v1136_v53 = vld [vmem:[%s1632_s1 + $0xa8] sm:$0xff]  }
  0x37   :  { %v998_v2 = vpack.c.bf16 %v502_v56, %v501_v51  ;;  %v249_v3 = vadd.f32 %v1216_v4, %v181_v57  ;;  %v250_v5 = vadd.f32 %v1216_v4, %v182_v58  ;;  %v867_v6 = vunpack.c.l.bf16 %v1132_v55 }
  0x38   :  { %v503_v7 = vmax.f32 %v439_v60, 0.0  ;;  %v504_v8 = vmax.f32 %v440_v61, 0.0  ;;  %v183_v9 = vmul.f32 %v1211_v1, %v739_v62  ;;  %v184_v10 = vmul.f32 %v1211_v1, %v740_v63  ;;  %v1106_v62 = vld [vmem:[%s1631_s0 + $0xb0] sm:$0xff]  }
  0x39   :  { %1160 = vst [vmem:[%s1635_s4 + $0x70] sm:$0xff] %v998_v2   ;;  %v441_v12 = vadd.f32 %v863_v54, %v249_v3  ;;  %v442_v13 = vadd.f32 %v864_v59, %v250_v5  ;;  %v868_v14 = vunpack.c.h.bf16 %v1132_v55  ;;  %v743_v15 = vunpack.c.l.bf16 %v1102_v0 }
  0x3a   :  { %v1003_v16 = vpack.c.bf16 %v504_v8, %v503_v7  ;;  %v251_v17 = vadd.f32 %v1216_v4, %v183_v9  ;;  %v252_v18 = vadd.f32 %v1216_v4, %v184_v10  ;;  %v744_v19 = vunpack.c.h.bf16 %v1102_v0  ;;  %v1137_v9 = vld [vmem:[%s1632_s1 + $0xb0] sm:$0xff]  }
  0x3b   :  { %v505_v21 = vmax.f32 %v441_v12, 0.0  ;;  %v506_v22 = vmax.f32 %v442_v13, 0.0  ;;  %v185_v23 = vmul.f32 %v1211_v1, %v743_v15  ;;  %v871_v24 = vunpack.c.l.bf16 %v1133_v11 }
  0x3c   :  { %1161 = vst [vmem:[%s1635_s4 + $0x78] sm:$0xff] %v1003_v16   ;;  %v443_v26 = vadd.f32 %v867_v6, %v251_v17  ;;  %v444_v27 = vadd.f32 %v868_v14, %v252_v18  ;;  %v186_v28 = vmul.f32 %v1211_v1, %v744_v19  ;;  %v872_v29 = vunpack.c.h.bf16 %v1133_v11  ;;  %v1107_v18 = vld [vmem:[%s1631_s0 + $0xb8] sm:$0xff]  }
  0x3d   :  { %v1008_v30 = vpack.c.bf16 %v506_v22, %v505_v21  ;;  %v253_v31 = vadd.f32 %v1216_v4, %v185_v23  ;;  %v747_v32 = vunpack.c.l.bf16 %v1103_v20  ;;  %v748_v33 = vunpack.c.h.bf16 %v1103_v20  ;;  %v1138_v23 = vld [vmem:[%s1632_s1 + $0xb8] sm:$0xff]  }
  0x3e   :  { %v507_v35 = vmax.f32 %v443_v26, 0.0  ;;  %v508_v36 = vmax.f32 %v444_v27, 0.0  ;;  %v254_v37 = vadd.f32 %v1216_v4, %v186_v28  ;;  %v875_v38 = vunpack.c.l.bf16 %v1134_v25 }
  0x3f   :  { %1162 = vst [vmem:[%s1635_s4 + $0x80] sm:$0xff] %v1008_v30   ;;  %v445_v40 = vadd.f32 %v871_v24, %v253_v31  ;;  %v187_v41 = vmul.f32 %v1211_v1, %v747_v32  ;;  %v188_v42 = vmul.f32 %v1211_v1, %v748_v33  ;;  %v876_v43 = vunpack.c.h.bf16 %v1134_v25  ;;  %v1108_v32 = vld [vmem:[%s1631_s0 + $0xc0] sm:$0xff]  }
  0x40   :  { %v1013_v44 = vpack.c.bf16 %v508_v36, %v507_v35  ;;  %v446_v45 = vadd.f32 %v872_v29, %v254_v37  ;;  %v751_v46 = vunpack.c.l.bf16 %v1104_v34  ;;  %v752_v47 = vunpack.c.h.bf16 %v1104_v34  ;;  %v1139_v37 = vld [vmem:[%s1632_s1 + $0xc0] sm:$0xff]  }
  0x41   :  { %v509_v49 = vmax.f32 %v445_v40, 0.0  ;;  %v255_v50 = vadd.f32 %v1216_v4, %v187_v41  ;;  %v256_v51 = vadd.f32 %v1216_v4, %v188_v42  ;;  %v879_v52 = vunpack.c.l.bf16 %v1135_v39 }
  0x42   :  { %1163 = vst [vmem:[%s1635_s4 + $0x88] sm:$0xff] %v1013_v44   ;;  %v510_v54 = vmax.f32 %v446_v45, 0.0  ;;  %v189_v55 = vmul.f32 %v1211_v1, %v751_v46  ;;  %v190_v56 = vmul.f32 %v1211_v1, %v752_v47  ;;  %v880_v57 = vunpack.c.h.bf16 %v1135_v39  ;;  %v1109_v46 = vld [vmem:[%s1631_s0 + $0xc8] sm:$0xff]  }
  0x43   :  { %v447_v58 = vadd.f32 %v875_v38, %v255_v50  ;;  %v448_v59 = vadd.f32 %v876_v43, %v256_v51  ;;  %v755_v60 = vunpack.c.l.bf16 %v1105_v48  ;;  %v756_v61 = vunpack.c.h.bf16 %v1105_v48  ;;  %v1140_v51 = vld [vmem:[%s1632_s1 + $0xc8] sm:$0xff]  }
  0x44   :  { %v1018_v63 = vpack.c.bf16 %v510_v54, %v509_v49  ;;  %v257_v0 = vadd.f32 %v1216_v4, %v189_v55  ;;  %v258_v2 = vadd.f32 %v1216_v4, %v190_v56  ;;  %v883_v3 = vunpack.c.l.bf16 %v1136_v53 }
  0x45   :  { %v511_v5 = vmax.f32 %v447_v58, 0.0  ;;  %v512_v6 = vmax.f32 %v448_v59, 0.0  ;;  %v191_v7 = vmul.f32 %v1211_v1, %v755_v60  ;;  %v192_v8 = vmul.f32 %v1211_v1, %v756_v61  ;;  %v1110_v60 = vld [vmem:[%s1631_s0 + $0xd0] sm:$0xff]  }
  0x46   :  { %1164 = vst [vmem:[%s1635_s4 + $0x90] sm:$0xff] %v1018_v63   ;;  %v449_v10 = vadd.f32 %v879_v52, %v257_v0  ;;  %v450_v11 = vadd.f32 %v880_v57, %v258_v2  ;;  %v884_v12 = vunpack.c.h.bf16 %v1136_v53  ;;  %v759_v13 = vunpack.c.l.bf16 %v1106_v62 }
  0x47   :  { %v1023_v14 = vpack.c.bf16 %v512_v6, %v511_v5  ;;  %v259_v15 = vadd.f32 %v1216_v4, %v191_v7  ;;  %v260_v16 = vadd.f32 %v1216_v4, %v192_v8  ;;  %v760_v17 = vunpack.c.h.bf16 %v1106_v62  ;;  %v1141_v7 = vld [vmem:[%s1632_s1 + $0xd0] sm:$0xff]  }
  0x48   :  { %v513_v19 = vmax.f32 %v449_v10, 0.0  ;;  %v514_v20 = vmax.f32 %v450_v11, 0.0  ;;  %v193_v21 = vmul.f32 %v1211_v1, %v759_v13  ;;  %v887_v22 = vunpack.c.l.bf16 %v1137_v9 }
  0x49   :  { %1165 = vst [vmem:[%s1635_s4 + $0x98] sm:$0xff] %v1023_v14   ;;  %v451_v24 = vadd.f32 %v883_v3, %v259_v15  ;;  %v452_v25 = vadd.f32 %v884_v12, %v260_v16  ;;  %v194_v26 = vmul.f32 %v1211_v1, %v760_v17  ;;  %v888_v27 = vunpack.c.h.bf16 %v1137_v9  ;;  %v1111_v16 = vld [vmem:[%s1631_s0 + $0xd8] sm:$0xff]  }
  0x4a   :  { %v1028_v28 = vpack.c.bf16 %v514_v20, %v513_v19  ;;  %v261_v29 = vadd.f32 %v1216_v4, %v193_v21  ;;  %v763_v30 = vunpack.c.l.bf16 %v1107_v18  ;;  %v764_v31 = vunpack.c.h.bf16 %v1107_v18  ;;  %v1142_v21 = vld [vmem:[%s1632_s1 + $0xd8] sm:$0xff]  }
  0x4b   :  { %v515_v33 = vmax.f32 %v451_v24, 0.0  ;;  %v516_v34 = vmax.f32 %v452_v25, 0.0  ;;  %v262_v35 = vadd.f32 %v1216_v4, %v194_v26  ;;  %v891_v36 = vunpack.c.l.bf16 %v1138_v23 }
  0x4c   :  { %1166 = vst [vmem:[%s1635_s4 + $0xa0] sm:$0xff] %v1028_v28   ;;  %v453_v38 = vadd.f32 %v887_v22, %v261_v29  ;;  %v195_v39 = vmul.f32 %v1211_v1, %v763_v30  ;;  %v196_v40 = vmul.f32 %v1211_v1, %v764_v31  ;;  %v892_v41 = vunpack.c.h.bf16 %v1138_v23  ;;  %v1112_v30 = vld [vmem:[%s1631_s0 + $0xe0] sm:$0xff]  }
  0x4d   :  { %v1033_v42 = vpack.c.bf16 %v516_v34, %v515_v33  ;;  %v454_v43 = vadd.f32 %v888_v27, %v262_v35  ;;  %v767_v44 = vunpack.c.l.bf16 %v1108_v32  ;;  %v768_v45 = vunpack.c.h.bf16 %v1108_v32  ;;  %v1143_v35 = vld [vmem:[%s1632_s1 + $0xe0] sm:$0xff]  }
  0x4e   :  { %v517_v47 = vmax.f32 %v453_v38, 0.0  ;;  %v263_v48 = vadd.f32 %v1216_v4, %v195_v39  ;;  %v264_v49 = vadd.f32 %v1216_v4, %v196_v40  ;;  %v895_v50 = vunpack.c.l.bf16 %v1139_v37 }
  0x4f   :  { %1167 = vst [vmem:[%s1635_s4 + $0xa8] sm:$0xff] %v1033_v42   ;;  %v518_v52 = vmax.f32 %v454_v43, 0.0  ;;  %v197_v53 = vmul.f32 %v1211_v1, %v767_v44  ;;  %v198_v54 = vmul.f32 %v1211_v1, %v768_v45  ;;  %v896_v55 = vunpack.c.h.bf16 %v1139_v37  ;;  %v1113_v44 = vld [vmem:[%s1631_s0 + $0xe8] sm:$0xff]  }
  0x50   :  { %v455_v56 = vadd.f32 %v891_v36, %v263_v48  ;;  %v456_v57 = vadd.f32 %v892_v41, %v264_v49  ;;  %v771_v58 = vunpack.c.l.bf16 %v1109_v46  ;;  %v772_v59 = vunpack.c.h.bf16 %v1109_v46  ;;  %v1144_v49 = vld [vmem:[%s1632_s1 + $0xe8] sm:$0xff]  }
  0x51   :  { %v1038_v61 = vpack.c.bf16 %v518_v52, %v517_v47  ;;  %v265_v62 = vadd.f32 %v1216_v4, %v197_v53  ;;  %v266_v63 = vadd.f32 %v1216_v4, %v198_v54  ;;  %v899_v0 = vunpack.c.l.bf16 %v1140_v51 }
  0x52   :  { %v519_v2 = vmax.f32 %v455_v56, 0.0  ;;  %v520_v3 = vmax.f32 %v456_v57, 0.0  ;;  %v199_v5 = vmul.f32 %v1211_v1, %v771_v58  ;;  %v200_v6 = vmul.f32 %v1211_v1, %v772_v59  ;;  %v1114_v58 = vld [vmem:[%s1631_s0 + $0xf0] sm:$0xff]  }
  0x53   :  { %1168 = vst [vmem:[%s1635_s4 + $0xb0] sm:$0xff] %v1038_v61   ;;  %v457_v8 = vadd.f32 %v895_v50, %v265_v62  ;;  %v458_v9 = vadd.f32 %v896_v55, %v266_v63  ;;  %v900_v10 = vunpack.c.h.bf16 %v1140_v51  ;;  %v775_v11 = vunpack.c.l.bf16 %v1110_v60 }
  0x54   :  { %v1043_v12 = vpack.c.bf16 %v520_v3, %v519_v2  ;;  %v267_v13 = vadd.f32 %v1216_v4, %v199_v5  ;;  %v268_v14 = vadd.f32 %v1216_v4, %v200_v6  ;;  %v776_v15 = vunpack.c.h.bf16 %v1110_v60  ;;  %v1145_v5 = vld [vmem:[%s1632_s1 + $0xf0] sm:$0xff]  }
  0x55   :  { %v521_v17 = vmax.f32 %v457_v8, 0.0  ;;  %v522_v18 = vmax.f32 %v458_v9, 0.0  ;;  %v201_v19 = vmul.f32 %v1211_v1, %v775_v11  ;;  %v903_v20 = vunpack.c.l.bf16 %v1141_v7 }
  0x56   :  { %1169 = vst [vmem:[%s1635_s4 + $0xb8] sm:$0xff] %v1043_v12   ;;  %v459_v22 = vadd.f32 %v899_v0, %v267_v13  ;;  %v460_v23 = vadd.f32 %v900_v10, %v268_v14  ;;  %v202_v24 = vmul.f32 %v1211_v1, %v776_v15  ;;  %v904_v25 = vunpack.c.h.bf16 %v1141_v7  ;;  %v1115_v14 = vld [vmem:[%s1631_s0 + $0xf8] sm:$0xff]  }
  0x57   :  { %v1048_v26 = vpack.c.bf16 %v522_v18, %v521_v17  ;;  %v269_v27 = vadd.f32 %v1216_v4, %v201_v19  ;;  %v779_v28 = vunpack.c.l.bf16 %v1111_v16  ;;  %v780_v29 = vunpack.c.h.bf16 %v1111_v16  ;;  %v1146_v19 = vld [vmem:[%s1632_s1 + $0xf8] sm:$0xff]  }
  0x58   :  { %v523_v31 = vmax.f32 %v459_v22, 0.0  ;;  %v524_v32 = vmax.f32 %v460_v23, 0.0  ;;  %v270_v33 = vadd.f32 %v1216_v4, %v202_v24  ;;  %v907_v34 = vunpack.c.l.bf16 %v1142_v21 }
  0x59   :  { %1170 = vst [vmem:[%s1635_s4 + $0xc0] sm:$0xff] %v1048_v26   ;;  %v461_v36 = vadd.f32 %v903_v20, %v269_v27  ;;  %v203_v37 = vmul.f32 %v1211_v1, %v779_v28  ;;  %v204_v38 = vmul.f32 %v1211_v1, %v780_v29  ;;  %v908_v39 = vunpack.c.h.bf16 %v1142_v21 }
  0x5a   :  { %v1053_v40 = vpack.c.bf16 %v524_v32, %v523_v31  ;;  %v462_v41 = vadd.f32 %v904_v25, %v270_v33  ;;  %v783_v42 = vunpack.c.l.bf16 %v1112_v30  ;;  %v784_v43 = vunpack.c.h.bf16 %v1112_v30 }
  0x5b   :  { %v525_v45 = vmax.f32 %v461_v36, 0.0  ;;  %v271_v46 = vadd.f32 %v1216_v4, %v203_v37  ;;  %v272_v47 = vadd.f32 %v1216_v4, %v204_v38  ;;  %v911_v48 = vunpack.c.l.bf16 %v1143_v35 }
  0x5c   :  { %1171 = vst [vmem:[%s1635_s4 + $0xc8] sm:$0xff] %v1053_v40   ;;  %v526_v50 = vmax.f32 %v462_v41, 0.0  ;;  %v205_v51 = vmul.f32 %v1211_v1, %v783_v42  ;;  %v206_v52 = vmul.f32 %v1211_v1, %v784_v43  ;;  %v912_v53 = vunpack.c.h.bf16 %v1143_v35 }
  0x5d   :  { %v463_v54 = vadd.f32 %v907_v34, %v271_v46  ;;  %v464_v55 = vadd.f32 %v908_v39, %v272_v47  ;;  %v787_v56 = vunpack.c.l.bf16 %v1113_v44  ;;  %v788_v57 = vunpack.c.h.bf16 %v1113_v44 }
  0x5e   :  { %v1058_v59 = vpack.c.bf16 %v526_v50, %v525_v45  ;;  %v273_v60 = vadd.f32 %v1216_v4, %v205_v51  ;;  %v274_v61 = vadd.f32 %v1216_v4, %v206_v52  ;;  %v915_v62 = vunpack.c.l.bf16 %v1144_v49 }
  0x5f   :  { %v527_v63 = vmax.f32 %v463_v54, 0.0  ;;  %v528_v0 = vmax.f32 %v464_v55, 0.0  ;;  %v207_v2 = vmul.f32 %v1211_v1, %v787_v56  ;;  %v208_v3 = vmul.f32 %v1211_v1, %v788_v57 }
  0x60   :  { %1172 = vst [vmem:[%s1635_s4 + $0xd0] sm:$0xff] %v1058_v59   ;;  %v465_v6 = vadd.f32 %v911_v48, %v273_v60  ;;  %v466_v7 = vadd.f32 %v912_v53, %v274_v61  ;;  %v916_v8 = vunpack.c.h.bf16 %v1144_v49  ;;  %v791_v9 = vunpack.c.l.bf16 %v1114_v58 }
  0x61   :  { %v1063_v10 = vpack.c.bf16 %v528_v0, %v527_v63  ;;  %v275_v11 = vadd.f32 %v1216_v4, %v207_v2  ;;  %v276_v12 = vadd.f32 %v1216_v4, %v208_v3  ;;  %v792_v13 = vunpack.c.h.bf16 %v1114_v58 }
  0x62   :  { %v529_v15 = vmax.f32 %v465_v6, 0.0  ;;  %v530_v16 = vmax.f32 %v466_v7, 0.0  ;;  %v209_v17 = vmul.f32 %v1211_v1, %v791_v9  ;;  %v919_v18 = vunpack.c.l.bf16 %v1145_v5 }
  0x63   :  { %1173 = vst [vmem:[%s1635_s4 + $0xd8] sm:$0xff] %v1063_v10   ;;  %v467_v20 = vadd.f32 %v915_v62, %v275_v11  ;;  %v468_v21 = vadd.f32 %v916_v8, %v276_v12  ;;  %v210_v22 = vmul.f32 %v1211_v1, %v792_v13  ;;  %v920_v23 = vunpack.c.h.bf16 %v1145_v5 }
  0x64   :  { %v1068_v24 = vpack.c.bf16 %v530_v16, %v529_v15  ;;  %v277_v25 = vadd.f32 %v1216_v4, %v209_v17  ;;  %v795_v26 = vunpack.c.l.bf16 %v1115_v14  ;;  %v796_v27 = vunpack.c.h.bf16 %v1115_v14 }
  0x65   :  { %v531_v28 = vmax.f32 %v467_v20, 0.0  ;;  %v532_v29 = vmax.f32 %v468_v21, 0.0  ;;  %v278_v30 = vadd.f32 %v1216_v4, %v210_v22  ;;  %v923_v31 = vunpack.c.l.bf16 %v1146_v19 }
  0x66   :  { %1174 = vst [vmem:[%s1635_s4 + $0xe0] sm:$0xff] %v1068_v24   ;;  %v469_v32 = vadd.f32 %v919_v18, %v277_v25  ;;  %v211_v33 = vmul.f32 %v1211_v1, %v795_v26  ;;  %v212_v34 = vmul.f32 %v1211_v1, %v796_v27  ;;  %v924_v35 = vunpack.c.h.bf16 %v1146_v19 }
  0x67   :  { %v1073_v36 = vpack.c.bf16 %v532_v29, %v531_v28  ;;  %v470_v37 = vadd.f32 %v920_v23, %v278_v30 }
  0x68   :  { %v533_v38 = vmax.f32 %v469_v32, 0.0  ;;  %v279_v39 = vadd.f32 %v1216_v4, %v211_v33  ;;  %v280_v40 = vadd.f32 %v1216_v4, %v212_v34 }
  0x69   :  { %1175 = vst [vmem:[%s1635_s4 + $0xe8] sm:$0xff] %v1073_v36   ;;  %v534_v41 = vmax.f32 %v470_v37, 0.0 }
  0x6a   :  { %v471_v42 = vadd.f32 %v923_v31, %v279_v39  ;;  %v472_v43 = vadd.f32 %v924_v35, %v280_v40 }
  0x6b   :  { %v1078_v44 = vpack.c.bf16 %v534_v41, %v533_v38 }
  0x6c   :  { %v535_v45 = vmax.f32 %v471_v42, 0.0  ;;  %v536_v46 = vmax.f32 %v472_v43, 0.0 }
  0x6d   :  { %1176 = vst [vmem:[%s1635_s4 + $0xf0] sm:$0xff] %v1078_v44  }
  0x6e   :  { %v1083_v1 = vpack.c.bf16 %v536_v46, %v535_v45 }
  0x70   :  { %1177 = vst [vmem:[%s1635_s4 + $0xf8] sm:$0xff] %v1083_v1  }

// kernel: bottleneck_forward.7
= control target key start
LH: loop header
LB: loop body
LE: loop exit
PB: predicated region body
PF: predicated region fallthrough
CT: control target
= control target key end

     0   :  { %s5903_s18 = smov 0   ;;  %s5905_s19 = smov 0   ;;  %s7081_s0 = inlined_call_operand.vmem [shape: bf16[2,16,16,128], index: 0, kind: input, shape index: {}]   ;;  %s7082_s1 = inlined_call_operand.vmem [shape: f32[1,128], index: 1, kind: input, shape index: {}]   ;;  %s7083_s2 = inlined_call_operand.vmem [shape: f32[1,128], index: 2, kind: input, shape index: {}]   ;;  %s7084_s3 = inlined_call_operand.vmem [shape: bf16[9,128,128], index: 3, kind: input, shape index: {}]   ;;  %s7085_s4 = inlined_call_operand.vmem [shape: bf16[512,128], index: 4, kind: output, shape index: {0}]   ;;  %s7086_s5 = inlined_call_operand.vmem [shape: f32[2,2,128], index: 5, kind: output, shape index: {1}]  }
   0x1   :  { %s5907_s20 = smov 0  }
   0x2 LB: > { %s28_s21 = sadd.s32 1, %s5866_s19  ;;  %p4309_p0 = scmp.ge.s32.totalorder %s5870_s20, 1  ;;  %s5870_s20 = sphi %s5907_s20, %s16_s20   ;;  %s5866_s19 = sphi %s5905_s19, %s7112_s19   ;;  %s5862_s18 = sphi %s5903_s18, %s7111_s18  }
   0x3   : > { %p30_p1 = scmp.ge.s32.totalorder %s28_s21, 2  ;;  %p215_p2 = scmp.lt.s32.totalorder %s5870_s20, 3 }
   0x5   : > { %s7114_s21 = smov (%p30_p1, %s28_s21), 0  ;;  %p216_p3 = pnand %p4309_p0, %p215_p2 }
   0x7   : > { %219 = sbr.rel (%p216_p3) target bundleno = 853 (0x355), region = 36 }
   0xc   : > { %v5357_v0 = vld [vmem:[%s7084_s3 + $0x78] sm:$0xff]  ;;  %p257_p4 = scmp.lt.s32.totalorder %s5862_s18, 1  ;;  %v5872_v1 = vmov 0   ;;  %v5356_v2 = vld [vmem:[%s7084_s3 + $0x70] sm:$0xff]  ;;  %v5944_v3 = vld [vmem:[%s7082_s1] ss:$0 sm:$0xff] }
   0xd   : > { %531 = vst [vmem:[#allocation2 + $0xb0] sm:$0xf] %v5872_v1  ;;  %5795 = vmatpush.bf16.msra.mxu1 %v5357_v0  ;;  %5796 = vmatpush.bf16.msra.mxu2 %v5357_v0  ;;  %v5355_v4 = vld [vmem:[%s7084_s3 + $0x68] sm:$0xff]  ;;  %v5955_v8 = vld [vmem:[%s7083_s2] ss:$0 sm:$0xff]  ;;  %v5353_v16 = vld [vmem:[%s7084_s3 + $0x58] sm:$0xff] }
   0xe   : > { %s5932_s26 = scalar_select %p257_p4, %s5862_s18, 1  ;;  %5797 = vmatpush.bf16.msra.mxu3 %v5357_v0  ;;  %1474 = vmatpush.bf16.msra.mxu0 %v5357_v0  ;;  %532 = vst [vmem:[#allocation2 + $0xb4] sm:$0xf] %v5872_v1  ;;  %v5354_v11 = vld [vmem:[%s7084_s3 + $0x60] sm:$0xff]  ;;  %v5352_v18 = vld [vmem:[%s7084_s3 + $0x50] sm:$0xff]  ;;  %v5351_v19 = vld [vmem:[%s7084_s3 + $0x48] sm:$0xff] }
   0xf   : > { %487 = vst [vmem:[#allocation2] sm:$0xf] %v5872_v1  ;;  %v5350_v20 = vld [vmem:[%s7084_s3 + $0x40] sm:$0xff]  ;;  %v5381_v32 = vld [vmem:[%s7084_s3 + $0xb8] sm:$0xff]  ;;  %v5380_v38 = vld [vmem:[%s7084_s3 + $0xb0] sm:$0xff]  ;;  %vm887_vm3 = vcmask 1043456  }
  0x10   : > { %s5309_s27 = sshll.u32 %s5932_s26, 7  ;;  %488 = vst [vmem:[#allocation2 + $0x4] sm:$0xf] %v5872_v1  ;;  %v5405_v34 = vld [vmem:[%s7084_s3 + $0xf8] sm:$0xff]  ;;  %v5404_v44 = vld [vmem:[%s7084_s3 + $0xf0] sm:$0xff]  ;;  %s4312_s24 = sshll.u32 %s5862_s18, 5 }
  0x11   : > { %s5939_s30 = scalar_lea.vmem %s7081_s0, %s5309_s27  ;;  %5798 = vmatpush.bf16.msra.mxu1 %v5356_v2  ;;  %5799 = vmatpush.bf16.msra.mxu2 %v5356_v2  ;;  %489 = vst [vmem:[#allocation2 + $0x8] sm:$0xf] %v5872_v1  ;;  %v5333_v36 = vld [vmem:[%s7084_s3 + $0x38] sm:$0xff]  ;;  %v5332_v45 = vld [vmem:[%s7084_s3 + $0x30] sm:$0xff]  ;;  %vm595_vm0 = vsmask.f32 256 }
  0x12   : > { %v5752_v5 = vld [vmem:[%s5939_s30 + $0x18] sm:$0xff]   ;;  %5800 = vmatpush.bf16.msra.mxu3 %v5356_v2  ;;  %1475 = vmatpush.bf16.msra.mxu0 %v5356_v2  ;;  %490 = vst [vmem:[#allocation2 + $0xc] sm:$0xf] %v5872_v1  ;;  %v5753_v29 = vld [vmem:[%s5939_s30 + $0x20] sm:$0xff]   ;;  %vm596_vm1 = vsmask.f32 4368 }
  0x13   : > { %v5540_v6 = vunpack.c.l.bf16 %v5752_v5  ;;  %v5541_v7 = vunpack.c.h.bf16 %v5752_v5  ;;  %491 = vst [vmem:[#allocation2 + $0x10] sm:$0xf] %v5872_v1  ;;  %v5756_v22 = vld [vmem:[%s5939_s30 + $0x38] sm:$0xff]   ;;  %v5757_v30 = vld [vmem:[%s5939_s30 + $0x40] sm:$0xff]   ;;  %v5544_v40 = vunpack.c.l.bf16 %v5753_v29  ;;  %v5545_v41 = vunpack.c.h.bf16 %v5753_v29  ;;  %vm6344_vm2 = vmor %vm595_vm0, %vm596_vm1  ;;  %p267_p5 = scmp.lt.s32.totalorder %s4312_s24, 63  ;;  %s4314_s29 = sshll.u32 %s5932_s26, 1 }
  0x14   : > { %492 = vst [vmem:[#allocation2 + $0x14] sm:$0xf] %v5872_v1  ;;  %v5556_v23 = vunpack.c.l.bf16 %v5756_v22  ;;  %v5557_v24 = vunpack.c.h.bf16 %v5756_v22  ;;  %v5760_v25 = vld [vmem:[%s5939_s30 + $0x58] sm:$0xff]   ;;  %v5761_v37 = vld [vmem:[%s5939_s30 + $0x60] sm:$0xff]   ;;  %v5560_v46 = vunpack.c.l.bf16 %v5757_v30  ;;  %v5561_v49 = vunpack.c.h.bf16 %v5757_v30  ;;  %v5762_v22 = vld [vmem:[%s5939_s30 + $0x68] sm:$0xff]   ;;  %s281_s8 = scalar_lea.vmem %s7086_s5, %s4314_s29 }
  0x15   : > { %v361_v9 = vmul.f32 %v5944_v3, %v5540_v6  ;;  %v362_v10 = vmul.f32 %v5944_v3, %v5541_v7  ;;  %5801 = vmatpush.bf16.msra.mxu1 %v5355_v4  ;;  %5802 = vmatpush.bf16.msra.mxu2 %v5355_v4  ;;  %493 = vst [vmem:[#allocation2 + $0x18] sm:$0xf] %v5872_v1  ;;  %v5572_v27 = vunpack.c.l.bf16 %v5760_v25  ;;  %v5573_v28 = vunpack.c.h.bf16 %v5760_v25  ;;  %v5429_v39 = vld [vmem:[%s7084_s3 + $0x138] sm:$0xff]  ;;  %v5527_v47 = vld [vmem:[%s5939_s30] sm:$0xff]   ;;  %s7116_s24 = smov (!%p267_p5, %s4312_s24), 63 }
  0x16   : > { %5803 = vmatpush.bf16.msra.mxu3 %v5355_v4  ;;  %1476 = vmatpush.bf16.msra.mxu0 %v5355_v4  ;;  %494 = vst [vmem:[#allocation2 + $0x1c] sm:$0xf] %v5872_v1  ;;  %v369_v26 = vmul.f32 %v5944_v3, %v5556_v23  ;;  %v370_v31 = vmul.f32 %v5944_v3, %v5557_v24  ;;  %v5576_v50 = vunpack.c.l.bf16 %v5761_v37  ;;  %v5577_v51 = vunpack.c.h.bf16 %v5761_v37  ;;  %s4313_s25 = sshll.u32 %s7116_s24, 2 }
  0x17   : > { %v397_v12 = vadd.f32 %v5955_v8, %v361_v9  ;;  %v398_v13 = vadd.f32 %v5955_v8, %v362_v10  ;;  %495 = vst [vmem:[#allocation2 + $0x20] sm:$0xf] %v5872_v1  ;;  %v377_v42 = vmul.f32 %v5944_v3, %v5572_v27  ;;  %v378_v43 = vmul.f32 %v5944_v3, %v5573_v28  ;;  %s7008_s28 = scalar_lea.vmem %s7085_s4, %s4313_s25 }
  0x18   : > { %496 = vst [vmem:[#allocation2 + $0x24] sm:$0xf] %v5872_v1  ;;  %v405_v35 = vadd.f32 %v5955_v8, %v369_v26  ;;  %v406_v48 = vadd.f32 %v5955_v8, %v370_v31  ;;  %v363_v53 = vmul.f32 %v5944_v3, %v5544_v40  ;;  %v364_v54 = vmul.f32 %v5944_v3, %v5545_v41  ;;  %v5750_v31 = vld [vmem:[%s5939_s30 + $0x8] sm:$0xff]  }
  0x19   : > { %v5970_v14 = vmax.f32 %v397_v12, 0.0  ;;  %v5972_v15 = vmax.f32 %v398_v13, 0.0  ;;  %5804 = vmatpush.bf16.msra.mxu1 %v5354_v11  ;;  %5805 = vmatpush.bf16.msra.mxu2 %v5354_v11  ;;  %497 = vst [vmem:[#allocation2 + $0x28] sm:$0xf] %v5872_v1  ;;  %v5528_v55 = vunpack.c.l.bf16 %v5527_v47  ;;  %v5529_v56 = vunpack.c.h.bf16 %v5527_v47  ;;  %v5378_v47 = vld [vmem:[%s7084_s3 + $0xa0] sm:$0xff] }
  0x1a   : > { %5806 = vmatpush.bf16.msra.mxu3 %v5354_v11  ;;  %1477 = vmatpush.bf16.msra.mxu0 %v5354_v11  ;;  %498 = vst [vmem:[#allocation2 + $0x2c] sm:$0xf] %v5872_v1  ;;  %v6103_v52 = vmax.f32 %v405_v35, 0.0  ;;  %v413_v57 = vadd.f32 %v5955_v8, %v377_v42  ;;  %v414_v58 = vadd.f32 %v5955_v8, %v378_v43  ;;  %v6113_v60 = vmax.f32 %v406_v48, 0.0  ;;  %v5331_v42 = vld [vmem:[%s7084_s3 + $0x28] sm:$0xff] }
  0x1b   : > { %v5608_v17 = vpack.c.bf16 %v5972_v15, %v5970_v14  ;;  %499 = vst [vmem:[#allocation2 + $0x30] sm:$0xf] %v5872_v1  ;;  %v371_v59 = vmul.f32 %v5944_v3, %v5560_v46  ;;  %v372_v61 = vmul.f32 %v5944_v3, %v5561_v49  ;;  %v379_v62 = vmul.f32 %v5944_v3, %v5576_v50  ;;  %v5402_v49 = vld [vmem:[%s7084_s3 + $0xe0] sm:$0xff]  ;;  %v5427_v50 = vld [vmem:[%s7084_s3 + $0x128] sm:$0xff] }
  0x1c   : > { %500 = vst [vmem:[#allocation2 + $0x34] sm:$0xf] %v5872_v1  ;;  %v380_v63 = vmul.f32 %v5944_v3, %v5577_v51  ;;  %v399_v0 = vadd.f32 %v5955_v8, %v363_v53  ;;  %v400_v2 = vadd.f32 %v5955_v8, %v364_v54  ;;  %v355_v4 = vmul.f32 %v5944_v3, %v5528_v55  ;;  %v5330_v51 = vld [vmem:[%s7084_s3 + $0x20] sm:$0xff] }
  0x1d   : > { %5767 = vst [vmem:[#allocation2 + $0xb0] sm:$0xff] %v5608_v17   ;;  %5807 = vmatpush.bf16.msra.mxu1 %v5353_v16  ;;  %5808 = vmatpush.bf16.msra.mxu2 %v5353_v16  ;;  %v356_v5 = vmul.f32 %v5944_v3, %v5529_v56  ;;  %v6125_v6 = vmax.f32 %v413_v57, 0.0  ;;  %v6127_v7 = vmax.f32 %v414_v58, 0.0  ;;  %v407_v9 = vadd.f32 %v5955_v8, %v371_v59  ;;  %v5758_v17 = vld [vmem:[%s5939_s30 + $0x48] sm:$0xff]  }
  0x1e   : > { %5809 = vmatpush.bf16.msra.mxu3 %v5353_v16  ;;  %1478 = vmatpush.bf16.msra.mxu0 %v5353_v16  ;;  %501 = vst [vmem:[#allocation2 + $0x38] sm:$0xf] %v5872_v1  ;;  %v5628_v10 = vpack.c.bf16 %v6113_v60, %v6103_v52  ;;  %v408_v11 = vadd.f32 %v5955_v8, %v372_v61  ;;  %v5754_v16 = vld [vmem:[%s5939_s30 + $0x28] sm:$0xff]   ;;  %v6141_v23 = vmax.f32 %v399_v0, 0.0  ;;  %v6143_v24 = vmax.f32 %v400_v2, 0.0 }
  0x1f   : > { %502 = vst [vmem:[#allocation2 + $0x3c] sm:$0xf] %v5872_v1  ;;  %v415_v12 = vadd.f32 %v5955_v8, %v379_v62  ;;  %v416_v13 = vadd.f32 %v5955_v8, %v380_v63  ;;  %v391_v25 = vadd.f32 %v5955_v8, %v355_v4  ;;  %v392_v26 = vadd.f32 %v5955_v8, %v356_v5 }
  0x20   : > { %503 = vst [vmem:[#allocation2 + $0x40] sm:$0xf] %v5872_v1  ;;  %v5648_v27 = vpack.c.bf16 %v6127_v7, %v6125_v6  ;;  %v6150_v28 = vmax.f32 %v407_v9, 0.0  ;;  %v5580_v37 = vunpack.c.l.bf16 %v5762_v22  ;;  %v5532_v56 = vunpack.c.l.bf16 %v5750_v31 }
  0x21   : > { %5810 = vmatpush.bf16.msra.mxu1 %v5352_v18  ;;  %5811 = vmatpush.bf16.msra.mxu2 %v5352_v18  ;;  %504 = vst [vmem:[#allocation2 + $0x44] sm:$0xf] %v5872_v1  ;;  %v6170_v40 = vmax.f32 %v415_v12, 0.0  ;;  %v6172_v41 = vmax.f32 %v416_v13, 0.0  ;;  %v6183_v46 = vmax.f32 %v392_v26, 0.0  ;;  %v5533_v61 = vunpack.c.h.bf16 %v5750_v31  ;;  %v5763_v26 = vld [vmem:[%s5939_s30 + $0x70] sm:$0xff]  }
  0x22   : > { %5812 = vmatpush.bf16.msra.mxu3 %v5352_v18  ;;  %1479 = vmatpush.bf16.msra.mxu0 %v5352_v18  ;;  %505 = vst [vmem:[#allocation2 + $0x48] sm:$0xf] %v5872_v1  ;;  %v5548_v18 = vunpack.c.l.bf16 %v5754_v16  ;;  %v381_v58 = vmul.f32 %v5944_v3, %v5580_v37  ;;  %v357_v2 = vmul.f32 %v5944_v3, %v5532_v56  ;;  %v5376_v56 = vld [vmem:[%s7084_s3 + $0x90] sm:$0xff]  ;;  %vm888_vm4 = vsmask.f32 7938 }
  0x23   : > { %506 = vst [vmem:[#allocation2 + $0x4c] sm:$0xf] %v5872_v1  ;;  %v5653_v4 = vpack.c.bf16 %v6172_v41, %v6170_v40  ;;  %v358_v12 = vmul.f32 %v5944_v3, %v5533_v61  ;;  %vm6349_vm5 = vmand %vm887_vm3, %vm888_vm4  ;;  %vm987_vm6 = vsmask.f32 3328  ;;  %vm988_vm7 = vsmask.f32 7440 }
  0x24   : > { %507 = vst [vmem:[#allocation2 + $0x50] sm:$0xf] %v5872_v1  ;;  %v5338_v21 = vld [vmem:[#allocation2 + $0xb0] sm:$0xff]  ;;  %v365_v29 = vmul.f32 %v5944_v3, %v5548_v18  ;;  %v393_v13 = vadd.f32 %v5955_v8, %v357_v2  ;;  %vm6377_vm8 = vmor %vm987_vm6, %vm988_vm7 }
  0x25   : > { %5813 = vmatpush.bf16.msra.mxu1 %v5351_v19  ;;  %5814 = vmatpush.bf16.msra.mxu2 %v5351_v19  ;;  %508 = vst [vmem:[#allocation2 + $0x54] sm:$0xf] %v5872_v1  ;;  %v394_v18 = vadd.f32 %v5955_v8, %v358_v12  ;;  %vm6383_vm9 = vmand %vm887_vm3, %vm987_vm6 }
  0x26   : > { %5815 = vmatpush.bf16.msra.mxu3 %v5351_v19  ;;  %1480 = vmatpush.bf16.msra.mxu0 %v5351_v19  ;;  %509 = vst [vmem:[#allocation2 + $0x58] sm:$0xf] %v5872_v1  ;;  %v5549_v19 = vunpack.c.h.bf16 %v5754_v16  ;;  %v401_v43 = vadd.f32 %v5955_v8, %v365_v29 }
  0x27   : > { %510 = vst [vmem:[#allocation2 + $0x5c] sm:$0xf] %v5872_v1 }
  0x28   : > { %511 = vst [vmem:[#allocation2 + $0x60] sm:$0xf] %v5872_v1  ;;  %v366_v30 = vmul.f32 %v5944_v3, %v5549_v19  ;;  %v6199_v53 = vmax.f32 %v401_v43, 0.0  ;;  %v6236_v19 = vmax.f32 %v393_v13, 0.0  ;;  %v5585_v43 = vunpack.c.h.bf16 %v5763_v26 }
  0x29   : > { %5816 = vmatpush.bf16.msra.mxu1 %v5350_v20  ;;  %5817 = vmatpush.bf16.msra.mxu2 %v5350_v20  ;;  %512 = vst [vmem:[#allocation2 + $0x64] sm:$0xf] %v5872_v1 }
  0x2a   : > { %5818 = vmatpush.bf16.msra.mxu3 %v5350_v20  ;;  %1481 = vmatpush.bf16.msra.mxu0 %v5350_v20  ;;  %513 = vst [vmem:[#allocation2 + $0x68] sm:$0xf] %v5872_v1  ;;  %v5564_v20 = vunpack.c.l.bf16 %v5758_v17  ;;  %v402_v48 = vadd.f32 %v5955_v8, %v366_v30 }
  0x2b   : > { %514 = vst [vmem:[#allocation2 + $0x6c] sm:$0xf] %v5872_v1 }
  0x2c   : > { %1502 = vmatmul.bf16.vlgmr.msra.gmra.mxu1 %v5338_v21  ;;  %515 = vst [vmem:[#allocation2 + $0x70] sm:$0xf] %v5872_v1  ;;  %v5565_v21 = vunpack.c.h.bf16 %v5758_v17  ;;  %v373_v35 = vmul.f32 %v5944_v3, %v5564_v20  ;;  %v6204_v57 = vmax.f32 %v402_v48, 0.0 }
  0x2d   : > { %516 = vst [vmem:[#allocation2 + $0x74] sm:$0xf] %v5872_v1  ;;  %1990 = vmatpush.bf16.msrb.mxu2 %v5381_v32  ;;  %1707 = vmatpush.bf16.msrb.mxu1 %v5333_v36  ;;  %v5379_v32 = vld [vmem:[%s7084_s3 + $0xa8] sm:$0xff] }
  0x2e   : > { %517 = vst [vmem:[#allocation2 + $0x78] sm:$0xf] %v5872_v1  ;;  %2305 = vmatpush.bf16.msrb.mxu3 %v5405_v34  ;;  %2620 = vmatpush.bf16.msrb.mxu0 %v5429_v39  ;;  %v5428_v34 = vld [vmem:[%s7084_s3 + $0x130] sm:$0xff]  ;;  %v374_v36 = vmul.f32 %v5944_v3, %v5565_v21  ;;  %v6168_v39 = vmax.f32 %v408_v11, 0.0  ;;  %v409_v54 = vadd.f32 %v5955_v8, %v373_v35  ;;  %v6240_v21 = vmax.f32 %v394_v18, 0.0 }
  0x2f   : > { %518 = vst [vmem:[#allocation2 + $0x7c] sm:$0xf] %v5872_v1  ;;  %v5618_v9 = vpack.c.bf16 %v6204_v57, %v6199_v53  ;;  %v5751_v35 = vld [vmem:[%s5939_s30 + $0x10] sm:$0xff]  }
  0x30   : > { %519 = vst [vmem:[#allocation2 + $0x80] sm:$0xf] %v5872_v1  ;;  %v410_v55 = vadd.f32 %v5955_v8, %v374_v36  ;;  %v5633_v62 = vpack.c.bf16 %v6168_v39, %v6150_v28  ;;  %v6211_v63 = vmax.f32 %v409_v54, 0.0  ;;  %v5537_v2 = vunpack.c.h.bf16 %v5751_v35 }
  0x31   : > { %520 = vst [vmem:[#allocation2 + $0x84] sm:$0xf] %v5872_v1  ;;  %1991 = vmatpush.bf16.msrb.mxu2 %v5380_v38  ;;  %1708 = vmatpush.bf16.msrb.mxu1 %v5332_v45  ;;  %v5581_v38 = vunpack.c.h.bf16 %v5762_v22  ;;  %v6181_v45 = vmax.f32 %v391_v25, 0.0  ;;  %v5755_v22 = vld [vmem:[%s5939_s30 + $0x30] sm:$0xff]  }
  0x32   : > { %521 = vst [vmem:[#allocation2 + $0x88] sm:$0xf] %v5872_v1  ;;  %2306 = vmatpush.bf16.msrb.mxu3 %v5404_v44  ;;  %v5613_v44 = vpack.c.bf16 %v6143_v24, %v6141_v23  ;;  %2621 = vmatpush.bf16.msrb.mxu0 %v5428_v34  ;;  %v6213_v0 = vmax.f32 %v410_v55, 0.0  ;;  %v5759_v25 = vld [vmem:[%s5939_s30 + $0x50] sm:$0xff]   ;;  %v5552_v29 = vunpack.c.l.bf16 %v5755_v22  ;;  %v5553_v30 = vunpack.c.h.bf16 %v5755_v22 }
  0x33   : > { %522 = vst [vmem:[#allocation2 + $0x8c] sm:$0xf] %v5872_v1  ;;  %v382_v59 = vmul.f32 %v5944_v3, %v5581_v38  ;;  %v5593_v5 = vpack.c.bf16 %v6183_v46, %v6181_v45  ;;  %v5568_v31 = vunpack.c.l.bf16 %v5759_v25  ;;  %v5569_v34 = vunpack.c.h.bf16 %v5759_v25 }
  0x34   : > { %523 = vst [vmem:[#allocation2 + $0x90] sm:$0xf] %v5872_v1  ;;  %v5638_v16 = vpack.c.bf16 %v6213_v0, %v6211_v63  ;;  %v367_v37 = vmul.f32 %v5944_v3, %v5552_v29  ;;  %v368_v38 = vmul.f32 %v5944_v3, %v5553_v30 }
  0x35   : > { %524 = vst [vmem:[#allocation2 + $0x94] sm:$0xf] %v5872_v1  ;;  %1992 = vmatpush.bf16.msrb.mxu2 %v5379_v32  ;;  %1709 = vmatpush.bf16.msrb.mxu1 %v5331_v42  ;;  %v5584_v42 = vunpack.c.l.bf16 %v5763_v26  ;;  %v375_v48 = vmul.f32 %v5944_v3, %v5568_v31  ;;  %v376_v61 = vmul.f32 %v5944_v3, %v5569_v34 }
  0x36   : > { %525 = vst [vmem:[#allocation2 + $0x98] sm:$0xf] %v5872_v1  ;;  %2622 = vmatpush.bf16.msrb.mxu0 %v5427_v50  ;;  %v5426_v50 = vld [vmem:[%s7084_s3 + $0x120] sm:$0xff]  ;;  %v403_v54 = vadd.f32 %v5955_v8, %v367_v37  ;;  %v6314_v37 = vpack.c.bf16 %v6183_v46, %v6183_v46  ;;  %v5375_v46 = vld [vmem:[%s7084_s3 + $0x88] sm:$0xff] }
  0x37   : > { %526 = vst [vmem:[#allocation2 + $0x9c] sm:$0xf] %v5872_v1 }
  0x38   : > { %527 = vst [vmem:[#allocation2 + $0xa0] sm:$0xf] %v5872_v1 }
  0x39   : > { %528 = vst [vmem:[#allocation2 + $0xa4] sm:$0xf] %v5872_v1  ;;  %1993 = vmatpush.bf16.msrb.mxu2 %v5378_v47  ;;  %1710 = vmatpush.bf16.msrb.mxu1 %v5330_v51  ;;  %v5401_v47 = vld [vmem:[%s7084_s3 + $0xd8] sm:$0xff] }
  0x3a   : > { %529 = vst [vmem:[#allocation2 + $0xa8] sm:$0xf] %v5872_v1  ;;  %v5329_v51 = vld [vmem:[%s7084_s3 + $0x18] sm:$0xff]  ;;  %2623 = vmatpush.bf16.msrb.mxu0 %v5426_v50  ;;  %v5424_v50 = vld [vmem:[%s7084_s3 + $0x110] sm:$0xff] }
  0x3b   : > { %530 = vst [vmem:[#allocation2 + $0xac] sm:$0xf] %v5872_v1 }
  0x3c   : > { %533 = vst [vmem:[#allocation2 + $0xb8] sm:$0xf] %v5872_v1  ;;  %v5334_v33 = vld [vmem:[#allocation2 + $0x90] sm:$0xff] }
  0x3d   : > { %534 = vst [vmem:[#allocation2 + $0xbc] sm:$0xf] %v5872_v1  ;;  %1482 = vmatmul.bf16.vlgmr.msra.gmra.mxu0 %v5334_v33  ;;  %v5403_v33 = vld [vmem:[%s7084_s3 + $0xe8] sm:$0xff]  ;;  %1711 = vmatpush.bf16.msrb.mxu1 %v5329_v51 }
  0x3e   : > { %535 = vst [vmem:[#allocation2 + $0xc0] sm:$0xf] %v5872_v1  ;;  %2307 = vmatpush.bf16.msrb.mxu3 %v5403_v33  ;;  %v5598_v33 = vpack.c.bf16 %v6240_v21, %v6236_v19  ;;  %v5327_v51 = vld [vmem:[%s7084_s3 + $0x8] sm:$0xff] }
  0x3f   : > { %536 = vst [vmem:[#allocation2 + $0xc4] sm:$0xf] %v5872_v1 }
  0x40   : > { %537 = vst [vmem:[#allocation2 + $0xc8] sm:$0xf] %v5872_v1 }
  0x41   : > { %538 = vst [vmem:[#allocation2 + $0xcc] sm:$0xf] %v5872_v1 }
  0x42   : > { %539 = vst [vmem:[#allocation2 + $0xd0] sm:$0xf] %v5872_v1  ;;  %2308 = vmatpush.bf16.msrb.mxu3 %v5402_v49  ;;  %v5536_v49 = vunpack.c.l.bf16 %v5751_v35 }
  0x43   : > { %540 = vst [vmem:[#allocation2 + $0xd4] sm:$0xf] %v5872_v1 }
  0x44   : > { %541 = vst [vmem:[#allocation2 + $0xd8] sm:$0xf] %v5872_v1  ;;  %v359_v12 = vmul.f32 %v5944_v3, %v5536_v49  ;;  %v5399_v49 = vld [vmem:[%s7084_s3 + $0xc8] sm:$0xff] }
  0x45   : > { %542 = vst [vmem:[#allocation2 + $0xdc] sm:$0xf] %v5872_v1 }
  0x46   : > { %543 = vst [vmem:[#allocation2 + $0xe0] sm:$0xf] %v5872_v1  ;;  %2309 = vmatpush.bf16.msrb.mxu3 %v5401_v47  ;;  %v395_v26 = vadd.f32 %v5955_v8, %v359_v12  ;;  %v607_v47 = vshrl.u32 %v6314_v37, 16 }
  0x47   : > { %544 = vst [vmem:[#allocation2 + $0xe4] sm:$0xf] %v5872_v1 }
  0x48   : > { %545 = vst [vmem:[#allocation2 + $0xe8] sm:$0xf] %v5872_v1 }
  0x49   : > { %546 = vst [vmem:[#allocation2 + $0xec] sm:$0xf] %v5872_v1 }
  0x4a   : > { %547 = vst [vmem:[#allocation2 + $0xf0] sm:$0xf] %v5872_v1 }
  0x4b   : > { %548 = vst [vmem:[#allocation2 + $0xf4] sm:$0xf] %v5872_v1 }
  0x4c   : > { %549 = vst [vmem:[#allocation2 + $0xf8] sm:$0xf] %v5872_v1 }
  0x4d   : > { %550 = vst [vmem:[#allocation2 + $0xfc] sm:$0xf] %v5872_v1 }
  0x4e   : > { %551 = vst [vmem:[#allocation2 + $0x100] sm:$0xf] %v5872_v1 }
  0x4f   : > { %552 = vst [vmem:[#allocation2 + $0x104] sm:$0xf] %v5872_v1 }
  0x50   : > { %553 = vst [vmem:[#allocation2 + $0x108] sm:$0xf] %v5872_v1 }
  0x51   : > { %554 = vst [vmem:[#allocation2 + $0x10c] sm:$0xf] %v5872_v1 }
  0x52   : > { %555 = vst [vmem:[#allocation2 + $0x110] sm:$0xf] %v5872_v1 }
  0x53   : > { %556 = vst [vmem:[#allocation2 + $0x114] sm:$0xf] %v5872_v1 }
  0x54   : > { %557 = vst [vmem:[#allocation2 + $0x118] sm:$0xf] %v5872_v1 }
  0x55   : > { %558 = vst [vmem:[#allocation2 + $0x11c] sm:$0xf] %v5872_v1 }
  0x56   : > { %559 = vst [vmem:[#allocation2 + $0x120] sm:$0xf] %v5872_v1 }
  0x57   : > { %560 = vst [vmem:[#allocation2 + $0x124] sm:$0xf] %v5872_v1 }
  0x58   : > { %561 = vst [vmem:[#allocation2 + $0x128] sm:$0xf] %v5872_v1 }
  0x59   : > { %562 = vst [vmem:[#allocation2 + $0x12c] sm:$0xf] %v5872_v1 }
  0x5a   : > { %563 = vst [vmem:[#allocation2 + $0x130] sm:$0xf] %v5872_v1 }
  0x5b   : > { %564 = vst [vmem:[#allocation2 + $0x134] sm:$0xf] %v5872_v1 }
  0x5c   : > { %565 = vst [vmem:[#allocation2 + $0x138] sm:$0xf] %v5872_v1 }
  0x5d   : > { %566 = vst [vmem:[#allocation2 + $0x13c] sm:$0xf] %v5872_v1 }
  0x5e   : > { %567 = vst [vmem:[#allocation2 + $0x140] sm:$0xf] %v5872_v1 }
  0x5f   : > { %568 = vst [vmem:[#allocation2 + $0x144] sm:$0xf] %v5872_v1 }
  0x60   : > { %569 = vst [vmem:[#allocation2 + $0x148] sm:$0xf] %v5872_v1 }
  0x61   : > { %570 = vst [vmem:[#allocation2 + $0x14c] sm:$0xf] %v5872_v1 }
  0x62   : > { %571 = vst [vmem:[#allocation2 + $0x150] sm:$0xf] %v5872_v1 }
  0x63   : > { %572 = vst [vmem:[#allocation2 + $0x154] sm:$0xf] %v5872_v1 }
  0x64   : > { %573 = vst [vmem:[#allocation2 + $0x158] sm:$0xf] %v5872_v1 }
  0x65   : > { %574 = vst [vmem:[#allocation2 + $0x15c] sm:$0xf] %v5872_v1 }
  0x66   : > { %575 = vst [vmem:[#allocation2 + $0x160] sm:$0xf] %v5872_v1 }
  0x67   : > { %576 = vst [vmem:[#allocation2 + $0x164] sm:$0xf] %v5872_v1 }
  0x68   : > { %577 = vst [vmem:[#allocation2 + $0x168] sm:$0xf] %v5872_v1 }
  0x69   : > { %578 = vst [vmem:[#allocation2 + $0x16c] sm:$0xf] %v5872_v1 }
  0x6a   : > { %579 = vst [vmem:[#allocation2 + $0x170] sm:$0xf] %v5872_v1 }
  0x6b   : > { %580 = vst [vmem:[#allocation2 + $0x174] sm:$0xf] %v5872_v1 }
  0x6c   : > { %581 = vst [vmem:[#allocation2 + $0x178] sm:$0xf] %v5872_v1 }
  0x6d   : > { %582 = vst [vmem:[#allocation2 + $0x17c] sm:$0xf] %v5872_v1 }
  0x6e   : > { %583 = vst [vmem:[#allocation2 + $0x180] sm:$0xf] %v5872_v1 }
  0x6f   : > { %584 = vst [vmem:[#allocation2 + $0x184] sm:$0xf] %v5872_v1 }
  0x70   : > { %585 = vst [vmem:[#allocation2 + $0x188] sm:$0xf] %v5872_v1 }
  0x71   : > { %586 = vst [vmem:[#allocation2 + $0x18c] sm:$0xf] %v5872_v1 }
  0x72   : > { %587 = vst [vmem:[#allocation2 + $0x190] sm:$0xf] %v5872_v1 }
  0x73   : > { %588 = vst [vmem:[#allocation2 + $0x194] sm:$0xf] %v5872_v1 }
  0x74   : > { %589 = vst [vmem:[#allocation2 + $0x198] sm:$0xf] %v5872_v1 }
  0x75   : > { %590 = vst [vmem:[#allocation2 + $0x19c] sm:$0xf] %v5872_v1 }
  0x76   : > { %591 = vst [vmem:[#allocation2 + $0x1a0] sm:$0xf] %v5872_v1 }
  0x77   : > { %592 = vst [vmem:[#allocation2 + $0x1a4] sm:$0xf] %v5872_v1 }
  0x78   : > { %593 = vst [vmem:[#allocation2 + $0x1a8] sm:$0xf] %v5872_v1 }
  0x79   : > { %594 = vst [vmem:[#allocation2 + $0x1ac] sm:$0xf] %v5872_v1  ;;  %v417_v1 = vadd.f32 %v5955_v8, %v381_v58  ;;  %v5400_v58 = vld [vmem:[%s7084_s3 + $0xd0] sm:$0xff] }
  0x7a   : > { %5771 = vst [vmem:[#allocation2 + $0xd0] sm:$0xff] %v5628_v10   ;;  %v418_v10 = vadd.f32 %v5955_v8, %v382_v59  ;;  %v404_v59 = vadd.f32 %v5955_v8, %v368_v38  ;;  %2310 = vmatpush.bf16.msrb.mxu3 %v5400_v58  ;;  %v609_v58 = vrot.slane %v607_v47, 7 }
  0x7b   : > { %5775 = vst [vmem:[#allocation2 + $0xf0] sm:$0xff] %v5648_v27   ;;  %v6227_v11 = vmax.f32 %v417_v1, 0.0  ;;  %v5328_v1 = vld [vmem:[%s7084_s3 + $0x10] sm:$0xff] }
  0x7c   : > { %5768 = vst [vmem:[#allocation2 + $0xb8] sm:$0xff] %v5613_v44   ;;  %v6233_v17 = vmax.f32 %v418_v10, 0.0  ;;  %v5377_v44 = vld [vmem:[%s7084_s3 + $0x98] sm:$0xff]  ;;  %v384_v10 = vmul.f32 %v5944_v3, %v5585_v43  ;;  %v6284_v13 = vmax.f32 %v404_v59, 0.0  ;;  %1712 = vmatpush.bf16.msrb.mxu1 %v5328_v1  ;;  %v610_v59 = vshll.u32 %v6314_v37, 16 }
  0x7d   : > { %5772 = vst [vmem:[#allocation2 + $0xd8] sm:$0xff] %v5633_v62   ;;  %1994 = vmatpush.bf16.msrb.mxu2 %v5377_v44  ;;  %v411_v62 = vadd.f32 %v5955_v8, %v375_v48 }
  0x7e   : > { %5776 = vst [vmem:[#allocation2 + $0xf8] sm:$0xff] %v5653_v4   ;;  %v5658_v20 = vpack.c.bf16 %v6233_v17, %v6227_v11  ;;  %v5425_v4 = vld [vmem:[%s7084_s3 + $0x118] sm:$0xff]  ;;  %v420_v25 = vadd.f32 %v5955_v8, %v384_v10  ;;  %2311 = vmatpush.bf16.msrb.mxu3 %v5399_v49  ;;  %v890_v10 = vld [vmem:[#allocation2 + $0x8] sm:$0xf] }
  0x7f   : > { %5594 = vst [vmem:[#allocation2 + $0x98] sm:$0xff] %v5593_v5   ;;  %v6279_v5 = vmax.f32 %v403_v54, 0.0  ;;  %v6287_v18 = vmax.f32 %v411_v62, 0.0  ;;  %2624 = vmatpush.bf16.msrb.mxu0 %v5425_v4  ;;  %v5374_v54 = vld [vmem:[%s7084_s3 + $0x80] sm:$0xff]  ;;  %v612_v4 = vor.u32 %v610_v59, %v609_v58 }
  0x80   : > { %5769 = vst [vmem:[#allocation2 + $0xc0] sm:$0xff] %v5618_v9   ;;  %v383_v9 = vmul.f32 %v5944_v3, %v5584_v42  ;;  %v6299_v31 = vmax.f32 %v420_v25, 0.0  ;;  %1713 = vmatpush.bf16.msrb.mxu1 %v5327_v51  ;;  %v5326_v62 = vld [vmem:[%s7084_s3] sm:$0xff] }
  0x81   : > { %v5342_v27 = vld [vmem:[#allocation2 + $0xd0] sm:$0xff]  ;;  %5773 = vst [vmem:[#allocation2 + $0xe0] sm:$0xff] %v5638_v16   ;;  %v412_v16 = vadd.f32 %v5955_v8, %v376_v61  ;;  %1995 = vmatpush.bf16.msrb.mxu2 %v5376_v56  ;;  %v5423_v61 = vld [vmem:[%s7084_s3 + $0x108] sm:$0xff] }
  0x82   : > { %v5346_v32 = vld [vmem:[#allocation2 + $0xf0] sm:$0xff]  ;;  %5777 = vst [vmem:[#allocation2 + $0x100] sm:$0xff] %v5658_v20   ;;  %1522 = vmatmul.bf16.vlgmr.msra.gmra.mxu2 %v5342_v27  ;;  %v360_v20 = vmul.f32 %v5944_v3, %v5537_v2  ;;  %v419_v22 = vadd.f32 %v5955_v8, %v383_v9  ;;  %v5623_v27 = vpack.c.bf16 %v6284_v13, %v6279_v5 }
  0x83   : > { %v5339_v36 = vld [vmem:[#allocation2 + $0xb8] sm:$0xff]  ;;  %1542 = vmatmul.bf16.vlgmr.msra.gmra.mxu3 %v5346_v32  ;;  %5765 = vst [vmem:[#allocation2 + $0xa0] sm:$0xff] %v5598_v33   ;;  %v6295_v29 = vmax.f32 %v412_v16, 0.0  ;;  %v6302_v32 = vmax.f32 %v395_v26, 0.0  ;;  %2625 = vmatpush.bf16.msrb.mxu0 %v5424_v50  ;;  %v5422_v16 = vld [vmem:[%s7084_s3 + $0x100] sm:$0xff] }
  0x84   : > { %1507 = vmatmul.bf16.gmra.mxu1 %v5339_v36  ;;  %v6297_v30 = vmax.f32 %v419_v22, 0.0  ;;  %v396_v3 = vadd.f32 %v5955_v8, %v360_v20  ;;  %5770 = vst [vmem:[#allocation2 + $0xc8] sm:$0xff] %v5623_v27   ;;  %v455_v36 = vpack.c.bf16 %v6181_v45, %v6181_v45  ;;  %v5343_v8 = vld [vmem:[#allocation2 + $0xd8] sm:$0xff] }
  0x85   : > { %v5643_v33 = vpack.c.bf16 %v6295_v29, %v6287_v18  ;;  %v5347_v42 = vld [vmem:[#allocation2 + $0xf8] sm:$0xff]  ;;  %1996 = vmatpush.bf16.msrb.mxu2 %v5375_v46  ;;  %1714 = vmatpush.bf16.msrb.mxu1 %v5326_v62 }
  0x86   : > { %v5335_v55 = vld [vmem:[#allocation2 + $0x98] sm:$0xff]  ;;  %v5663_v34 = vpack.c.bf16 %v6299_v31, %v6297_v30  ;;  %v6308_v35 = vmax.f32 %v396_v3, 0.0  ;;  %v599_v44 = vshrl.u32 %v455_v36, 16  ;;  %v602_v45 = vshll.u32 %v455_v36, 16 }
  0x87   : > { %1487 = vmatmul.bf16.gmra.mxu0 %v5335_v55  ;;  %5774 = vst [vmem:[#allocation2 + $0xe8] sm:$0xff] %v5643_v33   ;;  %v5340_v43 = vld [vmem:[#allocation2 + $0xc0] sm:$0xff]  ;;  %v457_v3 = vpack.c.bf16 %v6236_v19, %v6236_v19  ;;  %v458_v33 = vpack.c.bf16 %v6240_v21, %v6240_v21  ;;  %v5477_v36 = vld [vmem:[%s7084_s3 + $0x1b8] sm:$0xff] }
  0x88   : > { %5778 = vst [vmem:[#allocation2 + $0x108] sm:$0xff] %v5663_v34   ;;  %v5603_v38 = vpack.c.bf16 %v6308_v35, %v6302_v32  ;;  %v5398_v55 = vld [vmem:[%s7084_s3 + $0xc0] sm:$0xff]  ;;  %v601_v56 = vrot.slane %v599_v44, 7  ;;  %2626 = vmatpush.bf16.msrb.mxu0 %v5423_v61  ;;  %v990_v37 = vrot.slane %v599_v44, 4  ;;  %v5453_v19 = vld [vmem:[%s7084_s3 + $0x178] sm:$0xff] }
  0x89   : > { %1997 = vmatpush.bf16.msrb.mxu2 %v5374_v54  ;;  %2312 = vmatpush.bf16.msrb.mxu3 %v5398_v55  ;;  %v5344_v25 = vld [vmem:[#allocation2 + $0xe0] sm:$0xff]  ;;  %v5525_v21 = vld [vmem:[%s7084_s3 + $0x238] sm:$0xff]  ;;  %v618_v49 = vshll.u32 %v457_v3, 16  ;;  %v623_v50 = vshrl.u32 %v458_v33, 16  ;;  %v626_v51 = vshll.u32 %v458_v33, 16 }
  0x8a   : > { %5766 = vst [vmem:[#allocation2 + $0xa8] sm:$0xff] %v5603_v38   ;;  %v5336_v48 = vld [vmem:[#allocation2 + $0xa0] sm:$0xff]  ;;  %v604_v2 = vor.u32 %v602_v45, %v601_v56  ;;  %v605_v9 = vrot.slane %v601_v56, 4  ;;  %v994_v38 = vrot.slane %v610_v59, 5  ;;  %2935 = vmatpush.bf16.msra.mxu1 %v5453_v19  ;;  %v1169_v55 = vld [vmem:[#allocation2 + $0x12c] sm:$0xf] }
  0x8b   : > { %v5348_v26 = vld [vmem:[#allocation2 + $0x100] sm:$0xff]  ;;  %v5341_v27 = vld [vmem:[#allocation2 + $0xc8] sm:$0xff]  ;;  %v625_v59 = vrot.slane %v623_v50, 7  ;;  %v894_v61 = vld [vmem:[#allocation2 + $0x10] sm:$0xf] }
  0x8c   : > { %v613_v20 = vsel %vm6344_vm2, %v605_v9, %v612_v4  ;;  %v891_v22 = vsel %vm6349_vm5, %v604_v2, %v890_v10  ;;  %2627 = vmatpush.bf16.msrb.mxu0 %v5422_v16  ;;  %v5406_v33 = vld [vmem:[#allocation2 + $0x98] sm:$0xff] }
  0x8d   : > { %892 = vst [vmem:[#allocation2 + $0x8] sm:$0xf] %v891_v22  ;;  %3250 = vmatpush.bf16.msra.mxu2 %v5477_v36  ;;  %v628_v10 = vor.u32 %v626_v51, %v625_v59  ;;  %v1000_v36 = vrot.slane %v618_v49, 5 }
  0x8e   : > { %893 = vst [vmem:[#allocation2 + $0xc] sm:$0xf] %v613_v20  ;;  %v5345_v22 = vld [vmem:[#allocation2 + $0xe8] sm:$0xff] }
  0x90   : > { %3880 = vmatpush.bf16.msra.mxu0 %v5525_v21 }
  0x91   : > { %v5337_v34 = vld [vmem:[#allocation2 + $0xa8] sm:$0xff] }
  0x92   : > { %1527 = vmatmul.bf16.gmra.mxu2 %v5343_v8  ;;  %v991_v8 = vrot.slane %v602_v45, 5 }
  0x93   : > { %1547 = vmatmul.bf16.gmra.mxu3 %v5347_v42  ;;  %v5501_v42 = vld [vmem:[%s7084_s3 + $0x1f8] sm:$0xff] }
  0x94   : > { %1512 = vmatmul.bf16.gmra.mxu1 %v5340_v43  ;;  %v996_v43 = vrot.slane %v607_v47, 4  ;;  %v992_v44 = vor.u32 %v991_v8, %v990_v37  ;;  %3565 = vmatpush.bf16.msra.mxu3 %v5501_v42  ;;  %v1003_v37 = vrot.slane %v626_v51, 5  ;;  %v1005_v8 = vrot.slane %v623_v50, 4 }
  0x96   : > { %v997_v46 = vor.u32 %v996_v43, %v994_v38  ;;  %v993_v54 = vrot.slane %v992_v44, 4  ;;  %v1006_v21 = vor.u32 %v1005_v8, %v1003_v37 }
  0x97   : > { %1492 = vmatmul.bf16.gmra.mxu0 %v5336_v48  ;;  %v615_v48 = vshrl.u32 %v457_v3, 16  ;;  %v5310_v3 = vld [vmem:[#allocation2] sm:$0xff] }
  0x98   : > { %v998_v58 = vrot.slane %v997_v46, 4  ;;  %v995_v62 = vsel %vm6377_vm8, %v993_v54, %v994_v38  ;;  %v1173_v46 = vld [vmem:[#allocation2 + $0x134] sm:$0xf] }
  0x99   : > { %v617_v56 = vrot.slane %v615_v48, 7  ;;  %1167 = vst [vmem:[#allocation2 + $0x128] sm:$0xf] %v995_v62  ;;  %v5358_v62 = vld [vmem:[#allocation2 + $0x120] sm:$0xff] }
  0x9a   : > { %v1170_v9 = vsel %vm6383_vm9, %v998_v58, %v1169_v55  ;;  %v1007_v55 = vrot.slane %v1006_v21, 4 }
  0x9b   : > { %v620_v2 = vor.u32 %v618_v49, %v617_v56  ;;  %v621_v4 = vrot.slane %v617_v56, 4  ;;  %1171 = vst [vmem:[#allocation2 + $0x12c] sm:$0xf] %v1170_v9  ;;  %v462_v9 = vpack.c.bf16 %v5972_v15, %v5972_v15  ;;  %v5524_v15 = vld [vmem:[%s7084_s3 + $0x230] sm:$0xff] }
  0x9c   : > { %v1174_v50 = vsel %vm6383_vm9, %v1007_v55, %v1173_v46  ;;  %3881 = vmatpush.bf16.msra.mxu0 %v5524_v15 }
  0x9d   : > { %v895_v16 = vsel %vm6349_vm5, %v620_v2, %v894_v61  ;;  %v629_v20 = vsel %vm6344_vm2, %v621_v4, %v628_v10  ;;  %1175 = vst [vmem:[#allocation2 + $0x134] sm:$0xf] %v1174_v50  ;;  %v5382_v2 = vld [vmem:[#allocation2 + $0x8] sm:$0xff]  ;;  %v461_v4 = vpack.c.bf16 %v5970_v14, %v5970_v14  ;;  %v5452_v14 = vld [vmem:[%s7084_s3 + $0x170] sm:$0xff]  ;;  %v658_v8 = vshll.u32 %v462_v9, 16 }
  0x9e   : > { %896 = vst [vmem:[#allocation2 + $0x10] sm:$0xf] %v895_v16  ;;  %v5311_v10 = vld [vmem:[#allocation2 + $0x8] sm:$0xff]  ;;  %v5407_v16 = vld [vmem:[#allocation2 + $0xa0] sm:$0xff]  ;;  %2936 = vmatpush.bf16.msra.mxu1 %v5452_v14  ;;  %v463_v50 = vpack.c.bf16 %v6141_v23, %v6141_v23 }
  0x9f   : > { %897 = vst [vmem:[#allocation2 + $0x14] sm:$0xf] %v629_v20  ;;  %v5476_v20 = vld [vmem:[%s7084_s3 + $0x1b0] sm:$0xff]  ;;  %v1181_v14 = vld [vmem:[#allocation2 + $0x144] sm:$0xf] }
  0xa0   : > { %3251 = vmatpush.bf16.msra.mxu2 %v5476_v20 }
  0xa2   : > { %1532 = vmatmul.bf16.gmra.mxu2 %v5344_v25  ;;  %v5349_v25 = vld [vmem:[#allocation2 + $0x108] sm:$0xff] }
  0xa3   : > { %1552 = vmatmul.bf16.gmra.mxu3 %v5348_v26  ;;  %v459_v26 = vpack.c.bf16 %v6302_v32, %v6302_v32 }
  0xa4   : > { %1517 = vmatmul.bf16.gmra.mxu1 %v5341_v27  ;;  %v460_v27 = vpack.c.bf16 %v6308_v35, %v6308_v35 }
  0xa5   : > { %v631_v38 = vshrl.u32 %v459_v26, 16  ;;  %v634_v43 = vshll.u32 %v459_v26, 16 }
  0xa6   : > { %v639_v42 = vshrl.u32 %v460_v27, 16  ;;  %v642_v44 = vshll.u32 %v460_v27, 16 }
  0xa7   : > { %1497 = vmatmul.bf16.gmra.mxu0 %v5337_v34  ;;  %v999_v34 = vrot.slane %v615_v48, 4  ;;  %v633_v32 = vrot.slane %v631_v38, 7  ;;  %v898_v48 = vld [vmem:[#allocation2 + $0x18] sm:$0xf]  ;;  %v1009_v26 = vrot.slane %v634_v43, 5 }
  0xa8   : > { %v641_v54 = vrot.slane %v639_v42, 7  ;;  %v1012_v27 = vrot.slane %v642_v44, 5 }
  0xa9   : > { %v1001_v19 = vor.u32 %v1000_v36, %v999_v34  ;;  %v636_v56 = vor.u32 %v634_v43, %v633_v32  ;;  %v637_v58 = vrot.slane %v633_v32, 4  ;;  %v655_v34 = vshrl.u32 %v462_v9, 16 }
  0xaa   : > { %v644_v59 = vor.u32 %v642_v44, %v641_v54  ;;  %v1177_v44 = vld [vmem:[#allocation2 + $0x13c] sm:$0xf]  ;;  %v1021_v9 = vrot.slane %v658_v8, 5 }
  0xab   : > { %v1002_v35 = vrot.slane %v1001_v19, 4  ;;  %v899_v61 = vsel %vm6349_vm5, %v636_v56, %v898_v48  ;;  %v657_v21 = vrot.slane %v655_v34, 7  ;;  %v5359_v48 = vld [vmem:[#allocation2 + $0x128] sm:$0xff] }
  0xac   : > { %v645_v51 = vsel %vm6344_vm2, %v637_v58, %v644_v59  ;;  %900 = vst [vmem:[#allocation2 + $0x18] sm:$0xf] %v899_v61  ;;  %v5312_v61 = vld [vmem:[#allocation2 + $0x10] sm:$0xff] }
  0xad   : > { %v1004_v49 = vsel %vm6377_vm8, %v1002_v35, %v1003_v37  ;;  %901 = vst [vmem:[#allocation2 + $0x1c] sm:$0xf] %v645_v51  ;;  %v650_v37 = vshll.u32 %v461_v4, 16  ;;  %v660_v35 = vor.u32 %v658_v8, %v657_v21  ;;  %v464_v51 = vpack.c.bf16 %v6143_v24, %v6143_v24 }
  0xae   : > { %1172 = vst [vmem:[#allocation2 + $0x130] sm:$0xf] %v1004_v49  ;;  %v5383_v49 = vld [vmem:[#allocation2 + $0x10] sm:$0xff] }
  0xaf   : > { %v671_v20 = vshrl.u32 %v464_v51, 16 }
  0xb1   : > { %v673_v15 = vrot.slane %v671_v20, 7 }
  0xb2   : > { %1537 = vmatmul.bf16.gmra.mxu2 %v5345_v22  ;;  %v5500_v22 = vld [vmem:[%s7084_s3 + $0x1f0] sm:$0xff] }
  0xb3   : > { %1557 = vmatmul.bf16.gmra.mxu3 %v5349_v25  ;;  %v1008_v25 = vrot.slane %v631_v38, 4 }
  0xb4   : > { %1715 = vmatmul.bf16.vlgmr.msrb.gmra.mxu1 %v5310_v3  ;;  %v1014_v3 = vrot.slane %v639_v42, 4  ;;  %3566 = vmatpush.bf16.msra.mxu3 %v5500_v22  ;;  %v902_v42 = vld [vmem:[#allocation2 + $0x20] sm:$0xf] }
  0xb5   : > { %v1010_v36 = vor.u32 %v1009_v26, %v1008_v25  ;;  %v666_v26 = vshll.u32 %v463_v50, 16 }
  0xb6   : > { %v1015_v38 = vor.u32 %v1014_v3, %v1012_v27 }
  0xb7   : > { %2628 = vmatmul.bf16.vlgmr.msrb.gmra.mxu0 %v5406_v33  ;;  %v647_v33 = vshrl.u32 %v461_v4, 16  ;;  %v1011_v43 = vrot.slane %v1010_v36, 4  ;;  %v1018_v4 = vrot.slane %v650_v37, 5 }
  0xb8   : > { %v1016_v46 = vrot.slane %v1015_v38, 4 }
  0xb9   : > { %v649_v19 = vrot.slane %v647_v33, 7  ;;  %v1013_v55 = vsel %vm6377_vm8, %v1011_v43, %v1012_v27  ;;  %v674_v27 = vshll.u32 %v464_v51, 16  ;;  %v5360_v43 = vld [vmem:[#allocation2 + $0x130] sm:$0xff] }
  0xba   : > { %1176 = vst [vmem:[#allocation2 + $0x138] sm:$0xf] %v1013_v55  ;;  %v1178_v56 = vsel %vm6383_vm9, %v1016_v46, %v1177_v44  ;;  %v5384_v44 = vld [vmem:[#allocation2 + $0x18] sm:$0xff]  ;;  %v465_v46 = vpack.c.bf16 %v6199_v53, %v6199_v53  ;;  %v5499_v55 = vld [vmem:[%s7084_s3 + $0x1e8] sm:$0xff]  ;;  %v1032_v53 = vrot.slane %v671_v20, 4 }
  0xbb   : > { %v652_v32 = vor.u32 %v650_v37, %v649_v19  ;;  %v653_v54 = vrot.slane %v649_v19, 4  ;;  %1179 = vst [vmem:[#allocation2 + $0x13c] sm:$0xf] %v1178_v56  ;;  %v676_v19 = vor.u32 %v674_v27, %v673_v15  ;;  %3567 = vmatpush.bf16.msra.mxu3 %v5499_v55  ;;  %v1185_v20 = vld [vmem:[#allocation2 + $0x14c] sm:$0xf] }
  0xbd   : > { %v661_v58 = vsel %vm6344_vm2, %v653_v54, %v660_v35  ;;  %v903_v59 = vsel %vm6349_vm5, %v652_v32, %v902_v42  ;;  %v466_v32 = vpack.c.bf16 %v6204_v57, %v6204_v57  ;;  %v5313_v54 = vld [vmem:[#allocation2 + $0x18] sm:$0xff]  ;;  %v5409_v35 = vld [vmem:[#allocation2 + $0xb0] sm:$0xff]  ;;  %v5475_v42 = vld [vmem:[%s7084_s3 + $0x1a8] sm:$0xff] }
  0xbe   : > { %904 = vst [vmem:[#allocation2 + $0x20] sm:$0xf] %v903_v59  ;;  %v1030_v59 = vrot.slane %v674_v27, 5  ;;  %3252 = vmatpush.bf16.msra.mxu2 %v5475_v42  ;;  %v910_v27 = vld [vmem:[#allocation2 + $0x30] sm:$0xf] }
  0xbf   : > { %905 = vst [vmem:[#allocation2 + $0x24] sm:$0xf] %v661_v58  ;;  %v1027_v58 = vrot.slane %v666_v26, 5  ;;  %v690_v51 = vshll.u32 %v466_v32, 16 }
  0xc2   : > { %1998 = vmatmul.bf16.vlgmr.msrb.gmra.mxu2 %v5358_v62  ;;  %v5408_v62 = vld [vmem:[#allocation2 + $0xa8] sm:$0xff] }
  0xc3   : > { %2313 = vmatmul.bf16.vlgmr.msrb.gmra.mxu3 %v5382_v2  ;;  %v1017_v2 = vrot.slane %v647_v33, 4  ;;  %v906_v33 = vld [vmem:[#allocation2 + $0x28] sm:$0xf] }
  0xc4   : > { %1720 = vmatmul.bf16.gmra.mxu1 %v5311_v10  ;;  %v1023_v10 = vrot.slane %v655_v34, 4 }
  0xc5   : > { %v1019_v22 = vor.u32 %v1018_v4, %v1017_v2  ;;  %v1033_v2 = vor.u32 %v1032_v53, %v1030_v59 }
  0xc6   : > { %v1024_v25 = vor.u32 %v1023_v10, %v1021_v9 }
  0xc7   : > { %2633 = vmatmul.bf16.gmra.mxu0 %v5407_v16  ;;  %v663_v16 = vshrl.u32 %v463_v50, 16  ;;  %v1020_v24 = vrot.slane %v1019_v22, 4  ;;  %v682_v50 = vshll.u32 %v465_v46, 16 }
  0xc8   : > { %v1025_v3 = vrot.slane %v1024_v25, 4 }
  0xc9   : > { %v665_v23 = vrot.slane %v663_v16, 7  ;;  %v1022_v34 = vsel %vm6377_vm8, %v1020_v24, %v1021_v9  ;;  %v1026_v56 = vrot.slane %v663_v16, 4  ;;  %v1034_v16 = vrot.slane %v1033_v2, 4 }
  0xca   : > { %v1182_v37 = vsel %vm6383_vm9, %v1025_v3, %v1181_v14  ;;  %1180 = vst [vmem:[#allocation2 + $0x140] sm:$0xf] %v1022_v34  ;;  %v6467_v3 = vpop.f32.mrf.mxu1  ;;  %v6473_v34 = vpop.f32.mrf.mxu0 }
  0xcb   : > { %v668_v36 = vor.u32 %v666_v26, %v665_v23  ;;  %v669_v38 = vrot.slane %v665_v23, 4  ;;  %1183 = vst [vmem:[#allocation2 + $0x144] sm:$0xf] %v1182_v37  ;;  %v1028_v57 = vor.u32 %v1027_v58, %v1026_v56  ;;  %v1186_v23 = vsel %vm6383_vm9, %v1034_v16, %v1185_v20  ;;  %v5314_v37 = vld [vmem:[#allocation2 + $0x20] sm:$0xff] }
  0xcc   : > { %1187 = vst [vmem:[#allocation2 + $0x14c] sm:$0xf] %v1186_v23  ;;  %v6489_v20 = vpack.c.bf16 %v6103_v52, %v6103_v52  ;;  %v5498_v23 = vld [vmem:[%s7084_s3 + $0x1e0] sm:$0xff] }
  0xcd   : > { %v677_v8 = vsel %vm6344_vm2, %v669_v38, %v676_v19  ;;  %v907_v21 = vsel %vm6349_vm5, %v668_v36, %v906_v33  ;;  %v1029_v10 = vrot.slane %v1028_v57, 4  ;;  %v5361_v36 = vld [vmem:[#allocation2 + $0x138] sm:$0xff]  ;;  %v5385_v38 = vld [vmem:[#allocation2 + $0x20] sm:$0xff]  ;;  %v467_v19 = vpack.c.bf16 %v6279_v5, %v6279_v5  ;;  %v1189_v57 = vld [vmem:[#allocation2 + $0x154] sm:$0xf]  ;;  %3568 = vmatpush.bf16.msra.mxu3 %v5498_v23 }
  0xce   : > { %908 = vst [vmem:[#allocation2 + $0x28] sm:$0xf] %v907_v21  ;;  %v468_v33 = vpack.c.bf16 %v6284_v13, %v6284_v13 }
  0xcf   : > { %909 = vst [vmem:[#allocation2 + $0x2c] sm:$0xf] %v677_v8  ;;  %v1031_v14 = vsel %vm6377_vm8, %v1029_v10, %v1030_v59  ;;  %v5410_v8 = vld [vmem:[#allocation2 + $0xb8] sm:$0xff]  ;;  %v698_v55 = vshll.u32 %v467_v19, 16 }
  0xd0   : > { %1184 = vst [vmem:[#allocation2 + $0x148] sm:$0xf] %v1031_v14  ;;  %v706_v5 = vshll.u32 %v468_v33, 16  ;;  %v5474_v14 = vld [vmem:[%s7084_s3 + $0x1a0] sm:$0xff] }
  0xd1   : > { %3253 = vmatpush.bf16.msra.mxu2 %v5474_v14 }
  0xd2   : > { %2003 = vmatmul.bf16.gmra.mxu2 %v5359_v48  ;;  %v679_v48 = vshrl.u32 %v465_v46, 16  ;;  %v6475_v13 = vpop.f32.mrf.mxu1  ;;  %v6481_v2 = vpop.f32.mrf.mxu0  ;;  %v5362_v10 = vld [vmem:[#allocation2 + $0x140] sm:$0xff] }
  0xd3   : > { %2318 = vmatmul.bf16.gmra.mxu3 %v5383_v49  ;;  %v687_v49 = vshrl.u32 %v466_v32, 16  ;;  %v695_v32 = vshrl.u32 %v467_v19, 16 }
  0xd4   : > { %1725 = vmatmul.bf16.gmra.mxu1 %v5312_v61  ;;  %v5451_v61 = vld [vmem:[%s7084_s3 + $0x168] sm:$0xff]  ;;  %v681_v4 = vrot.slane %v679_v48, 7  ;;  %v1035_v21 = vrot.slane %v679_v48, 4 }
  0xd5   : > { %v689_v9 = vrot.slane %v687_v49, 7  ;;  %2937 = vmatpush.bf16.msra.mxu1 %v5451_v61  ;;  %v1041_v46 = vrot.slane %v687_v49, 4  ;;  %v697_v56 = vrot.slane %v695_v32, 7  ;;  %v1044_v52 = vrot.slane %v695_v32, 4 }
  0xd6   : > { %v684_v22 = vor.u32 %v682_v50, %v681_v4  ;;  %v685_v25 = vrot.slane %v681_v4, 4  ;;  %v5386_v16 = vld [vmem:[#allocation2 + $0x28] sm:$0xff] }
  0xd7   : > { %2638 = vmatmul.bf16.gmra.mxu0 %v5408_v62  ;;  %v5523_v62 = vld [vmem:[%s7084_s3 + $0x228] sm:$0xff]  ;;  %v692_v26 = vor.u32 %v690_v51, %v689_v9  ;;  %v700_v61 = vor.u32 %v698_v55, %v697_v56  ;;  %v701_v48 = vrot.slane %v697_v56, 4 }
  0xd8   : > { %3882 = vmatpush.bf16.msra.mxu0 %v5523_v62  ;;  %v911_v24 = vsel %vm6349_vm5, %v684_v22, %v910_v27  ;;  %v6493_v22 = vpack.c.bf16 %v6113_v60, %v6113_v60  ;;  %v5411_v27 = vld [vmem:[#allocation2 + $0xc0] sm:$0xff] }
  0xd9   : > { %v693_v15 = vsel %vm6344_vm2, %v685_v25, %v692_v26  ;;  %912 = vst [vmem:[#allocation2 + $0x30] sm:$0xf] %v911_v24  ;;  %v5315_v25 = vld [vmem:[#allocation2 + $0x28] sm:$0xff]  ;;  %v1048_v24 = vrot.slane %v706_v5, 5 }
  0xda   : > { %913 = vst [vmem:[#allocation2 + $0x34] sm:$0xf] %v693_v15  ;;  %v1045_v15 = vrot.slane %v698_v55, 5  ;;  %v719_v19 = vshrl.u32 %v6493_v22, 16 }
  0xe2   : > { %2008 = vmatmul.bf16.gmra.mxu2 %v5360_v43  ;;  %v1036_v43 = vrot.slane %v682_v50, 5 }
  0xe3   : > { %2323 = vmatmul.bf16.gmra.mxu3 %v5384_v44  ;;  %v1039_v44 = vrot.slane %v690_v51, 5  ;;  %v914_v51 = vld [vmem:[#allocation2 + $0x38] sm:$0xf] }
  0xe4   : > { %1730 = vmatmul.bf16.gmra.mxu1 %v5313_v54  ;;  %v703_v54 = vshrl.u32 %v468_v33, 16  ;;  %v915_v9 = vsel %vm6349_vm5, %v700_v61, %v914_v51 }
  0xe5   : > { %v1042_v42 = vor.u32 %v1041_v46, %v1039_v44  ;;  %916 = vst [vmem:[#allocation2 + $0x38] sm:$0xf] %v915_v9  ;;  %v5522_v46 = vld [vmem:[%s7084_s3 + $0x220] sm:$0xff] }
  0xe6   : > { %v705_v58 = vrot.slane %v703_v54, 7  ;;  %v1050_v60 = vrot.slane %v703_v54, 4  ;;  %3883 = vmatpush.bf16.msra.mxu0 %v5522_v46 }
  0xe7   : > { %2643 = vmatmul.bf16.gmra.mxu0 %v5409_v35  ;;  %v1037_v35 = vor.u32 %v1036_v43, %v1035_v21  ;;  %v1043_v53 = vrot.slane %v1042_v42, 4  ;;  %v722_v21 = vshll.u32 %v6493_v22, 16  ;;  %v5316_v22 = vld [vmem:[#allocation2 + $0x30] sm:$0xff] }
  0xe8   : > { %v708_v50 = vor.u32 %v706_v5, %v705_v58  ;;  %v1051_v32 = vor.u32 %v1050_v60, %v1048_v24  ;;  %v1193_v5 = vld [vmem:[#allocation2 + $0x15c] sm:$0xf] }
  0xe9   : > { %v1038_v59 = vrot.slane %v1037_v35, 4  ;;  %v1190_v62 = vsel %vm6383_vm9, %v1043_v53, %v1189_v57  ;;  %v721_v35 = vrot.slane %v719_v19, 7  ;;  %v918_v53 = vld [vmem:[#allocation2 + $0x40] sm:$0xf] }
  0xea   : > { %v709_v4 = vsel %vm6344_vm2, %v701_v48, %v708_v50  ;;  %1191 = vst [vmem:[#allocation2 + $0x154] sm:$0xf] %v1190_v62  ;;  %v1052_v55 = vrot.slane %v1051_v32, 4  ;;  %v6533_v62 = vpack.c.bf16 %v6150_v28, %v6150_v28  ;;  %v1059_v28 = vrot.slane %v719_v19, 4 }
  0xeb   : > { %v1040_v49 = vsel %vm6377_vm8, %v1038_v59, %v1039_v44  ;;  %917 = vst [vmem:[#allocation2 + $0x3c] sm:$0xf] %v709_v4  ;;  %v5450_v44 = vld [vmem:[%s7084_s3 + $0x160] sm:$0xff]  ;;  %v724_v59 = vor.u32 %v722_v21, %v721_v35  ;;  %v6537_v4 = vpack.c.bf16 %v6168_v39, %v6168_v39  ;;  %v5412_v39 = vld [vmem:[#allocation2 + $0xc8] sm:$0xff] }
  0xec   : > { %1188 = vst [vmem:[#allocation2 + $0x150] sm:$0xf] %v1040_v49  ;;  %2938 = vmatpush.bf16.msra.mxu1 %v5450_v44  ;;  %v1194_v48 = vsel %vm6383_vm9, %v1052_v55, %v1193_v5  ;;  %v730_v23 = vshll.u32 %v6533_v62, 16 }
  0xed   : > { %1195 = vst [vmem:[#allocation2 + $0x15c] sm:$0xf] %v1194_v48  ;;  %v738_v19 = vshll.u32 %v6537_v4, 16 }
  0xf2   : > { %2013 = vmatmul.bf16.gmra.mxu2 %v5361_v36 }
  0xf3   : > { %2328 = vmatmul.bf16.gmra.mxu3 %v5385_v38  ;;  %v711_v38 = vshrl.u32 %v6489_v20, 16 }
  0xf4   : > { %1735 = vmatmul.bf16.gmra.mxu1 %v5314_v37  ;;  %v1046_v37 = vor.u32 %v1045_v15, %v1044_v52 }
  0xf5   : > { %v713_v54 = vrot.slane %v711_v38, 7  ;;  %v1053_v52 = vrot.slane %v711_v38, 4 }
  0xf6   : > { %v1047_v42 = vrot.slane %v1046_v37, 4 }
  0xf7   : > { %2648 = vmatmul.bf16.gmra.mxu0 %v5410_v8  ;;  %v714_v8 = vshll.u32 %v6489_v20, 16  ;;  %v717_v58 = vrot.slane %v713_v54, 4  ;;  %v5387_v20 = vld [vmem:[#allocation2 + $0x30] sm:$0xff] }
  0xf8   : > { %v1049_v61 = vsel %vm6377_vm8, %v1047_v42, %v1048_v24  ;;  %v1057_v24 = vrot.slane %v722_v21, 5 }
  0xf9   : > { %v716_v56 = vor.u32 %v714_v8, %v713_v54  ;;  %1192 = vst [vmem:[#allocation2 + $0x158] sm:$0xf] %v1049_v61  ;;  %v725_v50 = vsel %vm6344_vm2, %v717_v58, %v724_v59  ;;  %v1054_v15 = vrot.slane %v714_v8, 5  ;;  %v1197_v8 = vld [vmem:[#allocation2 + $0x164] sm:$0xf] }
  0xfa   : > { %921 = vst [vmem:[#allocation2 + $0x44] sm:$0xf] %v725_v50  ;;  %v1060_v46 = vor.u32 %v1059_v28, %v1057_v24  ;;  %v5317_v28 = vld [vmem:[#allocation2 + $0x38] sm:$0xff] }
  0xfb   : > { %v919_v51 = vsel %vm6349_vm5, %v716_v56, %v918_v53  ;;  %v1055_v44 = vor.u32 %v1054_v15, %v1053_v52  ;;  %v922_v56 = vld [vmem:[#allocation2 + $0x48] sm:$0xf] }
  0xfc   : > { %920 = vst [vmem:[#allocation2 + $0x40] sm:$0xf] %v919_v51  ;;  %v1061_v55 = vrot.slane %v1060_v46, 4  ;;  %v6569_v51 = vpack.c.bf16 %v6211_v63, %v6211_v63 }
  0xfd   : > { %v1056_v42 = vrot.slane %v1055_v44, 4  ;;  %v5497_v44 = vld [vmem:[%s7084_s3 + $0x1d8] sm:$0xff] }
  0xfe   : > { %v1198_v53 = vsel %vm6383_vm9, %v1061_v55, %v1197_v8  ;;  %v746_v63 = vshll.u32 %v6569_v51, 16  ;;  %3569 = vmatpush.bf16.msra.mxu3 %v5497_v44 }
  0xff   : > { %v1058_v59 = vsel %vm6377_vm8, %v1056_v42, %v1057_v24  ;;  %1199 = vst [vmem:[#allocation2 + $0x164] sm:$0xf] %v1198_v53  ;;  %v5473_v24 = vld [vmem:[%s7084_s3 + $0x198] sm:$0xff] }
 0x100   : > { %1196 = vst [vmem:[#allocation2 + $0x160] sm:$0xf] %v1058_v59  ;;  %3254 = vmatpush.bf16.msra.mxu2 %v5473_v24 }
 0x101   : > { %v6495_v26 = vpop.f32.mrf.mxu1 }
 0x102   : > { %2018 = vmatmul.bf16.gmra.mxu2 %v5362_v10 }
 0x103   : > { %2333 = vmatmul.bf16.gmra.mxu3 %v5386_v16  ;;  %v5363_v16 = vld [vmem:[#allocation2 + $0x148] sm:$0xff] }
 0x104   : > { %v6503_v36 = vpop.f32.mrf.mxu0  ;;  %1740 = vmatmul.bf16.gmra.mxu1 %v5315_v25  ;;  %v727_v25 = vshrl.u32 %v6533_v62, 16  ;;  %v6573_v62 = vpack.c.bf16 %v6213_v0, %v6213_v0  ;;  %v5413_v0 = vld [vmem:[#allocation2 + $0xd0] sm:$0xff] }
 0x105   : > { %v6507_v33 = vpop.f32.mrf.mxu2 }
 0x106   : > { %v6511_v43 = vpop.f32.mrf.mxu3  ;;  %v729_v32 = vrot.slane %v727_v25, 7  ;;  %v751_v52 = vshrl.u32 %v6573_v62, 16  ;;  %v1062_v46 = vrot.slane %v727_v25, 4 }
 0x107   : > { %2653 = vmatmul.bf16.gmra.mxu0 %v5411_v27  ;;  %v735_v27 = vshrl.u32 %v6537_v4, 16 }
 0x108   : > { %v732_v5 = vor.u32 %v730_v23, %v729_v32  ;;  %v733_v38 = vrot.slane %v729_v32, 4  ;;  %v1063_v32 = vrot.slane %v730_v23, 5 }
 0x109   : > { %v6519_v57 = vpop.f32.mrf.mxu1  ;;  %v737_v54 = vrot.slane %v735_v27, 7  ;;  %v1068_v55 = vrot.slane %v735_v27, 4  ;;  %v5449_v27 = vld [vmem:[%s7084_s3 + $0x158] sm:$0xff] }
 0x10a   : > { %v923_v61 = vsel %vm6349_vm5, %v732_v5, %v922_v56  ;;  %v754_v56 = vshll.u32 %v6573_v62, 16  ;;  %2939 = vmatpush.bf16.msra.mxu1 %v5449_v27  ;;  %v1072_v27 = vrot.slane %v746_v63, 5 }
 0x10b   : > { %v740_v21 = vor.u32 %v738_v19, %v737_v54  ;;  %924 = vst [vmem:[#allocation2 + $0x48] sm:$0xf] %v923_v61  ;;  %v1066_v54 = vrot.slane %v738_v19, 5 }
 0x10c   : > { %v6529_v49 = vpop.f32.mrf.mxu0 }
 0x10d   : > { %v6539_v9 = vpop.f32.mrf.mxu2  ;;  %v741_v48 = vsel %vm6344_vm2, %v733_v38, %v740_v21  ;;  %v1064_v38 = vor.u32 %v1063_v32, %v1062_v46  ;;  %v753_v21 = vrot.slane %v751_v52, 7  ;;  %v1069_v53 = vor.u32 %v1068_v55, %v1066_v54 }
 0x10e   : > { %v6541_v10 = vpop.f32.mrf.mxu3  ;;  %925 = vst [vmem:[#allocation2 + $0x4c] sm:$0xf] %v741_v48  ;;  %v5521_v48 = vld [vmem:[%s7084_s3 + $0x218] sm:$0xff]  ;;  %v6617_v32 = vpack.c.bf16 %v6287_v18, %v6287_v18 }
 0x10f   : > { %v1065_v25 = vrot.slane %v1064_v38, 4  ;;  %v756_v61 = vor.u32 %v754_v56, %v753_v21  ;;  %3884 = vmatpush.bf16.msra.mxu0 %v5521_v48  ;;  %v5389_v21 = vld [vmem:[#allocation2 + $0x40] sm:$0xff]  ;;  %v1075_v48 = vrot.slane %v754_v56, 5  ;;  %v1205_v56 = vld [vmem:[#allocation2 + $0x174] sm:$0xf] }
 0x110   : > { %v762_v18 = vshll.u32 %v6617_v32, 16 }
 0x111   : > { %v6545_v14 = vpop.f32.mrf.mxu1  ;;  %v1067_v62 = vsel %vm6377_vm8, %v1065_v25, %v1066_v54  ;;  %v6621_v54 = vpack.c.bf16 %v6295_v29, %v6295_v29  ;;  %v759_v25 = vshrl.u32 %v6617_v32, 16 }
 0x112   : > { %2023 = vmatmul.bf16.gmra.mxu2 %v5363_v16  ;;  %1200 = vst [vmem:[#allocation2 + $0x168] sm:$0xf] %v1067_v62 }
 0x113   : > { %2338 = vmatmul.bf16.gmra.mxu3 %v5387_v20  ;;  %v5364_v20 = vld [vmem:[#allocation2 + $0x150] sm:$0xff]  ;;  %v770_v32 = vshll.u32 %v6621_v54, 16 }
 0x114   : > { %v6548_v60 = vpop.f32.mrf.mxu0  ;;  %1745 = vmatmul.bf16.gmra.mxu1 %v5316_v22  ;;  %v5388_v22 = vld [vmem:[#allocation2 + $0x38] sm:$0xff] }
 0x115   : > { %v6550_v37 = vpop.f32.mrf.mxu2 }
 0x116   : > { %v6552_v35 = vpop.f32.mrf.mxu3 }
 0x117   : > { %2658 = vmatmul.bf16.gmra.mxu0 %v5412_v39  ;;  %v743_v39 = vshrl.u32 %v6569_v51, 16  ;;  %v1070_v51 = vrot.slane %v1069_v53, 4  ;;  %v5318_v53 = vld [vmem:[#allocation2 + $0x40] sm:$0xff] }
 0x119   : > { %v6555_v58 = vpop.f32.mrf.mxu1  ;;  %v745_v8 = vrot.slane %v743_v39, 7  ;;  %v1071_v29 = vrot.slane %v743_v39, 4 }
 0x11b   : > { %v748_v23 = vor.u32 %v746_v63, %v745_v8  ;;  %v749_v19 = vrot.slane %v745_v8, 4  ;;  %v5365_v8 = vld [vmem:[#allocation2 + $0x158] sm:$0xff] }
 0x11c   : > { %v6565_v50 = vpop.f32.mrf.mxu0 }
 0x11d   : > { %v6575_v4 = vpop.f32.mrf.mxu2 }
 0x11e   : > { %v6577_v16 = vpop.f32.mrf.mxu3 }
 0x11f   : > { %7098 = vst [vmem:[#allocation3_spill] sm:$0xff] %v6577_v16 }
 0x121   : > { %v6581_v15 = vpop.f32.mrf.mxu1 }
 0x122   : > { %2028 = vmatmul.bf16.gmra.mxu2 %v5364_v20  ;;  %v1201_v20 = vld [vmem:[#allocation2 + $0x16c] sm:$0xf] }
 0x123   : > { %2343 = vmatmul.bf16.gmra.mxu3 %v5388_v22  ;;  %v1202_v24 = vsel %vm6383_vm9, %v1070_v51, %v1201_v20  ;;  %v1077_v51 = vrot.slane %v751_v52, 4 }
 0x124   : > { %v6590_v42 = vpop.f32.mrf.mxu0  ;;  %1750 = vmatmul.bf16.gmra.mxu1 %v5317_v28  ;;  %v757_v28 = vsel %vm6344_vm2, %v749_v19, %v756_v61  ;;  %1203 = vst [vmem:[#allocation2 + $0x16c] sm:$0xf] %v1202_v24  ;;  %v5414_v61 = vld [vmem:[#allocation2 + $0xd8] sm:$0xff]  ;;  %v761_v24 = vrot.slane %v759_v25, 7 }
 0x125   : > { %v6592_v5 = vpop.f32.mrf.mxu2  ;;  %929 = vst [vmem:[#allocation2 + $0x54] sm:$0xf] %v757_v28  ;;  %v1073_v28 = vor.u32 %v1072_v27, %v1071_v29 }
 0x126   : > { %v6595_v59 = vpop.f32.mrf.mxu3  ;;  %v764_v39 = vor.u32 %v762_v18, %v761_v24  ;;  %v765_v63 = vrot.slane %v761_v24, 4  ;;  %v5319_v24 = vld [vmem:[#allocation2 + $0x48] sm:$0xff] }
 0x127   : > { %7099 = vst [vmem:[#allocation4_spill] sm:$0xff] %v6595_v59  ;;  %2663 = vmatmul.bf16.gmra.mxu0 %v5413_v0  ;;  %v926_v0 = vld [vmem:[#allocation2 + $0x50] sm:$0xf]  ;;  %v930_v59 = vld [vmem:[#allocation2 + $0x58] sm:$0xf] }
 0x128   : > { %v927_v44 = vsel %vm6349_vm5, %v748_v23, %v926_v0  ;;  %v767_v23 = vshrl.u32 %v6621_v54, 16  ;;  %v1078_v0 = vor.u32 %v1077_v51, %v1075_v48  ;;  %v931_v27 = vsel %vm6349_vm5, %v764_v39, %v930_v59 }
 0x129   : > { %v6603_v22 = vpop.f32.mrf.mxu1  ;;  %928 = vst [vmem:[#allocation2 + $0x50] sm:$0xf] %v927_v44 }
 0x12a   : > { %v769_v44 = vrot.slane %v767_v23, 7  ;;  %932 = vst [vmem:[#allocation2 + $0x58] sm:$0xf] %v931_v27 }
 0x12c   : > { %v6613_v46 = vpop.f32.mrf.mxu0  ;;  %v772_v52 = vor.u32 %v770_v32, %v769_v44 }
 0x12d   : > { %v6623_v55 = vpop.f32.mrf.mxu2 }
 0x12e   : > { %v6625_v38 = vpop.f32.mrf.mxu3 }
 0x12f   : > { %7100 = vst [vmem:[#allocation5_spill] sm:$0xff] %v6625_v38 }
 0x131   : > { %v1716_v19 = vpop.f32.mrf.mxu1 }
 0x132   : > { %2033 = vmatmul.bf16.gmra.mxu2 %v5365_v8  ;;  %v1074_v8 = vrot.slane %v1073_v28, 4  ;;  %v6656_v28 = vpack.c.bf16 %v6127_v7, %v6127_v7  ;;  %v5415_v7 = vld [vmem:[#allocation2 + $0xe0] sm:$0xff]  ;;  %v1717_v27 = vadd.f32 %v1716_v19, %v6473_v34 }
 0x133   : > { %2348 = vmatmul.bf16.gmra.mxu3 %v5389_v21  ;;  %v1079_v21 = vrot.slane %v1078_v0, 4  ;;  %v5390_v0 = vld [vmem:[#allocation2 + $0x48] sm:$0xff] }
 0x134   : > { %v6630_v20 = vpop.f32.mrf.mxu0  ;;  %1755 = vmatmul.bf16.gmra.mxu1 %v5318_v53  ;;  %v1076_v53 = vsel %vm6377_vm8, %v1074_v8, %v1075_v48  ;;  %v6652_v48 = vpack.c.bf16 %v6125_v6, %v6125_v6  ;;  %v7087_v8 = vshrl.u32 %v6656_v28, 16 }
 0x135   : > { %v6632_v62 = vpop.f32.mrf.mxu2  ;;  %v1206_v29 = vsel %vm6383_vm9, %v1079_v21, %v1205_v56  ;;  %1204 = vst [vmem:[#allocation2 + $0x170] sm:$0xf] %v1076_v53  ;;  %v5496_v56 = vld [vmem:[%s7084_s3 + $0x1d0] sm:$0xff]  ;;  %v1081_v53 = vrot.slane %v762_v18, 5 }
 0x136   : > { %v6634_v38 = vpop.f32.mrf.mxu3  ;;  %1207 = vst [vmem:[#allocation2 + $0x174] sm:$0xf] %v1206_v29  ;;  %v775_v44 = vshrl.u32 %v6652_v48, 16  ;;  %v1084_v29 = vrot.slane %v770_v32, 5  ;;  %3570 = vmatpush.bf16.msra.mxu3 %v5496_v56  ;;  %v785_v6 = vrot.slane %v7087_v8, 7  ;;  %v7102_v19 = vshll.u32 %v6652_v48, 16 }
 0x137   : > { %2668 = vmatmul.bf16.gmra.mxu0 %v5414_v61  ;;  %v773_v61 = vsel %vm6344_vm2, %v765_v63, %v772_v52  ;;  %v5472_v63 = vld [vmem:[%s7084_s3 + $0x190] sm:$0xff]  ;;  %v1080_v52 = vrot.slane %v759_v25, 4  ;;  %v786_v25 = vshll.u32 %v6656_v28, 16 }
 0x138   : > { %933 = vst [vmem:[#allocation2 + $0x5c] sm:$0xf] %v773_v61  ;;  %3255 = vmatpush.bf16.msra.mxu2 %v5472_v63 }
 0x139   : > { %v1718_v16 = vpop.f32.mrf.mxu1  ;;  %v788_v63 = vor.u32 %v786_v25, %v785_v6 }
 0x13a   : > { %v6644_v54 = vadd.f32 %v1718_v16, %v6481_v2  ;;  %v5366_v16 = vld [vmem:[#allocation2 + $0x160] sm:$0xff] }
 0x13c   : > { %v6648_v51 = vpop.f32.mrf.mxu0 }
 0x13d   : > { %v6658_v59 = vpop.f32.mrf.mxu2 }
 0x13e   : > { %v6660_v2 = vpop.f32.mrf.mxu3 }
 0x13f   : > { %7101 = vst [vmem:[#allocation6_spill] sm:$0xff] %v6660_v2 }
 0x141   : > { %v1721_v21 = vpop.f32.mrf.mxu1 }
 0x142   : > { %2038 = vmatmul.bf16.gmra.mxu2 %v5366_v16  ;;  %v6666_v39 = vadd.f32 %v1721_v21, %v6503_v36  ;;  %v1086_v36 = vrot.slane %v767_v23, 4  ;;  %v777_v21 = vrot.slane %v775_v44, 7 }
 0x143   : > { %2353 = vmatmul.bf16.gmra.mxu3 %v5390_v0  ;;  %v1082_v0 = vor.u32 %v1081_v53, %v1080_v52  ;;  %v5448_v52 = vld [vmem:[%s7084_s3 + $0x150] sm:$0xff] }
 0x144   : > { %v6675_v61 = vpop.f32.mrf.mxu0  ;;  %1760 = vmatmul.bf16.gmra.mxu1 %v5319_v24  ;;  %v1087_v2 = vor.u32 %v1086_v36, %v1084_v29  ;;  %v780_v23 = vor.u32 %v7102_v19, %v777_v21  ;;  %v781_v24 = vrot.slane %v777_v21, 4  ;;  %v5520_v53 = vld [vmem:[%s7084_s3 + $0x210] sm:$0xff] }
 0x145   : > { %v1999_v16 = vpop.f32.mrf.mxu2  ;;  %v1083_v34 = vrot.slane %v1082_v0, 4  ;;  %v934_v0 = vld [vmem:[#allocation2 + $0x60] sm:$0xf]  ;;  %2940 = vmatpush.bf16.msra.mxu1 %v5448_v52  ;;  %3885 = vmatpush.bf16.msra.mxu0 %v5520_v53 }
 0x146   : > { %v2079_v18 = vadd.f32 %v1999_v16, %v1717_v27  ;;  %v2314_v32 = vpop.f32.mrf.mxu3  ;;  %v1088_v8 = vrot.slane %v1087_v2, 4  ;;  %v1209_v27 = vld [vmem:[#allocation2 + $0x17c] sm:$0xf]  ;;  %v789_v36 = vsel %vm6344_vm2, %v781_v24, %v788_v63  ;;  %v935_v2 = vsel %vm6349_vm5, %v780_v23, %v934_v0  ;;  %v5367_v23 = vld [vmem:[#allocation2 + $0x168] sm:$0xff]  ;;  %v5391_v24 = vld [vmem:[#allocation2 + $0x50] sm:$0xff] }
 0x147   : > { %2673 = vmatmul.bf16.gmra.mxu0 %v5415_v7  ;;  %v1085_v7 = vsel %vm6377_vm8, %v1083_v34, %v1084_v29  ;;  %936 = vst [vmem:[#allocation2 + $0x60] sm:$0xf] %v935_v2  ;;  %v5320_v63 = vld [vmem:[#allocation2 + $0x50] sm:$0xff]  ;;  %v1093_v0 = vrot.slane %v786_v25, 5 }
 0x148   : > { %v2394_v56 = vadd.f32 %v2314_v32, %v2079_v18  ;;  %1208 = vst [vmem:[#allocation2 + $0x178] sm:$0xf] %v1085_v7  ;;  %v1210_v21 = vsel %vm6383_vm9, %v1088_v8, %v1209_v27  ;;  %v6712_v32 = vpack.c.bf16 %v6172_v41, %v6172_v41  ;;  %v7103_v7 = vshll.u32 %v6652_v48, 16 }
 0x149   : > { %v1723_v16 = vpop.f32.mrf.mxu1  ;;  %1211 = vst [vmem:[#allocation2 + $0x17c] sm:$0xf] %v1210_v21  ;;  %v7104_v21 = vshrl.u32 %v6656_v28, 16 }
 0x14a   : > { %v6695_v6 = vadd.f32 %v1723_v16, %v6529_v49  ;;  %v6702_v18 = vadd.f32 %v6630_v20, %v2394_v56  ;;  %v6708_v49 = vpack.c.bf16 %v6170_v40, %v6170_v40  ;;  %937 = vst [vmem:[#allocation2 + $0x64] sm:$0xf] %v789_v36  ;;  %v7088_v52 = vshrl.u32 %v6712_v32, 16 }
 0x14b   : > { %v1089_v16 = vrot.slane %v775_v44, 4  ;;  %v1090_v36 = vrot.slane %v7103_v7, 5  ;;  %v1095_v2 = vrot.slane %v7104_v21, 4  ;;  %v802_v25 = vshll.u32 %v6712_v32, 16  ;;  %v1213_v7 = vld [vmem:[#allocation2 + $0x184] sm:$0xf] }
 0x14c   : > { %v6704_v29 = vpop.f32.mrf.mxu0  ;;  %v791_v56 = vshrl.u32 %v6708_v49, 16  ;;  %v794_v40 = vshll.u32 %v6708_v49, 16 }
 0x14d   : > { %v2001_v34 = vpop.f32.mrf.mxu2 }
 0x14e   : > { %v2080_v8 = vadd.f32 %v2001_v34, %v6644_v54  ;;  %v2316_v19 = vpop.f32.mrf.mxu3  ;;  %v5416_v54 = vld [vmem:[#allocation2 + $0xe8] sm:$0xff] }
 0x150   : > { %v2395_v20 = vadd.f32 %v2316_v19, %v2080_v8  ;;  %v1091_v8 = vor.u32 %v1090_v36, %v1089_v16  ;;  %v1096_v19 = vor.u32 %v1095_v2, %v1093_v0  ;;  %v938_v36 = vld [vmem:[#allocation2 + $0x68] sm:$0xf] }
 0x151   : > { %v1726_v53 = vpop.f32.mrf.mxu1 }
 0x152   : > { %2043 = vmatmul.bf16.gmra.mxu2 %v5367_v23  ;;  %v6719_v41 = vadd.f32 %v1726_v53, %v6548_v60  ;;  %v6722_v27 = vadd.f32 %v6648_v51, %v2395_v20  ;;  %v793_v51 = vrot.slane %v791_v56, 7  ;;  %v801_v23 = vrot.slane %v7088_v52, 7 }
 0x153   : > { %2358 = vmatmul.bf16.gmra.mxu3 %v5391_v24  ;;  %v1092_v28 = vrot.slane %v1091_v8, 4  ;;  %v1097_v24 = vrot.slane %v1096_v19, 4 }
 0x154   : > { %v6730_v34 = vpop.f32.mrf.mxu0  ;;  %1765 = vmatmul.bf16.gmra.mxu1 %v5320_v63  ;;  %v796_v20 = vor.u32 %v794_v40, %v793_v51  ;;  %v797_v53 = vrot.slane %v793_v51, 4  ;;  %v804_v16 = vor.u32 %v802_v25, %v801_v23  ;;  %v6760_v51 = vpack.c.bf16 %v6233_v17, %v6233_v17 }
 0x155   : > { %v2004_v60 = vpop.f32.mrf.mxu2  ;;  %v1094_v2 = vsel %vm6377_vm8, %v1092_v28, %v1093_v0  ;;  %v1214_v52 = vsel %vm6383_vm9, %v1097_v24, %v1213_v7  ;;  %v6756_v0 = vpack.c.bf16 %v6227_v11, %v6227_v11  ;;  %v5471_v7 = vld [vmem:[%s7084_s3 + $0x188] sm:$0xff] }
 0x156   : > { %v2081_v44 = vadd.f32 %v2004_v60, %v6666_v39  ;;  %v2319_v48 = vpop.f32.mrf.mxu3  ;;  %v939_v39 = vsel %vm6349_vm5, %v796_v20, %v938_v36  ;;  %1212 = vst [vmem:[#allocation2 + $0x180] sm:$0xf] %v1094_v2  ;;  %v805_v60 = vsel %vm6344_vm2, %v797_v53, %v804_v16  ;;  %v815_v20 = vshrl.u32 %v6760_v51, 16  ;;  %v5495_v16 = vld [vmem:[%s7084_s3 + $0x1c8] sm:$0xff]  ;;  %3256 = vmatpush.bf16.msra.mxu2 %v5471_v7 }
 0x157   : > { %2678 = vmatmul.bf16.gmra.mxu0 %v5416_v54  ;;  %1215 = vst [vmem:[#allocation2 + $0x184] sm:$0xf] %v1214_v52  ;;  %v5321_v52 = vld [vmem:[#allocation2 + $0x58] sm:$0xff]  ;;  %v807_v24 = vshrl.u32 %v6756_v0, 16  ;;  %v810_v11 = vshll.u32 %v6756_v0, 16  ;;  %v1098_v36 = vrot.slane %v791_v56, 4  ;;  %3571 = vmatpush.bf16.msra.mxu3 %v5495_v16 }
 0x158   : > { %v2396_v63 = vadd.f32 %v2319_v48, %v2081_v44  ;;  %940 = vst [vmem:[#allocation2 + $0x68] sm:$0xf] %v939_v39  ;;  %v5368_v48 = vld [vmem:[#allocation2 + $0x170] sm:$0xff]  ;;  %v1102_v2 = vrot.slane %v802_v25, 5  ;;  %v818_v49 = vshll.u32 %v6760_v51, 16  ;;  %v5519_v7 = vld [vmem:[%s7084_s3 + $0x208] sm:$0xff] }
 0x159   : > { %v1728_v21 = vpop.f32.mrf.mxu1  ;;  %941 = vst [vmem:[#allocation2 + $0x6c] sm:$0xf] %v805_v60  ;;  %3886 = vmatpush.bf16.msra.mxu0 %v5519_v7  ;;  %v5418_v7 = vld [vmem:[#allocation2 + $0xf8] sm:$0xff] }
 0x15a   : > { %v6745_v54 = vadd.f32 %v1728_v21, %v6565_v50  ;;  %v6750_v8 = vadd.f32 %v6675_v61, %v2396_v63  ;;  %v5392_v61 = vld [vmem:[#allocation2 + $0x58] sm:$0xff]  ;;  %v1099_v21 = vrot.slane %v794_v40, 5 }
 0x15c   : > { %v6752_v19 = vpop.f32.mrf.mxu0 }
 0x15d   : > { %v2006_v50 = vpop.f32.mrf.mxu2 }
 0x15e   : > { %v2082_v23 = vadd.f32 %v2006_v50, %v6695_v6  ;;  %v2321_v44 = vpop.f32.mrf.mxu3  ;;  %v5417_v6 = vld [vmem:[#allocation2 + $0xf0] sm:$0xff]  ;;  %v1100_v50 = vor.u32 %v1099_v21, %v1098_v36 }
 0x160   : > { %v2397_v28 = vadd.f32 %v2321_v44, %v2082_v23  ;;  %v809_v23 = vrot.slane %v807_v24, 7  ;;  %v817_v44 = vrot.slane %v815_v20, 7 }
 0x161   : > { %v1731_v53 = vpop.f32.mrf.mxu1 }
 0x162   : > { %2048 = vmatmul.bf16.gmra.mxu2 %v5368_v48  ;;  %v6767_v17 = vadd.f32 %v1731_v53, %v6590_v42  ;;  %v6770_v63 = vadd.f32 %v6704_v29, %v2397_v28  ;;  %v7105_v29 = vshrl.u32 %v6712_v32, 16  ;;  %v1101_v48 = vrot.slane %v1100_v50, 4  ;;  %v5447_v53 = vld [vmem:[%s7084_s3 + $0x148] sm:$0xff] }
 0x163   : > { %2363 = vmatmul.bf16.gmra.mxu3 %v5392_v61  ;;  %v812_v32 = vor.u32 %v810_v11, %v809_v23  ;;  %v813_v61 = vrot.slane %v809_v23, 4  ;;  %v820_v28 = vor.u32 %v818_v49, %v817_v44  ;;  %2941 = vmatpush.bf16.msra.mxu1 %v5447_v53  ;;  %v6820_v44 = vpack.c.bf16 %v6299_v31, %v6299_v31 }
 0x164   : > { %v6780_v42 = vpop.f32.mrf.mxu0  ;;  %1770 = vmatmul.bf16.gmra.mxu1 %v5321_v52  ;;  %v1104_v39 = vrot.slane %v7105_v29, 4  ;;  %v942_v29 = vld [vmem:[#allocation2 + $0x70] sm:$0xf] }
 0x165   : > { %v2009_v60 = vpop.f32.mrf.mxu2  ;;  %v821_v21 = vsel %vm6344_vm2, %v813_v61, %v820_v28  ;;  %v943_v50 = vsel %vm6349_vm5, %v812_v32, %v942_v29  ;;  %v5393_v32 = vld [vmem:[#allocation2 + $0x60] sm:$0xff] }
 0x166   : > { %v2083_v56 = vadd.f32 %v2009_v60, %v6719_v41  ;;  %v2324_v40 = vpop.f32.mrf.mxu3  ;;  %v1105_v25 = vor.u32 %v1104_v39, %v1102_v2  ;;  %v1217_v41 = vld [vmem:[#allocation2 + $0x18c] sm:$0xf]  ;;  %944 = vst [vmem:[#allocation2 + $0x70] sm:$0xf] %v943_v50  ;;  %v5322_v61 = vld [vmem:[#allocation2 + $0x60] sm:$0xff] }
 0x167   : > { %2683 = vmatmul.bf16.gmra.mxu0 %v5417_v6  ;;  %v1103_v6 = vsel %vm6377_vm8, %v1101_v48, %v1102_v2  ;;  %945 = vst [vmem:[#allocation2 + $0x74] sm:$0xf] %v821_v21  ;;  %v5369_v48 = vld [vmem:[#allocation2 + $0x178] sm:$0xff] }
 0x168   : > { %v2398_v52 = vadd.f32 %v2324_v40, %v2083_v56  ;;  %v1106_v16 = vrot.slane %v1105_v25, 4  ;;  %1216 = vst [vmem:[#allocation2 + $0x188] sm:$0xf] %v1103_v6 }
 0x169   : > { %v1733_v36 = vpop.f32.mrf.mxu1 }
 0x16a   : > { %v6803_v39 = vadd.f32 %v1733_v36, %v6613_v46  ;;  %v1218_v60 = vsel %vm6383_vm9, %v1106_v16, %v1217_v41  ;;  %v6810_v23 = vadd.f32 %v6730_v34, %v2398_v52  ;;  %v6816_v46 = vpack.c.bf16 %v6297_v30, %v6297_v30 }
 0x16b   : > { %1219 = vst [vmem:[#allocation2 + $0x18c] sm:$0xf] %v1218_v60  ;;  %v831_v52 = vshrl.u32 %v6820_v44, 16  ;;  %v1108_v16 = vrot.slane %v810_v11, 5  ;;  %v1111_v41 = vrot.slane %v818_v49, 5  ;;  %v1113_v36 = vrot.slane %v815_v20, 4 }
 0x16c   : > { %v6812_v2 = vpop.f32.mrf.mxu0  ;;  %v823_v28 = vshrl.u32 %v6816_v46, 16  ;;  %v826_v30 = vshll.u32 %v6816_v46, 16  ;;  %v834_v49 = vshll.u32 %v6820_v44, 16 }
 0x16d   : > { %v2011_v56 = vpop.f32.mrf.mxu2 }
 0x16e   : > { %v2084_v40 = vadd.f32 %v2011_v56, %v6745_v54  ;;  %v2326_v25 = vpop.f32.mrf.mxu3  ;;  %v1107_v54 = vrot.slane %v807_v24, 4  ;;  %v825_v60 = vrot.slane %v823_v28, 7  ;;  %v833_v24 = vrot.slane %v831_v52, 7  ;;  %v5324_v1 = vld [vmem:[#allocation2 + $0x70] sm:$0xff] }
 0x170   : > { %v2399_v34 = vadd.f32 %v2326_v25, %v2084_v40  ;;  %v1109_v29 = vor.u32 %v1108_v16, %v1107_v54  ;;  %v828_v50 = vor.u32 %v826_v30, %v825_v60  ;;  %v829_v56 = vrot.slane %v825_v60, 4  ;;  %v1221_v25 = vld [vmem:[#allocation2 + $0x194] sm:$0xf] }
 0x171   : > { %v6825_v53 = vpop.f32.mrf.mxu1 }
 0x172   : > { %2053 = vmatmul.bf16.gmra.mxu2 %v5369_v48  ;;  %v6829_v31 = vadd.f32 %v6752_v19, %v2399_v34  ;;  %v1114_v19 = vor.u32 %v1113_v36, %v1111_v41  ;;  %v1110_v51 = vrot.slane %v1109_v29, 4  ;;  %v836_v48 = vor.u32 %v834_v49, %v833_v24  ;;  %v5764_v34 = vld [vmem:[%s5939_s30 + $0x78] sm:$0xff]   ;;  %v5371_v12 = vld [vmem:[#allocation2 + $0x188] sm:$0xff] }
 0x173   : > { %2368 = vmatmul.bf16.gmra.mxu3 %v5393_v32  ;;  %v946_v32 = vld [vmem:[#allocation2 + $0x78] sm:$0xf]  ;;  %v5588_v16 = vunpack.c.l.bf16 %v5764_v34 }
 0x174   : > { %v6837_v6 = vpop.f32.mrf.mxu0  ;;  %1775 = vmatmul.bf16.gmra.mxu1 %v5322_v61  ;;  %v1115_v20 = vrot.slane %v1114_v19, 4  ;;  %v837_v36 = vsel %vm6344_vm2, %v829_v56, %v836_v48 }
 0x175   : > { %v2014_v21 = vpop.f32.mrf.mxu2  ;;  %949 = vst [vmem:[#allocation2 + $0x7c] sm:$0xf] %v837_v36  ;;  %v5470_v36 = vld [vmem:[%s7084_s3 + $0x180] sm:$0xff] }
 0x176   : > { %v2085_v0 = vadd.f32 %v2014_v21, %v6767_v17  ;;  %v2329_v11 = vpop.f32.mrf.mxu3  ;;  %v1112_v17 = vsel %vm6377_vm8, %v1110_v51, %v1111_v41  ;;  %v1222_v54 = vsel %vm6383_vm9, %v1115_v20, %v1221_v25  ;;  %v5589_v21 = vunpack.c.h.bf16 %v5764_v34  ;;  %v5846_v41 = vld [vmem:[%s7082_s1] ss:$0 sm:$0xff]  ;;  %3257 = vmatpush.bf16.msra.mxu2 %v5470_v36  ;;  %v1225_v36 = vld [vmem:[#allocation2 + $0x19c] sm:$0xf] }
 0x177   : > { %2688 = vmatmul.bf16.gmra.mxu0 %v5418_v7  ;;  %v947_v7 = vsel %vm6349_vm5, %v828_v50, %v946_v32  ;;  %1220 = vst [vmem:[#allocation2 + $0x190] sm:$0xf] %v1112_v17  ;;  %v385_v19 = vmul.f32 %v5846_v41, %v5588_v16  ;;  %v5370_v50 = vld [vmem:[#allocation2 + $0x180] sm:$0xff]  ;;  %v5323_v32 = vld [vmem:[#allocation2 + $0x68] sm:$0xff] }
 0x178   : > { %v2400_v40 = vadd.f32 %v2329_v11, %v2085_v0  ;;  %1223 = vst [vmem:[#allocation2 + $0x194] sm:$0xf] %v1222_v54  ;;  %v386_v24 = vmul.f32 %v5846_v41, %v5589_v21  ;;  %v5847_v11 = vld [vmem:[%s7083_s2] ss:$0 sm:$0xff]  ;;  %v1116_v41 = vrot.slane %v823_v28, 4 }
 0x179   : > { %v6848_v61 = vpop.f32.mrf.mxu1  ;;  %948 = vst [vmem:[#allocation2 + $0x78] sm:$0xf] %v947_v7  ;;  %v421_v51 = vadd.f32 %v5847_v11, %v385_v19  ;;  %v5419_v16 = vld [vmem:[#allocation2 + $0x100] sm:$0xff]  ;;  %v1117_v19 = vrot.slane %v826_v30, 5 }
 0x17a   : > { %v6859_v29 = vadd.f32 %v6780_v42, %v2400_v40  ;;  %v422_v56 = vadd.f32 %v5847_v11, %v386_v24  ;;  %v5394_v40 = vld [vmem:[#allocation2 + $0x68] sm:$0xff]  ;;  %v5494_v21 = vld [vmem:[%s7084_s3 + $0x1c0] sm:$0xff]  ;;  %v1120_v24 = vrot.slane %v834_v49, 5  ;;  %v1122_v11 = vrot.slane %v831_v52, 4 }
 0x17b   : > { %v6870_v25 = vmax.f32 %v421_v51, 0.0  ;;  %3572 = vmatpush.bf16.msra.mxu3 %v5494_v21  ;;  %v1118_v28 = vor.u32 %v1117_v19, %v1116_v41 }
 0x17c   : > { %v6864_v60 = vpop.f32.mrf.mxu0  ;;  %v454_v34 = vmax.f32 %v422_v56, 0.0 }
 0x17d   : > { %v2016_v0 = vpop.f32.mrf.mxu2  ;;  %v6876_v54 = vpack.c.bf16 %v6870_v25, %v6870_v25  ;;  %v1119_v52 = vrot.slane %v1118_v28, 4 }
 0x17e   : > { %v2086_v42 = vadd.f32 %v2016_v0, %v6803_v39  ;;  %v2331_v20 = vpop.f32.mrf.mxu3  ;;  %v6878_v7 = vpack.c.bf16 %v454_v34, %v454_v34 }
 0x17f   : > { %v839_v51 = vshrl.u32 %v6876_v54, 16  ;;  %v842_v46 = vshll.u32 %v6876_v54, 16  ;;  %v1229_v54 = vld [vmem:[#allocation2 + $0x1a4] sm:$0xf]  ;;  %v5443_v45 = vld [vmem:[#allocation2 + $0x190] sm:$0xff] }
 0x180   : > { %v2401_v48 = vadd.f32 %v2331_v20, %v2086_v42  ;;  %v7089_v42 = vshrl.u32 %v6878_v7, 16  ;;  %v850_v30 = vshll.u32 %v6878_v7, 16 }
 0x181   : > { %v6872_v17 = vpop.f32.mrf.mxu1 }
 0x182   : > { %2058 = vmatmul.bf16.gmra.mxu2 %v5370_v50  ;;  %v6881_v39 = vadd.f32 %v6812_v2, %v2401_v48  ;;  %v1737_v2 = vadd.f32 %v6825_v53, %v6467_v3  ;;  %v1123_v53 = vor.u32 %v1122_v11, %v1120_v24  ;;  %v841_v50 = vrot.slane %v839_v51, 7  ;;  %v5518_v48 = vld [vmem:[%s7084_s3 + $0x200] sm:$0xff] }
 0x183   : > { %2373 = vmatmul.bf16.gmra.mxu3 %v5394_v40  ;;  %v849_v44 = vrot.slane %v7089_v42, 7  ;;  %v5446_v40 = vld [vmem:[%s7084_s3 + $0x140] sm:$0xff]  ;;  %3887 = vmatpush.bf16.msra.mxu0 %v5518_v48  ;;  %v5395_v48 = vld [vmem:[#allocation2 + $0x70] sm:$0xff] }
 0x184   : > { %v6895_v0 = vpop.f32.mrf.mxu0  ;;  %1780 = vmatmul.bf16.gmra.mxu1 %v5323_v32  ;;  %v1124_v32 = vrot.slane %v1123_v53, 4  ;;  %v844_v21 = vor.u32 %v842_v46, %v841_v50  ;;  %v845_v41 = vrot.slane %v841_v50, 4  ;;  %v950_v11 = vld [vmem:[#allocation2 + $0x80] sm:$0xf]  ;;  %v1739_v53 = vadd.f32 %v6848_v61, %v6475_v13 }
 0x185   : > { %v2019_v20 = vpop.f32.mrf.mxu2  ;;  %2942 = vmatpush.bf16.msra.mxu1 %v5446_v40  ;;  %v1742_v13 = vadd.f32 %v6872_v17, %v6495_v26  ;;  %v5325_v17 = vld [vmem:[#allocation2 + $0x78] sm:$0xff]  ;;  %v5464_v42 = vld [vmem:[#allocation2 + $0x60] sm:$0xff] }
 0x186   : > { %v2087_v49 = vadd.f32 %v2019_v20, %v1737_v2  ;;  %v2334_v3 = vpop.f32.mrf.mxu3  ;;  %v852_v2 = vor.u32 %v850_v30, %v849_v44  ;;  %v1226_v20 = vsel %vm6383_vm9, %v1124_v32, %v1225_v36  ;;  %v951_v28 = vsel %vm6349_vm5, %v844_v21, %v950_v11 }
 0x187   : > { %2693 = vmatmul.bf16.gmra.mxu0 %v5419_v16  ;;  %v1121_v16 = vsel %vm6377_vm8, %v1119_v52, %v1120_v24  ;;  %1227 = vst [vmem:[#allocation2 + $0x19c] sm:$0xf] %v1226_v20 }
 0x188   : > { %v2402_v56 = vadd.f32 %v2334_v3, %v2087_v49  ;;  %1224 = vst [vmem:[#allocation2 + $0x198] sm:$0xf] %v1121_v16  ;;  %v853_v49 = vsel %vm6344_vm2, %v845_v41, %v852_v2  ;;  %v5668_v3 = vpack.c.bf16 %v454_v34, %v6870_v25 }
 0x189   : > { %v1743_v19 = vpop.f32.mrf.mxu1  ;;  %952 = vst [vmem:[#allocation2 + $0x80] sm:$0xf] %v951_v28 }
 0x18a   : > { %v6927_v24 = vadd.f32 %v6837_v6, %v2402_v56  ;;  %953 = vst [vmem:[#allocation2 + $0x84] sm:$0xf] %v853_v49  ;;  %v5420_v6 = vld [vmem:[#allocation2 + $0x108] sm:$0xff]  ;;  %v1744_v11 = vadd.f32 %v1743_v19, %v6519_v57 }
 0x18b   : > { %5779 = vst [vmem:[#allocation2 + $0x110] sm:$0xff] %v5668_v3   ;;  %v5372_v3 = vld [vmem:[#allocation2 + $0x190] sm:$0xff] }
 0x18c   : > { %v2656_v50 = vpop.f32.mrf.mxu0 }
 0x18d   : > { %v2021_v44 = vpop.f32.mrf.mxu2 }
 0x18e   : > { %v2088_v52 = vadd.f32 %v2021_v44, %v1739_v53  ;;  %v2336_v40 = vpop.f32.mrf.mxu3  ;;  %v5396_v53 = vld [vmem:[#allocation2 + $0x78] sm:$0xff] }
 0x18f   : > { %v5515_v47 = vld [vmem:[#allocation2 + $0x198] sm:$0xff] }
 0x190   : > { %v2403_v32 = vadd.f32 %v2336_v40, %v2088_v52 }
 0x191   : > { %v1746_v36 = vpop.f32.mrf.mxu1 }
 0x192   : > { %2063 = vmatmul.bf16.gmra.mxu2 %v5371_v12  ;;  %v6932_v25 = vadd.f32 %v6864_v60, %v2403_v32  ;;  %v5421_v40 = vld [vmem:[#allocation2 + $0x110] sm:$0xff]  ;;  %v1747_v12 = vadd.f32 %v1746_v36, %v6545_v14  ;;  %v5430_v14 = vld [vmem:[#allocation2 + $0x128] sm:$0xff] }
 0x193   : > { %2378 = vmatmul.bf16.gmra.mxu3 %v5395_v48 }
 0x194   : > { %v2659_v61 = vpop.f32.mrf.mxu0  ;;  %1785 = vmatmul.bf16.gmra.mxu1 %v5324_v1 }
 0x195   : > { %v2024_v34 = vpop.f32.mrf.mxu2 }
 0x196   : > { %v2089_v56 = vadd.f32 %v2024_v34, %v1742_v13  ;;  %v2339_v21 = vpop.f32.mrf.mxu3 }
 0x197   : > { %2698 = vmatmul.bf16.gmra.mxu0 %v5420_v6 }
 0x198   : > { %v2404_v41 = vadd.f32 %v2339_v21, %v2089_v56 }
 0x199   : > { %v1748_v16 = vpop.f32.mrf.mxu1 }
 0x19a   : > { %v6937_v2 = vadd.f32 %v6895_v0, %v2404_v41  ;;  %v1749_v13 = vadd.f32 %v1748_v16, %v6555_v58  ;;  %v5373_v41 = vld [vmem:[#allocation2 + $0x198] sm:$0xff] }
 0x19c   : > { %v2661_v60 = vpop.f32.mrf.mxu0 }
 0x19d   : > { %v2026_v20 = vpop.f32.mrf.mxu2 }
 0x19e   : > { %v2090_v28 = vadd.f32 %v2026_v20, %v1744_v11  ;;  %v2341_v49 = vpop.f32.mrf.mxu3  ;;  %v5397_v11 = vld [vmem:[#allocation2 + $0x80] sm:$0xff] }
 0x1a0   : > { %v2405_v26 = vadd.f32 %v2341_v49, %v2090_v28  ;;  %v5502_v49 = vld [vmem:[#allocation2 + $0x130] sm:$0xff] }
 0x1a1   : > { %v1751_v44 = vpop.f32.mrf.mxu1 }
 0x1a2   : > { %2068 = vmatmul.bf16.gmra.mxu2 %v5372_v3  ;;  %v6940_v52 = vadd.f32 %v2656_v50, %v2405_v26  ;;  %v1752_v3 = vadd.f32 %v1751_v44, %v6581_v15  ;;  %v5431_v15 = vld [vmem:[#allocation2 + $0x130] sm:$0xff] }
 0x1a3   : > { %2383 = vmatmul.bf16.gmra.mxu3 %v5396_v53 }
 0x1a4   : > { %v2664_v0 = vpop.f32.mrf.mxu0  ;;  %1790 = vmatmul.bf16.gmra.mxu1 %v5325_v17 }
 0x1a5   : > { %v2029_v48 = vpop.f32.mrf.mxu2 }
 0x1a6   : > { %v2091_v57 = vadd.f32 %v2029_v48, %v1747_v12  ;;  %v2344_v19 = vpop.f32.mrf.mxu3 }
 0x1a7   : > { %2703 = vmatmul.bf16.gmra.mxu0 %v5421_v40 }
 0x1a8   : > { %v2406_v32 = vadd.f32 %v2344_v19, %v2091_v57 }
 0x1a9   : > { %v1753_v1 = vpop.f32.mrf.mxu1 }
 0x1aa   : > { %v6943_v6 = vadd.f32 %v2659_v61, %v2406_v32  ;;  %v1754_v12 = vadd.f32 %v1753_v1, %v6603_v22  ;;  %v5454_v32 = vld [vmem:[#allocation2 + $0x10] sm:$0xff] }
 0x1ac   : > { %v2666_v34 = vpop.f32.mrf.mxu0 }
 0x1ad   : > { %v2031_v56 = vpop.f32.mrf.mxu2 }
 0x1ae   : > { %v2092_v50 = vadd.f32 %v2031_v56, %v1749_v13  ;;  %v2346_v21 = vpop.f32.mrf.mxu3  ;;  %v5478_v13 = vld [vmem:[#allocation2 + $0xa0] sm:$0xff] }
 0x1b0   : > { %v2407_v20 = vadd.f32 %v2346_v21, %v2092_v50  ;;  %v5503_v21 = vld [vmem:[#allocation2 + $0x138] sm:$0xff] }
 0x1b1   : > { %v1756_v36 = vpop.f32.mrf.mxu1 }
 0x1b2   : > { %2073 = vmatmul.bf16.gmra.mxu2 %v5373_v41  ;;  %v6946_v28 = vadd.f32 %v2661_v60, %v2407_v20  ;;  %v1757_v41 = vadd.f32 %v1756_v36, %v6507_v33  ;;  %v5432_v33 = vld [vmem:[#allocation2 + $0x138] sm:$0xff] }
 0x1b3   : > { %2388 = vmatmul.bf16.gmra.mxu3 %v5397_v11 }
 0x1b4   : > { %v2669_v61 = vpop.f32.mrf.mxu0  ;;  %2943 = vmatmul.bf16.vlgmr.msra.gmra.mxu1 %v5430_v14 }
 0x1b5   : > { %v2034_v53 = vpop.f32.mrf.mxu2 }
 0x1b6   : > { %v2093_v58 = vadd.f32 %v2034_v53, %v1752_v3  ;;  %v2349_v16 = vpop.f32.mrf.mxu3 }
 0x1b7   : > { %3888 = vmatmul.bf16.vlgmr.msra.gmra.mxu0 %v5502_v49 }
 0x1b8   : > { %v2408_v26 = vadd.f32 %v2349_v16, %v2093_v58 }
 0x1b9   : > { %v1758_v17 = vpop.f32.mrf.mxu1 }
 0x1ba   : > { %v6949_v40 = vadd.f32 %v2664_v0, %v2408_v26  ;;  %v1759_v3 = vadd.f32 %v1758_v17, %v6539_v9  ;;  %v5455_v26 = vld [vmem:[#allocation2 + $0x18] sm:$0xff] }
 0x1bc   : > { %v2671_v48 = vpop.f32.mrf.mxu0 }
 0x1bd   : > { %v2036_v57 = vpop.f32.mrf.mxu2 }
 0x1be   : > { %v2094_v60 = vadd.f32 %v2036_v57, %v1754_v12  ;;  %v2351_v19 = vpop.f32.mrf.mxu3  ;;  %v5479_v12 = vld [vmem:[#allocation2 + $0xa8] sm:$0xff] }
 0x1c0   : > { %v2409_v56 = vadd.f32 %v2351_v19, %v2094_v60  ;;  %v5504_v19 = vld [vmem:[#allocation2 + $0x140] sm:$0xff] }
 0x1c1   : > { %v1761_v44 = vpop.f32.mrf.mxu1 }
 0x1c2   : > { %3258 = vmatmul.bf16.vlgmr.msra.gmra.mxu2 %v5454_v32  ;;  %v6952_v50 = vadd.f32 %v2666_v34, %v2409_v56  ;;  %v1762_v32 = vadd.f32 %v1761_v44, %v6550_v37  ;;  %v5433_v37 = vld [vmem:[#allocation2 + $0x140] sm:$0xff] }
 0x1c3   : > { %3573 = vmatmul.bf16.vlgmr.msra.gmra.mxu3 %v5478_v13 }
 0x1c4   : > { %v2674_v0 = vpop.f32.mrf.mxu0  ;;  %2948 = vmatmul.bf16.gmra.mxu1 %v5431_v15 }
 0x1c5   : > { %v2039_v11 = vpop.f32.mrf.mxu2 }
 0x1c6   : > { %v2095_v22 = vadd.f32 %v2039_v11, %v1757_v41  ;;  %v2354_v1 = vpop.f32.mrf.mxu3 }
 0x1c7   : > { %3893 = vmatmul.bf16.gmra.mxu0 %v5503_v21 }
 0x1c8   : > { %v2410_v20 = vadd.f32 %v2354_v1, %v2095_v22 }
 0x1c9   : > { %v1763_v14 = vpop.f32.mrf.mxu1 }
 0x1ca   : > { %v6955_v49 = vadd.f32 %v2669_v61, %v2410_v20  ;;  %v1764_v41 = vadd.f32 %v1763_v14, %v6575_v4  ;;  %v5456_v20 = vld [vmem:[#allocation2 + $0x20] sm:$0xff] }
 0x1cc   : > { %v2676_v53 = vpop.f32.mrf.mxu0 }
 0x1cd   : > { %v2041_v58 = vpop.f32.mrf.mxu2 }
 0x1ce   : > { %v2096_v34 = vadd.f32 %v2041_v58, %v1759_v3  ;;  %v2356_v16 = vpop.f32.mrf.mxu3  ;;  %v5480_v3 = vld [vmem:[#allocation2 + $0xb0] sm:$0xff] }
 0x1d0   : > { %v2411_v57 = vadd.f32 %v2356_v16, %v2096_v34  ;;  %v5505_v16 = vld [vmem:[#allocation2 + $0x148] sm:$0xff] }
 0x1d1   : > { %v1766_v36 = vpop.f32.mrf.mxu1 }
 0x1d2   : > { %3263 = vmatmul.bf16.gmra.mxu2 %v5455_v26  ;;  %v6958_v60 = vadd.f32 %v2671_v48, %v2411_v57  ;;  %v1767_v26 = vadd.f32 %v1766_v36, %v6592_v5  ;;  %v5434_v5 = vld [vmem:[#allocation2 + $0x148] sm:$0xff] }
 0x1d3   : > { %3578 = vmatmul.bf16.gmra.mxu3 %v5479_v12 }
 0x1d4   : > { %v2679_v61 = vpop.f32.mrf.mxu0  ;;  %2953 = vmatmul.bf16.gmra.mxu1 %v5432_v33 }
 0x1d5   : > { %v2044_v13 = vpop.f32.mrf.mxu2 }
 0x1d6   : > { %v2097_v9 = vadd.f32 %v2044_v13, %v1762_v32  ;;  %v2359_v17 = vpop.f32.mrf.mxu3 }
 0x1d7   : > { %3898 = vmatmul.bf16.gmra.mxu0 %v5504_v19 }
 0x1d8   : > { %v2412_v56 = vadd.f32 %v2359_v17, %v2097_v9 }
 0x1d9   : > { %v1768_v15 = vpop.f32.mrf.mxu1 }
 0x1da   : > { %v6961_v21 = vadd.f32 %v2674_v0, %v2412_v56  ;;  %v1769_v32 = vadd.f32 %v1768_v15, %v6623_v55  ;;  %v5457_v56 = vld [vmem:[#allocation2 + $0x28] sm:$0xff] }
 0x1dc   : > { %v2681_v11 = vpop.f32.mrf.mxu0 }
 0x1dd   : > { %v2046_v22 = vpop.f32.mrf.mxu2 }
 0x1de   : > { %v2098_v48 = vadd.f32 %v2046_v22, %v1764_v41  ;;  %v2361_v1 = vpop.f32.mrf.mxu3  ;;  %v5481_v41 = vld [vmem:[#allocation2 + $0xb8] sm:$0xff] }
 0x1e0   : > { %v2413_v58 = vadd.f32 %v2361_v1, %v2098_v48  ;;  %v5506_v1 = vld [vmem:[#allocation2 + $0x150] sm:$0xff] }
 0x1e1   : > { %v1771_v44 = vpop.f32.mrf.mxu1 }
 0x1e2   : > { %3268 = vmatmul.bf16.gmra.mxu2 %v5456_v20  ;;  %v6964_v34 = vadd.f32 %v2676_v53, %v2413_v58  ;;  %v1772_v20 = vadd.f32 %v1771_v44, %v6632_v62  ;;  %v5435_v62 = vld [vmem:[#allocation2 + $0x150] sm:$0xff] }
 0x1e3   : > { %3583 = vmatmul.bf16.gmra.mxu3 %v5480_v3 }
 0x1e4   : > { %v2684_v0 = vpop.f32.mrf.mxu0  ;;  %2958 = vmatmul.bf16.gmra.mxu1 %v5433_v37 }
 0x1e5   : > { %v2049_v12 = vpop.f32.mrf.mxu2 }
 0x1e6   : > { %v2099_v4 = vadd.f32 %v2049_v12, %v1767_v26  ;;  %v2364_v14 = vpop.f32.mrf.mxu3 }
 0x1e7   : > { %3903 = vmatmul.bf16.gmra.mxu0 %v5505_v16 }
 0x1e8   : > { %v2414_v57 = vadd.f32 %v2364_v14, %v2099_v4 }
 0x1e9   : > { %v1773_v33 = vpop.f32.mrf.mxu1 }
 0x1ea   : > { %v6967_v19 = vadd.f32 %v2679_v61, %v2414_v57  ;;  %v1774_v26 = vadd.f32 %v1773_v33, %v6658_v59  ;;  %v5458_v57 = vld [vmem:[#allocation2 + $0x30] sm:$0xff] }
 0x1ec   : > { %v2686_v13 = vpop.f32.mrf.mxu0 }
 0x1ed   : > { %v2051_v9 = vpop.f32.mrf.mxu2 }
 0x1ee   : > { %v2100_v53 = vadd.f32 %v2051_v9, %v1769_v32  ;;  %v2366_v17 = vpop.f32.mrf.mxu3  ;;  %v5482_v32 = vld [vmem:[#allocation2 + $0xc0] sm:$0xff] }
 0x1f0   : > { %v2415_v22 = vadd.f32 %v2366_v17, %v2100_v53  ;;  %v5507_v17 = vld [vmem:[#allocation2 + $0x158] sm:$0xff] }
 0x1f1   : > { %v1776_v36 = vpop.f32.mrf.mxu1 }
 0x1f2   : > { %3273 = vmatmul.bf16.gmra.mxu2 %v5457_v56  ;;  %v6970_v48 = vadd.f32 %v2681_v11, %v2415_v22  ;;  %v1777_v56 = vadd.f32 %v1776_v36, %v6511_v43  ;;  %v5436_v43 = vld [vmem:[#allocation2 + $0x158] sm:$0xff] }
 0x1f3   : > { %3588 = vmatmul.bf16.gmra.mxu3 %v5481_v41 }
 0x1f4   : > { %v2689_v61 = vpop.f32.mrf.mxu0  ;;  %2963 = vmatmul.bf16.gmra.mxu1 %v5434_v5 }
 0x1f5   : > { %v2054_v3 = vpop.f32.mrf.mxu2 }
 0x1f6   : > { %v2101_v55 = vadd.f32 %v2054_v3, %v1772_v20  ;;  %v2369_v15 = vpop.f32.mrf.mxu3 }
 0x1f7   : > { %3908 = vmatmul.bf16.gmra.mxu0 %v5506_v1 }
 0x1f8   : > { %v2416_v58 = vadd.f32 %v2369_v15, %v2101_v55 }
 0x1f9   : > { %v1778_v37 = vpop.f32.mrf.mxu1 }
 0x1fa   : > { %v6973_v16 = vadd.f32 %v2684_v0, %v2416_v58  ;;  %v1779_v20 = vadd.f32 %v1778_v37, %v6541_v10  ;;  %v5459_v58 = vld [vmem:[#allocation2 + $0x38] sm:$0xff] }
 0x1fc   : > { %v2691_v12 = vpop.f32.mrf.mxu0 }
 0x1fd   : > { %v2056_v4 = vpop.f32.mrf.mxu2 }
 0x1fe   : > { %v2102_v11 = vadd.f32 %v2056_v4, %v1774_v26  ;;  %v2371_v14 = vpop.f32.mrf.mxu3  ;;  %v5483_v26 = vld [vmem:[#allocation2 + $0xc8] sm:$0xff] }
 0x200   : > { %v2417_v9 = vadd.f32 %v2371_v14, %v2102_v11  ;;  %v5508_v14 = vld [vmem:[#allocation2 + $0x160] sm:$0xff] }
 0x201   : > { %v1781_v44 = vpop.f32.mrf.mxu1 }
 0x202   : > { %3278 = vmatmul.bf16.gmra.mxu2 %v5458_v57  ;;  %v6976_v53 = vadd.f32 %v2686_v13, %v2417_v9  ;;  %v1782_v57 = vadd.f32 %v1781_v44, %v6552_v35  ;;  %v5437_v35 = vld [vmem:[#allocation2 + $0x160] sm:$0xff] }
 0x203   : > { %3593 = vmatmul.bf16.gmra.mxu3 %v5482_v32 }
 0x204   : > { %v2694_v0 = vpop.f32.mrf.mxu0  ;;  %2968 = vmatmul.bf16.gmra.mxu1 %v5435_v62 }
 0x205   : > { %v2059_v41 = vpop.f32.mrf.mxu2 }
 0x206   : > { %v2103_v59 = vadd.f32 %v2059_v41, %v1777_v56  ;;  %v2374_v33 = vpop.f32.mrf.mxu3  ;;  %v7106_v56 = vld [vmem:[#allocation3_spill] sm:$0xff] }
 0x207   : > { %3913 = vmatmul.bf16.gmra.mxu0 %v5507_v17 }
 0x208   : > { %v2418_v22 = vadd.f32 %v2374_v33, %v2103_v59 }
 0x209   : > { %v1783_v5 = vpop.f32.mrf.mxu1 }
 0x20a   : > { %v6979_v1 = vadd.f32 %v2689_v61, %v2418_v22  ;;  %v1784_v41 = vadd.f32 %v1783_v5, %v7106_v56 }
 0x20c   : > { %v2696_v3 = vpop.f32.mrf.mxu0 }
 0x20d   : > { %v2061_v55 = vpop.f32.mrf.mxu2 }
 0x20e   : > { %v2104_v13 = vadd.f32 %v2061_v55, %v1779_v20  ;;  %v2376_v15 = vpop.f32.mrf.mxu3  ;;  %v5460_v20 = vld [vmem:[#allocation2 + $0x40] sm:$0xff]  ;;  %v5484_v55 = vld [vmem:[#allocation2 + $0xd0] sm:$0xff] }
 0x210   : > { %v2419_v4 = vadd.f32 %v2376_v15, %v2104_v13 }
 0x211   : > { %v1786_v36 = vpop.f32.mrf.mxu1 }
 0x212   : > { %3283 = vmatmul.bf16.gmra.mxu2 %v5459_v58  ;;  %v6982_v11 = vadd.f32 %v2691_v12, %v2419_v4  ;;  %v5509_v58 = vld [vmem:[#allocation2 + $0x168] sm:$0xff] }
 0x213   : > { %3598 = vmatmul.bf16.gmra.mxu3 %v5483_v26  ;;  %v7107_v26 = vld [vmem:[#allocation4_spill] sm:$0xff] }
 0x214   : > { %v2699_v61 = vpop.f32.mrf.mxu0  ;;  %2973 = vmatmul.bf16.gmra.mxu1 %v5436_v43  ;;  %v1787_v4 = vadd.f32 %v1786_v36, %v7107_v26  ;;  %v5438_v36 = vld [vmem:[#allocation2 + $0x168] sm:$0xff] }
 0x215   : > { %v2064_v32 = vpop.f32.mrf.mxu2 }
 0x216   : > { %v2105_v10 = vadd.f32 %v2064_v32, %v1782_v57  ;;  %v2379_v37 = vpop.f32.mrf.mxu3 }
 0x217   : > { %3918 = vmatmul.bf16.gmra.mxu0 %v5508_v14 }
 0x218   : > { %v2420_v9 = vadd.f32 %v2379_v37, %v2105_v10  ;;  %v7108_v37 = vld [vmem:[#allocation5_spill] sm:$0xff] }
 0x219   : > { %v1788_v62 = vpop.f32.mrf.mxu1 }
 0x21a   : > { %v6985_v17 = vadd.f32 %v2694_v0, %v2420_v9  ;;  %v1789_v9 = vadd.f32 %v1788_v62, %v7108_v37 }
 0x21c   : > { %v2701_v59 = vpop.f32.mrf.mxu0 }
 0x21d   : > { %v2066_v33 = vpop.f32.mrf.mxu2 }
 0x21e   : > { %v2106_v12 = vadd.f32 %v2066_v33, %v1784_v41  ;;  %v2381_v22 = vpop.f32.mrf.mxu3 }
 0x220   : > { %v2421_v13 = vadd.f32 %v2381_v22, %v2106_v12  ;;  %v5461_v12 = vld [vmem:[#allocation2 + $0x48] sm:$0xff]  ;;  %v5485_v22 = vld [vmem:[#allocation2 + $0xd8] sm:$0xff] }
 0x221   : > { %v1791_v44 = vpop.f32.mrf.mxu1 }
 0x222   : > { %3288 = vmatmul.bf16.gmra.mxu2 %v5460_v20  ;;  %v6988_v15 = vadd.f32 %v2696_v3, %v2421_v13 }
 0x223   : > { %3603 = vmatmul.bf16.gmra.mxu3 %v5484_v55 }
 0x224   : > { %v2704_v0 = vpop.f32.mrf.mxu0  ;;  %2978 = vmatmul.bf16.gmra.mxu1 %v5437_v35  ;;  %v5510_v35 = vld [vmem:[#allocation2 + $0x170] sm:$0xff] }
 0x225   : > { %v2069_v43 = vpop.f32.mrf.mxu2 }
 0x226   : > { %v2107_v5 = vadd.f32 %v2069_v43, %v1787_v4  ;;  %v2384_v14 = vpop.f32.mrf.mxu3 }
 0x227   : > { %3923 = vmatmul.bf16.gmra.mxu0 %v5509_v58  ;;  %v1792_v58 = vadd.f32 %v1791_v44, %v6634_v38  ;;  %v5439_v44 = vld [vmem:[#allocation2 + $0x170] sm:$0xff] }
 0x228   : > { %v2422_v57 = vadd.f32 %v2384_v14, %v2107_v5 }
 0x229   : > { %v1793_v32 = vpop.f32.mrf.mxu1 }
 0x22a   : > { %v6991_v10 = vadd.f32 %v2699_v61, %v2422_v57  ;;  %v7109_v57 = vld [vmem:[#allocation6_spill] sm:$0xff] }
 0x22b   : > { %v1794_v37 = vadd.f32 %v1793_v32, %v7109_v57 }
 0x22c   : > { %v2706_v56 = vpop.f32.mrf.mxu0 }
 0x22d   : > { %v2071_v41 = vpop.f32.mrf.mxu2 }
 0x22e   : > { %v2108_v3 = vadd.f32 %v2071_v41, %v1789_v9  ;;  %v2386_v33 = vpop.f32.mrf.mxu3 }
 0x230   : > { %v2423_v20 = vadd.f32 %v2386_v33, %v2108_v3  ;;  %v5462_v33 = vld [vmem:[#allocation2 + $0x50] sm:$0xff] }
 0x231   : > { %v2944_v55 = vpop.f32.mrf.mxu1 }
 0x232   : > { %3293 = vmatmul.bf16.gmra.mxu2 %v5461_v12  ;;  %v6994_v13 = vadd.f32 %v2701_v59, %v2423_v20  ;;  %v5486_v12 = vld [vmem:[#allocation2 + $0xe0] sm:$0xff]  ;;  %v3024_v32 = vadd.f32 %v2944_v55, %v6702_v18 }
 0x233   : > { %3608 = vmatmul.bf16.gmra.mxu3 %v5485_v22 }
 0x234   : > { %v3889_v61 = vpop.f32.mrf.mxu0  ;;  %2983 = vmatmul.bf16.gmra.mxu1 %v5438_v36  ;;  %v5511_v36 = vld [vmem:[#allocation2 + $0x178] sm:$0xff] }
 0x235   : > { %v2074_v26 = vpop.f32.mrf.mxu2 }
 0x236   : > { %v2109_v62 = vadd.f32 %v2074_v26, %v1792_v58  ;;  %v2389_v4 = vpop.f32.mrf.mxu3 }
 0x237   : > { %3928 = vmatmul.bf16.gmra.mxu0 %v5510_v35 }
 0x238   : > { %v2424_v43 = vadd.f32 %v2389_v4, %v2109_v62 }
 0x239   : > { %v2946_v5 = vpop.f32.mrf.mxu1 }
 0x23a   : > { %v6997_v14 = vadd.f32 %v2704_v0, %v2424_v43  ;;  %v3025_v43 = vadd.f32 %v2946_v5, %v6722_v27  ;;  %v5512_v5 = vld [vmem:[#allocation2 + $0x180] sm:$0xff] }
 0x23c   : > { %v3891_v9 = vpop.f32.mrf.mxu0 }
 0x23d   : > { %v2076_v59 = vpop.f32.mrf.mxu2 }
 0x23e   : > { %v2110_v41 = vadd.f32 %v2076_v59, %v1794_v37  ;;  %v2391_v3 = vpop.f32.mrf.mxu3 }
 0x240   : > { %v2425_v38 = vadd.f32 %v2391_v3, %v2110_v41  ;;  %v5463_v41 = vld [vmem:[#allocation2 + $0x58] sm:$0xff]  ;;  %v5487_v3 = vld [vmem:[#allocation2 + $0xe8] sm:$0xff] }
 0x241   : > { %v2949_v22 = vpop.f32.mrf.mxu1 }
 0x242   : > { %3298 = vmatmul.bf16.gmra.mxu2 %v5462_v33  ;;  %v7000_v20 = vadd.f32 %v2706_v56, %v2425_v38  ;;  %v5440_v38 = vld [vmem:[#allocation2 + $0x178] sm:$0xff]  ;;  %v3026_v27 = vadd.f32 %v2949_v22, %v6750_v8 }
 0x243   : > { %3613 = vmatmul.bf16.gmra.mxu3 %v5486_v12 }
 0x244   : > { %v3894_v35 = vpop.f32.mrf.mxu0  ;;  %2988 = vmatmul.bf16.gmra.mxu1 %v5439_v44 }
 0x245   : > { %v3259_v0 = vpop.f32.mrf.mxu2 }
 0x246   : > { %v3574_v58 = vpop.f32.mrf.mxu3  ;;  %v3339_v26 = vadd.f32 %v3259_v0, %v3024_v32 }
 0x247   : > { %3933 = vmatmul.bf16.gmra.mxu0 %v5511_v36 }
 0x248   : > { %v3654_v4 = vadd.f32 %v3574_v58, %v3339_v26 }
 0x249   : > { %v2951_v62 = vpop.f32.mrf.mxu1 }
 0x24a   : > { %v3969_v33 = vadd.f32 %v3889_v61, %v3654_v4  ;;  %v3027_v8 = vadd.f32 %v2951_v62, %v6770_v63 }
 0x24c   : > { %v3896_v57 = vpop.f32.mrf.mxu0  ;;  %v4103_v44 = vmul.f32 %v3969_v33, %v3969_v33 }
 0x24d   : > { %v3261_v56 = vpop.f32.mrf.mxu2 }
 0x24e   : > { %v3340_v37 = vadd.f32 %v3261_v56, %v3025_v43  ;;  %v3576_v59 = vpop.f32.mrf.mxu3 }
 0x250   : > { %v3655_v12 = vadd.f32 %v3576_v59, %v3340_v37 }
 0x251   : > { %v2954_v18 = vpop.f32.mrf.mxu1 }
 0x252   : > { %v3970_v55 = vadd.f32 %v3891_v9, %v3655_v12  ;;  %3303 = vmatmul.bf16.gmra.mxu2 %v5463_v41  ;;  %v3028_v63 = vadd.f32 %v2954_v18, %v6810_v23  ;;  %v5465_v18 = vld [vmem:[#allocation2 + $0x68] sm:$0xff] }
 0x253   : > { %3618 = vmatmul.bf16.gmra.mxu3 %v5487_v3 }
 0x254   : > { %v5673_v36 = vpack.c.bf16 %v3970_v55, %v3969_v33  ;;  %v4065_v0 = vadd.f32 %v3970_v55, %v3969_v33  ;;  %v4104_v61 = vmul.f32 %v3970_v55, %v3970_v55  ;;  %v3899_v32 = vpop.f32.mrf.mxu0  ;;  %2993 = vmatmul.bf16.gmra.mxu1 %v5440_v38  ;;  %v5488_v38 = vld [vmem:[#allocation2 + $0xf0] sm:$0xff] }
 0x255   : > { %v3264_v58 = vpop.f32.mrf.mxu2 }
 0x256   : > { %5674 = vst [vmem:[%s7008_s28] sm:$0xff] %v5673_v36   ;;  %v4135_v9 = vadd.f32 %v4104_v61, %v4103_v44  ;;  %v3341_v26 = vadd.f32 %v3264_v58, %v3026_v27  ;;  %v3579_v4 = vpop.f32.mrf.mxu3  ;;  %v5441_v44 = vld [vmem:[#allocation2 + $0x180] sm:$0xff] }
 0x257   : > { %3938 = vmatmul.bf16.gmra.mxu0 %v5512_v5  ;;  %v5513_v5 = vld [vmem:[#allocation2 + $0x188] sm:$0xff] }
 0x258   : > { %v3656_v43 = vadd.f32 %v3579_v4, %v3341_v26 }
 0x259   : > { %v2956_v56 = vpop.f32.mrf.mxu1 }
 0x25a   : > { %v3971_v37 = vadd.f32 %v3894_v35, %v3656_v43 }
 0x25c   : > { %v4066_v59 = vadd.f32 %v4065_v0, %v3971_v37  ;;  %v4105_v41 = vmul.f32 %v3971_v37, %v3971_v37  ;;  %v3901_v22 = vpop.f32.mrf.mxu0 }
 0x25d   : > { %v3266_v3 = vpop.f32.mrf.mxu2 }
 0x25e   : > { %v4136_v12 = vadd.f32 %v4135_v9, %v4105_v41  ;;  %v3342_v33 = vadd.f32 %v3266_v3, %v3027_v8  ;;  %v3581_v55 = vpop.f32.mrf.mxu3 }
 0x260   : > { %v3657_v36 = vadd.f32 %v3581_v55, %v3342_v33  ;;  %v3029_v33 = vadd.f32 %v2956_v56, %v6829_v31 }
 0x261   : > { %v2959_v27 = vpop.f32.mrf.mxu1 }
 0x262   : > { %v3972_v61 = vadd.f32 %v3896_v57, %v3657_v36  ;;  %3308 = vmatmul.bf16.gmra.mxu2 %v5464_v42  ;;  %v5489_v36 = vld [vmem:[#allocation2 + $0xf8] sm:$0xff]  ;;  %v3030_v31 = vadd.f32 %v2959_v27, %v6859_v29 }
 0x263   : > { %3623 = vmatmul.bf16.gmra.mxu3 %v5488_v38 }
 0x264   : > { %v5678_v35 = vpack.c.bf16 %v3972_v61, %v3971_v37  ;;  %v4067_v0 = vadd.f32 %v4066_v59, %v3972_v61  ;;  %v4106_v58 = vmul.f32 %v3972_v61, %v3972_v61  ;;  %v3904_v62 = vpop.f32.mrf.mxu0  ;;  %2998 = vmatmul.bf16.gmra.mxu1 %v5441_v44  ;;  %v5442_v61 = vld [vmem:[#allocation2 + $0x188] sm:$0xff] }
 0x265   : > { %v3269_v9 = vpop.f32.mrf.mxu2 }
 0x266   : > { %5780 = vst [vmem:[%s7008_s28 + $0x8] sm:$0xff] %v5678_v35   ;;  %v4137_v26 = vadd.f32 %v4136_v12, %v4106_v58  ;;  %v3343_v4 = vadd.f32 %v3269_v9, %v3028_v63  ;;  %v3584_v43 = vpop.f32.mrf.mxu3  ;;  %v1125_v9 = vrot.slane %v839_v51, 4 }
 0x267   : > { %3943 = vmatmul.bf16.gmra.mxu0 %v5513_v5  ;;  %v5514_v5 = vld [vmem:[#allocation2 + $0x190] sm:$0xff] }
 0x268   : > { %v3658_v41 = vadd.f32 %v3584_v43, %v3343_v4  ;;  %v7110_v4 = vshrl.u32 %v6878_v7, 16 }
 0x269   : > { %v2961_v8 = vpop.f32.mrf.mxu1 }
 0x26a   : > { %v3973_v3 = vadd.f32 %v3899_v32, %v3658_v41  ;;  %v1131_v43 = vrot.slane %v7110_v4, 4 }
 0x26c   : > { %v4068_v57 = vadd.f32 %v4067_v0, %v3973_v3  ;;  %v4107_v42 = vmul.f32 %v3973_v3, %v3973_v3  ;;  %v3906_v37 = vpop.f32.mrf.mxu0 }
 0x26d   : > { %v3271_v59 = vpop.f32.mrf.mxu2 }
 0x26e   : > { %v4138_v55 = vadd.f32 %v4137_v26, %v4107_v42  ;;  %v3344_v38 = vadd.f32 %v3271_v59, %v3029_v33  ;;  %v3586_v23 = vpop.f32.mrf.mxu3  ;;  %v1126_v26 = vrot.slane %v842_v46, 5 }
 0x270   : > { %v3659_v44 = vadd.f32 %v3586_v23, %v3344_v38  ;;  %v1127_v29 = vor.u32 %v1126_v26, %v1125_v9 }
 0x271   : > { %v2964_v12 = vpop.f32.mrf.mxu1 }
 0x272   : > { %v3974_v35 = vadd.f32 %v3901_v22, %v3659_v44  ;;  %3313 = vmatmul.bf16.gmra.mxu2 %v5465_v18  ;;  %v1129_v22 = vrot.slane %v850_v30, 5  ;;  %v1128_v59 = vrot.slane %v1127_v29, 4 }
 0x273   : > { %3628 = vmatmul.bf16.gmra.mxu3 %v5489_v36 }
 0x274   : > { %v5683_v32 = vpack.c.bf16 %v3974_v35, %v3973_v3  ;;  %v4069_v0 = vadd.f32 %v4068_v57, %v3974_v35  ;;  %v4108_v58 = vmul.f32 %v3974_v35, %v3974_v35  ;;  %v3909_v56 = vpop.f32.mrf.mxu0  ;;  %3003 = vmatmul.bf16.gmra.mxu1 %v5442_v61  ;;  %v1132_v27 = vor.u32 %v1131_v43, %v1129_v22 }
 0x275   : > { %v3274_v63 = vpop.f32.mrf.mxu2  ;;  %v1130_v46 = vsel %vm6377_vm8, %v1128_v59, %v1129_v22 }
 0x276   : > { %5781 = vst [vmem:[%s7008_s28 + $0x10] sm:$0xff] %v5683_v32   ;;  %v4139_v41 = vadd.f32 %v4138_v55, %v4108_v58  ;;  %v3345_v3 = vadd.f32 %v3274_v63, %v3030_v31  ;;  %v3589_v57 = vpop.f32.mrf.mxu3  ;;  %v1133_v51 = vrot.slane %v1132_v27, 4  ;;  %v3031_v55 = vadd.f32 %v2961_v8, %v6881_v39 }
 0x277   : > { %3948 = vmatmul.bf16.gmra.mxu0 %v5514_v5  ;;  %1228 = vst [vmem:[#allocation2 + $0x1a0] sm:$0xf] %v1130_v46  ;;  %v5466_v5 = vld [vmem:[#allocation2 + $0x70] sm:$0xff]  ;;  %v3032_v8 = vadd.f32 %v2964_v12, %v6927_v24  ;;  %v5467_v12 = vld [vmem:[#allocation2 + $0x78] sm:$0xff] }
 0x278   : > { %v3660_v42 = vadd.f32 %v3589_v57, %v3345_v3  ;;  %v1230_v7 = vsel %vm6383_vm9, %v1133_v51, %v1229_v54  ;;  %v5491_v54 = vld [vmem:[#allocation2 + $0x108] sm:$0xff] }
 0x279   : > { %v2966_v33 = vpop.f32.mrf.mxu1  ;;  %1231 = vst [vmem:[#allocation2 + $0x1a4] sm:$0xf] %v1230_v7  ;;  %v5444_v7 = vld [vmem:[#allocation2 + $0x198] sm:$0xff] }
 0x27a   : > { %v3975_v38 = vadd.f32 %v3904_v62, %v3660_v42  ;;  %v5490_v62 = vld [vmem:[#allocation2 + $0x100] sm:$0xff]  ;;  %v3033_v27 = vadd.f32 %v2966_v33, %v6932_v25 }
 0x27c   : > { %v4070_v30 = vadd.f32 %v4069_v0, %v3975_v38  ;;  %v4109_v23 = vmul.f32 %v3975_v38, %v3975_v38  ;;  %v3911_v18 = vpop.f32.mrf.mxu0 }
 0x27d   : > { %v3276_v36 = vpop.f32.mrf.mxu2 }
 0x27e   : > { %v4140_v44 = vadd.f32 %v4139_v41, %v4109_v23  ;;  %v3346_v61 = vadd.f32 %v3276_v36, %v3031_v55  ;;  %v3591_v35 = vpop.f32.mrf.mxu3 }
 0x280   : > { %v3661_v32 = vadd.f32 %v3591_v35, %v3346_v61  ;;  %v5516_v55 = vld [vmem:[#allocation2 + $0x1a0] sm:$0xff] }
 0x281   : > { %v2969_v58 = vpop.f32.mrf.mxu1 }
 0x282   : > { %v3976_v31 = vadd.f32 %v3906_v37, %v3661_v32  ;;  %3318 = vmatmul.bf16.gmra.mxu2 %v5466_v5  ;;  %v3034_v25 = vadd.f32 %v2969_v58, %v6937_v2  ;;  %v5468_v58 = vld [vmem:[#allocation2 + $0x80] sm:$0xff] }
 0x283   : > { %3633 = vmatmul.bf16.gmra.mxu3 %v5490_v62 }
 0x284   : > { %v5688_v0 = vpack.c.bf16 %v3976_v31, %v3975_v38  ;;  %v4071_v63 = vadd.f32 %v4070_v30, %v3976_v31  ;;  %v4110_v39 = vmul.f32 %v3976_v31, %v3976_v31  ;;  %v3914_v9 = vpop.f32.mrf.mxu0  ;;  %3008 = vmatmul.bf16.gmra.mxu1 %v5443_v45 }
 0x285   : > { %v3279_v26 = vpop.f32.mrf.mxu2 }
 0x286   : > { %5782 = vst [vmem:[%s7008_s28 + $0x18] sm:$0xff] %v5688_v0   ;;  %v4141_v22 = vadd.f32 %v4140_v44, %v4110_v39  ;;  %v3347_v4 = vadd.f32 %v3279_v26, %v3032_v8  ;;  %v3594_v43 = vpop.f32.mrf.mxu3 }
 0x287   : > { %3953 = vmatmul.bf16.gmra.mxu0 %v5515_v47 }
 0x288   : > { %v3662_v41 = vadd.f32 %v3594_v43, %v3347_v4  ;;  %v5445_v43 = vld [vmem:[#allocation2 + $0x1a0] sm:$0xff] }
 0x289   : > { %v2971_v3 = vpop.f32.mrf.mxu1 }
 0x28a   : > { %v3977_v57 = vadd.f32 %v3909_v56, %v3662_v41  ;;  %v3035_v0 = vadd.f32 %v2971_v3, %v6940_v52 }
 0x28c   : > { %v4072_v37 = vadd.f32 %v4071_v63, %v3977_v57  ;;  %v4111_v29 = vmul.f32 %v3977_v57, %v3977_v57  ;;  %v3916_v42 = vpop.f32.mrf.mxu0 }
 0x28d   : > { %v3281_v59 = vpop.f32.mrf.mxu2 }
 0x28e   : > { %v4142_v51 = vadd.f32 %v4141_v22, %v4111_v29  ;;  %v3348_v38 = vadd.f32 %v3281_v59, %v3033_v27  ;;  %v3596_v24 = vpop.f32.mrf.mxu3  ;;  %v5492_v22 = vld [vmem:[#allocation2 + $0x110] sm:$0xff] }
 0x290   : > { %v3663_v46 = vadd.f32 %v3596_v24, %v3348_v38 }
 0x291   : > { %v2974_v30 = vpop.f32.mrf.mxu1 }
 0x292   : > { %v3978_v23 = vadd.f32 %v3911_v18, %v3663_v46  ;;  %3323 = vmatmul.bf16.gmra.mxu2 %v5467_v12  ;;  %v3036_v52 = vadd.f32 %v2974_v30, %v6943_v6 }
 0x293   : > { %3638 = vmatmul.bf16.gmra.mxu3 %v5491_v54 }
 0x294   : > { %v5693_v56 = vpack.c.bf16 %v3978_v23, %v3977_v57  ;;  %v4073_v36 = vadd.f32 %v4072_v37, %v3978_v23  ;;  %v4112_v44 = vmul.f32 %v3978_v23, %v3978_v23  ;;  %v3919_v33 = vpop.f32.mrf.mxu0  ;;  %3013 = vmatmul.bf16.gmra.mxu1 %v5444_v7  ;;  %v5517_v37 = vld [vmem:[#allocation2 + $0x1a8] sm:$0xff] }
 0x295   : > { %v3284_v61 = vpop.f32.mrf.mxu2 }
 0x296   : > { %5783 = vst [vmem:[%s7008_s28 + $0x20] sm:$0xff] %v5693_v56   ;;  %v4143_v35 = vadd.f32 %v4142_v51, %v4112_v44  ;;  %v3349_v5 = vadd.f32 %v3284_v61, %v3034_v25  ;;  %v3599_v62 = vpop.f32.mrf.mxu3  ;;  %v5469_v44 = vld [vmem:[#allocation2 + $0x88] sm:$0xff]  ;;  %v5493_v25 = vld [vmem:[#allocation2 + $0x118] sm:$0xff] }
 0x297   : > { %3958 = vmatmul.bf16.gmra.mxu0 %v5516_v55 }
 0x298   : > { %v3664_v32 = vadd.f32 %v3599_v62, %v3349_v5 }
 0x299   : > { %v2976_v45 = vpop.f32.mrf.mxu1 }
 0x29a   : > { %v3979_v31 = vadd.f32 %v3914_v9, %v3664_v32  ;;  %v3037_v23 = vadd.f32 %v2976_v45, %v6946_v28 }
 0x29c   : > { %v4074_v18 = vadd.f32 %v4073_v36, %v3979_v31  ;;  %v4113_v47 = vmul.f32 %v3979_v31, %v3979_v31  ;;  %v3921_v63 = vpop.f32.mrf.mxu0 }
 0x29d   : > { %v3286_v39 = vpop.f32.mrf.mxu2 }
 0x29e   : > { %v4144_v8 = vadd.f32 %v4143_v35, %v4113_v47  ;;  %v3350_v26 = vadd.f32 %v3286_v39, %v3035_v0  ;;  %v3601_v2 = vpop.f32.mrf.mxu3 }
 0x2a0   : > { %v3665_v4 = vadd.f32 %v3601_v2, %v3350_v26 }
 0x2a1   : > { %v2979_v41 = vpop.f32.mrf.mxu1 }
 0x2a2   : > { %v3980_v57 = vadd.f32 %v3916_v42, %v3665_v4  ;;  %3328 = vmatmul.bf16.gmra.mxu2 %v5468_v58 }
 0x2a3   : > { %3643 = vmatmul.bf16.gmra.mxu3 %v5492_v22 }
 0x2a4   : > { %v5698_v9 = vpack.c.bf16 %v3980_v57, %v3979_v31  ;;  %v4075_v29 = vadd.f32 %v4074_v18, %v3980_v57  ;;  %v4114_v27 = vmul.f32 %v3980_v57, %v3980_v57  ;;  %v3924_v3 = vpop.f32.mrf.mxu0  ;;  %3018 = vmatmul.bf16.gmra.mxu1 %v5445_v43  ;;  %v3038_v31 = vadd.f32 %v2979_v41, %v6949_v40 }
 0x2a5   : > { %v3289_v59 = vpop.f32.mrf.mxu2 }
 0x2a6   : > { %5784 = vst [vmem:[%s7008_s28 + $0x28] sm:$0xff] %v5698_v9   ;;  %v4145_v51 = vadd.f32 %v4144_v8, %v4114_v27  ;;  %v3351_v38 = vadd.f32 %v3289_v59, %v3036_v52  ;;  %v3604_v24 = vpop.f32.mrf.mxu3 }
 0x2a7   : > { %3963 = vmatmul.bf16.gmra.mxu0 %v5517_v37 }
 0x2a8   : > { %v3666_v12 = vadd.f32 %v3604_v24, %v3351_v38 }
 0x2a9   : > { %v2981_v54 = vpop.f32.mrf.mxu1 }
 0x2aa   : > { %v3981_v46 = vadd.f32 %v3919_v33, %v3666_v12 }
 0x2ac   : > { %v4076_v42 = vadd.f32 %v4075_v29, %v3981_v46  ;;  %v4115_v7 = vmul.f32 %v3981_v46, %v3981_v46  ;;  %v3926_v55 = vpop.f32.mrf.mxu0 }
 0x2ad   : > { %v3291_v56 = vpop.f32.mrf.mxu2 }
 0x2ae   : > { %v4146_v36 = vadd.f32 %v4145_v51, %v4115_v7  ;;  %v3352_v6 = vadd.f32 %v3291_v56, %v3037_v23  ;;  %v3606_v30 = vpop.f32.mrf.mxu3 }
 0x2b0   : > { %v3667_v61 = vadd.f32 %v3606_v30, %v3352_v6 }
 0x2b1   : > { %v2984_v35 = vpop.f32.mrf.mxu1 }
 0x2b2   : > { %v3982_v5 = vadd.f32 %v3921_v63, %v3667_v61  ;;  %3333 = vmatmul.bf16.gmra.mxu2 %v5469_v44  ;;  %v3039_v63 = vadd.f32 %v2981_v54, %v6952_v50  ;;  %v3040_v59 = vadd.f32 %v2984_v35, %v6955_v49 }
 0x2b3   : > { %3648 = vmatmul.bf16.gmra.mxu3 %v5493_v25 }
 0x2b4   : > { %v5703_v62 = vpack.c.bf16 %v3982_v5, %v3981_v46  ;;  %v4077_v32 = vadd.f32 %v4076_v42, %v3982_v5  ;;  %v4116_v33 = vmul.f32 %v3982_v5, %v3982_v5  ;;  %v3929_v18 = vpop.f32.mrf.mxu0 }
 0x2b5   : > { %v3294_v28 = vpop.f32.mrf.mxu2 }
 0x2b6   : > { %5785 = vst [vmem:[%s7008_s28 + $0x30] sm:$0xff] %v5703_v62   ;;  %v4147_v45 = vadd.f32 %v4146_v36, %v4116_v33  ;;  %v3353_v47 = vadd.f32 %v3294_v28, %v3038_v31  ;;  %v3609_v0 = vpop.f32.mrf.mxu3 }
 0x2b8   : > { %v3668_v39 = vadd.f32 %v3609_v0, %v3353_v47 }
 0x2b9   : > { %v2986_v8 = vpop.f32.mrf.mxu1 }
 0x2ba   : > { %v3983_v26 = vadd.f32 %v3924_v3, %v3668_v39  ;;  %v3041_v23 = vadd.f32 %v2986_v8, %v6958_v60 }
 0x2bc   : > { %v4078_v2 = vadd.f32 %v4077_v32, %v3983_v26  ;;  %v4117_v58 = vmul.f32 %v3983_v26, %v3983_v26  ;;  %v3931_v22 = vpop.f32.mrf.mxu0 }
 0x2bd   : > { %v3296_v4 = vpop.f32.mrf.mxu2 }
 0x2be   : > { %v4148_v43 = vadd.f32 %v4147_v45, %v4117_v58  ;;  %v3354_v57 = vadd.f32 %v3296_v4, %v3039_v63  ;;  %v3611_v37 = vpop.f32.mrf.mxu3 }
 0x2c0   : > { %v3669_v40 = vadd.f32 %v3611_v37, %v3354_v57 }
 0x2c1   : > { %v2989_v41 = vpop.f32.mrf.mxu1 }
 0x2c2   : > { %v3984_v9 = vadd.f32 %v3926_v55, %v3669_v40  ;;  %v3042_v62 = vadd.f32 %v2989_v41, %v6961_v21 }
 0x2c4   : > { %v5708_v29 = vpack.c.bf16 %v3984_v9, %v3983_v26  ;;  %v4079_v27 = vadd.f32 %v4078_v2, %v3984_v9  ;;  %v4118_v52 = vmul.f32 %v3984_v9, %v3984_v9  ;;  %v3934_v51 = vpop.f32.mrf.mxu0 }
 0x2c5   : > { %v3299_v3 = vpop.f32.mrf.mxu2 }
 0x2c6   : > { %5786 = vst [vmem:[%s7008_s28 + $0x38] sm:$0xff] %v5708_v29   ;;  %v4149_v38 = vadd.f32 %v4148_v43, %v4118_v52  ;;  %v3355_v24 = vadd.f32 %v3299_v3, %v3040_v59  ;;  %v3614_v12 = vpop.f32.mrf.mxu3 }
 0x2c8   : > { %v3670_v50 = vadd.f32 %v3614_v12, %v3355_v24 }
 0x2c9   : > { %v2991_v54 = vpop.f32.mrf.mxu1 }
 0x2ca   : > { %v3985_v46 = vadd.f32 %v3929_v18, %v3670_v50  ;;  %v3043_v8 = vadd.f32 %v2991_v54, %v6964_v34 }
 0x2cc   : > { %v4080_v42 = vadd.f32 %v4079_v27, %v3985_v46  ;;  %v4119_v7 = vmul.f32 %v3985_v46, %v3985_v46  ;;  %v3936_v55 = vpop.f32.mrf.mxu0 }
 0x2cd   : > { %v3301_v56 = vpop.f32.mrf.mxu2 }
 0x2ce   : > { %v4150_v36 = vadd.f32 %v4149_v38, %v4119_v7  ;;  %v3356_v6 = vadd.f32 %v3301_v56, %v3041_v23  ;;  %v3616_v30 = vpop.f32.mrf.mxu3 }
 0x2d0   : > { %v3671_v49 = vadd.f32 %v3616_v30, %v3356_v6 }
 0x2d1   : > { %v2994_v44 = vpop.f32.mrf.mxu1 }
 0x2d2   : > { %v3986_v25 = vadd.f32 %v3931_v22, %v3671_v49  ;;  %v3044_v41 = vadd.f32 %v2994_v44, %v6967_v19 }
 0x2d4   : > { %v5713_v61 = vpack.c.bf16 %v3986_v25, %v3985_v46  ;;  %v4081_v35 = vadd.f32 %v4080_v42, %v3986_v25  ;;  %v4120_v5 = vmul.f32 %v3986_v25, %v3986_v25  ;;  %v3939_v32 = vpop.f32.mrf.mxu0 }
 0x2d5   : > { %v3304_v33 = vpop.f32.mrf.mxu2 }
 0x2d6   : > { %5787 = vst [vmem:[%s7008_s28 + $0x40] sm:$0xff] %v5713_v61   ;;  %v4151_v31 = vadd.f32 %v4150_v36, %v4120_v5  ;;  %v3357_v18 = vadd.f32 %v3304_v33, %v3042_v62  ;;  %v3619_v28 = vpop.f32.mrf.mxu3 }
 0x2d8   : > { %v3672_v60 = vadd.f32 %v3619_v28, %v3357_v18 }
 0x2d9   : > { %v2996_v45 = vpop.f32.mrf.mxu1 }
 0x2da   : > { %v3987_v47 = vadd.f32 %v3934_v51, %v3672_v60  ;;  %v3045_v12 = vadd.f32 %v2996_v45, %v6970_v48 }
 0x2dc   : > { %v4082_v0 = vadd.f32 %v4081_v35, %v3987_v47  ;;  %v4121_v39 = vmul.f32 %v3987_v47, %v3987_v47  ;;  %v3941_v2 = vpop.f32.mrf.mxu0 }
 0x2dd   : > { %v3306_v26 = vpop.f32.mrf.mxu2 }
 0x2de   : > { %v4152_v58 = vadd.f32 %v4151_v31, %v4121_v39  ;;  %v3358_v63 = vadd.f32 %v3306_v26, %v3043_v8  ;;  %v3621_v22 = vpop.f32.mrf.mxu3 }
 0x2e0   : > { %v3673_v21 = vadd.f32 %v3621_v22, %v3358_v63 }
 0x2e1   : > { %v2999_v4 = vpop.f32.mrf.mxu1 }
 0x2e2   : > { %v3988_v43 = vadd.f32 %v3936_v55, %v3673_v21  ;;  %v3046_v30 = vadd.f32 %v2999_v4, %v6973_v16 }
 0x2e4   : > { %v5718_v57 = vpack.c.bf16 %v3988_v43, %v3987_v47  ;;  %v4083_v37 = vadd.f32 %v4082_v0, %v3988_v43  ;;  %v4122_v40 = vmul.f32 %v3988_v43, %v3988_v43  ;;  %v3944_v59 = vpop.f32.mrf.mxu0 }
 0x2e5   : > { %v3309_v9 = vpop.f32.mrf.mxu2 }
 0x2e6   : > { %5788 = vst [vmem:[%s7008_s28 + $0x48] sm:$0xff] %v5718_v57   ;;  %v4153_v29 = vadd.f32 %v4152_v58, %v4122_v40  ;;  %v3359_v27 = vadd.f32 %v3309_v9, %v3044_v41  ;;  %v3624_v52 = vpop.f32.mrf.mxu3 }
 0x2e8   : > { %v3674_v34 = vadd.f32 %v3624_v52, %v3359_v27 }
 0x2e9   : > { %v3001_v51 = vpop.f32.mrf.mxu1 }
 0x2ea   : > { %v3989_v3 = vadd.f32 %v3939_v32, %v3674_v34  ;;  %v3047_v33 = vadd.f32 %v3001_v51, %v6976_v53 }
 0x2ec   : > { %v4084_v38 = vadd.f32 %v4083_v37, %v3989_v3  ;;  %v4123_v24 = vmul.f32 %v3989_v3, %v3989_v3  ;;  %v3946_v19 = vpop.f32.mrf.mxu0 }
 0x2ed   : > { %v3311_v50 = vpop.f32.mrf.mxu2 }
 0x2ee   : > { %v4154_v54 = vadd.f32 %v4153_v29, %v4123_v24  ;;  %v3360_v46 = vadd.f32 %v3311_v50, %v3045_v12  ;;  %v3626_v42 = vpop.f32.mrf.mxu3 }
 0x2f0   : > { %v3675_v7 = vadd.f32 %v3626_v42, %v3360_v46 }
 0x2f1   : > { %v3004_v55 = vpop.f32.mrf.mxu1 }
 0x2f2   : > { %v3990_v23 = vadd.f32 %v3941_v2, %v3675_v7  ;;  %v3048_v26 = vadd.f32 %v3004_v55, %v6979_v1 }
 0x2f4   : > { %v5723_v56 = vpack.c.bf16 %v3990_v23, %v3989_v3  ;;  %v4085_v36 = vadd.f32 %v4084_v38, %v3990_v23  ;;  %v4124_v6 = vmul.f32 %v3990_v23, %v3990_v23  ;;  %v3949_v5 = vpop.f32.mrf.mxu0 }
 0x2f5   : > { %v3314_v49 = vpop.f32.mrf.mxu2 }
 0x2f6   : > { %5789 = vst [vmem:[%s7008_s28 + $0x50] sm:$0xff] %v5723_v56   ;;  %v4155_v44 = vadd.f32 %v4154_v54, %v4124_v6  ;;  %v3361_v25 = vadd.f32 %v3314_v49, %v3046_v30  ;;  %v3629_v61 = vpop.f32.mrf.mxu3 }
 0x2f8   : > { %v3676_v35 = vadd.f32 %v3629_v61, %v3361_v25 }
 0x2f9   : > { %v3006_v18 = vpop.f32.mrf.mxu1 }
 0x2fa   : > { %v3991_v48 = vadd.f32 %v3944_v59, %v3676_v35  ;;  %v3049_v40 = vadd.f32 %v3006_v18, %v6982_v11 }
 0x2fc   : > { %v4086_v62 = vadd.f32 %v4085_v36, %v3991_v48  ;;  %v4125_v32 = vmul.f32 %v3991_v48, %v3991_v48  ;;  %v3951_v58 = vpop.f32.mrf.mxu0 }
 0x2fd   : > { %v3316_v31 = vpop.f32.mrf.mxu2 }
 0x2fe   : > { %v4156_v28 = vadd.f32 %v4155_v44, %v4125_v32  ;;  %v3362_v60 = vadd.f32 %v3316_v31, %v3047_v33  ;;  %v3631_v45 = vpop.f32.mrf.mxu3 }
 0x300   : > { %v3677_v47 = vadd.f32 %v3631_v45, %v3362_v60 }
 0x301   : > { %v3009_v4 = vpop.f32.mrf.mxu1 }
 0x302   : > { %v3992_v16 = vadd.f32 %v3946_v19, %v3677_v47  ;;  %v3050_v24 = vadd.f32 %v3009_v4, %v6985_v17 }
 0x304   : > { %v5728_v0 = vpack.c.bf16 %v3992_v16, %v3991_v48  ;;  %v4087_v39 = vadd.f32 %v4086_v62, %v3992_v16  ;;  %v4126_v8 = vmul.f32 %v3992_v16, %v3992_v16  ;;  %v3954_v52 = vpop.f32.mrf.mxu0 }
 0x305   : > { %v3319_v2 = vpop.f32.mrf.mxu2 }
 0x306   : > { %5790 = vst [vmem:[%s7008_s28 + $0x58] sm:$0xff] %v5728_v0   ;;  %v4157_v63 = vadd.f32 %v4156_v28, %v4126_v8  ;;  %v3363_v22 = vadd.f32 %v3319_v2, %v3048_v26  ;;  %v3634_v21 = vpop.f32.mrf.mxu3 }
 0x308   : > { %v3678_v53 = vadd.f32 %v3634_v21, %v3363_v22 }
 0x309   : > { %v3011_v59 = vpop.f32.mrf.mxu1 }
 0x30a   : > { %v3993_v43 = vadd.f32 %v3949_v5, %v3678_v53  ;;  %v3051_v56 = vadd.f32 %v3011_v59, %v6988_v15 }
 0x30c   : > { %v4088_v57 = vadd.f32 %v4087_v39, %v3993_v43  ;;  %v4127_v37 = vmul.f32 %v3993_v43, %v3993_v43  ;;  %v3956_v11 = vpop.f32.mrf.mxu0 }
 0x30d   : > { %v3321_v41 = vpop.f32.mrf.mxu2 }
 0x30e   : > { %v4158_v9 = vadd.f32 %v4157_v63, %v4127_v37  ;;  %v3364_v29 = vadd.f32 %v3321_v41, %v3049_v40  ;;  %v3636_v27 = vpop.f32.mrf.mxu3 }
 0x310   : > { %v3679_v1 = vadd.f32 %v3636_v27, %v3364_v29 }
 0x311   : > { %v3014_v19 = vpop.f32.mrf.mxu1 }
 0x312   : > { %v3994_v34 = vadd.f32 %v3951_v58, %v3679_v1  ;;  %v3052_v5 = vadd.f32 %v3014_v19, %v6991_v10 }
 0x314   : > { %v5733_v51 = vpack.c.bf16 %v3994_v34, %v3993_v43  ;;  %v4089_v3 = vadd.f32 %v4088_v57, %v3994_v34  ;;  %v4128_v38 = vmul.f32 %v3994_v34, %v3994_v34  ;;  %v3959_v25 = vpop.f32.mrf.mxu0 }
 0x315   : > { %v3324_v12 = vpop.f32.mrf.mxu2 }
 0x316   : > { %5791 = vst [vmem:[%s7008_s28 + $0x60] sm:$0xff] %v5733_v51   ;;  %v4159_v50 = vadd.f32 %v4158_v9, %v4128_v38  ;;  %v3365_v54 = vadd.f32 %v3324_v12, %v3050_v24  ;;  %v3639_v46 = vpop.f32.mrf.mxu3 }
 0x318   : > { %v3680_v42 = vadd.f32 %v3639_v46, %v3365_v54 }
 0x319   : > { %v3016_v32 = vpop.f32.mrf.mxu1 }
 0x31a   : > { %v3995_v7 = vadd.f32 %v3954_v52, %v3680_v42  ;;  %v3053_v47 = vadd.f32 %v3016_v32, %v6994_v13 }
 0x31c   : > { %v4090_v23 = vadd.f32 %v4089_v3, %v3995_v7  ;;  %v4129_v55 = vmul.f32 %v3995_v7, %v3995_v7  ;;  %v3961_v16 = vpop.f32.mrf.mxu0 }
 0x31d   : > { %v3326_v36 = vpop.f32.mrf.mxu2 }
 0x31e   : > { %v4160_v6 = vadd.f32 %v4159_v50, %v4129_v55  ;;  %v3366_v30 = vadd.f32 %v3326_v36, %v3051_v56  ;;  %v3641_v49 = vpop.f32.mrf.mxu3 }
 0x320   : > { %v3681_v44 = vadd.f32 %v3641_v49, %v3366_v30 }
 0x321   : > { %v3019_v2 = vpop.f32.mrf.mxu1 }
 0x322   : > { %v3996_v17 = vadd.f32 %v3956_v11, %v3681_v44  ;;  %v3054_v4 = vadd.f32 %v3019_v2, %v6997_v14 }
 0x324   : > { %v5738_v61 = vpack.c.bf16 %v3996_v17, %v3995_v7  ;;  %v4091_v35 = vadd.f32 %v4090_v23, %v3996_v17  ;;  %v4130_v48 = vmul.f32 %v3996_v17, %v3996_v17  ;;  %v3964_v40 = vpop.f32.mrf.mxu0 }
 0x325   : > { %v3329_v62 = vpop.f32.mrf.mxu2 }
 0x326   : > { %5792 = vst [vmem:[%s7008_s28 + $0x68] sm:$0xff] %v5738_v61   ;;  %v4161_v33 = vadd.f32 %v4160_v6, %v4130_v48  ;;  %v3367_v31 = vadd.f32 %v3329_v62, %v3052_v5  ;;  %v3644_v18 = vpop.f32.mrf.mxu3 }
 0x328   : > { %v3682_v28 = vadd.f32 %v3644_v18, %v3367_v31 }
 0x329   : > { %v3021_v41 = vpop.f32.mrf.mxu1 }
 0x32a   : > { %v3997_v15 = vadd.f32 %v3959_v25, %v3682_v28  ;;  %v3055_v52 = vadd.f32 %v3021_v41, %v7000_v20 }
 0x32c   : > { %v4092_v60 = vadd.f32 %v4091_v35, %v3997_v15  ;;  %v4131_v45 = vmul.f32 %v3997_v15, %v3997_v15  ;;  %v3966_v3 = vpop.f32.mrf.mxu0 }
 0x32d   : > { %v3331_v0 = vpop.f32.mrf.mxu2 }
 0x32e   : > { %v4162_v39 = vadd.f32 %v4161_v33, %v4131_v45  ;;  %v3368_v8 = vadd.f32 %v3331_v0, %v3053_v47  ;;  %v3646_v26 = vpop.f32.mrf.mxu3 }
 0x330   : > { %v3683_v10 = vadd.f32 %v3646_v26, %v3368_v8 }
 0x332   : > { %v3998_v58 = vadd.f32 %v3961_v16, %v3683_v10 }
 0x334   : > { %v5743_v63 = vpack.c.bf16 %v3998_v58, %v3997_v15  ;;  %v4093_v22 = vadd.f32 %v4092_v60, %v3998_v58  ;;  %v4132_v21 = vmul.f32 %v3998_v58, %v3998_v58 }
 0x335   : > { %v3334_v53 = vpop.f32.mrf.mxu2 }
 0x336   : > { %5793 = vst [vmem:[%s7008_s28 + $0x70] sm:$0xff] %v5743_v63   ;;  %v4163_v43 = vadd.f32 %v4162_v39, %v4132_v21  ;;  %v3369_v57 = vadd.f32 %v3334_v53, %v3054_v4  ;;  %v3649_v37 = vpop.f32.mrf.mxu3 }
 0x338   : > { %v3684_v13 = vadd.f32 %v3649_v37, %v3369_v57 }
 0x33a   : > { %v3999_v9 = vadd.f32 %v3964_v40, %v3684_v13 }
 0x33c   : > { %v4094_v29 = vadd.f32 %v4093_v22, %v3999_v9  ;;  %v4133_v27 = vmul.f32 %v3999_v9, %v3999_v9 }
 0x33d   : > { %v3336_v1 = vpop.f32.mrf.mxu2 }
 0x33e   : > { %v4164_v59 = vadd.f32 %v4163_v43, %v4133_v27  ;;  %v3370_v34 = vadd.f32 %v3336_v1, %v3055_v52  ;;  %v3651_v51 = vpop.f32.mrf.mxu3 }
 0x340   : > { %v3685_v14 = vadd.f32 %v3651_v51, %v3370_v34 }
 0x342   : > { %v4000_v38 = vadd.f32 %v3966_v3, %v3685_v14 }
 0x344   : > { %v5748_v24 = vpack.c.bf16 %v4000_v38, %v3999_v9  ;;  %v4095_v12 = vadd.f32 %v4094_v29, %v4000_v38  ;;  %v4134_v50 = vmul.f32 %v4000_v38, %v4000_v38 }
 0x346   : > { %5794 = vst [vmem:[%s7008_s28 + $0x78] sm:$0xff] %v5748_v24   ;;  %v4096_v54 = vrot.slane %v4095_v12, 4  ;;  %v4165_v46 = vadd.f32 %v4164_v59, %v4134_v50 }
 0x348   : > { %v4097_v42 = vadd.f32 %v4096_v54, %v4095_v12  ;;  %v4166_v11 = vrot.slane %v4165_v46, 4 }
 0x34a   : > { %v4098_v7 = vrot.slane %v4097_v42, 2  ;;  %v4167_v19 = vadd.f32 %v4166_v11, %v4165_v46 }
 0x34c   : > { %v4099_v20 = vadd.f32 %v4098_v7, %v4097_v42  ;;  %v4168_v23 = vrot.slane %v4167_v19, 2 }
 0x34e   : > { %v4100_v55 = vrot.slane %v4099_v20, 1  ;;  %v4169_v56 = vadd.f32 %v4168_v23, %v4167_v19 }
 0x350   : > { %v4101_v36 = vadd.f32 %v4100_v55, %v4099_v20  ;;  %v4170_v6 = vrot.slane %v4169_v56, 1 }
 0x352   : > { %4102 = vst [vmem:[%s281_s8] sm:$0x1] %v4101_v36  ;;  %v4171_v30 = vadd.f32 %v4170_v6, %v4169_v56 }
 0x354   : > { %4172 = vst [vmem:[%s281_s8 + $0x1] sm:$0x1] %v4171_v30 }
 0x355 PF: > { %s16_s20 = sadd.s32 1, %s5870_s20   ;;  %s7111_s18 = smov %s5866_s19 }
 0x356   : > { %p13_p6 = scmp.ge.s32.totalorder %s16_s20, 4   ;;  %s7112_s19 = smov %s7114_s21 }
 0x358   :  { %15 = sbr.rel (!%p13_p6) target bundleno = 2 (0x2), region = 104 }

</bundles_post_ra>
